<compile_context>
chip_gen: v6e
topology: v6e:2x2x1
jax: 0.10.0
libtpu: 0.0.40
codegen_flags: <defaults>
</compile_context>

<pallas_src>
import functools

import jax
import jax.numpy as jnp
import numpy as np
from jax.experimental import pallas as pl
from jax.experimental.pallas import tpu as pltpu


# ----------------------------- fused decoder kernel -----------------------------

def _make_decoder_kernel(layer_meta, H, W):
    """Build the fused kernel.

    layer_meta: list of dicts {'cin', 'cout', 'has_proj'} (static, trace-time).
    Ref order: dc_ref, me_ref, *weight_refs, out_ref, *pad_scratch_refs.
    """
    n_weight_refs = sum(10 if m["has_proj"] else 8 for m in layer_meta) + 2
    COL0 = 8          # sublane-aligned column offset of the conv interior

    def kernel(*refs):
        dc_ref, me_ref = refs[0], refs[1]
        w_refs = refs[2:2 + n_weight_refs]
        out_ref = refs[2 + n_weight_refs]
        pad_refs = refs[3 + n_weight_refs:]

        # latent = depth_context[..., None, None] + motion_embedding  (fused)
        x = me_ref[0] + dc_ref[0, 0][None, None, :]          # (H, W, C0) f32

        wi = 0
        for li, meta in enumerate(layer_meta):
            cin, cout, has_proj = meta["cin"], meta["cout"], meta["has_proj"]
            dw_w = w_refs[wi][...]
            dw_b = w_refs[wi + 1][...]
            gamma = w_refs[wi + 2][...]
            beta = w_refs[wi + 3][...]
            w1 = w_refs[wi + 4][...]
            b1 = w_refs[wi + 5][...]
            w2 = w_refs[wi + 6][...]
            b2 = w_refs[wi + 7][...]
            if has_proj:
                wr = w_refs[wi + 8][...]
                br = w_refs[wi + 9][...]
                wi += 10
            else:
                wr = br = None
                wi += 8

            # ---- depthwise 7x7 conv, SAME padding done in VMEM scratch ----
            pad_ref = pad_refs[li]                     # (H+6, W+16, cin) f32
            pad_ref[...] = jnp.zeros(pad_ref.shape, jnp.float32)
            # interior store at sublane-aligned column offset COL0 (=8)
            pad_ref[3:3 + H, COL0:COL0 + W, :] = x
            # 7 column-shifted slabs (one unaligned sublane read per dx, not 49)
            cols = [pad_ref[:, COL0 - 3 + dx:COL0 - 3 + dx + W, :]
                    for dx in range(7)]                # each (H+6, W, cin)
            acc = jnp.zeros((H, W, cin), jnp.float32)
            for dy in range(7):
                for dx in range(7):
                    # leading-dim slice: cheap vreg-row select
                    acc = acc + cols[dx][dy:dy + H] * dw_w[dy, dx]
            h = acc + dw_b[0]

            # ---- channel LayerNorm ----
            mu = jnp.mean(h, axis=-1, keepdims=True)
            var = jnp.mean(jnp.square(h - mu), axis=-1, keepdims=True)
            hn = (h - mu) * jax.lax.rsqrt(var + 1e-6) * gamma[0] + beta[0]

            # ---- MLP (bf16 MXU operands, f32 accumulate) + residual ----
            hn2 = hn.reshape(H * W, cin)
            z = jnp.dot(hn2.astype(jnp.bfloat16), w1,
                        preferred_element_type=jnp.float32) + b1[0]
            # TODO(synk): PyTorch nn.GELU defaults to the erf form; tanh
            # approximation used here for robust TPU lowering.
            z = jax.nn.gelu(z, approximate=True)
            z = jnp.dot(z.astype(jnp.bfloat16), w2,
                        preferred_element_type=jnp.float32) + b2[0]
            x2 = x.reshape(H * W, cin)
            if has_proj:
                res = jnp.dot(x2.astype(jnp.bfloat16), wr,
                              preferred_element_type=jnp.float32) + br[0]
            else:
                res = x2                               # identity residual
            x = (z + res).reshape(H, W, cout)

        # ---- to_patches: 1x1 conv -> lane-dense (H*W, r*r) output slab ----
        up_w = w_refs[wi][...]
        up_b = w_refs[wi + 1][...]
        y = jnp.dot(x.reshape(H * W, x.shape[-1]).astype(jnp.bfloat16), up_w,
                    preferred_element_type=jnp.float32) + up_b[0]
        out_ref[0] = y

    return kernel


# ----------------------------- parameters -----------------------------

def init_params(key, depth_context_size, channels, num_layers,
                out_channels=1, scale_factor=16):
    ks = iter(jax.random.split(key, 128))

    def nrm(shape, fan_in, dtype=jnp.float32):
        return (jax.random.normal(next(ks), shape, jnp.float32)
                / np.sqrt(float(fan_in))).astype(dtype)

    blocks = []
    cin = depth_context_size
    for _ in range(num_layers):
        cout = channels
        hidden = 4 * cout
        blk = dict(
            dw_w=nrm((7, 7, cin), 49.0),
            dw_b=0.1 * nrm((1, cin), 1.0),
            gamma=jnp.ones((1, cin), jnp.float32),
            beta=0.1 * nrm((1, cin), 1.0),
            w1=nrm((cin, hidden), cin, jnp.bfloat16),      # bf16 MXU weights
            b1=0.1 * nrm((1, hidden), 1.0),
            w2=nrm((hidden, cout), hidden, jnp.bfloat16),
            b2=0.1 * nrm((1, cout), 1.0),
        )
        if cin != cout:                                    # residual projection
            blk["wr"] = nrm((cin, cout), cin, jnp.bfloat16)
            blk["br"] = 0.1 * nrm((1, cout), 1.0)
        blocks.append(blk)
        cin = cout

    c2 = out_channels * scale_factor * scale_factor
    up = dict(w=nrm((channels, c2), channels, jnp.bfloat16),
              b=0.1 * nrm((1, c2), 1.0))
    return blocks, up


# ----------------------------- forward passes -----------------------------

def depth_context_decoder_forward(params, depth_context, motion_embedding_nchw,
                                  scale_factor=16):
    blocks, up = params
    B, C0, H, W = motion_embedding_nchw.shape
    r = scale_factor
    me = jnp.transpose(motion_embedding_nchw, (0, 2, 3, 1))    # NCHW -> NHWC glue
    dc3 = depth_context[:, None, :]                            # (B, 1, C0)

    layer_meta, weights = [], []
    cin = C0
    for blk in blocks:
        cout = blk["w2"].shape[-1]
        has_proj = "wr" in blk
        layer_meta.append(dict(cin=cin, cout=cout, has_proj=has_proj))
        weights += [blk["dw_w"], blk["dw_b"], blk["gamma"], blk["beta"],
                    blk["w1"], blk["b1"], blk["w2"], blk["b2"]]
        if has_proj:
            weights += [blk["wr"], blk["br"]]
        cin = cout
    weights += [up["w"], up["b"]]
    c2 = up["w"].shape[-1]

    kernel = _make_decoder_kernel(layer_meta, H, W)

    def _const_spec(a):
        return pl.BlockSpec(a.shape, lambda b, _nd=a.ndim: (0,) * _nd)

    in_specs = [pl.BlockSpec((1, 1, C0), lambda b: (b, 0, 0)),       # depth ctx
                pl.BlockSpec((1, H, W, C0), lambda b: (b, 0, 0, 0))]  # motion emb
    in_specs += [_const_spec(w) for w in weights]                    # VMEM-resident
    out_spec = pl.BlockSpec((1, H * W, c2), lambda b: (b, 0, 0))     # lane-dense

    scratch = [pltpu.VMEM((H + 6, W + 16, m["cin"]), jnp.float32)
               for m in layer_meta]

    y = pl.pallas_call(
        kernel,
        out_shape=jax.ShapeDtypeStruct((B, H * W, c2), jnp.float32),
        grid=(B,),
        in_specs=in_specs,
        out_specs=out_spec,
        scratch_shapes=scratch,
        compiler_params=pltpu.CompilerParams(
            dimension_semantics=("parallel",),          # 2 TCs on v7x
            vmem_limit_bytes=32 * 1024 * 1024),         # portable to v7x 64 MiB
    )(dc3, me, *weights)

    # PixelShuffle(r): channel k = c*r*r + i*r + j  (plain-JAX glue)
    oc = c2 // (r * r)
    y = y.reshape(B, H, W, oc, r, r)
    y = jnp.transpose(y, (0, 3, 1, 4, 2, 5))
    return y.reshape(B, oc, H * r, W * r)                # NCHW output


def reference_forward(params, depth_context, motion_embedding_nchw, scale_factor=16):
    # Pure-JAX reference with identical math (same bf16 matmul operands).
    blocks, up = params
    B, C, H, W = motion_embedding_nchw.shape
    x = jnp.transpose(motion_embedding_nchw, (0, 2, 3, 1)) + depth_context[:, None, None, :]
    for blk in blocks:
        cin = x.shape[-1]
        xpad = jnp.pad(x, ((0, 0), (3, 3), (3, 3), (0, 0)))
        acc = jnp.zeros((B, H, W, cin), jnp.float32)
        for dy in range(7):
            for dx in range(7):
                acc = acc + xpad[:, dy:dy + H, dx:dx + W, :] * blk["dw_w"][dy, dx, :]
        h = acc + blk["dw_b"][0]
        mu = jnp.mean(h, -1, keepdims=True)
        var = jnp.mean(jnp.square(h - mu), -1, keepdims=True)
        hn = (h - mu) * jax.lax.rsqrt(var + 1e-6) * blk["gamma"][0] + blk["beta"][0]
        hn2 = hn.reshape(B * H * W, cin)
        z = jnp.dot(hn2.astype(jnp.bfloat16), blk["w1"],
                    preferred_element_type=jnp.float32) + blk["b1"][0]
        z = jax.nn.gelu(z, approximate=True)
        z = jnp.dot(z.astype(jnp.bfloat16), blk["w2"],
                    preferred_element_type=jnp.float32) + blk["b2"][0]
        x2 = x.reshape(B * H * W, cin)
        if "wr" in blk:
            res = jnp.dot(x2.astype(jnp.bfloat16), blk["wr"],
                          preferred_element_type=jnp.float32) + blk["br"][0]
        else:
            res = x2
        x = (z + res).reshape(B, H, W, -1)
    y = jnp.dot(x.reshape(B * H * W, -1).astype(jnp.bfloat16), up["w"],
                preferred_element_type=jnp.float32) + up["b"][0]
    r = scale_factor
    oc = up["w"].shape[-1] // (r * r)
    y = y.reshape(B, H, W, oc, r, r).transpose(0, 3, 1, 4, 2, 5)
    return y.reshape(B, oc, H * r, W * r)


# ----------------------------- main -----------------------------

if __name__ == "__main__":
    B = 2
    depth_context_size = 4
    motion_context_size = 6          # unused in forward (as in the PyTorch module)
    channels = 8
    num_layers = 2
    H = W = 8
    scale_factor = 16

    key = jax.random.PRNGKey(0)
    k_dc, k_me, k_params = jax.random.split(key, 3)

    depth_context = jax.random.normal(k_dc, (B, depth_context_size), jnp.float32)
    motion_embedding = jax.random.normal(k_me, (B, depth_context_size, H, W), jnp.float32)

    params = init_params(k_params, depth_context_size, channels, num_layers,
                         out_channels=1, scale_factor=scale_factor)

    fwd = jax.jit(depth_context_decoder_forward, static_argnames=("scale_factor",))
    out = jax.block_until_ready(
        fwd(params, depth_context, motion_embedding, scale_factor=scale_factor))
    assert out.shape == (B, 1, H * scale_factor, W * scale_factor), out.shape

    ref = jax.block_until_ready(
        reference_forward(params, depth_context, motion_embedding, scale_factor))
    np.testing.assert_allclose(np.asarray(out), np.asarray(ref), rtol=1e-2, atol=1e-2)

    print("KERNEL_OK")
</pallas_src>

<mosaic_0001>
module attributes {stable_mosaic.version = 11 : i64} {
  func.func @kernel(%arg0: i32, %arg1: memref<1x1x4xf32, #tpu.memory_space<vmem>>, %arg2: memref<1x8x8x4xf32, #tpu.memory_space<vmem>>, %arg3: memref<7x7x4xf32, #tpu.memory_space<vmem>>, %arg4: memref<1x4xf32, #tpu.memory_space<vmem>>, %arg5: memref<1x4xf32, #tpu.memory_space<vmem>>, %arg6: memref<1x4xf32, #tpu.memory_space<vmem>>, %arg7: memref<4x32xbf16, #tpu.memory_space<vmem>>, %arg8: memref<1x32xf32, #tpu.memory_space<vmem>>, %arg9: memref<32x8xbf16, #tpu.memory_space<vmem>>, %arg10: memref<1x8xf32, #tpu.memory_space<vmem>>, %arg11: memref<4x8xbf16, #tpu.memory_space<vmem>>, %arg12: memref<1x8xf32, #tpu.memory_space<vmem>>, %arg13: memref<7x7x8xf32, #tpu.memory_space<vmem>>, %arg14: memref<1x8xf32, #tpu.memory_space<vmem>>, %arg15: memref<1x8xf32, #tpu.memory_space<vmem>>, %arg16: memref<1x8xf32, #tpu.memory_space<vmem>>, %arg17: memref<8x32xbf16, #tpu.memory_space<vmem>>, %arg18: memref<1x32xf32, #tpu.memory_space<vmem>>, %arg19: memref<32x8xbf16, #tpu.memory_space<vmem>>, %arg20: memref<1x8xf32, #tpu.memory_space<vmem>>, %arg21: memref<8x256xbf16, #tpu.memory_space<vmem>>, %arg22: memref<1x256xf32, #tpu.memory_space<vmem>>, %arg23: memref<1x64x256xf32, #tpu.memory_space<vmem>>, %arg24: memref<14x24x4xf32, #tpu.memory_space<vmem>>, %arg25: memref<14x24x8xf32, #tpu.memory_space<vmem>>) attributes {dimension_semantics = [#tpu.dimension_semantics<parallel>], iteration_bounds = array<i64: 2>, scalar_prefetch = 0 : i64, scratch_operands = 2 : i64, tpu.core_type = #tpu.core_type<tc>, window_params = [{transform_indices = @transform_0, window_bounds = array<i64: 1, 1, 4>}, {transform_indices = @transform_1, window_bounds = array<i64: 1, 8, 8, 4>}, {pipeline_mode = #tpu.pipeline_mode<synchronous>, transform_indices = @transform_2, window_bounds = array<i64: 7, 7, 4>}, {pipeline_mode = #tpu.pipeline_mode<synchronous>, transform_indices = @transform_3, window_bounds = array<i64: 1, 4>}, {pipeline_mode = #tpu.pipeline_mode<synchronous>, transform_indices = @transform_4, window_bounds = array<i64: 1, 4>}, {pipeline_mode = #tpu.pipeline_mode<synchronous>, transform_indices = @transform_5, window_bounds = array<i64: 1, 4>}, {pipeline_mode = #tpu.pipeline_mode<synchronous>, transform_indices = @transform_6, window_bounds = array<i64: 4, 32>}, {pipeline_mode = #tpu.pipeline_mode<synchronous>, transform_indices = @transform_7, window_bounds = array<i64: 1, 32>}, {pipeline_mode = #tpu.pipeline_mode<synchronous>, transform_indices = @transform_8, window_bounds = array<i64: 32, 8>}, {pipeline_mode = #tpu.pipeline_mode<synchronous>, transform_indices = @transform_9, window_bounds = array<i64: 1, 8>}, {pipeline_mode = #tpu.pipeline_mode<synchronous>, transform_indices = @transform_10, window_bounds = array<i64: 4, 8>}, {pipeline_mode = #tpu.pipeline_mode<synchronous>, transform_indices = @transform_11, window_bounds = array<i64: 1, 8>}, {pipeline_mode = #tpu.pipeline_mode<synchronous>, transform_indices = @transform_12, window_bounds = array<i64: 7, 7, 8>}, {pipeline_mode = #tpu.pipeline_mode<synchronous>, transform_indices = @transform_13, window_bounds = array<i64: 1, 8>}, {pipeline_mode = #tpu.pipeline_mode<synchronous>, transform_indices = @transform_14, window_bounds = array<i64: 1, 8>}, {pipeline_mode = #tpu.pipeline_mode<synchronous>, transform_indices = @transform_15, window_bounds = array<i64: 1, 8>}, {pipeline_mode = #tpu.pipeline_mode<synchronous>, transform_indices = @transform_16, window_bounds = array<i64: 8, 32>}, {pipeline_mode = #tpu.pipeline_mode<synchronous>, transform_indices = @transform_17, window_bounds = array<i64: 1, 32>}, {pipeline_mode = #tpu.pipeline_mode<synchronous>, transform_indices = @transform_18, window_bounds = array<i64: 32, 8>}, {pipeline_mode = #tpu.pipeline_mode<synchronous>, transform_indices = @transform_19, window_bounds = array<i64: 1, 8>}, {pipeline_mode = #tpu.pipeline_mode<synchronous>, transform_indices = @transform_20, window_bounds = array<i64: 8, 256>}, {pipeline_mode = #tpu.pipeline_mode<synchronous>, transform_indices = @transform_21, window_bounds = array<i64: 1, 256>}, {transform_indices = @transform_22, window_bounds = array<i64: 1, 64, 256>}]} {
    %c0 = arith.constant 0 : index
    %c0_0 = arith.constant 0 : index
    %c0_1 = arith.constant 0 : index
    %c0_2 = arith.constant 0 : index
    %0 = vector.load %arg2[%c0, %c0_0, %c0_1, %c0_2] : memref<1x8x8x4xf32, #tpu.memory_space<vmem>>, vector<1x8x8x4xf32>
    %1 = vector.shape_cast %0 : vector<1x8x8x4xf32> to vector<8x8x4xf32>
    %c0_3 = arith.constant 0 : index
    %c0_4 = arith.constant 0 : index
    %c0_5 = arith.constant 0 : index
    %2 = vector.load %arg1[%c0_3, %c0_4, %c0_5] : memref<1x1x4xf32, #tpu.memory_space<vmem>>, vector<1x1x4xf32>
    %3 = vector.shape_cast %2 : vector<1x1x4xf32> to vector<4xf32>
    %4 = vector.shape_cast %3 : vector<4xf32> to vector<1x1x4xf32>
    %5 = vector.broadcast %4 : vector<1x1x4xf32> to vector<8x8x4xf32>
    %6 = arith.addf %1, %5 : vector<8x8x4xf32>
    %c0_6 = arith.constant 0 : index
    %c0_7 = arith.constant 0 : index
    %c0_8 = arith.constant 0 : index
    %7 = vector.load %arg3[%c0_6, %c0_7, %c0_8] : memref<7x7x4xf32, #tpu.memory_space<vmem>>, vector<7x7x4xf32>
    %c0_9 = arith.constant 0 : index
    %c0_10 = arith.constant 0 : index
    %8 = vector.load %arg4[%c0_9, %c0_10] : memref<1x4xf32, #tpu.memory_space<vmem>>, vector<1x4xf32>
    %c0_11 = arith.constant 0 : index
    %c0_12 = arith.constant 0 : index
    %9 = vector.load %arg5[%c0_11, %c0_12] : memref<1x4xf32, #tpu.memory_space<vmem>>, vector<1x4xf32>
    %c0_13 = arith.constant 0 : index
    %c0_14 = arith.constant 0 : index
    %10 = vector.load %arg6[%c0_13, %c0_14] : memref<1x4xf32, #tpu.memory_space<vmem>>, vector<1x4xf32>
    %c0_15 = arith.constant 0 : index
    %c0_16 = arith.constant 0 : index
    %11 = vector.load %arg7[%c0_15, %c0_16] : memref<4x32xbf16, #tpu.memory_space<vmem>>, vector<4x32xbf16>
    %c0_17 = arith.constant 0 : index
    %c0_18 = arith.constant 0 : index
    %12 = vector.load %arg8[%c0_17, %c0_18] : memref<1x32xf32, #tpu.memory_space<vmem>>, vector<1x32xf32>
    %c0_19 = arith.constant 0 : index
    %c0_20 = arith.constant 0 : index
    %13 = vector.load %arg9[%c0_19, %c0_20] : memref<32x8xbf16, #tpu.memory_space<vmem>>, vector<32x8xbf16>
    %c0_21 = arith.constant 0 : index
    %c0_22 = arith.constant 0 : index
    %14 = vector.load %arg10[%c0_21, %c0_22] : memref<1x8xf32, #tpu.memory_space<vmem>>, vector<1x8xf32>
    %c0_23 = arith.constant 0 : index
    %c0_24 = arith.constant 0 : index
    %15 = vector.load %arg11[%c0_23, %c0_24] : memref<4x8xbf16, #tpu.memory_space<vmem>>, vector<4x8xbf16>
    %c0_25 = arith.constant 0 : index
    %c0_26 = arith.constant 0 : index
    %16 = vector.load %arg12[%c0_25, %c0_26] : memref<1x8xf32, #tpu.memory_space<vmem>>, vector<1x8xf32>
    %cst = arith.constant 0.000000e+00 : f32
    %17 = vector.broadcast %cst : f32 to vector<14x24x4xf32>
    %c0_27 = arith.constant 0 : index
    %c0_28 = arith.constant 0 : index
    %c0_29 = arith.constant 0 : index
    %18 = vector.load %arg24[%c0_27, %c0_28, %c0_29] : memref<14x24x4xf32, #tpu.memory_space<vmem>>, vector<14x24x4xf32>
    tpu.vector_store %arg24[%c0_27, %c0_28, %c0_29], %17 {strides = array<i32>} : memref<14x24x4xf32, #tpu.memory_space<vmem>>, vector<14x24x4xf32>,
    %c3 = arith.constant 3 : index
    %c8 = arith.constant 8 : index
    %c0_30 = arith.constant 0 : index
    %19 = vector.load %arg24[%c3, %c8, %c0_30] : memref<14x24x4xf32, #tpu.memory_space<vmem>>, vector<8x8x4xf32>
    tpu.vector_store %arg24[%c3, %c8, %c0_30], %6 {strides = array<i32>} : memref<14x24x4xf32, #tpu.memory_space<vmem>>, vector<8x8x4xf32>,
    %c0_31 = arith.constant 0 : index
    %c5 = arith.constant 5 : index
    %c0_32 = arith.constant 0 : index
    %20 = vector.load %arg24[%c0_31, %c5, %c0_32] : memref<14x24x4xf32, #tpu.memory_space<vmem>>, vector<14x8x4xf32>
    %c0_33 = arith.constant 0 : index
    %c6 = arith.constant 6 : index
    %c0_34 = arith.constant 0 : index
    %21 = vector.load %arg24[%c0_33, %c6, %c0_34] : memref<14x24x4xf32, #tpu.memory_space<vmem>>, vector<14x8x4xf32>
    %c0_35 = arith.constant 0 : index
    %c7 = arith.constant 7 : index
    %c0_36 = arith.constant 0 : index
    %22 = vector.load %arg24[%c0_35, %c7, %c0_36] : memref<14x24x4xf32, #tpu.memory_space<vmem>>, vector<14x8x4xf32>
    %c0_37 = arith.constant 0 : index
    %c8_38 = arith.constant 8 : index
    %c0_39 = arith.constant 0 : index
    %23 = vector.load %arg24[%c0_37, %c8_38, %c0_39] : memref<14x24x4xf32, #tpu.memory_space<vmem>>, vector<14x8x4xf32>
    %c0_40 = arith.constant 0 : index
    %c9 = arith.constant 9 : index
    %c0_41 = arith.constant 0 : index
    %24 = vector.load %arg24[%c0_40, %c9, %c0_41] : memref<14x24x4xf32, #tpu.memory_space<vmem>>, vector<14x8x4xf32>
    %c0_42 = arith.constant 0 : index
    %c10 = arith.constant 10 : index
    %c0_43 = arith.constant 0 : index
    %25 = vector.load %arg24[%c0_42, %c10, %c0_43] : memref<14x24x4xf32, #tpu.memory_space<vmem>>, vector<14x8x4xf32>
    %c0_44 = arith.constant 0 : index
    %c11 = arith.constant 11 : index
    %c0_45 = arith.constant 0 : index
    %26 = vector.load %arg24[%c0_44, %c11, %c0_45] : memref<14x24x4xf32, #tpu.memory_space<vmem>>, vector<14x8x4xf32>
    %cst_46 = arith.constant 0.000000e+00 : f32
    %27 = vector.broadcast %cst_46 : f32 to vector<8x8x4xf32>
    %28 = vector.extract_strided_slice %20 {offsets = [0, 0, 0], sizes = [8, 8, 4], strides = [1, 1, 1]} : vector<14x8x4xf32> to vector<8x8x4xf32>
    %29 = vector.extract_strided_slice %7 {offsets = [0, 0, 0], sizes = [1, 1, 4], strides = [1, 1, 1]} : vector<7x7x4xf32> to vector<1x1x4xf32>
    %30 = vector.shape_cast %29 : vector<1x1x4xf32> to vector<4xf32>
    %31 = vector.shape_cast %30 : vector<4xf32> to vector<1x1x4xf32>
    %32 = vector.broadcast %31 : vector<1x1x4xf32> to vector<8x8x4xf32>
    %33 = arith.mulf %28, %32 : vector<8x8x4xf32>
    %34 = arith.addf %27, %33 : vector<8x8x4xf32>
    %35 = vector.extract_strided_slice %21 {offsets = [0, 0, 0], sizes = [8, 8, 4], strides = [1, 1, 1]} : vector<14x8x4xf32> to vector<8x8x4xf32>
    %36 = vector.extract_strided_slice %7 {offsets = [0, 1, 0], sizes = [1, 1, 4], strides = [1, 1, 1]} : vector<7x7x4xf32> to vector<1x1x4xf32>
    %37 = vector.shape_cast %36 : vector<1x1x4xf32> to vector<4xf32>
    %38 = vector.shape_cast %37 : vector<4xf32> to vector<1x1x4xf32>
    %39 = vector.broadcast %38 : vector<1x1x4xf32> to vector<8x8x4xf32>
    %40 = arith.mulf %35, %39 : vector<8x8x4xf32>
    %41 = arith.addf %34, %40 : vector<8x8x4xf32>
    %42 = vector.extract_strided_slice %22 {offsets = [0, 0, 0], sizes = [8, 8, 4], strides = [1, 1, 1]} : vector<14x8x4xf32> to vector<8x8x4xf32>
    %43 = vector.extract_strided_slice %7 {offsets = [0, 2, 0], sizes = [1, 1, 4], strides = [1, 1, 1]} : vector<7x7x4xf32> to vector<1x1x4xf32>
    %44 = vector.shape_cast %43 : vector<1x1x4xf32> to vector<4xf32>
    %45 = vector.shape_cast %44 : vector<4xf32> to vector<1x1x4xf32>
    %46 = vector.broadcast %45 : vector<1x1x4xf32> to vector<8x8x4xf32>
    %47 = arith.mulf %42, %46 : vector<8x8x4xf32>
    %48 = arith.addf %41, %47 : vector<8x8x4xf32>
    %49 = vector.extract_strided_slice %23 {offsets = [0, 0, 0], sizes = [8, 8, 4], strides = [1, 1, 1]} : vector<14x8x4xf32> to vector<8x8x4xf32>
    %50 = vector.extract_strided_slice %7 {offsets = [0, 3, 0], sizes = [1, 1, 4], strides = [1, 1, 1]} : vector<7x7x4xf32> to vector<1x1x4xf32>
    %51 = vector.shape_cast %50 : vector<1x1x4xf32> to vector<4xf32>
    %52 = vector.shape_cast %51 : vector<4xf32> to vector<1x1x4xf32>
    %53 = vector.broadcast %52 : vector<1x1x4xf32> to vector<8x8x4xf32>
    %54 = arith.mulf %49, %53 : vector<8x8x4xf32>
    %55 = arith.addf %48, %54 : vector<8x8x4xf32>
    %56 = vector.extract_strided_slice %24 {offsets = [0, 0, 0], sizes = [8, 8, 4], strides = [1, 1, 1]} : vector<14x8x4xf32> to vector<8x8x4xf32>
    %57 = vector.extract_strided_slice %7 {offsets = [0, 4, 0], sizes = [1, 1, 4], strides = [1, 1, 1]} : vector<7x7x4xf32> to vector<1x1x4xf32>
    %58 = vector.shape_cast %57 : vector<1x1x4xf32> to vector<4xf32>
    %59 = vector.shape_cast %58 : vector<4xf32> to vector<1x1x4xf32>
    %60 = vector.broadcast %59 : vector<1x1x4xf32> to vector<8x8x4xf32>
    %61 = arith.mulf %56, %60 : vector<8x8x4xf32>
    %62 = arith.addf %55, %61 : vector<8x8x4xf32>
    %63 = vector.extract_strided_slice %25 {offsets = [0, 0, 0], sizes = [8, 8, 4], strides = [1, 1, 1]} : vector<14x8x4xf32> to vector<8x8x4xf32>
    %64 = vector.extract_strided_slice %7 {offsets = [0, 5, 0], sizes = [1, 1, 4], strides = [1, 1, 1]} : vector<7x7x4xf32> to vector<1x1x4xf32>
    %65 = vector.shape_cast %64 : vector<1x1x4xf32> to vector<4xf32>
    %66 = vector.shape_cast %65 : vector<4xf32> to vector<1x1x4xf32>
    %67 = vector.broadcast %66 : vector<1x1x4xf32> to vector<8x8x4xf32>
    %68 = arith.mulf %63, %67 : vector<8x8x4xf32>
    %69 = arith.addf %62, %68 : vector<8x8x4xf32>
    %70 = vector.extract_strided_slice %26 {offsets = [0, 0, 0], sizes = [8, 8, 4], strides = [1, 1, 1]} : vector<14x8x4xf32> to vector<8x8x4xf32>
    %71 = vector.extract_strided_slice %7 {offsets = [0, 6, 0], sizes = [1, 1, 4], strides = [1, 1, 1]} : vector<7x7x4xf32> to vector<1x1x4xf32>
    %72 = vector.shape_cast %71 : vector<1x1x4xf32> to vector<4xf32>
    %73 = vector.shape_cast %72 : vector<4xf32> to vector<1x1x4xf32>
    %74 = vector.broadcast %73 : vector<1x1x4xf32> to vector<8x8x4xf32>
    %75 = arith.mulf %70, %74 : vector<8x8x4xf32>
    %76 = arith.addf %69, %75 : vector<8x8x4xf32>
    %77 = vector.extract_strided_slice %20 {offsets = [1, 0, 0], sizes = [8, 8, 4], strides = [1, 1, 1]} : vector<14x8x4xf32> to vector<8x8x4xf32>
    %78 = vector.extract_strided_slice %7 {offsets = [1, 0, 0], sizes = [1, 1, 4], strides = [1, 1, 1]} : vector<7x7x4xf32> to vector<1x1x4xf32>
    %79 = vector.shape_cast %78 : vector<1x1x4xf32> to vector<4xf32>
    %80 = vector.shape_cast %79 : vector<4xf32> to vector<1x1x4xf32>
    %81 = vector.broadcast %80 : vector<1x1x4xf32> to vector<8x8x4xf32>
    %82 = arith.mulf %77, %81 : vector<8x8x4xf32>
    %83 = arith.addf %76, %82 : vector<8x8x4xf32>
    %84 = vector.extract_strided_slice %21 {offsets = [1, 0, 0], sizes = [8, 8, 4], strides = [1, 1, 1]} : vector<14x8x4xf32> to vector<8x8x4xf32>
    %85 = vector.extract_strided_slice %7 {offsets = [1, 1, 0], sizes = [1, 1, 4], strides = [1, 1, 1]} : vector<7x7x4xf32> to vector<1x1x4xf32>
    %86 = vector.shape_cast %85 : vector<1x1x4xf32> to vector<4xf32>
    %87 = vector.shape_cast %86 : vector<4xf32> to vector<1x1x4xf32>
    %88 = vector.broadcast %87 : vector<1x1x4xf32> to vector<8x8x4xf32>
    %89 = arith.mulf %84, %88 : vector<8x8x4xf32>
    %90 = arith.addf %83, %89 : vector<8x8x4xf32>
    %91 = vector.extract_strided_slice %22 {offsets = [1, 0, 0], sizes = [8, 8, 4], strides = [1, 1, 1]} : vector<14x8x4xf32> to vector<8x8x4xf32>
    %92 = vector.extract_strided_slice %7 {offsets = [1, 2, 0], sizes = [1, 1, 4], strides = [1, 1, 1]} : vector<7x7x4xf32> to vector<1x1x4xf32>
    %93 = vector.shape_cast %92 : vector<1x1x4xf32> to vector<4xf32>
    %94 = vector.shape_cast %93 : vector<4xf32> to vector<1x1x4xf32>
    %95 = vector.broadcast %94 : vector<1x1x4xf32> to vector<8x8x4xf32>
    %96 = arith.mulf %91, %95 : vector<8x8x4xf32>
    %97 = arith.addf %90, %96 : vector<8x8x4xf32>
    %98 = vector.extract_strided_slice %23 {offsets = [1, 0, 0], sizes = [8, 8, 4], strides = [1, 1, 1]} : vector<14x8x4xf32> to vector<8x8x4xf32>
    %99 = vector.extract_strided_slice %7 {offsets = [1, 3, 0], sizes = [1, 1, 4], strides = [1, 1, 1]} : vector<7x7x4xf32> to vector<1x1x4xf32>
    %100 = vector.shape_cast %99 : vector<1x1x4xf32> to vector<4xf32>
    %101 = vector.shape_cast %100 : vector<4xf32> to vector<1x1x4xf32>
    %102 = vector.broadcast %101 : vector<1x1x4xf32> to vector<8x8x4xf32>
    %103 = arith.mulf %98, %102 : vector<8x8x4xf32>
    %104 = arith.addf %97, %103 : vector<8x8x4xf32>
    %105 = vector.extract_strided_slice %24 {offsets = [1, 0, 0], sizes = [8, 8, 4], strides = [1, 1, 1]} : vector<14x8x4xf32> to vector<8x8x4xf32>
    %106 = vector.extract_strided_slice %7 {offsets = [1, 4, 0], sizes = [1, 1, 4], strides = [1, 1, 1]} : vector<7x7x4xf32> to vector<1x1x4xf32>
    %107 = vector.shape_cast %106 : vector<1x1x4xf32> to vector<4xf32>
    %108 = vector.shape_cast %107 : vector<4xf32> to vector<1x1x4xf32>
    %109 = vector.broadcast %108 : vector<1x1x4xf32> to vector<8x8x4xf32>
    %110 = arith.mulf %105, %109 : vector<8x8x4xf32>
    %111 = arith.addf %104, %110 : vector<8x8x4xf32>
    %112 = vector.extract_strided_slice %25 {offsets = [1, 0, 0], sizes = [8, 8, 4], strides = [1, 1, 1]} : vector<14x8x4xf32> to vector<8x8x4xf32>
    %113 = vector.extract_strided_slice %7 {offsets = [1, 5, 0], sizes = [1, 1, 4], strides = [1, 1, 1]} : vector<7x7x4xf32> to vector<1x1x4xf32>
    %114 = vector.shape_cast %113 : vector<1x1x4xf32> to vector<4xf32>
    %115 = vector.shape_cast %114 : vector<4xf32> to vector<1x1x4xf32>
    %116 = vector.broadcast %115 : vector<1x1x4xf32> to vector<8x8x4xf32>
    %117 = arith.mulf %112, %116 : vector<8x8x4xf32>
    %118 = arith.addf %111, %117 : vector<8x8x4xf32>
    %119 = vector.extract_strided_slice %26 {offsets = [1, 0, 0], sizes = [8, 8, 4], strides = [1, 1, 1]} : vector<14x8x4xf32> to vector<8x8x4xf32>
    %120 = vector.extract_strided_slice %7 {offsets = [1, 6, 0], sizes = [1, 1, 4], strides = [1, 1, 1]} : vector<7x7x4xf32> to vector<1x1x4xf32>
    %121 = vector.shape_cast %120 : vector<1x1x4xf32> to vector<4xf32>
    %122 = vector.shape_cast %121 : vector<4xf32> to vector<1x1x4xf32>
    %123 = vector.broadcast %122 : vector<1x1x4xf32> to vector<8x8x4xf32>
    %124 = arith.mulf %119, %123 : vector<8x8x4xf32>
    %125 = arith.addf %118, %124 : vector<8x8x4xf32>
    %126 = vector.extract_strided_slice %20 {offsets = [2, 0, 0], sizes = [8, 8, 4], strides = [1, 1, 1]} : vector<14x8x4xf32> to vector<8x8x4xf32>
    %127 = vector.extract_strided_slice %7 {offsets = [2, 0, 0], sizes = [1, 1, 4], strides = [1, 1, 1]} : vector<7x7x4xf32> to vector<1x1x4xf32>
    %128 = vector.shape_cast %127 : vector<1x1x4xf32> to vector<4xf32>
    %129 = vector.shape_cast %128 : vector<4xf32> to vector<1x1x4xf32>
    %130 = vector.broadcast %129 : vector<1x1x4xf32> to vector<8x8x4xf32>
    %131 = arith.mulf %126, %130 : vector<8x8x4xf32>
    %132 = arith.addf %125, %131 : vector<8x8x4xf32>
    %133 = vector.extract_strided_slice %21 {offsets = [2, 0, 0], sizes = [8, 8, 4], strides = [1, 1, 1]} : vector<14x8x4xf32> to vector<8x8x4xf32>
    %134 = vector.extract_strided_slice %7 {offsets = [2, 1, 0], sizes = [1, 1, 4], strides = [1, 1, 1]} : vector<7x7x4xf32> to vector<1x1x4xf32>
    %135 = vector.shape_cast %134 : vector<1x1x4xf32> to vector<4xf32>
    %136 = vector.shape_cast %135 : vector<4xf32> to vector<1x1x4xf32>
    %137 = vector.broadcast %136 : vector<1x1x4xf32> to vector<8x8x4xf32>
    %138 = arith.mulf %133, %137 : vector<8x8x4xf32>
    %139 = arith.addf %132, %138 : vector<8x8x4xf32>
    %140 = vector.extract_strided_slice %22 {offsets = [2, 0, 0], sizes = [8, 8, 4], strides = [1, 1, 1]} : vector<14x8x4xf32> to vector<8x8x4xf32>
    %141 = vector.extract_strided_slice %7 {offsets = [2, 2, 0], sizes = [1, 1, 4], strides = [1, 1, 1]} : vector<7x7x4xf32> to vector<1x1x4xf32>
    %142 = vector.shape_cast %141 : vector<1x1x4xf32> to vector<4xf32>
    %143 = vector.shape_cast %142 : vector<4xf32> to vector<1x1x4xf32>
    %144 = vector.broadcast %143 : vector<1x1x4xf32> to vector<8x8x4xf32>
    %145 = arith.mulf %140, %144 : vector<8x8x4xf32>
    %146 = arith.addf %139, %145 : vector<8x8x4xf32>
    %147 = vector.extract_strided_slice %23 {offsets = [2, 0, 0], sizes = [8, 8, 4], strides = [1, 1, 1]} : vector<14x8x4xf32> to vector<8x8x4xf32>
    %148 = vector.extract_strided_slice %7 {offsets = [2, 3, 0], sizes = [1, 1, 4], strides = [1, 1, 1]} : vector<7x7x4xf32> to vector<1x1x4xf32>
    %149 = vector.shape_cast %148 : vector<1x1x4xf32> to vector<4xf32>
    %150 = vector.shape_cast %149 : vector<4xf32> to vector<1x1x4xf32>
    %151 = vector.broadcast %150 : vector<1x1x4xf32> to vector<8x8x4xf32>
    %152 = arith.mulf %147, %151 : vector<8x8x4xf32>
    %153 = arith.addf %146, %152 : vector<8x8x4xf32>
    %154 = vector.extract_strided_slice %24 {offsets = [2, 0, 0], sizes = [8, 8, 4], strides = [1, 1, 1]} : vector<14x8x4xf32> to vector<8x8x4xf32>
    %155 = vector.extract_strided_slice %7 {offsets = [2, 4, 0], sizes = [1, 1, 4], strides = [1, 1, 1]} : vector<7x7x4xf32> to vector<1x1x4xf32>
    %156 = vector.shape_cast %155 : vector<1x1x4xf32> to vector<4xf32>
    %157 = vector.shape_cast %156 : vector<4xf32> to vector<1x1x4xf32>
    %158 = vector.broadcast %157 : vector<1x1x4xf32> to vector<8x8x4xf32>
    %159 = arith.mulf %154, %158 : vector<8x8x4xf32>
    %160 = arith.addf %153, %159 : vector<8x8x4xf32>
    %161 = vector.extract_strided_slice %25 {offsets = [2, 0, 0], sizes = [8, 8, 4], strides = [1, 1, 1]} : vector<14x8x4xf32> to vector<8x8x4xf32>
    %162 = vector.extract_strided_slice %7 {offsets = [2, 5, 0], sizes = [1, 1, 4], strides = [1, 1, 1]} : vector<7x7x4xf32> to vector<1x1x4xf32>
    %163 = vector.shape_cast %162 : vector<1x1x4xf32> to vector<4xf32>
    %164 = vector.shape_cast %163 : vector<4xf32> to vector<1x1x4xf32>
    %165 = vector.broadcast %164 : vector<1x1x4xf32> to vector<8x8x4xf32>
    %166 = arith.mulf %161, %165 : vector<8x8x4xf32>
    %167 = arith.addf %160, %166 : vector<8x8x4xf32>
    %168 = vector.extract_strided_slice %26 {offsets = [2, 0, 0], sizes = [8, 8, 4], strides = [1, 1, 1]} : vector<14x8x4xf32> to vector<8x8x4xf32>
    %169 = vector.extract_strided_slice %7 {offsets = [2, 6, 0], sizes = [1, 1, 4], strides = [1, 1, 1]} : vector<7x7x4xf32> to vector<1x1x4xf32>
    %170 = vector.shape_cast %169 : vector<1x1x4xf32> to vector<4xf32>
    %171 = vector.shape_cast %170 : vector<4xf32> to vector<1x1x4xf32>
    %172 = vector.broadcast %171 : vector<1x1x4xf32> to vector<8x8x4xf32>
    %173 = arith.mulf %168, %172 : vector<8x8x4xf32>
    %174 = arith.addf %167, %173 : vector<8x8x4xf32>
    %175 = vector.extract_strided_slice %20 {offsets = [3, 0, 0], sizes = [8, 8, 4], strides = [1, 1, 1]} : vector<14x8x4xf32> to vector<8x8x4xf32>
    %176 = vector.extract_strided_slice %7 {offsets = [3, 0, 0], sizes = [1, 1, 4], strides = [1, 1, 1]} : vector<7x7x4xf32> to vector<1x1x4xf32>
    %177 = vector.shape_cast %176 : vector<1x1x4xf32> to vector<4xf32>
    %178 = vector.shape_cast %177 : vector<4xf32> to vector<1x1x4xf32>
    %179 = vector.broadcast %178 : vector<1x1x4xf32> to vector<8x8x4xf32>
    %180 = arith.mulf %175, %179 : vector<8x8x4xf32>
    %181 = arith.addf %174, %180 : vector<8x8x4xf32>
    %182 = vector.extract_strided_slice %21 {offsets = [3, 0, 0], sizes = [8, 8, 4], strides = [1, 1, 1]} : vector<14x8x4xf32> to vector<8x8x4xf32>
    %183 = vector.extract_strided_slice %7 {offsets = [3, 1, 0], sizes = [1, 1, 4], strides = [1, 1, 1]} : vector<7x7x4xf32> to vector<1x1x4xf32>
    %184 = vector.shape_cast %183 : vector<1x1x4xf32> to vector<4xf32>
    %185 = vector.shape_cast %184 : vector<4xf32> to vector<1x1x4xf32>
    %186 = vector.broadcast %185 : vector<1x1x4xf32> to vector<8x8x4xf32>
    %187 = arith.mulf %182, %186 : vector<8x8x4xf32>
    %188 = arith.addf %181, %187 : vector<8x8x4xf32>
    %189 = vector.extract_strided_slice %22 {offsets = [3, 0, 0], sizes = [8, 8, 4], strides = [1, 1, 1]} : vector<14x8x4xf32> to vector<8x8x4xf32>
    %190 = vector.extract_strided_slice %7 {offsets = [3, 2, 0], sizes = [1, 1, 4], strides = [1, 1, 1]} : vector<7x7x4xf32> to vector<1x1x4xf32>
    %191 = vector.shape_cast %190 : vector<1x1x4xf32> to vector<4xf32>
    %192 = vector.shape_cast %191 : vector<4xf32> to vector<1x1x4xf32>
    %193 = vector.broadcast %192 : vector<1x1x4xf32> to vector<8x8x4xf32>
    %194 = arith.mulf %189, %193 : vector<8x8x4xf32>
    %195 = arith.addf %188, %194 : vector<8x8x4xf32>
    %196 = vector.extract_strided_slice %23 {offsets = [3, 0, 0], sizes = [8, 8, 4], strides = [1, 1, 1]} : vector<14x8x4xf32> to vector<8x8x4xf32>
    %197 = vector.extract_strided_slice %7 {offsets = [3, 3, 0], sizes = [1, 1, 4], strides = [1, 1, 1]} : vector<7x7x4xf32> to vector<1x1x4xf32>
    %198 = vector.shape_cast %197 : vector<1x1x4xf32> to vector<4xf32>
    %199 = vector.shape_cast %198 : vector<4xf32> to vector<1x1x4xf32>
    %200 = vector.broadcast %199 : vector<1x1x4xf32> to vector<8x8x4xf32>
    %201 = arith.mulf %196, %200 : vector<8x8x4xf32>
    %202 = arith.addf %195, %201 : vector<8x8x4xf32>
    %203 = vector.extract_strided_slice %24 {offsets = [3, 0, 0], sizes = [8, 8, 4], strides = [1, 1, 1]} : vector<14x8x4xf32> to vector<8x8x4xf32>
    %204 = vector.extract_strided_slice %7 {offsets = [3, 4, 0], sizes = [1, 1, 4], strides = [1, 1, 1]} : vector<7x7x4xf32> to vector<1x1x4xf32>
    %205 = vector.shape_cast %204 : vector<1x1x4xf32> to vector<4xf32>
    %206 = vector.shape_cast %205 : vector<4xf32> to vector<1x1x4xf32>
    %207 = vector.broadcast %206 : vector<1x1x4xf32> to vector<8x8x4xf32>
    %208 = arith.mulf %203, %207 : vector<8x8x4xf32>
    %209 = arith.addf %202, %208 : vector<8x8x4xf32>
    %210 = vector.extract_strided_slice %25 {offsets = [3, 0, 0], sizes = [8, 8, 4], strides = [1, 1, 1]} : vector<14x8x4xf32> to vector<8x8x4xf32>
    %211 = vector.extract_strided_slice %7 {offsets = [3, 5, 0], sizes = [1, 1, 4], strides = [1, 1, 1]} : vector<7x7x4xf32> to vector<1x1x4xf32>
    %212 = vector.shape_cast %211 : vector<1x1x4xf32> to vector<4xf32>
    %213 = vector.shape_cast %212 : vector<4xf32> to vector<1x1x4xf32>
    %214 = vector.broadcast %213 : vector<1x1x4xf32> to vector<8x8x4xf32>
    %215 = arith.mulf %210, %214 : vector<8x8x4xf32>
    %216 = arith.addf %209, %215 : vector<8x8x4xf32>
    %217 = vector.extract_strided_slice %26 {offsets = [3, 0, 0], sizes = [8, 8, 4], strides = [1, 1, 1]} : vector<14x8x4xf32> to vector<8x8x4xf32>
    %218 = vector.extract_strided_slice %7 {offsets = [3, 6, 0], sizes = [1, 1, 4], strides = [1, 1, 1]} : vector<7x7x4xf32> to vector<1x1x4xf32>
    %219 = vector.shape_cast %218 : vector<1x1x4xf32> to vector<4xf32>
    %220 = vector.shape_cast %219 : vector<4xf32> to vector<1x1x4xf32>
    %221 = vector.broadcast %220 : vector<1x1x4xf32> to vector<8x8x4xf32>
    %222 = arith.mulf %217, %221 : vector<8x8x4xf32>
    %223 = arith.addf %216, %222 : vector<8x8x4xf32>
    %224 = vector.extract_strided_slice %20 {offsets = [4, 0, 0], sizes = [8, 8, 4], strides = [1, 1, 1]} : vector<14x8x4xf32> to vector<8x8x4xf32>
    %225 = vector.extract_strided_slice %7 {offsets = [4, 0, 0], sizes = [1, 1, 4], strides = [1, 1, 1]} : vector<7x7x4xf32> to vector<1x1x4xf32>
    %226 = vector.shape_cast %225 : vector<1x1x4xf32> to vector<4xf32>
    %227 = vector.shape_cast %226 : vector<4xf32> to vector<1x1x4xf32>
    %228 = vector.broadcast %227 : vector<1x1x4xf32> to vector<8x8x4xf32>
    %229 = arith.mulf %224, %228 : vector<8x8x4xf32>
    %230 = arith.addf %223, %229 : vector<8x8x4xf32>
    %231 = vector.extract_strided_slice %21 {offsets = [4, 0, 0], sizes = [8, 8, 4], strides = [1, 1, 1]} : vector<14x8x4xf32> to vector<8x8x4xf32>
    %232 = vector.extract_strided_slice %7 {offsets = [4, 1, 0], sizes = [1, 1, 4], strides = [1, 1, 1]} : vector<7x7x4xf32> to vector<1x1x4xf32>
    %233 = vector.shape_cast %232 : vector<1x1x4xf32> to vector<4xf32>
    %234 = vector.shape_cast %233 : vector<4xf32> to vector<1x1x4xf32>
    %235 = vector.broadcast %234 : vector<1x1x4xf32> to vector<8x8x4xf32>
    %236 = arith.mulf %231, %235 : vector<8x8x4xf32>
    %237 = arith.addf %230, %236 : vector<8x8x4xf32>
    %238 = vector.extract_strided_slice %22 {offsets = [4, 0, 0], sizes = [8, 8, 4], strides = [1, 1, 1]} : vector<14x8x4xf32> to vector<8x8x4xf32>
    %239 = vector.extract_strided_slice %7 {offsets = [4, 2, 0], sizes = [1, 1, 4], strides = [1, 1, 1]} : vector<7x7x4xf32> to vector<1x1x4xf32>
    %240 = vector.shape_cast %239 : vector<1x1x4xf32> to vector<4xf32>
    %241 = vector.shape_cast %240 : vector<4xf32> to vector<1x1x4xf32>
    %242 = vector.broadcast %241 : vector<1x1x4xf32> to vector<8x8x4xf32>
    %243 = arith.mulf %238, %242 : vector<8x8x4xf32>
    %244 = arith.addf %237, %243 : vector<8x8x4xf32>
    %245 = vector.extract_strided_slice %23 {offsets = [4, 0, 0], sizes = [8, 8, 4], strides = [1, 1, 1]} : vector<14x8x4xf32> to vector<8x8x4xf32>
    %246 = vector.extract_strided_slice %7 {offsets = [4, 3, 0], sizes = [1, 1, 4], strides = [1, 1, 1]} : vector<7x7x4xf32> to vector<1x1x4xf32>
    %247 = vector.shape_cast %246 : vector<1x1x4xf32> to vector<4xf32>
    %248 = vector.shape_cast %247 : vector<4xf32> to vector<1x1x4xf32>
    %249 = vector.broadcast %248 : vector<1x1x4xf32> to vector<8x8x4xf32>
    %250 = arith.mulf %245, %249 : vector<8x8x4xf32>
    %251 = arith.addf %244, %250 : vector<8x8x4xf32>
    %252 = vector.extract_strided_slice %24 {offsets = [4, 0, 0], sizes = [8, 8, 4], strides = [1, 1, 1]} : vector<14x8x4xf32> to vector<8x8x4xf32>
    %253 = vector.extract_strided_slice %7 {offsets = [4, 4, 0], sizes = [1, 1, 4], strides = [1, 1, 1]} : vector<7x7x4xf32> to vector<1x1x4xf32>
    %254 = vector.shape_cast %253 : vector<1x1x4xf32> to vector<4xf32>
    %255 = vector.shape_cast %254 : vector<4xf32> to vector<1x1x4xf32>
    %256 = vector.broadcast %255 : vector<1x1x4xf32> to vector<8x8x4xf32>
    %257 = arith.mulf %252, %256 : vector<8x8x4xf32>
    %258 = arith.addf %251, %257 : vector<8x8x4xf32>
    %259 = vector.extract_strided_slice %25 {offsets = [4, 0, 0], sizes = [8, 8, 4], strides = [1, 1, 1]} : vector<14x8x4xf32> to vector<8x8x4xf32>
    %260 = vector.extract_strided_slice %7 {offsets = [4, 5, 0], sizes = [1, 1, 4], strides = [1, 1, 1]} : vector<7x7x4xf32> to vector<1x1x4xf32>
    %261 = vector.shape_cast %260 : vector<1x1x4xf32> to vector<4xf32>
    %262 = vector.shape_cast %261 : vector<4xf32> to vector<1x1x4xf32>
    %263 = vector.broadcast %262 : vector<1x1x4xf32> to vector<8x8x4xf32>
    %264 = arith.mulf %259, %263 : vector<8x8x4xf32>
    %265 = arith.addf %258, %264 : vector<8x8x4xf32>
    %266 = vector.extract_strided_slice %26 {offsets = [4, 0, 0], sizes = [8, 8, 4], strides = [1, 1, 1]} : vector<14x8x4xf32> to vector<8x8x4xf32>
    %267 = vector.extract_strided_slice %7 {offsets = [4, 6, 0], sizes = [1, 1, 4], strides = [1, 1, 1]} : vector<7x7x4xf32> to vector<1x1x4xf32>
    %268 = vector.shape_cast %267 : vector<1x1x4xf32> to vector<4xf32>
    %269 = vector.shape_cast %268 : vector<4xf32> to vector<1x1x4xf32>
    %270 = vector.broadcast %269 : vector<1x1x4xf32> to vector<8x8x4xf32>
    %271 = arith.mulf %266, %270 : vector<8x8x4xf32>
    %272 = arith.addf %265, %271 : vector<8x8x4xf32>
    %273 = vector.extract_strided_slice %20 {offsets = [5, 0, 0], sizes = [8, 8, 4], strides = [1, 1, 1]} : vector<14x8x4xf32> to vector<8x8x4xf32>
    %274 = vector.extract_strided_slice %7 {offsets = [5, 0, 0], sizes = [1, 1, 4], strides = [1, 1, 1]} : vector<7x7x4xf32> to vector<1x1x4xf32>
    %275 = vector.shape_cast %274 : vector<1x1x4xf32> to vector<4xf32>
    %276 = vector.shape_cast %275 : vector<4xf32> to vector<1x1x4xf32>
    %277 = vector.broadcast %276 : vector<1x1x4xf32> to vector<8x8x4xf32>
    %278 = arith.mulf %273, %277 : vector<8x8x4xf32>
    %279 = arith.addf %272, %278 : vector<8x8x4xf32>
    %280 = vector.extract_strided_slice %21 {offsets = [5, 0, 0], sizes = [8, 8, 4], strides = [1, 1, 1]} : vector<14x8x4xf32> to vector<8x8x4xf32>
    %281 = vector.extract_strided_slice %7 {offsets = [5, 1, 0], sizes = [1, 1, 4], strides = [1, 1, 1]} : vector<7x7x4xf32> to vector<1x1x4xf32>
    %282 = vector.shape_cast %281 : vector<1x1x4xf32> to vector<4xf32>
    %283 = vector.shape_cast %282 : vector<4xf32> to vector<1x1x4xf32>
    %284 = vector.broadcast %283 : vector<1x1x4xf32> to vector<8x8x4xf32>
    %285 = arith.mulf %280, %284 : vector<8x8x4xf32>
    %286 = arith.addf %279, %285 : vector<8x8x4xf32>
    %287 = vector.extract_strided_slice %22 {offsets = [5, 0, 0], sizes = [8, 8, 4], strides = [1, 1, 1]} : vector<14x8x4xf32> to vector<8x8x4xf32>
    %288 = vector.extract_strided_slice %7 {offsets = [5, 2, 0], sizes = [1, 1, 4], strides = [1, 1, 1]} : vector<7x7x4xf32> to vector<1x1x4xf32>
    %289 = vector.shape_cast %288 : vector<1x1x4xf32> to vector<4xf32>
    %290 = vector.shape_cast %289 : vector<4xf32> to vector<1x1x4xf32>
    %291 = vector.broadcast %290 : vector<1x1x4xf32> to vector<8x8x4xf32>
    %292 = arith.mulf %287, %291 : vector<8x8x4xf32>
    %293 = arith.addf %286, %292 : vector<8x8x4xf32>
    %294 = vector.extract_strided_slice %23 {offsets = [5, 0, 0], sizes = [8, 8, 4], strides = [1, 1, 1]} : vector<14x8x4xf32> to vector<8x8x4xf32>
    %295 = vector.extract_strided_slice %7 {offsets = [5, 3, 0], sizes = [1, 1, 4], strides = [1, 1, 1]} : vector<7x7x4xf32> to vector<1x1x4xf32>
    %296 = vector.shape_cast %295 : vector<1x1x4xf32> to vector<4xf32>
    %297 = vector.shape_cast %296 : vector<4xf32> to vector<1x1x4xf32>
    %298 = vector.broadcast %297 : vector<1x1x4xf32> to vector<8x8x4xf32>
    %299 = arith.mulf %294, %298 : vector<8x8x4xf32>
    %300 = arith.addf %293, %299 : vector<8x8x4xf32>
    %301 = vector.extract_strided_slice %24 {offsets = [5, 0, 0], sizes = [8, 8, 4], strides = [1, 1, 1]} : vector<14x8x4xf32> to vector<8x8x4xf32>
    %302 = vector.extract_strided_slice %7 {offsets = [5, 4, 0], sizes = [1, 1, 4], strides = [1, 1, 1]} : vector<7x7x4xf32> to vector<1x1x4xf32>
    %303 = vector.shape_cast %302 : vector<1x1x4xf32> to vector<4xf32>
    %304 = vector.shape_cast %303 : vector<4xf32> to vector<1x1x4xf32>
    %305 = vector.broadcast %304 : vector<1x1x4xf32> to vector<8x8x4xf32>
    %306 = arith.mulf %301, %305 : vector<8x8x4xf32>
    %307 = arith.addf %300, %306 : vector<8x8x4xf32>
    %308 = vector.extract_strided_slice %25 {offsets = [5, 0, 0], sizes = [8, 8, 4], strides = [1, 1, 1]} : vector<14x8x4xf32> to vector<8x8x4xf32>
    %309 = vector.extract_strided_slice %7 {offsets = [5, 5, 0], sizes = [1, 1, 4], strides = [1, 1, 1]} : vector<7x7x4xf32> to vector<1x1x4xf32>
    %310 = vector.shape_cast %309 : vector<1x1x4xf32> to vector<4xf32>
    %311 = vector.shape_cast %310 : vector<4xf32> to vector<1x1x4xf32>
    %312 = vector.broadcast %311 : vector<1x1x4xf32> to vector<8x8x4xf32>
    %313 = arith.mulf %308, %312 : vector<8x8x4xf32>
    %314 = arith.addf %307, %313 : vector<8x8x4xf32>
    %315 = vector.extract_strided_slice %26 {offsets = [5, 0, 0], sizes = [8, 8, 4], strides = [1, 1, 1]} : vector<14x8x4xf32> to vector<8x8x4xf32>
    %316 = vector.extract_strided_slice %7 {offsets = [5, 6, 0], sizes = [1, 1, 4], strides = [1, 1, 1]} : vector<7x7x4xf32> to vector<1x1x4xf32>
    %317 = vector.shape_cast %316 : vector<1x1x4xf32> to vector<4xf32>
    %318 = vector.shape_cast %317 : vector<4xf32> to vector<1x1x4xf32>
    %319 = vector.broadcast %318 : vector<1x1x4xf32> to vector<8x8x4xf32>
    %320 = arith.mulf %315, %319 : vector<8x8x4xf32>
    %321 = arith.addf %314, %320 : vector<8x8x4xf32>
    %322 = vector.extract_strided_slice %20 {offsets = [6, 0, 0], sizes = [8, 8, 4], strides = [1, 1, 1]} : vector<14x8x4xf32> to vector<8x8x4xf32>
    %323 = vector.extract_strided_slice %7 {offsets = [6, 0, 0], sizes = [1, 1, 4], strides = [1, 1, 1]} : vector<7x7x4xf32> to vector<1x1x4xf32>
    %324 = vector.shape_cast %323 : vector<1x1x4xf32> to vector<4xf32>
    %325 = vector.shape_cast %324 : vector<4xf32> to vector<1x1x4xf32>
    %326 = vector.broadcast %325 : vector<1x1x4xf32> to vector<8x8x4xf32>
    %327 = arith.mulf %322, %326 : vector<8x8x4xf32>
    %328 = arith.addf %321, %327 : vector<8x8x4xf32>
    %329 = vector.extract_strided_slice %21 {offsets = [6, 0, 0], sizes = [8, 8, 4], strides = [1, 1, 1]} : vector<14x8x4xf32> to vector<8x8x4xf32>
    %330 = vector.extract_strided_slice %7 {offsets = [6, 1, 0], sizes = [1, 1, 4], strides = [1, 1, 1]} : vector<7x7x4xf32> to vector<1x1x4xf32>
    %331 = vector.shape_cast %330 : vector<1x1x4xf32> to vector<4xf32>
    %332 = vector.shape_cast %331 : vector<4xf32> to vector<1x1x4xf32>
    %333 = vector.broadcast %332 : vector<1x1x4xf32> to vector<8x8x4xf32>
    %334 = arith.mulf %329, %333 : vector<8x8x4xf32>
    %335 = arith.addf %328, %334 : vector<8x8x4xf32>
    %336 = vector.extract_strided_slice %22 {offsets = [6, 0, 0], sizes = [8, 8, 4], strides = [1, 1, 1]} : vector<14x8x4xf32> to vector<8x8x4xf32>
    %337 = vector.extract_strided_slice %7 {offsets = [6, 2, 0], sizes = [1, 1, 4], strides = [1, 1, 1]} : vector<7x7x4xf32> to vector<1x1x4xf32>
    %338 = vector.shape_cast %337 : vector<1x1x4xf32> to vector<4xf32>
    %339 = vector.shape_cast %338 : vector<4xf32> to vector<1x1x4xf32>
    %340 = vector.broadcast %339 : vector<1x1x4xf32> to vector<8x8x4xf32>
    %341 = arith.mulf %336, %340 : vector<8x8x4xf32>
    %342 = arith.addf %335, %341 : vector<8x8x4xf32>
    %343 = vector.extract_strided_slice %23 {offsets = [6, 0, 0], sizes = [8, 8, 4], strides = [1, 1, 1]} : vector<14x8x4xf32> to vector<8x8x4xf32>
    %344 = vector.extract_strided_slice %7 {offsets = [6, 3, 0], sizes = [1, 1, 4], strides = [1, 1, 1]} : vector<7x7x4xf32> to vector<1x1x4xf32>
    %345 = vector.shape_cast %344 : vector<1x1x4xf32> to vector<4xf32>
    %346 = vector.shape_cast %345 : vector<4xf32> to vector<1x1x4xf32>
    %347 = vector.broadcast %346 : vector<1x1x4xf32> to vector<8x8x4xf32>
    %348 = arith.mulf %343, %347 : vector<8x8x4xf32>
    %349 = arith.addf %342, %348 : vector<8x8x4xf32>
    %350 = vector.extract_strided_slice %24 {offsets = [6, 0, 0], sizes = [8, 8, 4], strides = [1, 1, 1]} : vector<14x8x4xf32> to vector<8x8x4xf32>
    %351 = vector.extract_strided_slice %7 {offsets = [6, 4, 0], sizes = [1, 1, 4], strides = [1, 1, 1]} : vector<7x7x4xf32> to vector<1x1x4xf32>
    %352 = vector.shape_cast %351 : vector<1x1x4xf32> to vector<4xf32>
    %353 = vector.shape_cast %352 : vector<4xf32> to vector<1x1x4xf32>
    %354 = vector.broadcast %353 : vector<1x1x4xf32> to vector<8x8x4xf32>
    %355 = arith.mulf %350, %354 : vector<8x8x4xf32>
    %356 = arith.addf %349, %355 : vector<8x8x4xf32>
    %357 = vector.extract_strided_slice %25 {offsets = [6, 0, 0], sizes = [8, 8, 4], strides = [1, 1, 1]} : vector<14x8x4xf32> to vector<8x8x4xf32>
    %358 = vector.extract_strided_slice %7 {offsets = [6, 5, 0], sizes = [1, 1, 4], strides = [1, 1, 1]} : vector<7x7x4xf32> to vector<1x1x4xf32>
    %359 = vector.shape_cast %358 : vector<1x1x4xf32> to vector<4xf32>
    %360 = vector.shape_cast %359 : vector<4xf32> to vector<1x1x4xf32>
    %361 = vector.broadcast %360 : vector<1x1x4xf32> to vector<8x8x4xf32>
    %362 = arith.mulf %357, %361 : vector<8x8x4xf32>
    %363 = arith.addf %356, %362 : vector<8x8x4xf32>
    %364 = vector.extract_strided_slice %26 {offsets = [6, 0, 0], sizes = [8, 8, 4], strides = [1, 1, 1]} : vector<14x8x4xf32> to vector<8x8x4xf32>
    %365 = vector.extract_strided_slice %7 {offsets = [6, 6, 0], sizes = [1, 1, 4], strides = [1, 1, 1]} : vector<7x7x4xf32> to vector<1x1x4xf32>
    %366 = vector.shape_cast %365 : vector<1x1x4xf32> to vector<4xf32>
    %367 = vector.shape_cast %366 : vector<4xf32> to vector<1x1x4xf32>
    %368 = vector.broadcast %367 : vector<1x1x4xf32> to vector<8x8x4xf32>
    %369 = arith.mulf %364, %368 : vector<8x8x4xf32>
    %370 = arith.addf %363, %369 : vector<8x8x4xf32>
    %371 = vector.shape_cast %8 : vector<1x4xf32> to vector<4xf32>
    %372 = vector.shape_cast %371 : vector<4xf32> to vector<1x1x4xf32>
    %373 = vector.broadcast %372 : vector<1x1x4xf32> to vector<8x8x4xf32>
    %374 = arith.addf %370, %373 : vector<8x8x4xf32>
    %cst_47 = arith.constant dense<0.000000e+00> : vector<8x8xf32>
    %375 = vector.multi_reduction <add>, %374, %cst_47 [2] : vector<8x8x4xf32> to vector<8x8xf32>
    %376 = vector.shape_cast %375 : vector<8x8xf32> to vector<8x8x1xf32>
    %cst_48 = arith.constant 4.000000e+00 : f32
    %377 = vector.broadcast %cst_48 : f32 to vector<8x8x1xf32>
    %378 = arith.divf %376, %377 : vector<8x8x1xf32>
    %379 = vector.broadcast %378 : vector<8x8x1xf32> to vector<8x8x4xf32>
    %380 = arith.subf %374, %379 : vector<8x8x4xf32>
    %381 = arith.mulf %380, %380 : vector<8x8x4xf32>
    %cst_49 = arith.constant dense<0.000000e+00> : vector<8x8xf32>
    %382 = vector.multi_reduction <add>, %381, %cst_49 [2] : vector<8x8x4xf32> to vector<8x8xf32>
    %383 = vector.shape_cast %382 : vector<8x8xf32> to vector<8x8x1xf32>
    %cst_50 = arith.constant 4.000000e+00 : f32
    %384 = vector.broadcast %cst_50 : f32 to vector<8x8x1xf32>
    %385 = arith.divf %383, %384 : vector<8x8x1xf32>
    %386 = vector.broadcast %378 : vector<8x8x1xf32> to vector<8x8x4xf32>
    %387 = arith.subf %374, %386 : vector<8x8x4xf32>
    %cst_51 = arith.constant 9.99999997E-7 : f32
    %388 = vector.broadcast %cst_51 : f32 to vector<8x8x1xf32>
    %389 = arith.addf %385, %388 : vector<8x8x1xf32>
    %390 = math.rsqrt %389 : vector<8x8x1xf32>
    %391 = vector.broadcast %390 : vector<8x8x1xf32> to vector<8x8x4xf32>
    %392 = arith.mulf %387, %391 : vector<8x8x4xf32>
    %393 = vector.shape_cast %9 : vector<1x4xf32> to vector<4xf32>
    %394 = vector.shape_cast %393 : vector<4xf32> to vector<1x1x4xf32>
    %395 = vector.broadcast %394 : vector<1x1x4xf32> to vector<8x8x4xf32>
    %396 = arith.mulf %392, %395 : vector<8x8x4xf32>
    %397 = vector.shape_cast %10 : vector<1x4xf32> to vector<4xf32>
    %398 = vector.shape_cast %397 : vector<4xf32> to vector<1x1x4xf32>
    %399 = vector.broadcast %398 : vector<1x1x4xf32> to vector<8x8x4xf32>
    %400 = arith.addf %396, %399 : vector<8x8x4xf32>
    %401 = vector.shape_cast %400 : vector<8x8x4xf32> to vector<64x4xf32>
    %402 = arith.truncf %401 : vector<64x4xf32> to vector<64x4xbf16>
    %cst_52 = arith.constant dense<0.000000e+00> : vector<64x32xf32>
    %403 = tpu.matmul %402, %11, %cst_52 {dimension_numbers = #tpu.dot_dimension_numbers<[1], [0], [0], [1], [0, 0, 1, 1], [], []>} : vector<64x4xbf16>, vector<4x32xbf16>, vector<64x32xf32> -> vector<64x32xf32>
    %404 = vector.shape_cast %12 : vector<1x32xf32> to vector<32xf32>
    %405 = vector.shape_cast %404 : vector<32xf32> to vector<1x32xf32>
    %406 = vector.broadcast %405 : vector<1x32xf32> to vector<64x32xf32>
    %407 = arith.addf %403, %406 : vector<64x32xf32>
    %408 = arith.mulf %407, %407 : vector<64x32xf32>
    %409 = arith.mulf %407, %408 : vector<64x32xf32>
    %cst_53 = arith.constant 4.471500e-02 : f32
    %410 = vector.broadcast %cst_53 : f32 to vector<64x32xf32>
    %411 = arith.mulf %410, %409 : vector<64x32xf32>
    %412 = arith.addf %407, %411 : vector<64x32xf32>
    %cst_54 = arith.constant 0.797884583 : f32
    %413 = vector.broadcast %cst_54 : f32 to vector<64x32xf32>
    %414 = arith.mulf %413, %412 : vector<64x32xf32>
    %415 = math.tanh %414 : vector<64x32xf32>
    %cst_55 = arith.constant 1.000000e+00 : f32
    %416 = vector.broadcast %cst_55 : f32 to vector<64x32xf32>
    %417 = arith.addf %416, %415 : vector<64x32xf32>
    %cst_56 = arith.constant 5.000000e-01 : f32
    %418 = vector.broadcast %cst_56 : f32 to vector<64x32xf32>
    %419 = arith.mulf %418, %417 : vector<64x32xf32>
    %420 = arith.mulf %407, %419 : vector<64x32xf32>
    %421 = arith.truncf %420 : vector<64x32xf32> to vector<64x32xbf16>
    %cst_57 = arith.constant dense<0.000000e+00> : vector<64x8xf32>
    %422 = tpu.matmul %421, %13, %cst_57 {dimension_numbers = #tpu.dot_dimension_numbers<[1], [0], [0], [1], [0, 0, 1, 1], [], []>} : vector<64x32xbf16>, vector<32x8xbf16>, vector<64x8xf32> -> vector<64x8xf32>
    %423 = vector.shape_cast %14 : vector<1x8xf32> to vector<8xf32>
    %424 = vector.shape_cast %423 : vector<8xf32> to vector<1x8xf32>
    %425 = vector.broadcast %424 : vector<1x8xf32> to vector<64x8xf32>
    %426 = arith.addf %422, %425 : vector<64x8xf32>
    %427 = vector.shape_cast %6 : vector<8x8x4xf32> to vector<64x4xf32>
    %428 = arith.truncf %427 : vector<64x4xf32> to vector<64x4xbf16>
    %cst_58 = arith.constant dense<0.000000e+00> : vector<64x8xf32>
    %429 = tpu.matmul %428, %15, %cst_58 {dimension_numbers = #tpu.dot_dimension_numbers<[1], [0], [0], [1], [0, 0, 1, 1], [], []>} : vector<64x4xbf16>, vector<4x8xbf16>, vector<64x8xf32> -> vector<64x8xf32>
    %430 = vector.shape_cast %16 : vector<1x8xf32> to vector<8xf32>
    %431 = vector.shape_cast %430 : vector<8xf32> to vector<1x8xf32>
    %432 = vector.broadcast %431 : vector<1x8xf32> to vector<64x8xf32>
    %433 = arith.addf %429, %432 : vector<64x8xf32>
    %434 = arith.addf %426, %433 : vector<64x8xf32>
    %435 = vector.shape_cast %434 : vector<64x8xf32> to vector<8x8x8xf32>
    %c0_59 = arith.constant 0 : index
    %c0_60 = arith.constant 0 : index
    %c0_61 = arith.constant 0 : index
    %436 = vector.load %arg13[%c0_59, %c0_60, %c0_61] : memref<7x7x8xf32, #tpu.memory_space<vmem>>, vector<7x7x8xf32>
    %c0_62 = arith.constant 0 : index
    %c0_63 = arith.constant 0 : index
    %437 = vector.load %arg14[%c0_62, %c0_63] : memref<1x8xf32, #tpu.memory_space<vmem>>, vector<1x8xf32>
    %c0_64 = arith.constant 0 : index
    %c0_65 = arith.constant 0 : index
    %438 = vector.load %arg15[%c0_64, %c0_65] : memref<1x8xf32, #tpu.memory_space<vmem>>, vector<1x8xf32>
    %c0_66 = arith.constant 0 : index
    %c0_67 = arith.constant 0 : index
    %439 = vector.load %arg16[%c0_66, %c0_67] : memref<1x8xf32, #tpu.memory_space<vmem>>, vector<1x8xf32>
    %c0_68 = arith.constant 0 : index
    %c0_69 = arith.constant 0 : index
    %440 = vector.load %arg17[%c0_68, %c0_69] : memref<8x32xbf16, #tpu.memory_space<vmem>>, vector<8x32xbf16>
    %c0_70 = arith.constant 0 : index
    %c0_71 = arith.constant 0 : index
    %441 = vector.load %arg18[%c0_70, %c0_71] : memref<1x32xf32, #tpu.memory_space<vmem>>, vector<1x32xf32>
    %c0_72 = arith.constant 0 : index
    %c0_73 = arith.constant 0 : index
    %442 = vector.load %arg19[%c0_72, %c0_73] : memref<32x8xbf16, #tpu.memory_space<vmem>>, vector<32x8xbf16>
    %c0_74 = arith.constant 0 : index
    %c0_75 = arith.constant 0 : index
    %443 = vector.load %arg20[%c0_74, %c0_75] : memref<1x8xf32, #tpu.memory_space<vmem>>, vector<1x8xf32>
    %cst_76 = arith.constant 0.000000e+00 : f32
    %444 = vector.broadcast %cst_76 : f32 to vector<14x24x8xf32>
    %c0_77 = arith.constant 0 : index
    %c0_78 = arith.constant 0 : index
    %c0_79 = arith.constant 0 : index
    %445 = vector.load %arg25[%c0_77, %c0_78, %c0_79] : memref<14x24x8xf32, #tpu.memory_space<vmem>>, vector<14x24x8xf32>
    tpu.vector_store %arg25[%c0_77, %c0_78, %c0_79], %444 {strides = array<i32>} : memref<14x24x8xf32, #tpu.memory_space<vmem>>, vector<14x24x8xf32>,
    %c3_80 = arith.constant 3 : index
    %c8_81 = arith.constant 8 : index
    %c0_82 = arith.constant 0 : index
    %446 = vector.load %arg25[%c3_80, %c8_81, %c0_82] : memref<14x24x8xf32, #tpu.memory_space<vmem>>, vector<8x8x8xf32>
    tpu.vector_store %arg25[%c3_80, %c8_81, %c0_82], %435 {strides = array<i32>} : memref<14x24x8xf32, #tpu.memory_space<vmem>>, vector<8x8x8xf32>,
    %c0_83 = arith.constant 0 : index
    %c5_84 = arith.constant 5 : index
    %c0_85 = arith.constant 0 : index
    %447 = vector.load %arg25[%c0_83, %c5_84, %c0_85] : memref<14x24x8xf32, #tpu.memory_space<vmem>>, vector<14x8x8xf32>
    %c0_86 = arith.constant 0 : index
    %c6_87 = arith.constant 6 : index
    %c0_88 = arith.constant 0 : index
    %448 = vector.load %arg25[%c0_86, %c6_87, %c0_88] : memref<14x24x8xf32, #tpu.memory_space<vmem>>, vector<14x8x8xf32>
    %c0_89 = arith.constant 0 : index
    %c7_90 = arith.constant 7 : index
    %c0_91 = arith.constant 0 : index
    %449 = vector.load %arg25[%c0_89, %c7_90, %c0_91] : memref<14x24x8xf32, #tpu.memory_space<vmem>>, vector<14x8x8xf32>
    %c0_92 = arith.constant 0 : index
    %c8_93 = arith.constant 8 : index
    %c0_94 = arith.constant 0 : index
    %450 = vector.load %arg25[%c0_92, %c8_93, %c0_94] : memref<14x24x8xf32, #tpu.memory_space<vmem>>, vector<14x8x8xf32>
    %c0_95 = arith.constant 0 : index
    %c9_96 = arith.constant 9 : index
    %c0_97 = arith.constant 0 : index
    %451 = vector.load %arg25[%c0_95, %c9_96, %c0_97] : memref<14x24x8xf32, #tpu.memory_space<vmem>>, vector<14x8x8xf32>
    %c0_98 = arith.constant 0 : index
    %c10_99 = arith.constant 10 : index
    %c0_100 = arith.constant 0 : index
    %452 = vector.load %arg25[%c0_98, %c10_99, %c0_100] : memref<14x24x8xf32, #tpu.memory_space<vmem>>, vector<14x8x8xf32>
    %c0_101 = arith.constant 0 : index
    %c11_102 = arith.constant 11 : index
    %c0_103 = arith.constant 0 : index
    %453 = vector.load %arg25[%c0_101, %c11_102, %c0_103] : memref<14x24x8xf32, #tpu.memory_space<vmem>>, vector<14x8x8xf32>
    %cst_104 = arith.constant 0.000000e+00 : f32
    %454 = vector.broadcast %cst_104 : f32 to vector<8x8x8xf32>
    %455 = vector.extract_strided_slice %447 {offsets = [0, 0, 0], sizes = [8, 8, 8], strides = [1, 1, 1]} : vector<14x8x8xf32> to vector<8x8x8xf32>
    %456 = vector.extract_strided_slice %436 {offsets = [0, 0, 0], sizes = [1, 1, 8], strides = [1, 1, 1]} : vector<7x7x8xf32> to vector<1x1x8xf32>
    %457 = vector.shape_cast %456 : vector<1x1x8xf32> to vector<8xf32>
    %458 = vector.shape_cast %457 : vector<8xf32> to vector<1x1x8xf32>
    %459 = vector.broadcast %458 : vector<1x1x8xf32> to vector<8x8x8xf32>
    %460 = arith.mulf %455, %459 : vector<8x8x8xf32>
    %461 = arith.addf %454, %460 : vector<8x8x8xf32>
    %462 = vector.extract_strided_slice %448 {offsets = [0, 0, 0], sizes = [8, 8, 8], strides = [1, 1, 1]} : vector<14x8x8xf32> to vector<8x8x8xf32>
    %463 = vector.extract_strided_slice %436 {offsets = [0, 1, 0], sizes = [1, 1, 8], strides = [1, 1, 1]} : vector<7x7x8xf32> to vector<1x1x8xf32>
    %464 = vector.shape_cast %463 : vector<1x1x8xf32> to vector<8xf32>
    %465 = vector.shape_cast %464 : vector<8xf32> to vector<1x1x8xf32>
    %466 = vector.broadcast %465 : vector<1x1x8xf32> to vector<8x8x8xf32>
    %467 = arith.mulf %462, %466 : vector<8x8x8xf32>
    %468 = arith.addf %461, %467 : vector<8x8x8xf32>
    %469 = vector.extract_strided_slice %449 {offsets = [0, 0, 0], sizes = [8, 8, 8], strides = [1, 1, 1]} : vector<14x8x8xf32> to vector<8x8x8xf32>
    %470 = vector.extract_strided_slice %436 {offsets = [0, 2, 0], sizes = [1, 1, 8], strides = [1, 1, 1]} : vector<7x7x8xf32> to vector<1x1x8xf32>
    %471 = vector.shape_cast %470 : vector<1x1x8xf32> to vector<8xf32>
    %472 = vector.shape_cast %471 : vector<8xf32> to vector<1x1x8xf32>
    %473 = vector.broadcast %472 : vector<1x1x8xf32> to vector<8x8x8xf32>
    %474 = arith.mulf %469, %473 : vector<8x8x8xf32>
    %475 = arith.addf %468, %474 : vector<8x8x8xf32>
    %476 = vector.extract_strided_slice %450 {offsets = [0, 0, 0], sizes = [8, 8, 8], strides = [1, 1, 1]} : vector<14x8x8xf32> to vector<8x8x8xf32>
    %477 = vector.extract_strided_slice %436 {offsets = [0, 3, 0], sizes = [1, 1, 8], strides = [1, 1, 1]} : vector<7x7x8xf32> to vector<1x1x8xf32>
    %478 = vector.shape_cast %477 : vector<1x1x8xf32> to vector<8xf32>
    %479 = vector.shape_cast %478 : vector<8xf32> to vector<1x1x8xf32>
    %480 = vector.broadcast %479 : vector<1x1x8xf32> to vector<8x8x8xf32>
    %481 = arith.mulf %476, %480 : vector<8x8x8xf32>
    %482 = arith.addf %475, %481 : vector<8x8x8xf32>
    %483 = vector.extract_strided_slice %451 {offsets = [0, 0, 0], sizes = [8, 8, 8], strides = [1, 1, 1]} : vector<14x8x8xf32> to vector<8x8x8xf32>
    %484 = vector.extract_strided_slice %436 {offsets = [0, 4, 0], sizes = [1, 1, 8], strides = [1, 1, 1]} : vector<7x7x8xf32> to vector<1x1x8xf32>
    %485 = vector.shape_cast %484 : vector<1x1x8xf32> to vector<8xf32>
    %486 = vector.shape_cast %485 : vector<8xf32> to vector<1x1x8xf32>
    %487 = vector.broadcast %486 : vector<1x1x8xf32> to vector<8x8x8xf32>
    %488 = arith.mulf %483, %487 : vector<8x8x8xf32>
    %489 = arith.addf %482, %488 : vector<8x8x8xf32>
    %490 = vector.extract_strided_slice %452 {offsets = [0, 0, 0], sizes = [8, 8, 8], strides = [1, 1, 1]} : vector<14x8x8xf32> to vector<8x8x8xf32>
    %491 = vector.extract_strided_slice %436 {offsets = [0, 5, 0], sizes = [1, 1, 8], strides = [1, 1, 1]} : vector<7x7x8xf32> to vector<1x1x8xf32>
    %492 = vector.shape_cast %491 : vector<1x1x8xf32> to vector<8xf32>
    %493 = vector.shape_cast %492 : vector<8xf32> to vector<1x1x8xf32>
    %494 = vector.broadcast %493 : vector<1x1x8xf32> to vector<8x8x8xf32>
    %495 = arith.mulf %490, %494 : vector<8x8x8xf32>
    %496 = arith.addf %489, %495 : vector<8x8x8xf32>
    %497 = vector.extract_strided_slice %453 {offsets = [0, 0, 0], sizes = [8, 8, 8], strides = [1, 1, 1]} : vector<14x8x8xf32> to vector<8x8x8xf32>
    %498 = vector.extract_strided_slice %436 {offsets = [0, 6, 0], sizes = [1, 1, 8], strides = [1, 1, 1]} : vector<7x7x8xf32> to vector<1x1x8xf32>
    %499 = vector.shape_cast %498 : vector<1x1x8xf32> to vector<8xf32>
    %500 = vector.shape_cast %499 : vector<8xf32> to vector<1x1x8xf32>
    %501 = vector.broadcast %500 : vector<1x1x8xf32> to vector<8x8x8xf32>
    %502 = arith.mulf %497, %501 : vector<8x8x8xf32>
    %503 = arith.addf %496, %502 : vector<8x8x8xf32>
    %504 = vector.extract_strided_slice %447 {offsets = [1, 0, 0], sizes = [8, 8, 8], strides = [1, 1, 1]} : vector<14x8x8xf32> to vector<8x8x8xf32>
    %505 = vector.extract_strided_slice %436 {offsets = [1, 0, 0], sizes = [1, 1, 8], strides = [1, 1, 1]} : vector<7x7x8xf32> to vector<1x1x8xf32>
    %506 = vector.shape_cast %505 : vector<1x1x8xf32> to vector<8xf32>
    %507 = vector.shape_cast %506 : vector<8xf32> to vector<1x1x8xf32>
    %508 = vector.broadcast %507 : vector<1x1x8xf32> to vector<8x8x8xf32>
    %509 = arith.mulf %504, %508 : vector<8x8x8xf32>
    %510 = arith.addf %503, %509 : vector<8x8x8xf32>
    %511 = vector.extract_strided_slice %448 {offsets = [1, 0, 0], sizes = [8, 8, 8], strides = [1, 1, 1]} : vector<14x8x8xf32> to vector<8x8x8xf32>
    %512 = vector.extract_strided_slice %436 {offsets = [1, 1, 0], sizes = [1, 1, 8], strides = [1, 1, 1]} : vector<7x7x8xf32> to vector<1x1x8xf32>
    %513 = vector.shape_cast %512 : vector<1x1x8xf32> to vector<8xf32>
    %514 = vector.shape_cast %513 : vector<8xf32> to vector<1x1x8xf32>
    %515 = vector.broadcast %514 : vector<1x1x8xf32> to vector<8x8x8xf32>
    %516 = arith.mulf %511, %515 : vector<8x8x8xf32>
    %517 = arith.addf %510, %516 : vector<8x8x8xf32>
    %518 = vector.extract_strided_slice %449 {offsets = [1, 0, 0], sizes = [8, 8, 8], strides = [1, 1, 1]} : vector<14x8x8xf32> to vector<8x8x8xf32>
    %519 = vector.extract_strided_slice %436 {offsets = [1, 2, 0], sizes = [1, 1, 8], strides = [1, 1, 1]} : vector<7x7x8xf32> to vector<1x1x8xf32>
    %520 = vector.shape_cast %519 : vector<1x1x8xf32> to vector<8xf32>
    %521 = vector.shape_cast %520 : vector<8xf32> to vector<1x1x8xf32>
    %522 = vector.broadcast %521 : vector<1x1x8xf32> to vector<8x8x8xf32>
    %523 = arith.mulf %518, %522 : vector<8x8x8xf32>
    %524 = arith.addf %517, %523 : vector<8x8x8xf32>
    %525 = vector.extract_strided_slice %450 {offsets = [1, 0, 0], sizes = [8, 8, 8], strides = [1, 1, 1]} : vector<14x8x8xf32> to vector<8x8x8xf32>
    %526 = vector.extract_strided_slice %436 {offsets = [1, 3, 0], sizes = [1, 1, 8], strides = [1, 1, 1]} : vector<7x7x8xf32> to vector<1x1x8xf32>
    %527 = vector.shape_cast %526 : vector<1x1x8xf32> to vector<8xf32>
    %528 = vector.shape_cast %527 : vector<8xf32> to vector<1x1x8xf32>
    %529 = vector.broadcast %528 : vector<1x1x8xf32> to vector<8x8x8xf32>
    %530 = arith.mulf %525, %529 : vector<8x8x8xf32>
    %531 = arith.addf %524, %530 : vector<8x8x8xf32>
    %532 = vector.extract_strided_slice %451 {offsets = [1, 0, 0], sizes = [8, 8, 8], strides = [1, 1, 1]} : vector<14x8x8xf32> to vector<8x8x8xf32>
    %533 = vector.extract_strided_slice %436 {offsets = [1, 4, 0], sizes = [1, 1, 8], strides = [1, 1, 1]} : vector<7x7x8xf32> to vector<1x1x8xf32>
    %534 = vector.shape_cast %533 : vector<1x1x8xf32> to vector<8xf32>
    %535 = vector.shape_cast %534 : vector<8xf32> to vector<1x1x8xf32>
    %536 = vector.broadcast %535 : vector<1x1x8xf32> to vector<8x8x8xf32>
    %537 = arith.mulf %532, %536 : vector<8x8x8xf32>
    %538 = arith.addf %531, %537 : vector<8x8x8xf32>
    %539 = vector.extract_strided_slice %452 {offsets = [1, 0, 0], sizes = [8, 8, 8], strides = [1, 1, 1]} : vector<14x8x8xf32> to vector<8x8x8xf32>
    %540 = vector.extract_strided_slice %436 {offsets = [1, 5, 0], sizes = [1, 1, 8], strides = [1, 1, 1]} : vector<7x7x8xf32> to vector<1x1x8xf32>
    %541 = vector.shape_cast %540 : vector<1x1x8xf32> to vector<8xf32>
    %542 = vector.shape_cast %541 : vector<8xf32> to vector<1x1x8xf32>
    %543 = vector.broadcast %542 : vector<1x1x8xf32> to vector<8x8x8xf32>
    %544 = arith.mulf %539, %543 : vector<8x8x8xf32>
    %545 = arith.addf %538, %544 : vector<8x8x8xf32>
    %546 = vector.extract_strided_slice %453 {offsets = [1, 0, 0], sizes = [8, 8, 8], strides = [1, 1, 1]} : vector<14x8x8xf32> to vector<8x8x8xf32>
    %547 = vector.extract_strided_slice %436 {offsets = [1, 6, 0], sizes = [1, 1, 8], strides = [1, 1, 1]} : vector<7x7x8xf32> to vector<1x1x8xf32>
    %548 = vector.shape_cast %547 : vector<1x1x8xf32> to vector<8xf32>
    %549 = vector.shape_cast %548 : vector<8xf32> to vector<1x1x8xf32>
    %550 = vector.broadcast %549 : vector<1x1x8xf32> to vector<8x8x8xf32>
    %551 = arith.mulf %546, %550 : vector<8x8x8xf32>
    %552 = arith.addf %545, %551 : vector<8x8x8xf32>
    %553 = vector.extract_strided_slice %447 {offsets = [2, 0, 0], sizes = [8, 8, 8], strides = [1, 1, 1]} : vector<14x8x8xf32> to vector<8x8x8xf32>
    %554 = vector.extract_strided_slice %436 {offsets = [2, 0, 0], sizes = [1, 1, 8], strides = [1, 1, 1]} : vector<7x7x8xf32> to vector<1x1x8xf32>
    %555 = vector.shape_cast %554 : vector<1x1x8xf32> to vector<8xf32>
    %556 = vector.shape_cast %555 : vector<8xf32> to vector<1x1x8xf32>
    %557 = vector.broadcast %556 : vector<1x1x8xf32> to vector<8x8x8xf32>
    %558 = arith.mulf %553, %557 : vector<8x8x8xf32>
    %559 = arith.addf %552, %558 : vector<8x8x8xf32>
    %560 = vector.extract_strided_slice %448 {offsets = [2, 0, 0], sizes = [8, 8, 8], strides = [1, 1, 1]} : vector<14x8x8xf32> to vector<8x8x8xf32>
    %561 = vector.extract_strided_slice %436 {offsets = [2, 1, 0], sizes = [1, 1, 8], strides = [1, 1, 1]} : vector<7x7x8xf32> to vector<1x1x8xf32>
    %562 = vector.shape_cast %561 : vector<1x1x8xf32> to vector<8xf32>
    %563 = vector.shape_cast %562 : vector<8xf32> to vector<1x1x8xf32>
    %564 = vector.broadcast %563 : vector<1x1x8xf32> to vector<8x8x8xf32>
    %565 = arith.mulf %560, %564 : vector<8x8x8xf32>
    %566 = arith.addf %559, %565 : vector<8x8x8xf32>
    %567 = vector.extract_strided_slice %449 {offsets = [2, 0, 0], sizes = [8, 8, 8], strides = [1, 1, 1]} : vector<14x8x8xf32> to vector<8x8x8xf32>
    %568 = vector.extract_strided_slice %436 {offsets = [2, 2, 0], sizes = [1, 1, 8], strides = [1, 1, 1]} : vector<7x7x8xf32> to vector<1x1x8xf32>
    %569 = vector.shape_cast %568 : vector<1x1x8xf32> to vector<8xf32>
    %570 = vector.shape_cast %569 : vector<8xf32> to vector<1x1x8xf32>
    %571 = vector.broadcast %570 : vector<1x1x8xf32> to vector<8x8x8xf32>
    %572 = arith.mulf %567, %571 : vector<8x8x8xf32>
    %573 = arith.addf %566, %572 : vector<8x8x8xf32>
    %574 = vector.extract_strided_slice %450 {offsets = [2, 0, 0], sizes = [8, 8, 8], strides = [1, 1, 1]} : vector<14x8x8xf32> to vector<8x8x8xf32>
    %575 = vector.extract_strided_slice %436 {offsets = [2, 3, 0], sizes = [1, 1, 8], strides = [1, 1, 1]} : vector<7x7x8xf32> to vector<1x1x8xf32>
    %576 = vector.shape_cast %575 : vector<1x1x8xf32> to vector<8xf32>
    %577 = vector.shape_cast %576 : vector<8xf32> to vector<1x1x8xf32>
    %578 = vector.broadcast %577 : vector<1x1x8xf32> to vector<8x8x8xf32>
    %579 = arith.mulf %574, %578 : vector<8x8x8xf32>
    %580 = arith.addf %573, %579 : vector<8x8x8xf32>
    %581 = vector.extract_strided_slice %451 {offsets = [2, 0, 0], sizes = [8, 8, 8], strides = [1, 1, 1]} : vector<14x8x8xf32> to vector<8x8x8xf32>
    %582 = vector.extract_strided_slice %436 {offsets = [2, 4, 0], sizes = [1, 1, 8], strides = [1, 1, 1]} : vector<7x7x8xf32> to vector<1x1x8xf32>
    %583 = vector.shape_cast %582 : vector<1x1x8xf32> to vector<8xf32>
    %584 = vector.shape_cast %583 : vector<8xf32> to vector<1x1x8xf32>
    %585 = vector.broadcast %584 : vector<1x1x8xf32> to vector<8x8x8xf32>
    %586 = arith.mulf %581, %585 : vector<8x8x8xf32>
    %587 = arith.addf %580, %586 : vector<8x8x8xf32>
    %588 = vector.extract_strided_slice %452 {offsets = [2, 0, 0], sizes = [8, 8, 8], strides = [1, 1, 1]} : vector<14x8x8xf32> to vector<8x8x8xf32>
    %589 = vector.extract_strided_slice %436 {offsets = [2, 5, 0], sizes = [1, 1, 8], strides = [1, 1, 1]} : vector<7x7x8xf32> to vector<1x1x8xf32>
    %590 = vector.shape_cast %589 : vector<1x1x8xf32> to vector<8xf32>
    %591 = vector.shape_cast %590 : vector<8xf32> to vector<1x1x8xf32>
    %592 = vector.broadcast %591 : vector<1x1x8xf32> to vector<8x8x8xf32>
    %593 = arith.mulf %588, %592 : vector<8x8x8xf32>
    %594 = arith.addf %587, %593 : vector<8x8x8xf32>
    %595 = vector.extract_strided_slice %453 {offsets = [2, 0, 0], sizes = [8, 8, 8], strides = [1, 1, 1]} : vector<14x8x8xf32> to vector<8x8x8xf32>
    %596 = vector.extract_strided_slice %436 {offsets = [2, 6, 0], sizes = [1, 1, 8], strides = [1, 1, 1]} : vector<7x7x8xf32> to vector<1x1x8xf32>
    %597 = vector.shape_cast %596 : vector<1x1x8xf32> to vector<8xf32>
    %598 = vector.shape_cast %597 : vector<8xf32> to vector<1x1x8xf32>
    %599 = vector.broadcast %598 : vector<1x1x8xf32> to vector<8x8x8xf32>
    %600 = arith.mulf %595, %599 : vector<8x8x8xf32>
    %601 = arith.addf %594, %600 : vector<8x8x8xf32>
    %602 = vector.extract_strided_slice %447 {offsets = [3, 0, 0], sizes = [8, 8, 8], strides = [1, 1, 1]} : vector<14x8x8xf32> to vector<8x8x8xf32>
    %603 = vector.extract_strided_slice %436 {offsets = [3, 0, 0], sizes = [1, 1, 8], strides = [1, 1, 1]} : vector<7x7x8xf32> to vector<1x1x8xf32>
    %604 = vector.shape_cast %603 : vector<1x1x8xf32> to vector<8xf32>
    %605 = vector.shape_cast %604 : vector<8xf32> to vector<1x1x8xf32>
    %606 = vector.broadcast %605 : vector<1x1x8xf32> to vector<8x8x8xf32>
    %607 = arith.mulf %602, %606 : vector<8x8x8xf32>
    %608 = arith.addf %601, %607 : vector<8x8x8xf32>
    %609 = vector.extract_strided_slice %448 {offsets = [3, 0, 0], sizes = [8, 8, 8], strides = [1, 1, 1]} : vector<14x8x8xf32> to vector<8x8x8xf32>
    %610 = vector.extract_strided_slice %436 {offsets = [3, 1, 0], sizes = [1, 1, 8], strides = [1, 1, 1]} : vector<7x7x8xf32> to vector<1x1x8xf32>
    %611 = vector.shape_cast %610 : vector<1x1x8xf32> to vector<8xf32>
    %612 = vector.shape_cast %611 : vector<8xf32> to vector<1x1x8xf32>
    %613 = vector.broadcast %612 : vector<1x1x8xf32> to vector<8x8x8xf32>
    %614 = arith.mulf %609, %613 : vector<8x8x8xf32>
    %615 = arith.addf %608, %614 : vector<8x8x8xf32>
    %616 = vector.extract_strided_slice %449 {offsets = [3, 0, 0], sizes = [8, 8, 8], strides = [1, 1, 1]} : vector<14x8x8xf32> to vector<8x8x8xf32>
    %617 = vector.extract_strided_slice %436 {offsets = [3, 2, 0], sizes = [1, 1, 8], strides = [1, 1, 1]} : vector<7x7x8xf32> to vector<1x1x8xf32>
    %618 = vector.shape_cast %617 : vector<1x1x8xf32> to vector<8xf32>
    %619 = vector.shape_cast %618 : vector<8xf32> to vector<1x1x8xf32>
    %620 = vector.broadcast %619 : vector<1x1x8xf32> to vector<8x8x8xf32>
    %621 = arith.mulf %616, %620 : vector<8x8x8xf32>
    %622 = arith.addf %615, %621 : vector<8x8x8xf32>
    %623 = vector.extract_strided_slice %450 {offsets = [3, 0, 0], sizes = [8, 8, 8], strides = [1, 1, 1]} : vector<14x8x8xf32> to vector<8x8x8xf32>
    %624 = vector.extract_strided_slice %436 {offsets = [3, 3, 0], sizes = [1, 1, 8], strides = [1, 1, 1]} : vector<7x7x8xf32> to vector<1x1x8xf32>
    %625 = vector.shape_cast %624 : vector<1x1x8xf32> to vector<8xf32>
    %626 = vector.shape_cast %625 : vector<8xf32> to vector<1x1x8xf32>
    %627 = vector.broadcast %626 : vector<1x1x8xf32> to vector<8x8x8xf32>
    %628 = arith.mulf %623, %627 : vector<8x8x8xf32>
    %629 = arith.addf %622, %628 : vector<8x8x8xf32>
    %630 = vector.extract_strided_slice %451 {offsets = [3, 0, 0], sizes = [8, 8, 8], strides = [1, 1, 1]} : vector<14x8x8xf32> to vector<8x8x8xf32>
    %631 = vector.extract_strided_slice %436 {offsets = [3, 4, 0], sizes = [1, 1, 8], strides = [1, 1, 1]} : vector<7x7x8xf32> to vector<1x1x8xf32>
    %632 = vector.shape_cast %631 : vector<1x1x8xf32> to vector<8xf32>
    %633 = vector.shape_cast %632 : vector<8xf32> to vector<1x1x8xf32>
    %634 = vector.broadcast %633 : vector<1x1x8xf32> to vector<8x8x8xf32>
    %635 = arith.mulf %630, %634 : vector<8x8x8xf32>
    %636 = arith.addf %629, %635 : vector<8x8x8xf32>
    %637 = vector.extract_strided_slice %452 {offsets = [3, 0, 0], sizes = [8, 8, 8], strides = [1, 1, 1]} : vector<14x8x8xf32> to vector<8x8x8xf32>
    %638 = vector.extract_strided_slice %436 {offsets = [3, 5, 0], sizes = [1, 1, 8], strides = [1, 1, 1]} : vector<7x7x8xf32> to vector<1x1x8xf32>
    %639 = vector.shape_cast %638 : vector<1x1x8xf32> to vector<8xf32>
    %640 = vector.shape_cast %639 : vector<8xf32> to vector<1x1x8xf32>
    %641 = vector.broadcast %640 : vector<1x1x8xf32> to vector<8x8x8xf32>
    %642 = arith.mulf %637, %641 : vector<8x8x8xf32>
    %643 = arith.addf %636, %642 : vector<8x8x8xf32>
    %644 = vector.extract_strided_slice %453 {offsets = [3, 0, 0], sizes = [8, 8, 8], strides = [1, 1, 1]} : vector<14x8x8xf32> to vector<8x8x8xf32>
    %645 = vector.extract_strided_slice %436 {offsets = [3, 6, 0], sizes = [1, 1, 8], strides = [1, 1, 1]} : vector<7x7x8xf32> to vector<1x1x8xf32>
    %646 = vector.shape_cast %645 : vector<1x1x8xf32> to vector<8xf32>
    %647 = vector.shape_cast %646 : vector<8xf32> to vector<1x1x8xf32>
    %648 = vector.broadcast %647 : vector<1x1x8xf32> to vector<8x8x8xf32>
    %649 = arith.mulf %644, %648 : vector<8x8x8xf32>
    %650 = arith.addf %643, %649 : vector<8x8x8xf32>
    %651 = vector.extract_strided_slice %447 {offsets = [4, 0, 0], sizes = [8, 8, 8], strides = [1, 1, 1]} : vector<14x8x8xf32> to vector<8x8x8xf32>
    %652 = vector.extract_strided_slice %436 {offsets = [4, 0, 0], sizes = [1, 1, 8], strides = [1, 1, 1]} : vector<7x7x8xf32> to vector<1x1x8xf32>
    %653 = vector.shape_cast %652 : vector<1x1x8xf32> to vector<8xf32>
    %654 = vector.shape_cast %653 : vector<8xf32> to vector<1x1x8xf32>
    %655 = vector.broadcast %654 : vector<1x1x8xf32> to vector<8x8x8xf32>
    %656 = arith.mulf %651, %655 : vector<8x8x8xf32>
    %657 = arith.addf %650, %656 : vector<8x8x8xf32>
    %658 = vector.extract_strided_slice %448 {offsets = [4, 0, 0], sizes = [8, 8, 8], strides = [1, 1, 1]} : vector<14x8x8xf32> to vector<8x8x8xf32>
    %659 = vector.extract_strided_slice %436 {offsets = [4, 1, 0], sizes = [1, 1, 8], strides = [1, 1, 1]} : vector<7x7x8xf32> to vector<1x1x8xf32>
    %660 = vector.shape_cast %659 : vector<1x1x8xf32> to vector<8xf32>
    %661 = vector.shape_cast %660 : vector<8xf32> to vector<1x1x8xf32>
    %662 = vector.broadcast %661 : vector<1x1x8xf32> to vector<8x8x8xf32>
    %663 = arith.mulf %658, %662 : vector<8x8x8xf32>
    %664 = arith.addf %657, %663 : vector<8x8x8xf32>
    %665 = vector.extract_strided_slice %449 {offsets = [4, 0, 0], sizes = [8, 8, 8], strides = [1, 1, 1]} : vector<14x8x8xf32> to vector<8x8x8xf32>
    %666 = vector.extract_strided_slice %436 {offsets = [4, 2, 0], sizes = [1, 1, 8], strides = [1, 1, 1]} : vector<7x7x8xf32> to vector<1x1x8xf32>
    %667 = vector.shape_cast %666 : vector<1x1x8xf32> to vector<8xf32>
    %668 = vector.shape_cast %667 : vector<8xf32> to vector<1x1x8xf32>
    %669 = vector.broadcast %668 : vector<1x1x8xf32> to vector<8x8x8xf32>
    %670 = arith.mulf %665, %669 : vector<8x8x8xf32>
    %671 = arith.addf %664, %670 : vector<8x8x8xf32>
    %672 = vector.extract_strided_slice %450 {offsets = [4, 0, 0], sizes = [8, 8, 8], strides = [1, 1, 1]} : vector<14x8x8xf32> to vector<8x8x8xf32>
    %673 = vector.extract_strided_slice %436 {offsets = [4, 3, 0], sizes = [1, 1, 8], strides = [1, 1, 1]} : vector<7x7x8xf32> to vector<1x1x8xf32>
    %674 = vector.shape_cast %673 : vector<1x1x8xf32> to vector<8xf32>
    %675 = vector.shape_cast %674 : vector<8xf32> to vector<1x1x8xf32>
    %676 = vector.broadcast %675 : vector<1x1x8xf32> to vector<8x8x8xf32>
    %677 = arith.mulf %672, %676 : vector<8x8x8xf32>
    %678 = arith.addf %671, %677 : vector<8x8x8xf32>
    %679 = vector.extract_strided_slice %451 {offsets = [4, 0, 0], sizes = [8, 8, 8], strides = [1, 1, 1]} : vector<14x8x8xf32> to vector<8x8x8xf32>
    %680 = vector.extract_strided_slice %436 {offsets = [4, 4, 0], sizes = [1, 1, 8], strides = [1, 1, 1]} : vector<7x7x8xf32> to vector<1x1x8xf32>
    %681 = vector.shape_cast %680 : vector<1x1x8xf32> to vector<8xf32>
    %682 = vector.shape_cast %681 : vector<8xf32> to vector<1x1x8xf32>
    %683 = vector.broadcast %682 : vector<1x1x8xf32> to vector<8x8x8xf32>
    %684 = arith.mulf %679, %683 : vector<8x8x8xf32>
    %685 = arith.addf %678, %684 : vector<8x8x8xf32>
    %686 = vector.extract_strided_slice %452 {offsets = [4, 0, 0], sizes = [8, 8, 8], strides = [1, 1, 1]} : vector<14x8x8xf32> to vector<8x8x8xf32>
    %687 = vector.extract_strided_slice %436 {offsets = [4, 5, 0], sizes = [1, 1, 8], strides = [1, 1, 1]} : vector<7x7x8xf32> to vector<1x1x8xf32>
    %688 = vector.shape_cast %687 : vector<1x1x8xf32> to vector<8xf32>
    %689 = vector.shape_cast %688 : vector<8xf32> to vector<1x1x8xf32>
    %690 = vector.broadcast %689 : vector<1x1x8xf32> to vector<8x8x8xf32>
    %691 = arith.mulf %686, %690 : vector<8x8x8xf32>
    %692 = arith.addf %685, %691 : vector<8x8x8xf32>
    %693 = vector.extract_strided_slice %453 {offsets = [4, 0, 0], sizes = [8, 8, 8], strides = [1, 1, 1]} : vector<14x8x8xf32> to vector<8x8x8xf32>
    %694 = vector.extract_strided_slice %436 {offsets = [4, 6, 0], sizes = [1, 1, 8], strides = [1, 1, 1]} : vector<7x7x8xf32> to vector<1x1x8xf32>
    %695 = vector.shape_cast %694 : vector<1x1x8xf32> to vector<8xf32>
    %696 = vector.shape_cast %695 : vector<8xf32> to vector<1x1x8xf32>
    %697 = vector.broadcast %696 : vector<1x1x8xf32> to vector<8x8x8xf32>
    %698 = arith.mulf %693, %697 : vector<8x8x8xf32>
    %699 = arith.addf %692, %698 : vector<8x8x8xf32>
    %700 = vector.extract_strided_slice %447 {offsets = [5, 0, 0], sizes = [8, 8, 8], strides = [1, 1, 1]} : vector<14x8x8xf32> to vector<8x8x8xf32>
    %701 = vector.extract_strided_slice %436 {offsets = [5, 0, 0], sizes = [1, 1, 8], strides = [1, 1, 1]} : vector<7x7x8xf32> to vector<1x1x8xf32>
    %702 = vector.shape_cast %701 : vector<1x1x8xf32> to vector<8xf32>
    %703 = vector.shape_cast %702 : vector<8xf32> to vector<1x1x8xf32>
    %704 = vector.broadcast %703 : vector<1x1x8xf32> to vector<8x8x8xf32>
    %705 = arith.mulf %700, %704 : vector<8x8x8xf32>
    %706 = arith.addf %699, %705 : vector<8x8x8xf32>
    %707 = vector.extract_strided_slice %448 {offsets = [5, 0, 0], sizes = [8, 8, 8], strides = [1, 1, 1]} : vector<14x8x8xf32> to vector<8x8x8xf32>
    %708 = vector.extract_strided_slice %436 {offsets = [5, 1, 0], sizes = [1, 1, 8], strides = [1, 1, 1]} : vector<7x7x8xf32> to vector<1x1x8xf32>
    %709 = vector.shape_cast %708 : vector<1x1x8xf32> to vector<8xf32>
    %710 = vector.shape_cast %709 : vector<8xf32> to vector<1x1x8xf32>
    %711 = vector.broadcast %710 : vector<1x1x8xf32> to vector<8x8x8xf32>
    %712 = arith.mulf %707, %711 : vector<8x8x8xf32>
    %713 = arith.addf %706, %712 : vector<8x8x8xf32>
    %714 = vector.extract_strided_slice %449 {offsets = [5, 0, 0], sizes = [8, 8, 8], strides = [1, 1, 1]} : vector<14x8x8xf32> to vector<8x8x8xf32>
    %715 = vector.extract_strided_slice %436 {offsets = [5, 2, 0], sizes = [1, 1, 8], strides = [1, 1, 1]} : vector<7x7x8xf32> to vector<1x1x8xf32>
    %716 = vector.shape_cast %715 : vector<1x1x8xf32> to vector<8xf32>
    %717 = vector.shape_cast %716 : vector<8xf32> to vector<1x1x8xf32>
    %718 = vector.broadcast %717 : vector<1x1x8xf32> to vector<8x8x8xf32>
    %719 = arith.mulf %714, %718 : vector<8x8x8xf32>
    %720 = arith.addf %713, %719 : vector<8x8x8xf32>
    %721 = vector.extract_strided_slice %450 {offsets = [5, 0, 0], sizes = [8, 8, 8], strides = [1, 1, 1]} : vector<14x8x8xf32> to vector<8x8x8xf32>
    %722 = vector.extract_strided_slice %436 {offsets = [5, 3, 0], sizes = [1, 1, 8], strides = [1, 1, 1]} : vector<7x7x8xf32> to vector<1x1x8xf32>
    %723 = vector.shape_cast %722 : vector<1x1x8xf32> to vector<8xf32>
    %724 = vector.shape_cast %723 : vector<8xf32> to vector<1x1x8xf32>
    %725 = vector.broadcast %724 : vector<1x1x8xf32> to vector<8x8x8xf32>
    %726 = arith.mulf %721, %725 : vector<8x8x8xf32>
    %727 = arith.addf %720, %726 : vector<8x8x8xf32>
    %728 = vector.extract_strided_slice %451 {offsets = [5, 0, 0], sizes = [8, 8, 8], strides = [1, 1, 1]} : vector<14x8x8xf32> to vector<8x8x8xf32>
    %729 = vector.extract_strided_slice %436 {offsets = [5, 4, 0], sizes = [1, 1, 8], strides = [1, 1, 1]} : vector<7x7x8xf32> to vector<1x1x8xf32>
    %730 = vector.shape_cast %729 : vector<1x1x8xf32> to vector<8xf32>
    %731 = vector.shape_cast %730 : vector<8xf32> to vector<1x1x8xf32>
    %732 = vector.broadcast %731 : vector<1x1x8xf32> to vector<8x8x8xf32>
    %733 = arith.mulf %728, %732 : vector<8x8x8xf32>
    %734 = arith.addf %727, %733 : vector<8x8x8xf32>
    %735 = vector.extract_strided_slice %452 {offsets = [5, 0, 0], sizes = [8, 8, 8], strides = [1, 1, 1]} : vector<14x8x8xf32> to vector<8x8x8xf32>
    %736 = vector.extract_strided_slice %436 {offsets = [5, 5, 0], sizes = [1, 1, 8], strides = [1, 1, 1]} : vector<7x7x8xf32> to vector<1x1x8xf32>
    %737 = vector.shape_cast %736 : vector<1x1x8xf32> to vector<8xf32>
    %738 = vector.shape_cast %737 : vector<8xf32> to vector<1x1x8xf32>
    %739 = vector.broadcast %738 : vector<1x1x8xf32> to vector<8x8x8xf32>
    %740 = arith.mulf %735, %739 : vector<8x8x8xf32>
    %741 = arith.addf %734, %740 : vector<8x8x8xf32>
    %742 = vector.extract_strided_slice %453 {offsets = [5, 0, 0], sizes = [8, 8, 8], strides = [1, 1, 1]} : vector<14x8x8xf32> to vector<8x8x8xf32>
    %743 = vector.extract_strided_slice %436 {offsets = [5, 6, 0], sizes = [1, 1, 8], strides = [1, 1, 1]} : vector<7x7x8xf32> to vector<1x1x8xf32>
    %744 = vector.shape_cast %743 : vector<1x1x8xf32> to vector<8xf32>
    %745 = vector.shape_cast %744 : vector<8xf32> to vector<1x1x8xf32>
    %746 = vector.broadcast %745 : vector<1x1x8xf32> to vector<8x8x8xf32>
    %747 = arith.mulf %742, %746 : vector<8x8x8xf32>
    %748 = arith.addf %741, %747 : vector<8x8x8xf32>
    %749 = vector.extract_strided_slice %447 {offsets = [6, 0, 0], sizes = [8, 8, 8], strides = [1, 1, 1]} : vector<14x8x8xf32> to vector<8x8x8xf32>
    %750 = vector.extract_strided_slice %436 {offsets = [6, 0, 0], sizes = [1, 1, 8], strides = [1, 1, 1]} : vector<7x7x8xf32> to vector<1x1x8xf32>
    %751 = vector.shape_cast %750 : vector<1x1x8xf32> to vector<8xf32>
    %752 = vector.shape_cast %751 : vector<8xf32> to vector<1x1x8xf32>
    %753 = vector.broadcast %752 : vector<1x1x8xf32> to vector<8x8x8xf32>
    %754 = arith.mulf %749, %753 : vector<8x8x8xf32>
    %755 = arith.addf %748, %754 : vector<8x8x8xf32>
    %756 = vector.extract_strided_slice %448 {offsets = [6, 0, 0], sizes = [8, 8, 8], strides = [1, 1, 1]} : vector<14x8x8xf32> to vector<8x8x8xf32>
    %757 = vector.extract_strided_slice %436 {offsets = [6, 1, 0], sizes = [1, 1, 8], strides = [1, 1, 1]} : vector<7x7x8xf32> to vector<1x1x8xf32>
    %758 = vector.shape_cast %757 : vector<1x1x8xf32> to vector<8xf32>
    %759 = vector.shape_cast %758 : vector<8xf32> to vector<1x1x8xf32>
    %760 = vector.broadcast %759 : vector<1x1x8xf32> to vector<8x8x8xf32>
    %761 = arith.mulf %756, %760 : vector<8x8x8xf32>
    %762 = arith.addf %755, %761 : vector<8x8x8xf32>
    %763 = vector.extract_strided_slice %449 {offsets = [6, 0, 0], sizes = [8, 8, 8], strides = [1, 1, 1]} : vector<14x8x8xf32> to vector<8x8x8xf32>
    %764 = vector.extract_strided_slice %436 {offsets = [6, 2, 0], sizes = [1, 1, 8], strides = [1, 1, 1]} : vector<7x7x8xf32> to vector<1x1x8xf32>
    %765 = vector.shape_cast %764 : vector<1x1x8xf32> to vector<8xf32>
    %766 = vector.shape_cast %765 : vector<8xf32> to vector<1x1x8xf32>
    %767 = vector.broadcast %766 : vector<1x1x8xf32> to vector<8x8x8xf32>
    %768 = arith.mulf %763, %767 : vector<8x8x8xf32>
    %769 = arith.addf %762, %768 : vector<8x8x8xf32>
    %770 = vector.extract_strided_slice %450 {offsets = [6, 0, 0], sizes = [8, 8, 8], strides = [1, 1, 1]} : vector<14x8x8xf32> to vector<8x8x8xf32>
    %771 = vector.extract_strided_slice %436 {offsets = [6, 3, 0], sizes = [1, 1, 8], strides = [1, 1, 1]} : vector<7x7x8xf32> to vector<1x1x8xf32>
    %772 = vector.shape_cast %771 : vector<1x1x8xf32> to vector<8xf32>
    %773 = vector.shape_cast %772 : vector<8xf32> to vector<1x1x8xf32>
    %774 = vector.broadcast %773 : vector<1x1x8xf32> to vector<8x8x8xf32>
    %775 = arith.mulf %770, %774 : vector<8x8x8xf32>
    %776 = arith.addf %769, %775 : vector<8x8x8xf32>
    %777 = vector.extract_strided_slice %451 {offsets = [6, 0, 0], sizes = [8, 8, 8], strides = [1, 1, 1]} : vector<14x8x8xf32> to vector<8x8x8xf32>
    %778 = vector.extract_strided_slice %436 {offsets = [6, 4, 0], sizes = [1, 1, 8], strides = [1, 1, 1]} : vector<7x7x8xf32> to vector<1x1x8xf32>
    %779 = vector.shape_cast %778 : vector<1x1x8xf32> to vector<8xf32>
    %780 = vector.shape_cast %779 : vector<8xf32> to vector<1x1x8xf32>
    %781 = vector.broadcast %780 : vector<1x1x8xf32> to vector<8x8x8xf32>
    %782 = arith.mulf %777, %781 : vector<8x8x8xf32>
    %783 = arith.addf %776, %782 : vector<8x8x8xf32>
    %784 = vector.extract_strided_slice %452 {offsets = [6, 0, 0], sizes = [8, 8, 8], strides = [1, 1, 1]} : vector<14x8x8xf32> to vector<8x8x8xf32>
    %785 = vector.extract_strided_slice %436 {offsets = [6, 5, 0], sizes = [1, 1, 8], strides = [1, 1, 1]} : vector<7x7x8xf32> to vector<1x1x8xf32>
    %786 = vector.shape_cast %785 : vector<1x1x8xf32> to vector<8xf32>
    %787 = vector.shape_cast %786 : vector<8xf32> to vector<1x1x8xf32>
    %788 = vector.broadcast %787 : vector<1x1x8xf32> to vector<8x8x8xf32>
    %789 = arith.mulf %784, %788 : vector<8x8x8xf32>
    %790 = arith.addf %783, %789 : vector<8x8x8xf32>
    %791 = vector.extract_strided_slice %453 {offsets = [6, 0, 0], sizes = [8, 8, 8], strides = [1, 1, 1]} : vector<14x8x8xf32> to vector<8x8x8xf32>
    %792 = vector.extract_strided_slice %436 {offsets = [6, 6, 0], sizes = [1, 1, 8], strides = [1, 1, 1]} : vector<7x7x8xf32> to vector<1x1x8xf32>
    %793 = vector.shape_cast %792 : vector<1x1x8xf32> to vector<8xf32>
    %794 = vector.shape_cast %793 : vector<8xf32> to vector<1x1x8xf32>
    %795 = vector.broadcast %794 : vector<1x1x8xf32> to vector<8x8x8xf32>
    %796 = arith.mulf %791, %795 : vector<8x8x8xf32>
    %797 = arith.addf %790, %796 : vector<8x8x8xf32>
    %798 = vector.shape_cast %437 : vector<1x8xf32> to vector<8xf32>
    %799 = vector.shape_cast %798 : vector<8xf32> to vector<1x1x8xf32>
    %800 = vector.broadcast %799 : vector<1x1x8xf32> to vector<8x8x8xf32>
    %801 = arith.addf %797, %800 : vector<8x8x8xf32>
    %cst_105 = arith.constant dense<0.000000e+00> : vector<8x8xf32>
    %802 = vector.multi_reduction <add>, %801, %cst_105 [2] : vector<8x8x8xf32> to vector<8x8xf32>
    %803 = vector.shape_cast %802 : vector<8x8xf32> to vector<8x8x1xf32>
    %cst_106 = arith.constant 8.000000e+00 : f32
    %804 = vector.broadcast %cst_106 : f32 to vector<8x8x1xf32>
    %805 = arith.divf %803, %804 : vector<8x8x1xf32>
    %806 = vector.broadcast %805 : vector<8x8x1xf32> to vector<8x8x8xf32>
    %807 = arith.subf %801, %806 : vector<8x8x8xf32>
    %808 = arith.mulf %807, %807 : vector<8x8x8xf32>
    %cst_107 = arith.constant dense<0.000000e+00> : vector<8x8xf32>
    %809 = vector.multi_reduction <add>, %808, %cst_107 [2] : vector<8x8x8xf32> to vector<8x8xf32>
    %810 = vector.shape_cast %809 : vector<8x8xf32> to vector<8x8x1xf32>
    %cst_108 = arith.constant 8.000000e+00 : f32
    %811 = vector.broadcast %cst_108 : f32 to vector<8x8x1xf32>
    %812 = arith.divf %810, %811 : vector<8x8x1xf32>
    %813 = vector.broadcast %805 : vector<8x8x1xf32> to vector<8x8x8xf32>
    %814 = arith.subf %801, %813 : vector<8x8x8xf32>
    %cst_109 = arith.constant 9.99999997E-7 : f32
    %815 = vector.broadcast %cst_109 : f32 to vector<8x8x1xf32>
    %816 = arith.addf %812, %815 : vector<8x8x1xf32>
    %817 = math.rsqrt %816 : vector<8x8x1xf32>
    %818 = vector.broadcast %817 : vector<8x8x1xf32> to vector<8x8x8xf32>
    %819 = arith.mulf %814, %818 : vector<8x8x8xf32>
    %820 = vector.shape_cast %438 : vector<1x8xf32> to vector<8xf32>
    %821 = vector.shape_cast %820 : vector<8xf32> to vector<1x1x8xf32>
    %822 = vector.broadcast %821 : vector<1x1x8xf32> to vector<8x8x8xf32>
    %823 = arith.mulf %819, %822 : vector<8x8x8xf32>
    %824 = vector.shape_cast %439 : vector<1x8xf32> to vector<8xf32>
    %825 = vector.shape_cast %824 : vector<8xf32> to vector<1x1x8xf32>
    %826 = vector.broadcast %825 : vector<1x1x8xf32> to vector<8x8x8xf32>
    %827 = arith.addf %823, %826 : vector<8x8x8xf32>
    %828 = vector.shape_cast %827 : vector<8x8x8xf32> to vector<64x8xf32>
    %829 = arith.truncf %828 : vector<64x8xf32> to vector<64x8xbf16>
    %cst_110 = arith.constant dense<0.000000e+00> : vector<64x32xf32>
    %830 = tpu.matmul %829, %440, %cst_110 {dimension_numbers = #tpu.dot_dimension_numbers<[1], [0], [0], [1], [0, 0, 1, 1], [], []>} : vector<64x8xbf16>, vector<8x32xbf16>, vector<64x32xf32> -> vector<64x32xf32>
    %831 = vector.shape_cast %441 : vector<1x32xf32> to vector<32xf32>
    %832 = vector.shape_cast %831 : vector<32xf32> to vector<1x32xf32>
    %833 = vector.broadcast %832 : vector<1x32xf32> to vector<64x32xf32>
    %834 = arith.addf %830, %833 : vector<64x32xf32>
    %835 = arith.mulf %834, %834 : vector<64x32xf32>
    %836 = arith.mulf %834, %835 : vector<64x32xf32>
    %cst_111 = arith.constant 4.471500e-02 : f32
    %837 = vector.broadcast %cst_111 : f32 to vector<64x32xf32>
    %838 = arith.mulf %837, %836 : vector<64x32xf32>
    %839 = arith.addf %834, %838 : vector<64x32xf32>
    %cst_112 = arith.constant 0.797884583 : f32
    %840 = vector.broadcast %cst_112 : f32 to vector<64x32xf32>
    %841 = arith.mulf %840, %839 : vector<64x32xf32>
    %842 = math.tanh %841 : vector<64x32xf32>
    %cst_113 = arith.constant 1.000000e+00 : f32
    %843 = vector.broadcast %cst_113 : f32 to vector<64x32xf32>
    %844 = arith.addf %843, %842 : vector<64x32xf32>
    %cst_114 = arith.constant 5.000000e-01 : f32
    %845 = vector.broadcast %cst_114 : f32 to vector<64x32xf32>
    %846 = arith.mulf %845, %844 : vector<64x32xf32>
    %847 = arith.mulf %834, %846 : vector<64x32xf32>
    %848 = arith.truncf %847 : vector<64x32xf32> to vector<64x32xbf16>
    %cst_115 = arith.constant dense<0.000000e+00> : vector<64x8xf32>
    %849 = tpu.matmul %848, %442, %cst_115 {dimension_numbers = #tpu.dot_dimension_numbers<[1], [0], [0], [1], [0, 0, 1, 1], [], []>} : vector<64x32xbf16>, vector<32x8xbf16>, vector<64x8xf32> -> vector<64x8xf32>
    %850 = vector.shape_cast %443 : vector<1x8xf32> to vector<8xf32>
    %851 = vector.shape_cast %850 : vector<8xf32> to vector<1x8xf32>
    %852 = vector.broadcast %851 : vector<1x8xf32> to vector<64x8xf32>
    %853 = arith.addf %849, %852 : vector<64x8xf32>
    %854 = vector.shape_cast %435 : vector<8x8x8xf32> to vector<64x8xf32>
    %855 = arith.addf %853, %854 : vector<64x8xf32>
    %856 = vector.shape_cast %855 : vector<64x8xf32> to vector<8x8x8xf32>
    %c0_116 = arith.constant 0 : index
    %c0_117 = arith.constant 0 : index
    %857 = vector.load %arg21[%c0_116, %c0_117] : memref<8x256xbf16, #tpu.memory_space<vmem>>, vector<8x256xbf16>
    %c0_118 = arith.constant 0 : index
    %c0_119 = arith.constant 0 : index
    %858 = vector.load %arg22[%c0_118, %c0_119] : memref<1x256xf32, #tpu.memory_space<vmem>>, vector<1x256xf32>
    %859 = vector.shape_cast %856 : vector<8x8x8xf32> to vector<64x8xf32>
    %860 = arith.truncf %859 : vector<64x8xf32> to vector<64x8xbf16>
    %cst_120 = arith.constant dense<0.000000e+00> : vector<64x256xf32>
    %861 = tpu.matmul %860, %857, %cst_120 {dimension_numbers = #tpu.dot_dimension_numbers<[1], [0], [0], [1], [0, 0, 1, 1], [], []>} : vector<64x8xbf16>, vector<8x256xbf16>, vector<64x256xf32> -> vector<64x256xf32>
    %862 = vector.shape_cast %858 : vector<1x256xf32> to vector<256xf32>
    %863 = vector.shape_cast %862 : vector<256xf32> to vector<1x256xf32>
    %864 = vector.broadcast %863 : vector<1x256xf32> to vector<64x256xf32>
    %865 = arith.addf %861, %864 : vector<64x256xf32>
    %c0_121 = arith.constant 0 : index
    %c0_122 = arith.constant 0 : index
    %c0_123 = arith.constant 0 : index
    %866 = vector.load %arg23[%c0_121, %c0_122, %c0_123] : memref<1x64x256xf32, #tpu.memory_space<vmem>>, vector<1x64x256xf32>
    %867 = vector.shape_cast %866 : vector<1x64x256xf32> to vector<64x256xf32>
    %868 = vector.shape_cast %865 : vector<64x256xf32> to vector<1x64x256xf32>
    tpu.vector_store %arg23[%c0_121, %c0_122, %c0_123], %868 {strides = array<i32>} : memref<1x64x256xf32, #tpu.memory_space<vmem>>, vector<1x64x256xf32>,
    return
  }
  func.func @transform_0(%arg0: i32) -> (i32, i32, i32) {
    %c0_i32 = arith.constant 0 : i32
    %c0_i32_0 = arith.constant 0 : i32
    %c0_i32_1 = arith.constant 0 : i32
    return %arg0, %c0_i32, %c0_i32_0 : i32, i32, i32
  }
  func.func @transform_1(%arg0: i32) -> (i32, i32, i32, i32) {
    %c0_i32 = arith.constant 0 : i32
    %c0_i32_0 = arith.constant 0 : i32
    %c0_i32_1 = arith.constant 0 : i32
    %c0_i32_2 = arith.constant 0 : i32
    return %arg0, %c0_i32, %c0_i32_0, %c0_i32_1 : i32, i32, i32, i32
  }
  func.func @transform_2(%arg0: i32) -> (i32, i32, i32) {
    %c0_i32 = arith.constant 0 : i32
    %c0_i32_0 = arith.constant 0 : i32
    %c0_i32_1 = arith.constant 0 : i32
    %c0_i32_2 = arith.constant 0 : i32
    return %c0_i32, %c0_i32_0, %c0_i32_1 : i32, i32, i32
  }
  func.func @transform_3(%arg0: i32) -> (i32, i32) {
    %c0_i32 = arith.constant 0 : i32
    %c0_i32_0 = arith.constant 0 : i32
    %c0_i32_1 = arith.constant 0 : i32
    return %c0_i32, %c0_i32_0 : i32, i32
  }
  func.func @transform_4(%arg0: i32) -> (i32, i32) {
    %c0_i32 = arith.constant 0 : i32
    %c0_i32_0 = arith.constant 0 : i32
    %c0_i32_1 = arith.constant 0 : i32
    return %c0_i32, %c0_i32_0 : i32, i32
  }
  func.func @transform_5(%arg0: i32) -> (i32, i32) {
    %c0_i32 = arith.constant 0 : i32
    %c0_i32_0 = arith.constant 0 : i32
    %c0_i32_1 = arith.constant 0 : i32
    return %c0_i32, %c0_i32_0 : i32, i32
  }
  func.func @transform_6(%arg0: i32) -> (i32, i32) {
    %c0_i32 = arith.constant 0 : i32
    %c0_i32_0 = arith.constant 0 : i32
    %c0_i32_1 = arith.constant 0 : i32
    return %c0_i32, %c0_i32_0 : i32, i32
  }
  func.func @transform_7(%arg0: i32) -> (i32, i32) {
    %c0_i32 = arith.constant 0 : i32
    %c0_i32_0 = arith.constant 0 : i32
    %c0_i32_1 = arith.constant 0 : i32
    return %c0_i32, %c0_i32_0 : i32, i32
  }
  func.func @transform_8(%arg0: i32) -> (i32, i32) {
    %c0_i32 = arith.constant 0 : i32
    %c0_i32_0 = arith.constant 0 : i32
    %c0_i32_1 = arith.constant 0 : i32
    return %c0_i32, %c0_i32_0 : i32, i32
  }
  func.func @transform_9(%arg0: i32) -> (i32, i32) {
    %c0_i32 = arith.constant 0 : i32
    %c0_i32_0 = arith.constant 0 : i32
    %c0_i32_1 = arith.constant 0 : i32
    return %c0_i32, %c0_i32_0 : i32, i32
  }
  func.func @transform_10(%arg0: i32) -> (i32, i32) {
    %c0_i32 = arith.constant 0 : i32
    %c0_i32_0 = arith.constant 0 : i32
    %c0_i32_1 = arith.constant 0 : i32
    return %c0_i32, %c0_i32_0 : i32, i32
  }
  func.func @transform_11(%arg0: i32) -> (i32, i32) {
    %c0_i32 = arith.constant 0 : i32
    %c0_i32_0 = arith.constant 0 : i32
    %c0_i32_1 = arith.constant 0 : i32
    return %c0_i32, %c0_i32_0 : i32, i32
  }
  func.func @transform_12(%arg0: i32) -> (i32, i32, i32) {
    %c0_i32 = arith.constant 0 : i32
    %c0_i32_0 = arith.constant 0 : i32
    %c0_i32_1 = arith.constant 0 : i32
    %c0_i32_2 = arith.constant 0 : i32
    return %c0_i32, %c0_i32_0, %c0_i32_1 : i32, i32, i32
  }
  func.func @transform_13(%arg0: i32) -> (i32, i32) {
    %c0_i32 = arith.constant 0 : i32
    %c0_i32_0 = arith.constant 0 : i32
    %c0_i32_1 = arith.constant 0 : i32
    return %c0_i32, %c0_i32_0 : i32, i32
  }
  func.func @transform_14(%arg0: i32) -> (i32, i32) {
    %c0_i32 = arith.constant 0 : i32
    %c0_i32_0 = arith.constant 0 : i32
    %c0_i32_1 = arith.constant 0 : i32
    return %c0_i32, %c0_i32_0 : i32, i32
  }
  func.func @transform_15(%arg0: i32) -> (i32, i32) {
    %c0_i32 = arith.constant 0 : i32
    %c0_i32_0 = arith.constant 0 : i32
    %c0_i32_1 = arith.constant 0 : i32
    return %c0_i32, %c0_i32_0 : i32, i32
  }
  func.func @transform_16(%arg0: i32) -> (i32, i32) {
    %c0_i32 = arith.constant 0 : i32
    %c0_i32_0 = arith.constant 0 : i32
    %c0_i32_1 = arith.constant 0 : i32
    return %c0_i32, %c0_i32_0 : i32, i32
  }
  func.func @transform_17(%arg0: i32) -> (i32, i32) {
    %c0_i32 = arith.constant 0 : i32
    %c0_i32_0 = arith.constant 0 : i32
    %c0_i32_1 = arith.constant 0 : i32
    return %c0_i32, %c0_i32_0 : i32, i32
  }
  func.func @transform_18(%arg0: i32) -> (i32, i32) {
    %c0_i32 = arith.constant 0 : i32
    %c0_i32_0 = arith.constant 0 : i32
    %c0_i32_1 = arith.constant 0 : i32
    return %c0_i32, %c0_i32_0 : i32, i32
  }
  func.func @transform_19(%arg0: i32) -> (i32, i32) {
    %c0_i32 = arith.constant 0 : i32
    %c0_i32_0 = arith.constant 0 : i32
    %c0_i32_1 = arith.constant 0 : i32
    return %c0_i32, %c0_i32_0 : i32, i32
  }
  func.func @transform_20(%arg0: i32) -> (i32, i32) {
    %c0_i32 = arith.constant 0 : i32
    %c0_i32_0 = arith.constant 0 : i32
    %c0_i32_1 = arith.constant 0 : i32
    return %c0_i32, %c0_i32_0 : i32, i32
  }
  func.func @transform_21(%arg0: i32) -> (i32, i32) {
    %c0_i32 = arith.constant 0 : i32
    %c0_i32_0 = arith.constant 0 : i32
    %c0_i32_1 = arith.constant 0 : i32
    return %c0_i32, %c0_i32_0 : i32, i32
  }
  func.func @transform_22(%arg0: i32) -> (i32, i32, i32) {
    %c0_i32 = arith.constant 0 : i32
    %c0_i32_0 = arith.constant 0 : i32
    %c0_i32_1 = arith.constant 0 : i32
    return %arg0, %c0_i32, %c0_i32_0 : i32, i32, i32
  }
}

</mosaic_0001>

<bundles_post_ra>
// kernel: depth_context_decoder_forward.1
= control target key start
LH: loop header
LB: loop body
LE: loop exit
PB: predicated region body
PF: predicated region fallthrough
CT: control target
= control target key end

     0   :  { %s7926_s0 = inlined_call_operand.vmem [shape: f32[2,1,4], index: 0, kind: input, shape index: {}]   ;;  %s7927_s1 = inlined_call_operand.vmem [shape: f32[2,8,8,4], index: 1, kind: input, shape index: {}]   ;;  %s7928_s2 = inlined_call_operand.vmem [shape: f32[7,7,4], index: 2, kind: input, shape index: {}]   ;;  %s7929_s3 = inlined_call_operand.vmem [shape: f32[1,4], index: 3, kind: input, shape index: {}]   ;;  %s7930_s4 = inlined_call_operand.vmem [shape: f32[1,4], index: 4, kind: input, shape index: {}]   ;;  %s7931_s5 = inlined_call_operand.vmem [shape: f32[1,4], index: 5, kind: input, shape index: {}]   ;;  %s7932_s6 = inlined_call_operand.vmem [shape: bf16[4,32], index: 6, kind: input, shape index: {}]   ;;  %s7933_s7 = inlined_call_operand.vmem [shape: f32[1,32], index: 7, kind: input, shape index: {}]   ;;  %s7934_s8 = inlined_call_operand.vmem [shape: bf16[32,8], index: 8, kind: input, shape index: {}]   ;;  %s7935_s9 = inlined_call_operand.vmem [shape: f32[1,8], index: 9, kind: input, shape index: {}]   ;;  %s7936_s10 = inlined_call_operand.vmem [shape: bf16[4,8], index: 10, kind: input, shape index: {}]   ;;  %s7937_s11 = inlined_call_operand.vmem [shape: f32[1,8], index: 11, kind: input, shape index: {}]   ;;  %s7938_s12 = inlined_call_operand.vmem [shape: f32[7,7,8], index: 12, kind: input, shape index: {}]   ;;  %s7939_s13 = inlined_call_operand.vmem [shape: f32[1,8], index: 13, kind: input, shape index: {}]   ;;  %s7940_s14 = inlined_call_operand.vmem [shape: f32[1,8], index: 14, kind: input, shape index: {}]   ;;  %s7941_s15 = inlined_call_operand.vmem [shape: f32[1,8], index: 15, kind: input, shape index: {}]   ;;  %s7942_s16 = inlined_call_operand.vmem [shape: bf16[8,32], index: 16, kind: input, shape index: {}]   ;;  %s7943_s17 = inlined_call_operand.vmem [shape: f32[1,32], index: 17, kind: input, shape index: {}]   ;;  %s7944_s18 = inlined_call_operand.vmem [shape: bf16[32,8], index: 18, kind: input, shape index: {}]   ;;  %s7945_s19 = inlined_call_operand.vmem [shape: f32[1,8], index: 19, kind: input, shape index: {}]   ;;  %s7946_s20 = inlined_call_operand.vmem [shape: bf16[8,256], index: 20, kind: input, shape index: {}]   ;;  %s7947_s21 = inlined_call_operand.vmem [shape: f32[1,256], index: 21, kind: input, shape index: {}]   ;;  %s7948_s22 = inlined_call_operand.vmem [shape: f32[2,64,256], index: 22, kind: output, shape index: {}]  }
   0x1   :  { %8212 = sst [smem:[#allocation125_spill]] %s7926_s0 }
   0x2   :  { %8213 = sst [smem:[#allocation126_spill]] %s7927_s1 }
   0x3   :  { %8214 = sst [smem:[#allocation127_spill]] %s7928_s2 }
   0x4   :  { %8215 = sst [smem:[#allocation128_spill]] %s7929_s3  ;;  %s4485_s3 = smov 0  }
   0x5   :  { %8216 = sst [smem:[#allocation129_spill]] %s7930_s4 }
   0x6   :  { %8217 = sst [smem:[#allocation130_spill]] %s7931_s5 }
   0x7   :  { %8218 = sst [smem:[#allocation131_spill]] %s7932_s6 }
   0x8 LB: > { %s4136_s28 = sadd.s32 4294967295, %s4366_s3   ;;  %p4140_p0 = scmp.ge.s32.totalorder %s4366_s3, 1  ;;  %s4366_s3 = sphi %s4485_s3, %s32_s3  }
   0x9   : > { %p620_p1 = scmp.lt.s32.totalorder %s4366_s3, 3 }
   0xb   : > { %p621_p2 = pnand %p4140_p0, %p620_p1 }
   0xd   : > { %624 = sbr.rel (%p621_p2) target bundleno = 2215 (0x8a7), region = 108 }
  0x12   : > { %p685_p3 = scmp.lt.s32.totalorder %s4136_s28, 1  ;;  %vm741_vm0 = vcmask 31744   ;;  %v891_v0 = vlaneseq  ;;  %s8219_s4 = sld [smem:[#allocation127_spill]]  ;;  %v7950_v2 = vmov 0.0   ;;  %vm2040_vm1 = vcmask 1041408  }
  0x13   : > { %742 = vst.msk [vmem:[#allocation2] sm:$0xff] %vm741_vm0, %v7950_v2  ;;  %743 = vst.msk [vmem:[#allocation2 + $0x8] sm:$0xff] %vm741_vm0, %v7950_v2  ;;  %s8220_s1 = sld [smem:[#allocation125_spill]]  ;;  %vm2203_vm2 = vcmask 261120   ;;  %vm2396_vm3 = vcmask 64512   ;;  %vm3695_vm4 = vcmask 1043456  }
  0x14   : > { %s8925_s28 = smov (!%p685_p3, %s4136_s28), 1  ;;  %744 = vst.msk [vmem:[#allocation2 + $0x10] sm:$0xff] %vm741_vm0, %v7950_v2  ;;  %745 = vst.msk [vmem:[#allocation2 + $0x18] sm:$0xff] %vm741_vm0, %v7950_v2  ;;  %v892_v3 = vshrl.u32 %v891_v0, 7  ;;  %s8221_s26 = sld [smem:[#allocation126_spill]] }
  0x15   : > { %746 = vst.msk [vmem:[#allocation2 + $0x20] sm:$0xff] %vm741_vm0, %v7950_v2  ;;  %747 = vst.msk [vmem:[#allocation2 + $0x28] sm:$0xff] %vm741_vm0, %v7950_v2  ;;  %s4190_s24 = sshll.u32 %s8925_s28, 6  ;;  %s8453_s30 = sld [smem:[#allocation128_spill]] }
  0x16   : > { %748 = vst.msk [vmem:[#allocation2 + $0x30] sm:$0xff] %vm741_vm0, %v7950_v2  ;;  %749 = vst.msk [vmem:[#allocation2 + $0x38] sm:$0xff] %vm741_vm0, %v7950_v2  ;;  %v4596_v5 = vsub.s32 0, %v892_v3  ;;  %v4598_v6 = vsub.s32 1, %v892_v3  ;;  %v4600_v7 = vsub.s32 2, %v892_v3  ;;  %v4605_v11 = vsub.s32 3, %v892_v3 }
  0x17   : > { %750 = vst.msk [vmem:[#allocation2 + $0x40] sm:$0xff] %vm741_vm0, %v7950_v2  ;;  %751 = vst.msk [vmem:[#allocation2 + $0x48] sm:$0xff] %vm741_vm0, %v7950_v2  ;;  %v4644_v23 = vsub.s32 4, %v892_v3  ;;  %v4646_v24 = vsub.s32 5, %v892_v3  ;;  %v4659_v31 = vsub.s32 6, %v892_v3  ;;  %s8579_s6 = sld [smem:[#allocation129_spill]] }
  0x18   : > { %v4498_v1 = vld [vmem:[%s8219_s4] sm:$0x7f]  ;;  %752 = vst.msk [vmem:[#allocation2 + $0x50] sm:$0xff] %vm741_vm0, %v7950_v2  ;;  %753 = vst.msk [vmem:[#allocation2 + $0x58] sm:$0xff] %vm741_vm0, %v7950_v2  ;;  %v4669_v36 = vld [vmem:[%s8219_s4 + $0x8] sm:$0x7f] }
  0x19   : > { %754 = vst.msk [vmem:[#allocation2 + $0x60] sm:$0xff] %vm741_vm0, %v7950_v2  ;;  %755 = vst.msk [vmem:[#allocation2 + $0x68] sm:$0xff] %vm741_vm0, %v7950_v2  ;;  %s687_s5 = scalar_lea.vmem %s8220_s1, %s8925_s28  ;;  %v4619_v16 = vrot.slane %v4498_v1, %v4596_v5  ;;  %v4626_v18 = vrot.slane %v4498_v1, %v4598_v6  ;;  %v4636_v19 = vrot.slane %v4498_v1, %v4600_v7  ;;  %s8578_s1 = sld [smem:[#allocation131_spill]] }
  0x1a   : > { %756 = vst.msk [vmem:[#allocation2 + $0x70] sm:$0xff] %vm741_vm0, %v7950_v2  ;;  %757 = vst.msk [vmem:[#allocation2 + $0x78] sm:$0xff] %vm741_vm0, %v7950_v2  ;;  %s4592_s2 = scalar_lea.vmem %s8221_s26, %s4190_s24  ;;  %v4594_v4 = vld [vmem:[%s687_s5] ss:$0 sm:$0xff]  ;;  %v793_v20 = vld [vmem:[#allocation2 + $0x5] sm:$0xff]  ;;  %v4657_v30 = vrot.slane %v4498_v1, %v4605_v11  ;;  %v4685_v47 = vrot.slane %v4498_v1, %v4644_v23  ;;  %v4689_v48 = vrot.slane %v4498_v1, %v4646_v24  ;;  %s8580_s27 = sld [smem:[#allocation130_spill]] }
  0x1b   : > { %758 = vst.msk [vmem:[#allocation2 + $0x80] sm:$0xff] %vm741_vm0, %v7950_v2  ;;  %759 = vst.msk [vmem:[#allocation2 + $0x88] sm:$0xff] %vm741_vm0, %v7950_v2  ;;  %v699_v8 = vld [vmem:[%s4592_s2] sm:$0xff]  ;;  %v700_v9 = vld [vmem:[%s4592_s2 + $0x8] sm:$0xff]  ;;  %v895_v28 = vmul.f32 %v4619_v16, %v793_v20  ;;  %v4693_v49 = vrot.slane %v4498_v1, %v4659_v31  ;;  %v4701_v54 = vrot.slane %v4669_v36, %v4596_v5  ;;  %s4191_s26 = sshll.u32 %s8925_s28, 7 }
  0x1c   : > { %760 = vst.msk [vmem:[#allocation2 + $0x90] sm:$0xff] %vm741_vm0, %v7950_v2  ;;  %761 = vst.msk [vmem:[#allocation2 + $0x98] sm:$0xff] %vm741_vm0, %v7950_v2  ;;  %v701_v10 = vld [vmem:[%s4592_s2 + $0x10] sm:$0xff]  ;;  %v702_v12 = vld [vmem:[%s4592_s2 + $0x18] sm:$0xff]  ;;  %v4609_v13 = vadd.f32 %v4594_v4, %v699_v8  ;;  %v4612_v14 = vadd.f32 %v4594_v4, %v700_v9  ;;  %v4705_v55 = vrot.slane %v4669_v36, %v4598_v6  ;;  %s7905_s29 = scalar_lea.vmem %s7948_s22, %s4191_s26 }
  0x1d   : > { %762 = vst.msk [vmem:[#allocation2 + $0xa0] sm:$0xff] %vm741_vm0, %v7950_v2  ;;  %763 = vst.msk [vmem:[#allocation2 + $0xa8] sm:$0xff] %vm741_vm0, %v7950_v2  ;;  %v4615_v15 = vadd.f32 %v4594_v4, %v701_v10  ;;  %v4622_v17 = vadd.f32 %v4594_v4, %v702_v12  ;;  %v4640_v21 = vld [vmem:[#allocation2 + $0x1d] sm:$0xff]  ;;  %v4642_v22 = vld [vmem:[#allocation2 + $0x35] sm:$0xff]  ;;  %v4709_v56 = vrot.slane %v4669_v36, %v4600_v7 }
  0x1e   : > { %764 = vst.msk [vmem:[#allocation2 + $0xb0] sm:$0xff] %vm741_vm0, %v7950_v2  ;;  %765 = vst.msk [vmem:[#allocation2 + $0xb8] sm:$0xff] %vm741_vm0, %v7950_v2  ;;  %v807_v25 = vld [vmem:[#allocation2 + $0x6] sm:$0xff]  ;;  %v4648_v26 = vld [vmem:[#allocation2 + $0x1e] sm:$0xff]  ;;  %v896_v29 = vmul.f32 %v4619_v16, %v4640_v21  ;;  %v897_v41 = vmul.f32 %v4619_v16, %v4642_v22  ;;  %v4733_v12 = vrot.slane %v4669_v36, %v4605_v11 }
  0x1f   : > { %766 = vst.msk [vmem:[#allocation2 + $0xc0] sm:$0xff] %vm741_vm0, %v7950_v2  ;;  %767 = vst.msk [vmem:[#allocation2 + $0xc8] sm:$0xff] %vm741_vm0, %v7950_v2  ;;  %v4650_v27 = vld [vmem:[#allocation2 + $0x36] sm:$0xff]  ;;  %v821_v32 = vld [vmem:[#allocation2 + $0x7] sm:$0xff]  ;;  %v915_v34 = vmul.f32 %v4626_v18, %v807_v25  ;;  %v916_v35 = vmul.f32 %v4626_v18, %v4648_v26 }
  0x20   : > { %768 = vst.msk [vmem:[#allocation2 + $0xd0] sm:$0xff] %vm741_vm0, %v7950_v2  ;;  %769 = vst.msk [vmem:[#allocation2 + $0xd8] sm:$0xff] %vm741_vm0, %v7950_v2  ;;  %v4661_v33 = vld [vmem:[#allocation2 + $0x1f] sm:$0xff]  ;;  %v835_v37 = vld [vmem:[#allocation2 + $0x8] sm:$0xff]  ;;  %v935_v38 = vmul.f32 %v4636_v19, %v821_v32  ;;  %v917_v42 = vmul.f32 %v4626_v18, %v4650_v27 }
  0x21   : > { %770 = vst.msk [vmem:[#allocation2 + $0xe0] sm:$0xff] %vm741_vm0, %v7950_v2  ;;  %771 = vst.msk [vmem:[#allocation2 + $0xe8] sm:$0xff] %vm741_vm0, %v7950_v2  ;;  %v936_v39 = vmul.f32 %v4636_v19, %v4661_v33  ;;  %v4674_v40 = vld [vmem:[#allocation2 + $0x20] sm:$0xff]  ;;  %v923_v43 = vadd.f32 %v915_v34, %v895_v28  ;;  %v924_v44 = vadd.f32 %v916_v35, %v896_v29  ;;  %v4680_v45 = vld [vmem:[#allocation2 + $0x37] sm:$0xff] }
  0x22   : > { %772 = vst.msk [vmem:[#allocation2 + $0xf0] sm:$0xff] %vm741_vm0, %v7950_v2  ;;  %773 = vst.msk [vmem:[#allocation2 + $0xf8] sm:$0xff] %vm741_vm0, %v7950_v2  ;;  %v955_v46 = vmul.f32 %v4657_v30, %v835_v37  ;;  %v849_v52 = vld [vmem:[#allocation2 + $0x9] sm:$0xff]  ;;  %v4715_v59 = vld [vmem:[#allocation2 + $0x21] sm:$0xff]  ;;  %v956_v63 = vmul.f32 %v4657_v30, %v4674_v40  ;;  %v925_v9 = vadd.f32 %v917_v42, %v897_v41 }
  0x23   : > { %774 = vst.msk [vmem:[#allocation2 + $0x100] sm:$0xff] %vm741_vm0, %v7950_v2  ;;  %775 = vst.msk [vmem:[#allocation2 + $0x108] sm:$0xff] %vm741_vm0, %v7950_v2  ;;  %v943_v53 = vadd.f32 %v935_v38, %v923_v43  ;;  %v944_v62 = vadd.f32 %v936_v39, %v924_v44  ;;  %v863_v3 = vld [vmem:[#allocation2 + $0xa] sm:$0xff]  ;;  %v937_v10 = vmul.f32 %v4636_v19, %v4680_v45  ;;  %v4739_v28 = vld [vmem:[#allocation2 + $0x22] sm:$0xff] }
  0x24   : > { %776 = vst.msk [vmem:[#allocation2 + $0x110] sm:$0xff] %vm741_vm0, %v7950_v2  ;;  %777 = vst.msk [vmem:[#allocation2 + $0x118] sm:$0xff] %vm741_vm0, %v7950_v2  ;;  %v975_v35 = vmul.f32 %v4685_v47, %v849_v52 }
  0x25   : > { %778 = vst.msk [vmem:[#allocation2 + $0x120] sm:$0xff] %vm741_vm0, %v7950_v2  ;;  %779 = vst.msk [vmem:[#allocation2 + $0x128] sm:$0xff] %vm741_vm0, %v7950_v2  ;;  %v963_v34 = vadd.f32 %v955_v46, %v943_v53  ;;  %v964_v53 = vadd.f32 %v956_v63, %v944_v62 }
  0x26   : > { %780 = vst.msk [vmem:[#allocation2 + $0x130] sm:$0xff] %vm741_vm0, %v7950_v2  ;;  %781 = vst.msk [vmem:[#allocation2 + $0x138] sm:$0xff] %vm741_vm0, %v7950_v2 }
  0x27   : > { %782 = vst.msk [vmem:[#allocation2 + $0x140] sm:$0xff] %vm741_vm0, %v7950_v2  ;;  %783 = vst.msk [vmem:[#allocation2 + $0x148] sm:$0xff] %vm741_vm0, %v7950_v2 }
  0x28   : > { %8222 = vst [vmem:[#allocation4_spill] sm:$0xff] %v4594_v4  ;;  %8223 = vst [vmem:[#allocation5_spill] sm:$0xff] %v4596_v5  ;;  %v4793_v5 = vld [vmem:[#allocation2 + $0x23] sm:$0xff] }
  0x29   : > { %8224 = vst [vmem:[#allocation6_spill] sm:$0xff] %v4598_v6  ;;  %8225 = vst [vmem:[#allocation7_spill] sm:$0xff] %v4600_v7  ;;  %v877_v6 = vld [vmem:[#allocation2 + $0xb] sm:$0xff] }
  0x2a   : > { %8226 = vst [vmem:[#allocation8_spill] sm:$0xff] %v4605_v11  ;;  %8227 = vst [vmem:[#allocation9_spill] sm:$0xff] %v4609_v13 }
  0x2b   : > { %8228 = vst [vmem:[#allocation10_spill] sm:$0xff] %v4612_v14  ;;  %8229 = vst [vmem:[#allocation11_spill] sm:$0xff] %v4615_v15 }
  0x2c   : > { %8230 = vst [vmem:[#allocation12_spill] sm:$0xff] %v4619_v16  ;;  %8231 = vst [vmem:[#allocation13_spill] sm:$0xff] %v4622_v17 }
  0x2d   : > { %8232 = vst [vmem:[#allocation14_spill] sm:$0xff] %v4626_v18  ;;  %785 = vst.msk [vmem:[#allocation2 + $0x50] sm:$0xff] %vm741_vm0, %v4609_v13  ;;  %v995_v13 = vmul.f32 %v4689_v48, %v863_v3 }
  0x2e   : > { %786 = vst.msk [vmem:[#allocation2 + $0x68] sm:$0xff] %vm741_vm0, %v4612_v14  ;;  %787 = vst.msk [vmem:[#allocation2 + $0x80] sm:$0xff] %vm741_vm0, %v4615_v15  ;;  %v4764_v15 = vld [vmem:[#allocation2 + $0x38] sm:$0xff] }
  0x2f   : > { %8233 = vst [vmem:[#allocation15_spill] sm:$0xff] %v4636_v19  ;;  %788 = vst.msk [vmem:[#allocation2 + $0x98] sm:$0xff] %vm741_vm0, %v4622_v17  ;;  %v976_v17 = vmul.f32 %v4685_v47, %v4715_v59 }
  0x30   : > { %8234 = vst [vmem:[#allocation16_spill] sm:$0xff] %v4642_v22  ;;  %8235 = vst [vmem:[#allocation17_spill] sm:$0xff] %v4644_v23 }
  0x31   : > { %8236 = vst [vmem:[#allocation18_spill] sm:$0xff] %v4646_v24  ;;  %8237 = vst [vmem:[#allocation19_spill] sm:$0xff] %v4657_v30 }
  0x32   : > { %8238 = vst [vmem:[#allocation20_spill] sm:$0xff] %v4659_v31  ;;  %8239 = vst [vmem:[#allocation21_spill] sm:$0xff] %v4669_v36  ;;  %v1015_v31 = vmul.f32 %v4693_v49, %v877_v6 }
  0x33   : > { %8240 = vst [vmem:[#allocation22_spill] sm:$0xff] %v4685_v47  ;;  %8241 = vst [vmem:[#allocation23_spill] sm:$0xff] %v4689_v48 }
  0x34   : > { %8242 = vst [vmem:[#allocation24_spill] sm:$0xff] %v4693_v49  ;;  %8243 = vst [vmem:[#allocation25_spill] sm:$0xff] %v4705_v55 }
  0x35   : > { %v4695_v50 = vld [vmem:[#allocation2 + $0x65] sm:$0xff]  ;;  %v4697_v51 = vld [vmem:[#allocation2 + $0x7d] sm:$0xff]  ;;  %8244 = vst [vmem:[#allocation26_spill] sm:$0xff] %v4709_v56  ;;  %8246 = vst [vmem:[#allocation28_spill] sm:$0xff] %v4733_v12 }
  0x36   : > { %v4711_v57 = vld [vmem:[#allocation2 + $0x95] sm:$0xff]  ;;  %v4713_v58 = vld [vmem:[#allocation2 + $0x66] sm:$0xff]  ;;  %v899_v60 = vmul.f32 %v4619_v16, %v4695_v50  ;;  %v900_v61 = vmul.f32 %v4619_v16, %v4697_v51  ;;  %v4723_v0 = vld [vmem:[#allocation2 + $0x7e] sm:$0xff]  ;;  %8248 = vst [vmem:[#allocation30_spill] sm:$0xff] %v4739_v28 }
  0x37   : > { %8245 = vst [vmem:[#allocation27_spill] sm:$0xff] %v4713_v58  ;;  %v4725_v1 = vld [vmem:[#allocation2 + $0x96] sm:$0xff]  ;;  %v919_v8 = vmul.f32 %v4626_v18, %v4713_v58  ;;  %v4735_v20 = vld [vmem:[#allocation2 + $0x67] sm:$0xff]  ;;  %v4737_v25 = vld [vmem:[#allocation2 + $0x7f] sm:$0xff]  ;;  %v901_v29 = vmul.f32 %v4619_v16, %v4711_v57  ;;  %v920_v32 = vmul.f32 %v4626_v18, %v4723_v0 }
  0x38   : > { %8247 = vst [vmem:[#allocation29_spill] sm:$0xff] %v4735_v20  ;;  %v4746_v37 = vld [vmem:[#allocation2 + $0x97] sm:$0xff]  ;;  %v4748_v38 = vld [vmem:[#allocation2 + $0x68] sm:$0xff]  ;;  %v4750_v39 = vld [vmem:[#allocation2 + $0x80] sm:$0xff]  ;;  %v921_v41 = vmul.f32 %v4626_v18, %v4725_v1  ;;  %v939_v43 = vmul.f32 %v4636_v19, %v4735_v20  ;;  %v940_v44 = vmul.f32 %v4636_v19, %v4737_v25  ;;  %v945_v20 = vadd.f32 %v937_v10, %v925_v9 }
  0x39   : > { %8249 = vst [vmem:[#allocation31_spill] sm:$0xff] %v4748_v38  ;;  %v927_v42 = vadd.f32 %v919_v8, %v899_v60  ;;  %v4758_v2 = vld [vmem:[#allocation2 + $0x69] sm:$0xff]  ;;  %v928_v46 = vadd.f32 %v920_v32, %v900_v61  ;;  %v959_v52 = vmul.f32 %v4657_v30, %v4748_v38  ;;  %v4766_v14 = vld [vmem:[#allocation2 + $0x81] sm:$0xff]  ;;  %v960_v8 = vmul.f32 %v4657_v30, %v4750_v39  ;;  %v4785_v16 = vld [vmem:[#allocation2 + $0x39] sm:$0xff] }
  0x3a   : > { %8250 = vst [vmem:[#allocation32_spill] sm:$0xff] %v4758_v2  ;;  %v4773_v61 = vrot.slane %v4669_v36, %v4644_v23  ;;  %v4775_v32 = vld [vmem:[#allocation2 + $0x6a] sm:$0xff]  ;;  %v941_v62 = vmul.f32 %v4636_v19, %v4746_v37  ;;  %v979_v4 = vmul.f32 %v4685_v47, %v4758_v2  ;;  %8253 = vst [vmem:[#allocation35_spill] sm:$0xff] %v4785_v16  ;;  %v4787_v3 = vld [vmem:[#allocation2 + $0x82] sm:$0xff] }
  0x3b   : > { %v947_v60 = vadd.f32 %v939_v43, %v927_v42  ;;  %8252 = vst [vmem:[#allocation34_spill] sm:$0xff] %v4775_v32  ;;  %v948_v63 = vadd.f32 %v940_v44, %v928_v46  ;;  %v996_v42 = vmul.f32 %v4689_v48, %v4739_v28  ;;  %v4783_v43 = vld [vmem:[#allocation2 + $0x98] sm:$0xff]  ;;  %v929_v23 = vadd.f32 %v921_v41, %v901_v29  ;;  %v4803_v9 = vld [vmem:[#allocation2 + $0x6b] sm:$0xff]  ;;  %v4805_v10 = vld [vmem:[#allocation2 + $0x83] sm:$0xff] }
  0x3c   : > { %8251 = vst [vmem:[#allocation33_spill] sm:$0xff] %v4773_v61  ;;  %v980_v7 = vmul.f32 %v4685_v47, %v4766_v14  ;;  %v983_v38 = vadd.f32 %v975_v35, %v963_v34  ;;  %v957_v44 = vmul.f32 %v4657_v30, %v4764_v15  ;;  %v984_v2 = vadd.f32 %v976_v17, %v964_v53  ;;  %v4801_v34 = vld [vmem:[#allocation2 + $0x4e] sm:$0xff] }
  0x3d   : > { %v967_v11 = vadd.f32 %v959_v52, %v947_v60  ;;  %v968_v46 = vadd.f32 %v960_v8, %v948_v63  ;;  %v999_v58 = vmul.f32 %v4689_v48, %v4775_v32  ;;  %v1035_v29 = vmul.f32 %v4701_v54, %v4640_v21  ;;  %v4813_v21 = vld [vmem:[#allocation2 + $0x4f] sm:$0xff]  ;;  %v4815_v52 = vld [vmem:[#allocation2 + $0x99] sm:$0xff] }
  0x3e   : > { %v1036_v41 = vmul.f32 %v4701_v54, %v4642_v22  ;;  %v961_v17 = vmul.f32 %v4657_v30, %v4783_v43  ;;  %v1000_v35 = vmul.f32 %v4689_v48, %v4787_v3  ;;  %v949_v53 = vadd.f32 %v941_v62, %v929_v23  ;;  %v4832_v23 = vld [vmem:[#allocation2 + $0x50] sm:$0xff] }
  0x3f   : > { %v987_v28 = vadd.f32 %v979_v4, %v967_v11  ;;  %v977_v4 = vmul.f32 %v4685_v47, %v4785_v16  ;;  %v988_v11 = vadd.f32 %v980_v7, %v968_v46  ;;  %v1003_v60 = vadd.f32 %v995_v13, %v983_v38  ;;  %v4820_v16 = vld [vmem:[#allocation2 + $0x3a] sm:$0xff] }
  0x40   : > { %v1004_v8 = vadd.f32 %v996_v42, %v984_v2  ;;  %v965_v32 = vadd.f32 %v957_v44, %v945_v20  ;;  %v1016_v36 = vmul.f32 %v4693_v49, %v4793_v5  ;;  %v4824_v7 = vmul.f32 %v4626_v18, %v4801_v34 }
  0x41   : > { %v1007_v63 = vadd.f32 %v999_v58, %v987_v28  ;;  %v1008_v22 = vadd.f32 %v1000_v35, %v988_v11  ;;  %v1019_v46 = vmul.f32 %v4693_v49, %v4803_v9  ;;  %v1020_v2 = vmul.f32 %v4693_v49, %v4805_v10  ;;  %v4842_v11 = vld [vmem:[#allocation2 + $0x51] sm:$0xff] }
  0x42   : > { %v1055_v13 = vmul.f32 %v4705_v55, %v4648_v26  ;;  %v4836_v6 = vmul.f32 %v4636_v19, %v4813_v21  ;;  %v981_v58 = vmul.f32 %v4685_v47, %v4815_v52  ;;  %v1023_v20 = vadd.f32 %v1015_v31, %v1003_v60  ;;  %v4844_v26 = vld [vmem:[#allocation2 + $0x9a] sm:$0xff] }
  0x43   : > { %v1024_v28 = vadd.f32 %v1016_v36, %v1004_v8  ;;  %v969_v38 = vadd.f32 %v961_v17, %v949_v53  ;;  %v1027_v62 = vadd.f32 %v1019_v46, %v1007_v63  ;;  %v1028_v42 = vadd.f32 %v1020_v2, %v1008_v22  ;;  %v4850_v31 = vld [vmem:[#allocation2 + $0x3b] sm:$0xff] }
  0x44   : > { %8254 = vst [vmem:[#allocation36_spill] sm:$0xff] %v4836_v6  ;;  %v1039_v44 = vmul.f32 %v4701_v54, %v4697_v51  ;;  %v985_v35 = vadd.f32 %v977_v4, %v965_v32  ;;  %v997_v19 = vmul.f32 %v4689_v48, %v4820_v16  ;;  %v1040_v18 = vmul.f32 %v4701_v54, %v4711_v57  ;;  %v4872_v2 = vld [vmem:[#allocation2 + $0x9b] sm:$0xff] }
  0x45   : > { %v1043_v6 = vadd.f32 %v1035_v29, %v1023_v20  ;;  %v4854_v22 = vmul.f32 %v4657_v30, %v4832_v23  ;;  %v1044_v36 = vadd.f32 %v1036_v41, %v1024_v28  ;;  %v1056_v53 = vmul.f32 %v4705_v55, %v4650_v27  ;;  %v4862_v29 = vld [vmem:[#allocation2 + $0x52] sm:$0xff] }
  0x46   : > { %v1047_v17 = vadd.f32 %v1039_v44, %v1027_v62  ;;  %v1048_v60 = vadd.f32 %v1040_v18, %v1028_v42  ;;  %v1059_v32 = vmul.f32 %v4705_v55, %v4723_v0  ;;  %v1060_v4 = vmul.f32 %v4705_v55, %v4725_v1  ;;  %v4878_v62 = vld [vmem:[#allocation2 + $0x53] sm:$0xff] }
  0x47   : > { %8255 = vst [vmem:[#allocation37_spill] sm:$0xff] %v4854_v22  ;;  %v1063_v8 = vadd.f32 %v1055_v13, %v1043_v6  ;;  %v4866_v63 = vmul.f32 %v4685_v47, %v4842_v11  ;;  %v989_v46 = vadd.f32 %v981_v58, %v969_v38  ;;  %v1001_v41 = vmul.f32 %v4689_v48, %v4844_v26 }
  0x48   : > { %v1075_v18 = vmul.f32 %v4709_v56, %v4661_v33  ;;  %v1005_v20 = vadd.f32 %v997_v19, %v985_v35  ;;  %v1017_v28 = vmul.f32 %v4693_v49, %v4850_v31  ;;  %v1067_v13 = vadd.f32 %v1059_v32, %v1047_v17 }
  0x49   : > { %8256 = vst [vmem:[#allocation38_spill] sm:$0xff] %v4866_v63  ;;  %v1079_v6 = vmul.f32 %v4709_v56, %v4737_v25  ;;  %v1064_v42 = vadd.f32 %v1056_v53, %v1044_v36  ;;  %v1076_v58 = vmul.f32 %v4709_v56, %v4680_v45  ;;  %v1095_v33 = vmul.f32 %v4733_v12, %v4674_v40 }
  0x4a   : > { %v1083_v38 = vadd.f32 %v1075_v18, %v1063_v8  ;;  %v4886_v19 = vmul.f32 %v4689_v48, %v4862_v29  ;;  %v1068_v44 = vadd.f32 %v1060_v4, %v1048_v60  ;;  %v1080_v35 = vmul.f32 %v4709_v56, %v4746_v37 }
  0x4b   : > { %v1087_v17 = vadd.f32 %v1079_v6, %v1067_v13  ;;  %v1009_v32 = vadd.f32 %v1001_v41, %v989_v46  ;;  %v1021_v36 = vmul.f32 %v4693_v49, %v4872_v2  ;;  %v1099_v53 = vmul.f32 %v4733_v12, %v4750_v39  ;;  %v4909_v46 = vld [vmem:[%s8219_s4 + $0x10] sm:$0x7f] }
  0x4c   : > { %8257 = vst [vmem:[#allocation39_spill] sm:$0xff] %v4886_v19  ;;  %v1103_v8 = vadd.f32 %v1095_v33, %v1083_v38  ;;  %v4896_v40 = vmul.f32 %v4693_v49, %v4878_v62  ;;  %v4898_v18 = vadd.f32 %v1017_v28, %v1005_v20  ;;  %v4902_v60 = vmul.f32 %v4701_v54, %v4695_v50  ;;  %v8275_v19 = vld [vmem:[#allocation29_spill] sm:$0xff] }
  0x4d   : > { %v1115_v4 = vmul.f32 %v4773_v61, %v4715_v59  ;;  %v1084_v41 = vadd.f32 %v1076_v58, %v1064_v42  ;;  %v1096_v13 = vmul.f32 %v4733_v12, %v4764_v15  ;;  %v1107_v6 = vadd.f32 %v1099_v53, %v1087_v17  ;;  %v8261_v59 = vld [vmem:[#allocation21_spill] sm:$0xff]  ;;  %v8265_v17 = vld [vmem:[#allocation20_spill] sm:$0xff] }
  0x4e   : > { %8258 = vst [vmem:[#allocation40_spill] sm:$0xff] %v4896_v40  ;;  %8259 = vst [vmem:[#allocation41_spill] sm:$0xff] %v4898_v18  ;;  %v1119_v20 = vmul.f32 %v4773_v61, %v4766_v14  ;;  %v1088_v28 = vadd.f32 %v1080_v35, %v1068_v44  ;;  %v1100_v38 = vmul.f32 %v4733_v12, %v4783_v43  ;;  %v8267_v44 = vld [vmem:[#allocation27_spill] sm:$0xff] }
  0x4f   : > { %8260 = vst [vmem:[#allocation42_spill] sm:$0xff] %v4902_v60  ;;  %v1123_v33 = vadd.f32 %v1115_v4, %v1103_v8  ;;  %v4919_v49 = vrot.slane %v8261_v59, %v4646_v24  ;;  %v4921_v48 = vadd.f32 %v1021_v36, %v1009_v32  ;;  %v4925_v42 = vmul.f32 %v4705_v55, %v4801_v34  ;;  %v8270_v4 = vld [vmem:[#allocation30_spill] sm:$0xff]  ;;  %v8271_v36 = vld [vmem:[#allocation5_spill] sm:$0xff] }
  0x50   : > { %v1127_v58 = vadd.f32 %v1119_v20, %v1107_v6  ;;  %v4929_v53 = vrot.slane %v8261_v59, %v8265_v17  ;;  %v4933_v35 = vmul.f32 %v4705_v55, %v8267_v44  ;;  %v4937_v8 = vmul.f32 %v4709_v56, %v4813_v21  ;;  %v8272_v20 = vld [vmem:[#allocation35_spill] sm:$0xff] }
  0x51   : > { %8262 = vst [vmem:[#allocation21_spill] sm:$0xff] %v4919_v49  ;;  %8263 = vst [vmem:[#allocation43_spill] sm:$0xff] %v4921_v48  ;;  %v1135_v32 = vmul.f32 %v4919_v49, %v8270_v4  ;;  %v4943_v47 = vrot.slane %v4909_v46, %v8271_v36  ;;  %v1104_v6 = vadd.f32 %v1096_v13, %v1084_v41  ;;  %v8273_v4 = vld [vmem:[#allocation6_spill] sm:$0xff] }
  0x52   : > { %8264 = vst [vmem:[#allocation44_spill] sm:$0xff] %v4925_v42  ;;  %8266 = vst [vmem:[#allocation45_spill] sm:$0xff] %v4929_v53  ;;  %v1116_v59 = vmul.f32 %v4773_v61, %v8272_v20  ;;  %v1139_v30 = vmul.f32 %v4919_v49, %v4787_v3  ;;  %v1108_v55 = vadd.f32 %v1100_v38, %v1088_v28  ;;  %v8278_v28 = vld [vmem:[#allocation31_spill] sm:$0xff] }
  0x53   : > { %8268 = vst [vmem:[#allocation27_spill] sm:$0xff] %v4933_v35  ;;  %8269 = vst [vmem:[#allocation46_spill] sm:$0xff] %v4937_v8  ;;  %v1155_v35 = vmul.f32 %v4929_v53, %v4793_v5  ;;  %v1120_v48 = vmul.f32 %v4773_v61, %v4815_v52  ;;  %v1143_v60 = vadd.f32 %v1135_v32, %v1123_v33  ;;  %v8281_v8 = vld [vmem:[#allocation16_spill] sm:$0xff] }
  0x54   : > { %v4955_v40 = vrot.slane %v4909_v46, %v8273_v4  ;;  %v4959_v41 = vmul.f32 %v4709_v56, %v8275_v19  ;;  %v4963_v13 = vmul.f32 %v4733_v12, %v4832_v23  ;;  %v1147_v63 = vadd.f32 %v1139_v30, %v1127_v58 }
  0x55   : > { %v1159_v5 = vmul.f32 %v4929_v53, %v4805_v10  ;;  %v4969_v38 = vmul.f32 %v4733_v12, %v8278_v28  ;;  %v4973_v33 = vmul.f32 %v4773_v61, %v4842_v11  ;;  %v1163_v32 = vadd.f32 %v1155_v35, %v1143_v60  ;;  %v8282_v60 = vld [vmem:[#allocation32_spill] sm:$0xff] }
  0x56   : > { %8274 = vst [vmem:[#allocation30_spill] sm:$0xff] %v4955_v40  ;;  %8276 = vst [vmem:[#allocation35_spill] sm:$0xff] %v4959_v41  ;;  %v1175_v56 = vmul.f32 %v4943_v47, %v8281_v8  ;;  %v1124_v41 = vadd.f32 %v1116_v59, %v1104_v6  ;;  %v1179_v58 = vmul.f32 %v4943_v47, %v4711_v57 }
  0x57   : > { %8277 = vst [vmem:[#allocation29_spill] sm:$0xff] %v4963_v13  ;;  %8279 = vst [vmem:[#allocation31_spill] sm:$0xff] %v4969_v38  ;;  %v1136_v13 = vmul.f32 %v4919_v49, %v4820_v16  ;;  %v1167_v30 = vadd.f32 %v1159_v5, %v1147_v63  ;;  %v1128_v22 = vadd.f32 %v1120_v48, %v1108_v55  ;;  %v8285_v55 = vld [vmem:[#allocation7_spill] sm:$0xff]  ;;  %v8289_v5 = vld [vmem:[#allocation17_spill] sm:$0xff] }
  0x58   : > { %8280 = vst [vmem:[#allocation47_spill] sm:$0xff] %v4973_v33  ;;  %v1140_v12 = vmul.f32 %v4919_v49, %v4844_v26  ;;  %v1183_v38 = vadd.f32 %v1175_v56, %v1163_v32  ;;  %v1195_v33 = vmul.f32 %v4955_v40, %v4650_v27  ;;  %v4987_v35 = vmul.f32 %v4773_v61, %v8282_v60  ;;  %v8287_v56 = vld [vmem:[#allocation8_spill] sm:$0xff]  ;;  %v8291_v61 = vld [vmem:[#allocation34_spill] sm:$0xff] }
  0x59   : > { %v4991_v8 = vmul.f32 %v4919_v49, %v4862_v29  ;;  %v1187_v63 = vadd.f32 %v1179_v58, %v1167_v30  ;;  %v1199_v6 = vmul.f32 %v4955_v40, %v4725_v1  ;;  %v4997_v59 = vrot.slane %v4909_v46, %v8285_v55 }
  0x5a   : > { %8283 = vst [vmem:[#allocation16_spill] sm:$0xff] %v4987_v35  ;;  %v1203_v48 = vadd.f32 %v1195_v33, %v1183_v38  ;;  %v5001_v27 = vrot.slane %v4909_v46, %v8287_v56  ;;  %v5005_v32 = vrot.slane %v4909_v46, %v8289_v5  ;;  %v5009_v35 = vmul.f32 %v4919_v49, %v8291_v61 }
  0x5b   : > { %8284 = vst [vmem:[#allocation32_spill] sm:$0xff] %v4991_v8  ;;  %8286 = vst [vmem:[#allocation48_spill] sm:$0xff] %v4997_v59  ;;  %v1144_v30 = vadd.f32 %v1136_v13, %v1124_v41  ;;  %v1156_v38 = vmul.f32 %v4929_v53, %v4850_v31  ;;  %v1207_v33 = vadd.f32 %v1199_v6, %v1187_v63  ;;  %v725_v41 = vld [vmem:[%s8219_s4 + $0x18] sm:$0x7f] }
  0x5c   : > { %8288 = vst [vmem:[#allocation49_spill] sm:$0xff] %v5001_v27  ;;  %8290 = vst [vmem:[#allocation50_spill] sm:$0xff] %v5005_v32  ;;  %v1148_v58 = vadd.f32 %v1140_v12, %v1128_v22  ;;  %v5015_v8 = vmul.f32 %v4929_v53, %v4878_v62  ;;  %v1215_v42 = vmul.f32 %v4997_v59, %v4680_v45 }
  0x5d   : > { %8292 = vst [vmem:[#allocation34_spill] sm:$0xff] %v5009_v35  ;;  %v5021_v18 = vrot.slane %v4909_v46, %v4646_v24  ;;  %v5028_v13 = vmul.f32 %v4929_v53, %v4803_v9  ;;  %v1160_v12 = vmul.f32 %v4929_v53, %v4872_v2  ;;  %v1219_v22 = vmul.f32 %v4997_v59, %v4746_v37 }
  0x5e   : > { %8293 = vst [vmem:[#allocation51_spill] sm:$0xff] %v5015_v8  ;;  %v1235_v45 = vmul.f32 %v5001_v27, %v4764_v15  ;;  %v1223_v63 = vadd.f32 %v1215_v42, %v1203_v48  ;;  %v1239_v6 = vmul.f32 %v5001_v27, %v4783_v43  ;;  %v1255_v49 = vmul.f32 %v5005_v32, %v8272_v20 }
  0x5f   : > { %8294 = vst [vmem:[#allocation52_spill] sm:$0xff] %v5021_v18  ;;  %8295 = vst [vmem:[#allocation53_spill] sm:$0xff] %v5028_v13  ;;  %v5042_v35 = vrot.slane %v4909_v46, %v8265_v17  ;;  %v5044_v13 = vadd.f32 %v1156_v38, %v1144_v30  ;;  %v5048_v53 = vmul.f32 %v4943_v47, %v4695_v50 }
  0x60   : > { %v5052_v15 = vmul.f32 %v4943_v47, %v4697_v51  ;;  %v1227_v42 = vadd.f32 %v1219_v22, %v1207_v33  ;;  %v1243_v48 = vadd.f32 %v1235_v45, %v1223_v63  ;;  %v1259_v8 = vmul.f32 %v5005_v32, %v4815_v52 }
  0x61   : > { %8296 = vst [vmem:[#allocation54_spill] sm:$0xff] %v5042_v35  ;;  %8297 = vst [vmem:[#allocation55_spill] sm:$0xff] %v5048_v53  ;;  %v1275_v20 = vmul.f32 %v5021_v18, %v4820_v16  ;;  %v5059_v46 = vrot.slane %v725_v41, %v8271_v36  ;;  %v5061_v30 = vadd.f32 %v1160_v12, %v1148_v58  ;;  %v5081_v12 = vld [vmem:[#allocation2 + $0x4d] sm:$0xff] }
  0x62   : > { %8298 = vst [vmem:[#allocation56_spill] sm:$0xff] %v5052_v15  ;;  %v5065_v38 = vmul.f32 %v4955_v40, %v4801_v34  ;;  %v5069_v15 = vmul.f32 %v4955_v40, %v8267_v44  ;;  %v1247_v33 = vadd.f32 %v1239_v6, %v1227_v42  ;;  %v5073_v22 = vmul.f32 %v4955_v40, %v4723_v0 }
  0x63   : > { %8299 = vst [vmem:[#allocation57_spill] sm:$0xff] %v5059_v46  ;;  %8300 = vst [vmem:[#allocation58_spill] sm:$0xff] %v5061_v30  ;;  %v5077_v16 = vmul.f32 %v4997_v59, %v4813_v21  ;;  %v1263_v45 = vadd.f32 %v1255_v49, %v1243_v48  ;;  %v1295_v58 = vmul.f32 %v5042_v35, %v4850_v31 }
  0x64   : > { %8301 = vst [vmem:[#allocation59_spill] sm:$0xff] %v5069_v15  ;;  %8302 = vst [vmem:[#allocation60_spill] sm:$0xff] %v5073_v22  ;;  %v5085_v63 = vmul.f32 %v4997_v59, %v8275_v19  ;;  %v5089_v6 = vmul.f32 %v4997_v59, %v4737_v25  ;;  %v1267_v42 = vadd.f32 %v1259_v8, %v1247_v33 }
  0x65   : > { %v1279_v22 = vmul.f32 %v5021_v18, %v4844_v26  ;;  %v5095_v49 = vmul.f32 %v5001_v27, %v4832_v23  ;;  %v5099_v31 = vmul.f32 %v5001_v27, %v8278_v28  ;;  %v1283_v48 = vadd.f32 %v1275_v20, %v1263_v45 }
  0x66   : > { %8303 = vst [vmem:[#allocation61_spill] sm:$0xff] %v5085_v63  ;;  %8304 = vst [vmem:[#allocation62_spill] sm:$0xff] %v5089_v6  ;;  %v1315_v30 = vmul.f32 %v5059_v46, %v5081_v12  ;;  %v5105_v59 = vmul.f32 %v5001_v27, %v4750_v39  ;;  %v5109_v8 = vmul.f32 %v5005_v32, %v4842_v11 }
  0x67   : > { %8305 = vst [vmem:[#allocation63_spill] sm:$0xff] %v5099_v31  ;;  %v5112_v33 = vrot.slane %v725_v41, %v8273_v4  ;;  %v5115_v6 = vrot.slane %v725_v41, %v8285_v55  ;;  %v5119_v20 = vmul.f32 %v5005_v32, %v8282_v60  ;;  %v5123_v45 = vmul.f32 %v5005_v32, %v4766_v14  ;;  %v726_v32 = vld [vmem:[%s8219_s4 + $0x20] sm:$0x7f] }
  0x68   : > { %8306 = vst [vmem:[#allocation64_spill] sm:$0xff] %v5105_v59  ;;  %v1303_v27 = vadd.f32 %v1295_v58, %v1283_v48  ;;  %v5126_v59 = vrot.slane %v725_v41, %v8287_v56  ;;  %v5130_v31 = vmul.f32 %v5021_v18, %v4862_v29  ;;  %v1287_v40 = vadd.f32 %v1279_v22, %v1267_v42 }
  0x69   : > { %8307 = vst [vmem:[#allocation65_spill] sm:$0xff] %v5112_v33  ;;  %8308 = vst [vmem:[#allocation66_spill] sm:$0xff] %v5115_v6  ;;  %v1299_v63 = vmul.f32 %v5042_v35, %v4872_v2  ;;  %v1335_v15 = vmul.f32 %v5112_v33, %v4801_v34  ;;  %v1355_v58 = vmul.f32 %v5115_v6, %v4813_v21 }
  0x6a   : > { %8309 = vst [vmem:[#allocation67_spill] sm:$0xff] %v5119_v20  ;;  %8310 = vst [vmem:[#allocation68_spill] sm:$0xff] %v5123_v45  ;;  %v5138_v20 = vmul.f32 %v5021_v18, %v8291_v61  ;;  %v1323_v45 = vadd.f32 %v1315_v30, %v1303_v27  ;;  %v5143_v48 = vrot.slane %v725_v41, %v8289_v5 }
  0x6b   : > { %8311 = vst [vmem:[#allocation69_spill] sm:$0xff] %v5126_v59  ;;  %8312 = vst [vmem:[#allocation70_spill] sm:$0xff] %v5130_v31  ;;  %v5147_v22 = vmul.f32 %v5021_v18, %v4787_v3  ;;  %v5151_v42 = vmul.f32 %v5042_v35, %v4878_v62  ;;  %v5155_v34 = vmul.f32 %v5042_v35, %v4803_v9 }
  0x6c   : > { %8313 = vst [vmem:[#allocation71_spill] sm:$0xff] %v5138_v20  ;;  %8314 = vst [vmem:[#allocation72_spill] sm:$0xff] %v5143_v48  ;;  %v5159_v27 = vmul.f32 %v5042_v35, %v4805_v10  ;;  %v5163_v21 = vmul.f32 %v5059_v46, %v4695_v50  ;;  %v1343_v30 = vadd.f32 %v1335_v15, %v1323_v45  ;;  %v8363_v20 = vld [vmem:[#allocation12_spill] sm:$0xff] }
  0x6d   : > { %8315 = vst [vmem:[#allocation73_spill] sm:$0xff] %v5147_v22  ;;  %8316 = vst [vmem:[#allocation74_spill] sm:$0xff] %v5151_v42  ;;  %v1375_v22 = vmul.f32 %v5126_v59, %v4832_v23  ;;  %v5168_v18 = vrot.slane %v725_v41, %v4646_v24  ;;  %v5181_v35 = vmul.f32 %v5059_v46, %v4711_v57 }
  0x6e   : > { %8317 = vst [vmem:[#allocation75_spill] sm:$0xff] %v5155_v34  ;;  %8318 = vst [vmem:[#allocation76_spill] sm:$0xff] %v5159_v27  ;;  %v5173_v34 = vadd.f32 %v1299_v63, %v1287_v40  ;;  %v5177_v27 = vmul.f32 %v5059_v46, %v4697_v51  ;;  %v5184_v15 = vrot.slane %v725_v41, %v8265_v17 }
  0x6f   : > { %8319 = vst [vmem:[#allocation77_spill] sm:$0xff] %v5163_v21  ;;  %8320 = vst [vmem:[#allocation78_spill] sm:$0xff] %v5168_v18  ;;  %v5188_v23 = vmul.f32 %v5112_v33, %v8267_v44  ;;  %v5192_v45 = vmul.f32 %v5112_v33, %v4723_v0  ;;  %v1363_v40 = vadd.f32 %v1355_v58, %v1343_v30  ;;  %v703_v21 = vld [vmem:[%s4592_s2 + $0x20] sm:$0xff] }
  0x70   : > { %8321 = vst [vmem:[#allocation79_spill] sm:$0xff] %v5173_v34  ;;  %8322 = vst [vmem:[#allocation80_spill] sm:$0xff] %v5177_v27  ;;  %v1395_v63 = vmul.f32 %v5143_v48, %v4842_v11  ;;  %v5198_v27 = vmul.f32 %v5112_v33, %v4725_v1  ;;  %v5202_v41 = vmul.f32 %v5115_v6, %v8275_v19 }
  0x71   : > { %8323 = vst [vmem:[#allocation81_spill] sm:$0xff] %v5181_v35  ;;  %8324 = vst [vmem:[#allocation82_spill] sm:$0xff] %v5184_v15  ;;  %v5206_v35 = vmul.f32 %v5115_v6, %v4737_v25  ;;  %v5214_v58 = vmul.f32 %v5126_v59, %v8278_v28  ;;  %v1383_v11 = vadd.f32 %v1375_v22, %v1363_v40 }
  0x72   : > { %8325 = vst [vmem:[#allocation83_spill] sm:$0xff] %v5188_v23  ;;  %8326 = vst [vmem:[#allocation84_spill] sm:$0xff] %v5192_v45  ;;  %v5210_v23 = vmul.f32 %v5115_v6, %v4746_v37  ;;  %v1415_v30 = vmul.f32 %v5168_v18, %v4862_v29  ;;  %v5223_v45 = vmul.f32 %v5126_v59, %v4750_v39 }
  0x73   : > { %8327 = vst [vmem:[#allocation85_spill] sm:$0xff] %v5198_v27  ;;  %8328 = vst [vmem:[#allocation86_spill] sm:$0xff] %v5202_v41  ;;  %v5219_v27 = vrot.slane %v726_v32, %v8271_v36  ;;  %v5235_v22 = vmul.f32 %v5143_v48, %v4766_v14  ;;  %v5239_v29 = vmul.f32 %v5143_v48, %v4815_v52 }
  0x74   : > { %8329 = vst [vmem:[#allocation87_spill] sm:$0xff] %v5206_v35  ;;  %8330 = vst [vmem:[#allocation88_spill] sm:$0xff] %v5210_v23  ;;  %v5227_v35 = vmul.f32 %v5126_v59, %v4783_v43  ;;  %v5231_v23 = vmul.f32 %v5143_v48, %v8282_v60  ;;  %v1403_v40 = vadd.f32 %v1395_v63, %v1383_v11 }
  0x75   : > { %8331 = vst [vmem:[#allocation89_spill] sm:$0xff] %v5214_v58  ;;  %8332 = vst [vmem:[#allocation90_spill] sm:$0xff] %v5223_v45  ;;  %v1435_v45 = vmul.f32 %v5184_v15, %v4878_v62  ;;  %v5244_v58 = vrot.slane %v726_v32, %v8273_v4  ;;  %v5262_v62 = vmul.f32 %v5168_v18, %v4844_v26 }
  0x76   : > { %8333 = vst [vmem:[#allocation91_spill] sm:$0xff] %v5227_v35  ;;  %8334 = vst [vmem:[#allocation92_spill] sm:$0xff] %v5231_v23  ;;  %v5248_v35 = vmul.f32 %v5168_v18, %v8291_v61  ;;  %v5252_v23 = vmul.f32 %v5168_v18, %v4787_v3  ;;  %v1423_v63 = vadd.f32 %v1415_v30, %v1403_v40 }
  0x77   : > { %8335 = vst [vmem:[#allocation93_spill] sm:$0xff] %v5235_v22  ;;  %8336 = vst [vmem:[#allocation94_spill] sm:$0xff] %v5239_v29  ;;  %v5255_v22 = vrot.slane %v726_v32, %v8285_v55  ;;  %v5258_v29 = vrot.slane %v726_v32, %v8287_v56  ;;  %v5266_v11 = vmul.f32 %v5184_v15, %v4803_v9 }
  0x78   : > { %8337 = vst [vmem:[#allocation95_spill] sm:$0xff] %v5248_v35  ;;  %8338 = vst [vmem:[#allocation96_spill] sm:$0xff] %v5252_v23  ;;  %v1455_v35 = vmul.f32 %v5219_v27, %v4695_v50  ;;  %v727_v23 = vld [vmem:[%s8219_s4 + $0x28] sm:$0x7f]  ;;  %v5275_v48 = vmul.f32 %v5184_v15, %v4805_v10  ;;  %v5279_v18 = vmul.f32 %v5184_v15, %v4872_v2 }
  0x79   : > { %8339 = vst [vmem:[#allocation97_spill] sm:$0xff] %v5255_v22  ;;  %8340 = vst [vmem:[#allocation98_spill] sm:$0xff] %v5258_v29  ;;  %v5282_v30 = vrot.slane %v726_v32, %v8289_v5  ;;  %v5285_v40 = vrot.slane %v726_v32, %v4646_v24  ;;  %v5289_v50 = vmul.f32 %v5219_v27, %v4711_v57 }
  0x7a   : > { %8341 = vst [vmem:[#allocation99_spill] sm:$0xff] %v5262_v62  ;;  %8342 = vst [vmem:[#allocation100_spill] sm:$0xff] %v5266_v11  ;;  %v1443_v62 = vadd.f32 %v1435_v45, %v1423_v63  ;;  %v1475_v11 = vmul.f32 %v5244_v58, %v8267_v44  ;;  %v1495_v15 = vmul.f32 %v5255_v22, %v8275_v19 }
  0x7b   : > { %8343 = vst [vmem:[#allocation101_spill] sm:$0xff] %v5275_v48  ;;  %8344 = vst [vmem:[#allocation102_spill] sm:$0xff] %v5279_v18  ;;  %v5294_v48 = vrot.slane %v726_v32, %v8265_v17  ;;  %v5298_v18 = vmul.f32 %v5244_v58, %v4725_v1  ;;  %v5304_v45 = vmul.f32 %v5255_v22, %v4746_v37 }
  0x7c   : > { %8345 = vst [vmem:[#allocation103_spill] sm:$0xff] %v5282_v30  ;;  %8346 = vst [vmem:[#allocation104_spill] sm:$0xff] %v5285_v40  ;;  %v1515_v63 = vmul.f32 %v5258_v29, %v8278_v28  ;;  %v5309_v44 = vrot.slane %v727_v23, %v8271_v36  ;;  %v5312_v32 = vrot.slane %v727_v23, %v8273_v4 }
  0x7d   : > { %8347 = vst [vmem:[#allocation105_spill] sm:$0xff] %v5289_v50  ;;  %8348 = vst [vmem:[#allocation106_spill] sm:$0xff] %v5294_v48  ;;  %v1463_v50 = vadd.f32 %v1455_v35, %v1443_v62  ;;  %v5315_v41 = vrot.slane %v727_v23, %v8285_v55  ;;  %v5319_v19 = vmul.f32 %v5258_v29, %v4783_v43  ;;  %v728_v62 = vld [vmem:[%s8219_s4 + $0x30] sm:$0x7f] }
  0x7e   : > { %8349 = vst [vmem:[#allocation107_spill] sm:$0xff] %v5298_v18  ;;  %8350 = vst [vmem:[#allocation108_spill] sm:$0xff] %v5304_v45  ;;  %v5322_v18 = vrot.slane %v727_v23, %v8287_v56  ;;  %v5325_v28 = vrot.slane %v727_v23, %v8289_v5  ;;  %v5328_v35 = vrot.slane %v727_v23, %v4646_v24 }
  0x7f   : > { %8351 = vst [vmem:[#allocation109_spill] sm:$0xff] %v5309_v44  ;;  %8352 = vst [vmem:[#allocation110_spill] sm:$0xff] %v5312_v32  ;;  %v1483_v45 = vadd.f32 %v1475_v11, %v1463_v50  ;;  %v1535_v59 = vmul.f32 %v5282_v30, %v8282_v60  ;;  %v1555_v6 = vmul.f32 %v5285_v40, %v8291_v61 }
  0x80   : > { %8353 = vst [vmem:[#allocation111_spill] sm:$0xff] %v5315_v41  ;;  %8354 = vst [vmem:[#allocation112_spill] sm:$0xff] %v5319_v19  ;;  %v5337_v19 = vmul.f32 %v5282_v30, %v4815_v52  ;;  %v5343_v33 = vmul.f32 %v5285_v40, %v4844_v26  ;;  %v1575_v34 = vmul.f32 %v5294_v48, %v4803_v9 }
  0x81   : > { %8355 = vst [vmem:[#allocation113_spill] sm:$0xff] %v5322_v18  ;;  %8356 = vst [vmem:[#allocation114_spill] sm:$0xff] %v5325_v28  ;;  %v5349_v11 = vmul.f32 %v5294_v48, %v4872_v2  ;;  %v5352_v60 = vrot.slane %v727_v23, %v8265_v17  ;;  %v1503_v50 = vadd.f32 %v1495_v15, %v1483_v45 }
  0x82   : > { %8357 = vst [vmem:[#allocation115_spill] sm:$0xff] %v5328_v35  ;;  %8358 = vst [vmem:[#allocation116_spill] sm:$0xff] %v5337_v19  ;;  %v1595_v19 = vmul.f32 %v5309_v44, %v4697_v51  ;;  %v1615_v61 = vmul.f32 %v5312_v32, %v4723_v0  ;;  %v5365_v9 = vmul.f32 %v5322_v18, %v4750_v39 }
  0x83   : > { %8359 = vst [vmem:[#allocation117_spill] sm:$0xff] %v5343_v33  ;;  %8360 = vst [vmem:[#allocation118_spill] sm:$0xff] %v5349_v11  ;;  %v5360_v33 = vmul.f32 %v5315_v41, %v4737_v25  ;;  %v5369_v23 = vmul.f32 %v5325_v28, %v4766_v14  ;;  %v5373_v15 = vmul.f32 %v5328_v35, %v4787_v3  ;;  %v8369_v41 = vld [vmem:[#allocation41_spill] sm:$0xff] }
  0x84   : > { %v5376_v45 = vrot.slane %v728_v62, %v8271_v36  ;;  %v1523_v11 = vadd.f32 %v1515_v63, %v1503_v50  ;;  %v898_v46 = vmul.f32 %v8363_v20, %v5081_v12  ;;  %v1037_v42 = vmul.f32 %v4701_v54, %v5081_v12  ;;  %v8367_v63 = vld [vmem:[#allocation4_spill] sm:$0xff] }
  0x85   : > { %8361 = vst [vmem:[#allocation119_spill] sm:$0xff] %v5373_v15  ;;  %v1176_v18 = vmul.f32 %v4943_v47, %v5081_v12  ;;  %v5385_v28 = vrot.slane %v728_v62, %v8273_v4  ;;  %v5388_v31 = vrot.slane %v728_v62, %v8285_v55  ;;  %v5391_v36 = vrot.slane %v728_v62, %v8287_v56 }
  0x86   : > { %8362 = vst [vmem:[#allocation120_spill] sm:$0xff] %v5376_v45  ;;  %v5394_v50 = vadd.f32 %v8367_v63, %v703_v21  ;;  %v1543_v35 = vadd.f32 %v1535_v59, %v1523_v11  ;;  %v926_v15 = vadd.f32 %v4824_v7, %v898_v46  ;;  %v1045_v53 = vadd.f32 %v1037_v42, %v8369_v41  ;;  %v704_v41 = vld [vmem:[%s4592_s2 + $0x28] sm:$0xff] }
  0x87   : > { %8364 = vst [vmem:[#allocation12_spill] sm:$0xff] %v5385_v28  ;;  %8365 = vst [vmem:[#allocation121_spill] sm:$0xff] %v5388_v31  ;;  %v1184_v12 = vadd.f32 %v1176_v18, %v5044_v13  ;;  %v5401_v4 = vmul.f32 %v5352_v60, %v4805_v10  ;;  %v5404_v55 = vrot.slane %v728_v62, %v8289_v5  ;;  %v8373_v18 = vld [vmem:[#allocation36_spill] sm:$0xff] }
  0x88   : > { %8366 = vst [vmem:[#allocation122_spill] sm:$0xff] %v5391_v36  ;;  %8368 = vst [vmem:[#allocation4_spill] sm:$0xff] %v5394_v50  ;;  %v5407_v56 = vrot.slane %v728_v62, %v4646_v24  ;;  %v5410_v21 = vrot.slane %v728_v62, %v8265_v17  ;;  %v1563_v7 = vadd.f32 %v1555_v6, %v1543_v35  ;;  %v8374_v13 = vld [vmem:[#allocation44_spill] sm:$0xff]  ;;  %v8375_v35 = vld [vmem:[#allocation37_spill] sm:$0xff] }
  0x89   : > { %8370 = vst [vmem:[#allocation41_spill] sm:$0xff] %v5404_v55  ;;  %789 = vst.msk [vmem:[#allocation2 + $0xb0] sm:$0xff] %vm741_vm0, %v5394_v50  ;;  %v946_v59 = vadd.f32 %v8373_v18, %v926_v15  ;;  %v1065_v46 = vadd.f32 %v8374_v13, %v1045_v53  ;;  %v1204_v42 = vadd.f32 %v5065_v38, %v1184_v12  ;;  %v8376_v15 = vld [vmem:[#allocation46_spill] sm:$0xff]  ;;  %v706_v24 = vld [vmem:[%s4592_s2 + $0x38] sm:$0xff] }
  0x8a   : > { %8371 = vst [vmem:[#allocation123_spill] sm:$0xff] %v5407_v56  ;;  %8372 = vst [vmem:[#allocation124_spill] sm:$0xff] %v5410_v21  ;;  %v5420_v11 = vmul.f32 %v5376_v45, %v4711_v57  ;;  %v5424_v62 = vmul.f32 %v5385_v28, %v4725_v1  ;;  %v5428_v17 = vmul.f32 %v5388_v31, %v4746_v37  ;;  %v705_v13 = vld [vmem:[%s4592_s2 + $0x30] sm:$0xff] }
  0x8b   : > { %v5432_v6 = vmul.f32 %v5391_v36, %v4783_v43  ;;  %v1583_v53 = vadd.f32 %v1575_v34, %v1563_v7  ;;  %v966_v38 = vadd.f32 %v8375_v35, %v946_v59  ;;  %v1085_v12 = vadd.f32 %v8376_v15, %v1065_v46  ;;  %v8378_v59 = vld [vmem:[#allocation38_spill] sm:$0xff]  ;;  %v8379_v46 = vld [vmem:[#allocation29_spill] sm:$0xff] }
  0x8c   : > { %v1224_v18 = vadd.f32 %v5077_v16, %v1204_v42  ;;  %v5441_v5 = vmul.f32 %v5404_v55, %v4815_v52  ;;  %v5445_v50 = vmul.f32 %v5407_v56, %v4844_v26  ;;  %v5449_v36 = vmul.f32 %v5410_v21, %v4872_v2 }
  0x8d   : > { %v5452_v34 = vadd.f32 %v8367_v63, %v704_v41  ;;  %v1603_v7 = vadd.f32 %v1595_v19, %v1583_v53  ;;  %v986_v16 = vadd.f32 %v8378_v59, %v966_v38  ;;  %v1105_v42 = vadd.f32 %v8379_v46, %v1085_v12  ;;  %v8382_v53 = vld [vmem:[#allocation39_spill] sm:$0xff] }
  0x8e   : > { %v5458_v35 = vmul.f32 %v5219_v27, %v4697_v51  ;;  %v1244_v15 = vadd.f32 %v5095_v49, %v1224_v18  ;;  %v5463_v56 = vmul.f32 %v5244_v58, %v4723_v0  ;;  %v5466_v21 = vadd.f32 %v8367_v63, %v705_v13  ;;  %v8383_v51 = vld [vmem:[#allocation47_spill] sm:$0xff]  ;;  %v8385_v13 = vld [vmem:[#allocation14_spill] sm:$0xff] }
  0x8f   : > { %8377 = vst [vmem:[#allocation36_spill] sm:$0xff] %v5452_v34  ;;  %790 = vst.msk [vmem:[#allocation2 + $0xc8] sm:$0xff] %vm741_vm0, %v5452_v34  ;;  %v5471_v19 = vadd.f32 %v8367_v63, %v706_v24  ;;  %v1623_v41 = vadd.f32 %v1615_v61, %v1603_v7  ;;  %v1006_v38 = vadd.f32 %v8382_v53, %v986_v16  ;;  %v8386_v7 = vld [vmem:[#allocation40_spill] sm:$0xff] }
  0x90   : > { %8380 = vst [vmem:[#allocation44_spill] sm:$0xff] %v5466_v21  ;;  %v1125_v12 = vadd.f32 %v8383_v51, %v1105_v42  ;;  %v5475_v59 = vld [vmem:[#allocation2 + $0xad] sm:$0xff]  ;;  %v5481_v0 = vmul.f32 %v5255_v22, %v4737_v25  ;;  %v5491_v63 = vmul.f32 %v5258_v29, %v4750_v39  ;;  %791 = vst.msk [vmem:[#allocation2 + $0xe0] sm:$0xff] %vm741_vm0, %v5466_v21  ;;  %v8387_v16 = vld [vmem:[#allocation32_spill] sm:$0xff] }
  0x91   : > { %8381 = vst [vmem:[#allocation37_spill] sm:$0xff] %v5471_v19  ;;  %v5477_v49 = vld [vmem:[#allocation2 + $0xae] sm:$0xff]  ;;  %v902_v18 = vmul.f32 %v8363_v20, %v5475_v59  ;;  %v1041_v61 = vmul.f32 %v4701_v54, %v5475_v59  ;;  %792 = vst.msk [vmem:[#allocation2 + $0xf8] sm:$0xff] %vm741_vm0, %v5471_v19  ;;  %v1643_v25 = vadd.f32 %v5360_v33, %v1623_v41  ;;  %v8424_v29 = vld [vmem:[#allocation48_spill] sm:$0xff] }
  0x92   : > { %8384 = vst [vmem:[#allocation46_spill] sm:$0xff] %v5477_v49  ;;  %v922_v24 = vmul.f32 %v8385_v13, %v5477_v49  ;;  %v1026_v20 = vadd.f32 %v8386_v7, %v1006_v38  ;;  %v1145_v46 = vadd.f32 %v8387_v16, %v1125_v12  ;;  %v5500_v42 = vld [vmem:[#allocation2 + $0xaf] sm:$0xff]  ;;  %v5504_v53 = vmul.f32 %v5282_v30, %v4766_v14  ;;  %v8394_v14 = vld [vmem:[#allocation51_spill] sm:$0xff] }
  0x93   : > { %8388 = vst [vmem:[#allocation38_spill] sm:$0xff] %v5500_v42  ;;  %v1264_v39 = vadd.f32 %v5109_v8, %v1244_v15  ;;  %v5509_v51 = vmul.f32 %v5285_v40, %v4787_v3  ;;  %v5513_v13 = vmul.f32 %v5294_v48, %v4805_v10  ;;  %v5517_v33 = vmul.f32 %v5309_v44, %v4711_v57  ;;  %v8393_v38 = vld [vmem:[#allocation42_spill] sm:$0xff]  ;;  %v8398_v15 = vld [vmem:[#allocation15_spill] sm:$0xff] }
  0x94   : > { %8389 = vst [vmem:[#allocation29_spill] sm:$0xff] %v5504_v53  ;;  %v1663_v41 = vadd.f32 %v5365_v9, %v1643_v25  ;;  %v1046_v12 = vadd.f32 %v8393_v38, %v1026_v20  ;;  %v1165_v7 = vadd.f32 %v8394_v14, %v1145_v46  ;;  %v5522_v16 = vld [vmem:[#allocation2 + $0xb0] sm:$0xff]  ;;  %v5526_v3 = vmul.f32 %v5312_v32, %v4725_v1  ;;  %v8399_v57 = vld [vmem:[#allocation43_spill] sm:$0xff]  ;;  %v8400_v9 = vld [vmem:[#allocation25_spill] sm:$0xff] }
  0x95   : > { %8390 = vst [vmem:[#allocation39_spill] sm:$0xff] %v5509_v51  ;;  %8391 = vst [vmem:[#allocation47_spill] sm:$0xff] %v5513_v13  ;;  %v5528_v8 = vld [vmem:[#allocation2 + $0xb1] sm:$0xff]  ;;  %v930_v10 = vadd.f32 %v922_v24, %v902_v18  ;;  %v942_v19 = vmul.f32 %v8398_v15, %v5500_v42  ;;  %v1049_v21 = vadd.f32 %v1041_v61, %v8399_v57  ;;  %v8407_v61 = vld [vmem:[#allocation113_spill] sm:$0xff] }
  0x96   : > { %8392 = vst [vmem:[#allocation14_spill] sm:$0xff] %v5517_v33  ;;  %8395 = vst [vmem:[#allocation40_spill] sm:$0xff] %v5522_v16  ;;  %v1061_v25 = vmul.f32 %v8400_v9, %v5477_v49  ;;  %v1683_v20 = vadd.f32 %v5369_v23, %v1663_v41  ;;  %v8401_v46 = vld [vmem:[#allocation27_spill] sm:$0xff]  ;;  %v8405_v48 = vld [vmem:[#allocation70_spill] sm:$0xff]  ;;  %v5547_v57 = vmul.f32 %v8407_v61, %v4783_v43 }
  0x97   : > { %8396 = vst [vmem:[#allocation32_spill] sm:$0xff] %v5526_v3  ;;  %8397 = vst [vmem:[#allocation42_spill] sm:$0xff] %v5528_v8  ;;  %v1066_v38 = vadd.f32 %v8401_v46, %v1046_v12  ;;  %v8402_v14 = vld [vmem:[#allocation55_spill] sm:$0xff]  ;;  %v1284_v18 = vadd.f32 %v8405_v48, %v1264_v39  ;;  %v8409_v44 = vld [vmem:[#allocation114_spill] sm:$0xff]  ;;  %v950_v40 = vadd.f32 %v942_v19, %v930_v10 }
  0x98   : > { %v1185_v34 = vadd.f32 %v8402_v14, %v1165_v7  ;;  %v8403_v1 = vld [vmem:[#allocation111_spill] sm:$0xff]  ;;  %8408 = vst [vmem:[#allocation15_spill] sm:$0xff] %v5547_v57  ;;  %v5551_v23 = vmul.f32 %v8409_v44, %v4815_v52  ;;  %v8415_v48 = vld [vmem:[#allocation22_spill] sm:$0xff]  ;;  %v1069_v43 = vadd.f32 %v1061_v25, %v1049_v21  ;;  %v1180_v52 = vmul.f32 %v4943_v47, %v5475_v59 }
  0x99   : > { %v5540_v32 = vmul.f32 %v8403_v1, %v4746_v37  ;;  %v8406_v24 = vld [vmem:[#allocation19_spill] sm:$0xff]  ;;  %v982_v39 = vmul.f32 %v8415_v48, %v5528_v8  ;;  %v8417_v61 = vld [vmem:[#allocation26_spill] sm:$0xff]  ;;  %v1220_v57 = vmul.f32 %v8424_v29, %v5500_v42 }
  0x9a   : > { %v962_v15 = vmul.f32 %v8406_v24, %v5522_v16  ;;  %8410 = vst [vmem:[#allocation43_spill] sm:$0xff] %v5551_v23  ;;  %v8411_v41 = vld [vmem:[#allocation119_spill] sm:$0xff]  ;;  %v1081_v30 = vmul.f32 %v8417_v61, %v5500_v42  ;;  %v8421_v48 = vld [vmem:[#allocation74_spill] sm:$0xff] }
  0x9b   : > { %8404 = vst [vmem:[#allocation51_spill] sm:$0xff] %v5540_v32  ;;  %v1703_v12 = vadd.f32 %v8411_v41, %v1683_v20  ;;  %v8412_v7 = vld [vmem:[#allocation35_spill] sm:$0xff]  ;;  %v1304_v23 = vadd.f32 %v8421_v48, %v1284_v18  ;;  %v8423_v10 = vld [vmem:[#allocation58_spill] sm:$0xff]  ;;  %v8428_v48 = vld [vmem:[#allocation28_spill] sm:$0xff] }
  0x9c   : > { %v1086_v46 = vadd.f32 %v8412_v7, %v1066_v38  ;;  %v8413_v14 = vld [vmem:[#allocation59_spill] sm:$0xff]  ;;  %v1188_v25 = vadd.f32 %v1180_v52, %v8423_v10  ;;  %v970_v32 = vadd.f32 %v962_v15, %v950_v40  ;;  %v1089_v18 = vadd.f32 %v1081_v30, %v1069_v43  ;;  %v8429_v10 = vld [vmem:[#allocation34_spill] sm:$0xff]  ;;  %v8433_v40 = vld [vmem:[#allocation49_spill] sm:$0xff] }
  0x9d   : > { %v1205_v37 = vadd.f32 %v8413_v14, %v1185_v34  ;;  %v5556_v1 = vld [vmem:[#allocation2 + $0xb2] sm:$0xff]  ;;  %v1723_v20 = vadd.f32 %v5401_v4, %v1703_v12  ;;  %v8419_v34 = vld [vmem:[#allocation61_spill] sm:$0xff]  ;;  %v8425_v4 = vld [vmem:[#allocation16_spill] sm:$0xff]  ;;  %v1240_v30 = vmul.f32 %v8433_v40, %v5522_v16 }
  0x9e   : > { %8414 = vst [vmem:[#allocation25_spill] sm:$0xff] %v5556_v1  ;;  %v5560_v24 = vld [vmem:[#allocation2 + $0xb3] sm:$0xff]  ;;  %v8434_v15 = vld [vmem:[#allocation57_spill] sm:$0xff] }
  0x9f   : > { %8416 = vst [vmem:[#allocation27_spill] sm:$0xff] %v5560_v24  ;;  %v8418_v38 = vld [vmem:[#allocation31_spill] sm:$0xff]  ;;  %v1225_v7 = vadd.f32 %v8419_v34, %v1205_v37  ;;  %v8420_v14 = vld [vmem:[#allocation30_spill] sm:$0xff]  ;;  %v1743_v22 = vadd.f32 %v5420_v11, %v1723_v20  ;;  %v8427_v37 = vld [vmem:[#allocation24_spill] sm:$0xff]  ;;  %v1319_v43 = vmul.f32 %v8434_v15, %v5475_v59 }
  0xa0   : > { %v1106_v41 = vadd.f32 %v8418_v38, %v1086_v46  ;;  %v1200_v44 = vmul.f32 %v8420_v14, %v5477_v49  ;;  %v8422_v19 = vld [vmem:[#allocation23_spill] sm:$0xff]  ;;  %v5582_v34 = vmul.f32 %v8427_v37, %v5560_v24  ;;  %v8431_v20 = vld [vmem:[#allocation33_spill] sm:$0xff]  ;;  %v8441_v15 = vld [vmem:[#allocation56_spill] sm:$0xff] }
  0xa1   : > { %v1002_v21 = vmul.f32 %v8422_v19, %v5556_v1  ;;  %v8426_v46 = vld [vmem:[#allocation63_spill] sm:$0xff]  ;;  %v1101_v19 = vmul.f32 %v8428_v48, %v5522_v16  ;;  %v1763_v52 = vadd.f32 %v5424_v62, %v1743_v22  ;;  %v8435_v22 = vld [vmem:[#allocation53_spill] sm:$0xff] }
  0xa2   : > { %v1126_v12 = vadd.f32 %v8425_v4, %v1106_v41  ;;  %v1245_v38 = vadd.f32 %v8426_v46, %v1225_v7  ;;  %v1208_v3 = vadd.f32 %v1200_v44, %v1188_v25  ;;  %v8430_v13 = vld [vmem:[#allocation67_spill] sm:$0xff]  ;;  %v1121_v41 = vmul.f32 %v8431_v20, %v5528_v8  ;;  %v8432_v7 = vld [vmem:[#allocation21_spill] sm:$0xff] }
  0xa3   : > { %v1141_v4 = vmul.f32 %v8432_v7, %v5556_v1  ;;  %v1783_v44 = vadd.f32 %v5428_v17, %v1763_v52  ;;  %v8436_v25 = vld [vmem:[#allocation71_spill] sm:$0xff]  ;;  %v1109_v37 = vadd.f32 %v1101_v19, %v1089_v18  ;;  %v8445_v19 = vld [vmem:[#allocation69_spill] sm:$0xff] }
  0xa4   : > { %v1146_v33 = vadd.f32 %v8429_v10, %v1126_v12  ;;  %v1265_v11 = vadd.f32 %v8430_v13, %v1245_v38  ;;  %v1228_v46 = vadd.f32 %v1220_v57, %v1208_v3  ;;  %v8437_v13 = vld [vmem:[#allocation77_spill] sm:$0xff]  ;;  %v8438_v10 = vld [vmem:[#allocation50_spill] sm:$0xff]  ;;  %v8439_v7 = vld [vmem:[#allocation79_spill] sm:$0xff] }
  0xa5   : > { %v1324_v38 = vadd.f32 %v8437_v13, %v1304_v23  ;;  %v1260_v51 = vmul.f32 %v8438_v10, %v5528_v8  ;;  %v1327_v3 = vadd.f32 %v1319_v43, %v8439_v7  ;;  %v8440_v57 = vld [vmem:[#allocation65_spill] sm:$0xff]  ;;  %v1803_v53 = vadd.f32 %v5432_v6, %v1783_v44  ;;  %v8442_v17 = vld [vmem:[#allocation75_spill] sm:$0xff]  ;;  %v8444_v23 = vld [vmem:[#allocation66_spill] sm:$0xff] }
  0xa6   : > { %v1166_v62 = vadd.f32 %v8435_v22, %v1146_v33  ;;  %v1285_v12 = vadd.f32 %v8436_v25, %v1265_v11  ;;  %v1339_v40 = vmul.f32 %v8440_v57, %v5477_v49  ;;  %v8443_v33 = vld [vmem:[#allocation83_spill] sm:$0xff]  ;;  %v1248_v11 = vadd.f32 %v1240_v30, %v1228_v46  ;;  %v8446_v43 = vld [vmem:[#allocation60_spill] sm:$0xff]  ;;  %v8448_v44 = vld [vmem:[#allocation86_spill] sm:$0xff] }
  0xa7   : > { %v1344_v22 = vadd.f32 %v8443_v33, %v1324_v38  ;;  %v1359_v18 = vmul.f32 %v8444_v23, %v5500_v42  ;;  %v1379_v13 = vmul.f32 %v8445_v19, %v5522_v16  ;;  %v1823_v7 = vadd.f32 %v5441_v5, %v1803_v53  ;;  %v8447_v10 = vld [vmem:[#allocation80_spill] sm:$0xff]  ;;  %v8450_v38 = vld [vmem:[#allocation62_spill] sm:$0xff]  ;;  %v8452_v23 = vld [vmem:[#allocation89_spill] sm:$0xff] }
  0xa8   : > { %v1186_v29 = vadd.f32 %v8441_v15, %v1166_v62  ;;  %v1305_v52 = vadd.f32 %v8442_v17, %v1285_v12  ;;  %v1347_v25 = vadd.f32 %v1339_v40, %v1327_v3  ;;  %v990_v62 = vadd.f32 %v982_v39, %v970_v32  ;;  %v8449_v46 = vld [vmem:[#allocation72_spill] sm:$0xff] }
  0xa9   : > { %v1364_v15 = vadd.f32 %v8448_v44, %v1344_v22  ;;  %v1129_v12 = vadd.f32 %v1121_v41, %v1109_v37  ;;  %v1399_v40 = vmul.f32 %v8449_v46, %v5528_v8  ;;  %v1843_v30 = vadd.f32 %v5445_v50, %v1823_v7  ;;  %v8451_v33 = vld [vmem:[#allocation84_spill] sm:$0xff]  ;;  %v8456_v37 = vld [vmem:[#allocation78_spill] sm:$0xff]  ;;  %v8458_v22 = vld [vmem:[#allocation87_spill] sm:$0xff] }
  0xaa   : > { %v1206_v57 = vadd.f32 %v8446_v43, %v1186_v29  ;;  %v1325_v6 = vadd.f32 %v8447_v10, %v1305_v52  ;;  %v1367_v17 = vadd.f32 %v1359_v18, %v1347_v25  ;;  %v5627_v29 = vld [vmem:[%s8453_s30] ss:$0 sm:$0xff]  ;;  %v1268_v53 = vadd.f32 %v1260_v51, %v1248_v11 }
  0xab   : > { %v1384_v5 = vadd.f32 %v8452_v23, %v1364_v15  ;;  %8454 = vst [vmem:[#allocation55_spill] sm:$0xff] %v5627_v29  ;;  %v8455_v32 = vld [vmem:[#allocation52_spill] sm:$0xff]  ;;  %v1419_v10 = vmul.f32 %v8456_v37, %v5556_v1  ;;  %v1863_v50 = vadd.f32 %v5449_v36, %v1843_v30  ;;  %v1010_v7 = vadd.f32 %v1002_v21, %v990_v62  ;;  %v8464_v36 = vld [vmem:[#allocation95_spill] sm:$0xff]  ;;  %v8467_v62 = vld [vmem:[#allocation82_spill] sm:$0xff] }
  0xac   : > { %v1226_v3 = vadd.f32 %v8450_v38, %v1206_v57  ;;  %v1345_v19 = vadd.f32 %v8451_v33, %v1325_v6  ;;  %v1280_v39 = vmul.f32 %v8455_v32, %v5556_v1  ;;  %v1387_v41 = vadd.f32 %v1379_v13, %v1367_v17  ;;  %v8457_v57 = vld [vmem:[#allocation64_spill] sm:$0xff]  ;;  %v8460_v6 = vld [vmem:[#allocation45_spill] sm:$0xff]  ;;  %v8463_v17 = vld [vmem:[#allocation90_spill] sm:$0xff] }
  0xad   : > { %v8459_v23 = vld [vmem:[#allocation92_spill] sm:$0xff]  ;;  %v1149_v43 = vadd.f32 %v1141_v4, %v1129_v12  ;;  %v1161_v51 = vmul.f32 %v8460_v6, %v5560_v24  ;;  %v5640_v44 = vadd.f32 %v5627_v29, %v1863_v50  ;;  %v8466_v33 = vld [vmem:[#allocation54_spill] sm:$0xff]  ;;  %v1439_v12 = vmul.f32 %v8467_v62, %v5560_v24 }
  0xae   : > { %v1246_v52 = vadd.f32 %v8457_v57, %v1226_v3  ;;  %v1365_v25 = vadd.f32 %v8458_v22, %v1345_v19  ;;  %v1404_v18 = vadd.f32 %v8459_v23, %v1384_v5  ;;  %v1407_v11 = vadd.f32 %v1399_v40, %v1387_v41  ;;  %v8462_v13 = vld [vmem:[#allocation68_spill] sm:$0xff]  ;;  %v5645_v3 = vld [vmem:[#allocation2 + $0x10d] sm:$0xff] }
  0xaf   : > { %8461 = vst [vmem:[#allocation70_spill] sm:$0xff] %v5640_v44  ;;  %8465 = vst [vmem:[#allocation19_spill] sm:$0xff] %v5645_v3  ;;  %v1288_v19 = vadd.f32 %v1280_v39, %v1268_v53  ;;  %v1300_v21 = vmul.f32 %v8466_v33, %v5560_v24  ;;  %v5651_v40 = vld [vmem:[#allocation2 + $0x10e] sm:$0xff]  ;;  %v1885_v5 = vsel %vm741_vm0, %v5640_v44, 0.0  ;;  %v8471_v22 = vld [vmem:[#allocation100_spill] sm:$0xff]  ;;  %v1030_v53 = vadd.f32 %v5582_v34, %v1010_v7 }
  0xb0   : > { %v1266_v15 = vadd.f32 %v8462_v13, %v1246_v52  ;;  %v1385_v38 = vadd.f32 %v8463_v17, %v1365_v25  ;;  %v1424_v30 = vadd.f32 %v8464_v36, %v1404_v18  ;;  %v1427_v4 = vadd.f32 %v1419_v10, %v1407_v11  ;;  %8468 = vst [vmem:[#allocation119_spill] sm:$0xff] %v5651_v40  ;;  %v8469_v41 = vld [vmem:[#allocation73_spill] sm:$0xff]  ;;  %v8473_v39 = vld [vmem:[#allocation115_spill] sm:$0xff] }
  0xb1   : > { %v8470_v57 = vld [vmem:[#allocation93_spill] sm:$0xff]  ;;  %1886 = vadd.xlane.f32.xlu0 %v1885_v5  ;;  %v5663_v10 = vmul.f32 %v8473_v39, %v4844_v26  ;;  %v5667_v18 = vmul.f32 %v5352_v60, %v4872_v2  ;;  %v5673_v13 = vmul.f32 %v5219_v27, %v5645_v3  ;;  %v5682_v26 = vmul.f32 %v5244_v58, %v5651_v40 }
  0xb2   : > { %v1286_v50 = vadd.f32 %v8469_v41, %v1266_v15  ;;  %v1405_v52 = vadd.f32 %v8470_v57, %v1385_v38  ;;  %v1444_v25 = vadd.f32 %v8471_v22, %v1424_v30  ;;  %v5658_v23 = vld [vmem:[#allocation2 + $0xc5] sm:$0xff]  ;;  %v1169_v2 = vadd.f32 %v1161_v51, %v1149_v43 }
  0xb3   : > { %8472 = vst [vmem:[#allocation35_spill] sm:$0xff] %v5658_v23  ;;  %v5669_v11 = vld [vmem:[#allocation2 + $0xc6] sm:$0xff]  ;;  %8475 = vst [vmem:[#allocation22_spill] sm:$0xff] %v5673_v13  ;;  %v1308_v30 = vadd.f32 %v1300_v21, %v1288_v19  ;;  %v5686_v5 = vmul.f32 %v5219_v27, %v5475_v59  ;;  %v1042_v41 = vmul.f32 %v4701_v54, %v5658_v23 }
  0xb4   : > { %8474 = vst [vmem:[#allocation59_spill] sm:$0xff] %v5669_v11  ;;  %v8476_v15 = vld [vmem:[#allocation76_spill] sm:$0xff]  ;;  %v1464_v34 = vadd.f32 %v5458_v35, %v1444_v25  ;;  %8479 = vst [vmem:[#allocation31_spill] sm:$0xff] %v5682_v26  ;;  %v5694_v22 = vld [vmem:[#allocation2 + $0xc8] sm:$0xff]  ;;  %v1062_v25 = vmul.f32 %v8400_v9, %v5669_v11  ;;  %v5700_v43 = vmul.f32 %v5376_v45, %v5475_v59 }
  0xb5   : > { %v1306_v17 = vadd.f32 %v8476_v15, %v1286_v50  ;;  %v8477_v38 = vld [vmem:[#allocation96_spill] sm:$0xff]  ;;  %8480 = vst [vmem:[#allocation61_spill] sm:$0xff] %v5686_v5  ;;  %v8481_v50 = vld [vmem:[#allocation81_spill] sm:$0xff]  ;;  %8482 = vst [vmem:[#allocation30_spill] sm:$0xff] %v5694_v22  ;;  %v5704_v51 = vmul.f32 %v5385_v28, %v5477_v49  ;;  %v1050_v54 = vadd.f32 %v1042_v41, %v1030_v53 }
  0xb6   : > { %v1425_v36 = vadd.f32 %v8477_v38, %v1405_v52  ;;  %v5678_v7 = vld [vmem:[#allocation2 + $0xc7] sm:$0xff]  ;;  %v5691_v52 = vadd.f32 %v1439_v12, %v1427_v4  ;;  %v1484_v35 = vadd.f32 %v5463_v56, %v1464_v34  ;;  %v5713_v9 = vmul.f32 %v5388_v31, %v5500_v42  ;;  %v8487_v38 = vld [vmem:[#allocation122_spill] sm:$0xff] }
  0xb7   : > { %8478 = vst [vmem:[#allocation26_spill] sm:$0xff] %v5678_v7  ;;  %v1326_v57 = vadd.f32 %v8481_v50, %v1306_v17  ;;  %v1082_v19 = vmul.f32 %v8417_v61, %v5678_v7  ;;  %v8483_v21 = vld [vmem:[#allocation85_spill] sm:$0xff]  ;;  %v5719_v34 = vmul.f32 %v8487_v38, %v5522_v16  ;;  %v1070_v41 = vadd.f32 %v1062_v25, %v1050_v54  ;;  %v5737_v25 = vld [vmem:[#allocation2 + $0xdd] sm:$0xff] }
  0xb8   : > { %v8484_v56 = vld [vmem:[#allocation101_spill] sm:$0xff]  ;;  %v1504_v15 = vadd.f32 %v5481_v0, %v1484_v35  ;;  %8485 = vst [vmem:[#allocation74_spill] sm:$0xff] %v5713_v9  ;;  %v1102_v61 = vmul.f32 %v8428_v48, %v5694_v22  ;;  %v8490_v0 = vld [vmem:[#allocation88_spill] sm:$0xff]  ;;  %v5731_v35 = vmul.f32 %v5404_v55, %v5528_v8  ;;  %8492 = vst [vmem:[#allocation24_spill] sm:$0xff] %v5737_v25 }
  0xb9   : > { %v1346_v4 = vadd.f32 %v8483_v21, %v1326_v57  ;;  %v1445_v12 = vadd.f32 %v8484_v56, %v1425_v36  ;;  %v5715_v17 = vld [vmem:[#allocation2 + $0xc9] sm:$0xff]  ;;  %8488 = vst [vmem:[#allocation58_spill] sm:$0xff] %v5719_v34  ;;  %v1181_v36 = vmul.f32 %v4943_v47, %v5658_v23  ;;  %v1201_v56 = vmul.f32 %v8420_v14, %v5669_v11  ;;  %v8500_v34 = vld [vmem:[#allocation39_spill] sm:$0xff] }
  0xba   : > { %8486 = vst [vmem:[#allocation23_spill] sm:$0xff] %v5715_v17  ;;  %v5721_v53 = vld [vmem:[#allocation2 + $0xca] sm:$0xff]  ;;  %v1524_v57 = vadd.f32 %v5491_v63, %v1504_v15  ;;  %8491 = vst [vmem:[#allocation63_spill] sm:$0xff] %v5731_v35  ;;  %v1090_v54 = vadd.f32 %v1082_v19, %v1070_v41  ;;  %v1122_v48 = vmul.f32 %v8431_v20, %v5715_v17  ;;  %v8494_v63 = vld [vmem:[#allocation91_spill] sm:$0xff] }
  0xbb   : > { %8489 = vst [vmem:[#allocation16_spill] sm:$0xff] %v5721_v53  ;;  %v1366_v50 = vadd.f32 %v8490_v0, %v1346_v4  ;;  %v5733_v21 = vld [vmem:[#allocation2 + $0xcb] sm:$0xff]  ;;  %v1189_v44 = vadd.f32 %v1181_v36, %v1169_v2  ;;  %v8493_v4 = vld [vmem:[#allocation48_spill] sm:$0xff] }
  0xbc   : > { %v1221_v0 = vmul.f32 %v8493_v4, %v5678_v7  ;;  %v8495_v5 = vld [vmem:[#allocation105_spill] sm:$0xff]  ;;  %v1110_v55 = vadd.f32 %v1102_v61, %v1090_v54  ;;  %v1162_v19 = vmul.f32 %v8460_v6, %v5733_v21  ;;  %v8499_v36 = vld [vmem:[#allocation94_spill] sm:$0xff]  ;;  %v8504_v54 = vld [vmem:[#allocation99_spill] sm:$0xff] }
  0xbd   : > { %v1386_v15 = vadd.f32 %v8494_v63, %v1366_v50  ;;  %v1465_v40 = vadd.f32 %v8495_v5, %v1445_v12  ;;  %v8496_v26 = vld [vmem:[#allocation29_spill] sm:$0xff]  ;;  %v1209_v41 = vadd.f32 %v1201_v56, %v1189_v44  ;;  %v5754_v50 = vld [vmem:[#allocation2 + $0xde] sm:$0xff]  ;;  %v8502_v6 = vld [vmem:[#allocation50_spill] sm:$0xff] }
  0xbe   : > { %v1544_v13 = vadd.f32 %v8496_v26, %v1524_v57  ;;  %v8497_v3 = vld [vmem:[#allocation21_spill] sm:$0xff]  ;;  %v1182_v26 = vmul.f32 %v4943_v47, %v5737_v25  ;;  %v1130_v12 = vadd.f32 %v1122_v48, %v1110_v55  ;;  %v1261_v44 = vmul.f32 %v8502_v6, %v5715_v17  ;;  %v8509_v6 = vld [vmem:[#allocation14_spill] sm:$0xff] }
  0xbf   : > { %v1142_v29 = vmul.f32 %v8497_v3, %v5721_v53  ;;  %v8498_v20 = vld [vmem:[#allocation49_spill] sm:$0xff]  ;;  %v1406_v35 = vadd.f32 %v8499_v36, %v1386_v15  ;;  %v1229_v61 = vadd.f32 %v1221_v0, %v1209_v41  ;;  %v8505_v15 = vld [vmem:[#allocation47_spill] sm:$0xff]  ;;  %v8506_v36 = vld [vmem:[#allocation66_spill] sm:$0xff]  ;;  %v1202_v28 = vmul.f32 %v8420_v14, %v5754_v50 }
  0xc0   : > { %v1241_v2 = vmul.f32 %v8498_v20, %v5694_v22  ;;  %v1564_v38 = vadd.f32 %v8500_v34, %v1544_v13  ;;  %v8501_v5 = vld [vmem:[#allocation57_spill] sm:$0xff]  ;;  %v1360_v31 = vmul.f32 %v8506_v36, %v5678_v7  ;;  %v1281_v48 = vmul.f32 %v8455_v32, %v5721_v53  ;;  %v8507_v0 = vld [vmem:[#allocation102_spill] sm:$0xff] }
  0xc1   : > { %v1320_v3 = vmul.f32 %v8501_v5, %v5658_v23  ;;  %v8503_v57 = vld [vmem:[#allocation65_spill] sm:$0xff]  ;;  %v1426_v63 = vadd.f32 %v8504_v54, %v1406_v35  ;;  %v1150_v47 = vadd.f32 %v1142_v29, %v1130_v12  ;;  %v1301_v29 = vmul.f32 %v8466_v33, %v5733_v21 }
  0xc2   : > { %v1340_v56 = vmul.f32 %v8503_v57, %v5669_v11  ;;  %v1584_v13 = vadd.f32 %v8505_v15, %v1564_v38  ;;  %v1249_v55 = vadd.f32 %v1241_v2, %v1229_v61  ;;  %v8510_v38 = vld [vmem:[#allocation69_spill] sm:$0xff]  ;;  %v1321_v14 = vmul.f32 %v8501_v5, %v5737_v25  ;;  %v8511_v2 = vld [vmem:[#allocation32_spill] sm:$0xff] }
  0xc3   : > { %v1328_v34 = vadd.f32 %v1320_v3, %v1308_v30  ;;  %v5773_v41 = vadd.f32 %v8507_v0, %v1426_v63  ;;  %v1380_v30 = vmul.f32 %v8510_v38, %v5694_v22  ;;  %v1170_v3 = vadd.f32 %v1162_v19, %v1150_v47  ;;  %v8513_v47 = vld [vmem:[#allocation107_spill] sm:$0xff] }
  0xc4   : > { %v1604_v9 = vadd.f32 %v8509_v6, %v1584_v13  ;;  %v1269_v54 = vadd.f32 %v1261_v44, %v1249_v55  ;;  %v1400_v63 = vmul.f32 %v8449_v46, %v5715_v17  ;;  %v1459_v6 = vmul.f32 %v5219_v27, %v5658_v23  ;;  %v8512_v13 = vld [vmem:[#allocation51_spill] sm:$0xff] }
  0xc5   : > { %8508 = vst [vmem:[#allocation28_spill] sm:$0xff] %v5773_v41  ;;  %v1348_v35 = vadd.f32 %v1340_v56, %v1328_v34  ;;  %v1341_v19 = vmul.f32 %v8503_v57, %v5754_v50  ;;  %v1420_v44 = vmul.f32 %v8456_v37, %v5721_v53  ;;  %v1479_v15 = vmul.f32 %v5244_v58, %v5669_v11  ;;  %v8515_v41 = vld [vmem:[#allocation15_spill] sm:$0xff] }
  0xc6   : > { %v1624_v12 = vadd.f32 %v8511_v2, %v1604_v9  ;;  %v1289_v56 = vadd.f32 %v1281_v48, %v1269_v54  ;;  %v1485_v55 = vadd.f32 %v8513_v47, %v1465_v40  ;;  %v1190_v0 = vadd.f32 %v1182_v26, %v1170_v3  ;;  %v8514_v54 = vld [vmem:[#allocation97_spill] sm:$0xff]  ;;  %v5801_v37 = vld [vmem:[#allocation2 + $0xdf] sm:$0xff] }
  0xc7   : > { %v1368_v61 = vadd.f32 %v1360_v31, %v1348_v35  ;;  %v1467_v31 = vadd.f32 %v1459_v6, %v5691_v52  ;;  %v1440_v48 = vmul.f32 %v8467_v62, %v5733_v21  ;;  %v1499_v2 = vmul.f32 %v8514_v54, %v5678_v7  ;;  %v8517_v52 = vld [vmem:[#allocation98_spill] sm:$0xff]  ;;  %v8518_v3 = vld [vmem:[#allocation103_spill] sm:$0xff] }
  0xc8   : > { %v1644_v34 = vadd.f32 %v8512_v13, %v1624_v12  ;;  %v1309_v35 = vadd.f32 %v1301_v29, %v1289_v56  ;;  %v8516_v12 = vld [vmem:[#allocation108_spill] sm:$0xff]  ;;  %v1460_v40 = vmul.f32 %v5219_v27, %v5737_v25  ;;  %v1519_v26 = vmul.f32 %v8517_v52, %v5694_v22  ;;  %v8519_v6 = vld [vmem:[#allocation43_spill] sm:$0xff] }
  0xc9   : > { %v1388_v9 = vadd.f32 %v1380_v30, %v1368_v61  ;;  %v1487_v46 = vadd.f32 %v1479_v15, %v1467_v31  ;;  %v1505_v30 = vadd.f32 %v8516_v12, %v1485_v55  ;;  %v1539_v29 = vmul.f32 %v8518_v3, %v5715_v17  ;;  %v8521_v12 = vld [vmem:[#allocation116_spill] sm:$0xff] }
  0xca   : > { %v1664_v57 = vadd.f32 %v8515_v41, %v1644_v34  ;;  %v1329_v61 = vadd.f32 %v1321_v14, %v1309_v35  ;;  %v8520_v34 = vld [vmem:[#allocation112_spill] sm:$0xff]  ;;  %v1222_v15 = vmul.f32 %v8493_v4, %v5801_v37  ;;  %v8524_v4 = vld [vmem:[#allocation109_spill] sm:$0xff] }
  0xcb   : > { %v1408_v5 = vadd.f32 %v1400_v63, %v1388_v9  ;;  %v1507_v41 = vadd.f32 %v1499_v2, %v1487_v46  ;;  %v1525_v47 = vadd.f32 %v8520_v34, %v1505_v30  ;;  %v1210_v63 = vadd.f32 %v1202_v28, %v1190_v0  ;;  %v8523_v28 = vld [vmem:[#allocation104_spill] sm:$0xff] }
  0xcc   : > { %v1684_v56 = vadd.f32 %v8519_v6, %v1664_v57  ;;  %v1349_v14 = vadd.f32 %v1341_v19, %v1329_v61  ;;  %v1361_v9 = vmul.f32 %v8506_v36, %v5801_v37  ;;  %v8522_v57 = vld [vmem:[#allocation123_spill] sm:$0xff]  ;;  %v1480_v46 = vmul.f32 %v5244_v58, %v5754_v50  ;;  %v8526_v61 = vld [vmem:[#allocation124_spill] sm:$0xff] }
  0xcd   : > { %v1428_v13 = vadd.f32 %v1420_v44, %v1408_v5  ;;  %v1527_v35 = vadd.f32 %v1519_v26, %v1507_v41  ;;  %v1545_v3 = vadd.f32 %v8521_v12, %v1525_v47  ;;  %v1836_v5 = vmul.f32 %v8522_v57, %v5556_v1 }
  0xce   : > { %v1704_v31 = vadd.f32 %v5663_v10, %v1684_v56  ;;  %v1559_v44 = vmul.f32 %v8523_v28, %v5721_v53  ;;  %v1597_v19 = vmul.f32 %v8524_v4, %v5475_v59  ;;  %v1856_v26 = vmul.f32 %v8526_v61, %v5560_v24  ;;  %v8528_v59 = vld [vmem:[#allocation118_spill] sm:$0xff] }
  0xcf   : > { %v1448_v55 = vadd.f32 %v1440_v48, %v1428_v13  ;;  %v1547_v10 = vadd.f32 %v1539_v29, %v1527_v35  ;;  %v8525_v48 = vld [vmem:[#allocation117_spill] sm:$0xff]  ;;  %v1230_v6 = vadd.f32 %v1222_v15, %v1210_v63  ;;  %v1500_v56 = vmul.f32 %v8514_v54, %v5801_v37  ;;  %v8527_v13 = vld [vmem:[#allocation106_spill] sm:$0xff]  ;;  %v5838_v29 = vld [vmem:[#allocation2 + $0xe0] sm:$0xff] }
  0xd0   : > { %v1724_v0 = vadd.f32 %v5667_v18, %v1704_v31  ;;  %v1565_v30 = vadd.f32 %v8525_v48, %v1545_v3  ;;  %v1579_v41 = vmul.f32 %v8527_v13, %v5733_v21  ;;  %v1369_v47 = vadd.f32 %v1361_v9, %v1349_v14  ;;  %v8529_v18 = vld [vmem:[#allocation110_spill] sm:$0xff]  ;;  %v8530_v63 = vld [vmem:[#allocation111_spill] sm:$0xff]  ;;  %v8531_v31 = vld [vmem:[#allocation113_spill] sm:$0xff] }
  0xd1   : > { %v1468_v2 = vadd.f32 %v1460_v40, %v1448_v55  ;;  %v1617_v40 = vmul.f32 %v8529_v18, %v5477_v49  ;;  %v1599_v3 = vmul.f32 %v8524_v4, %v5737_v25  ;;  %v1637_v15 = vmul.f32 %v8530_v63, %v5500_v42  ;;  %v8532_v35 = vld [vmem:[#allocation114_spill] sm:$0xff]  ;;  %v5848_v14 = vld [vmem:[#allocation2 + $0xe1] sm:$0xff] }
  0xd2   : > { %v1744_v34 = vadd.f32 %v5700_v43, %v1724_v0  ;;  %v1585_v12 = vadd.f32 %v8528_v59, %v1565_v30  ;;  %v1657_v55 = vmul.f32 %v8531_v31, %v5522_v16  ;;  %v1677_v43 = vmul.f32 %v8532_v35, %v5528_v8  ;;  %v5851_v59 = vld [vmem:[#allocation2 + $0xe2] sm:$0xff]  ;;  %v8533_v49 = vld [vmem:[#allocation74_spill] sm:$0xff] }
  0xd3   : > { %v1488_v0 = vadd.f32 %v1480_v46, %v1468_v2  ;;  %v1567_v48 = vadd.f32 %v1559_v44, %v1547_v10  ;;  %v1697_v25 = vmul.f32 %v8473_v39, %v5556_v1  ;;  %v1717_v42 = vmul.f32 %v5352_v60, %v5560_v24  ;;  %v8534_v46 = vld [vmem:[#allocation12_spill] sm:$0xff]  ;;  %v8535_v2 = vld [vmem:[#allocation50_spill] sm:$0xff] }
  0xd4   : > { %v1764_v9 = vadd.f32 %v5704_v51, %v1744_v34  ;;  %v1605_v30 = vadd.f32 %v1597_v19, %v1585_v12  ;;  %v1737_v16 = vmul.f32 %v5376_v45, %v5658_v23  ;;  %v1242_v8 = vmul.f32 %v8498_v20, %v5838_v29  ;;  %v5866_v19 = vld [vmem:[#allocation2 + $0xe3] sm:$0xff]  ;;  %v8537_v23 = vld [vmem:[#allocation122_spill] sm:$0xff] }
  0xd5   : > { %v5864_v44 = vmul.f32 %v8534_v46, %v5669_v11  ;;  %v1262_v10 = vmul.f32 %v8535_v2, %v5848_v14  ;;  %v8536_v34 = vld [vmem:[#allocation121_spill] sm:$0xff]  ;;  %v5876_v24 = vmul.f32 %v8537_v23, %v5694_v22  ;;  %v1587_v11 = vadd.f32 %v1579_v41, %v1567_v48  ;;  %v5881_v46 = vld [vmem:[#allocation2 + $0xf5] sm:$0xff] }
  0xd6   : > { %v1784_v35 = vadd.f32 %v8533_v49, %v1764_v9  ;;  %v1625_v51 = vadd.f32 %v1617_v40, %v1605_v30  ;;  %v5872_v12 = vmul.f32 %v8536_v34, %v5678_v7  ;;  %v1250_v20 = vadd.f32 %v1242_v8, %v1230_v6  ;;  %v8538_v40 = vld [vmem:[#allocation58_spill] sm:$0xff]  ;;  %v8539_v8 = vld [vmem:[#allocation72_spill] sm:$0xff] }
  0xd7   : > { %v1282_v49 = vmul.f32 %v8455_v32, %v5851_v59  ;;  %v1508_v30 = vadd.f32 %v1500_v56, %v1488_v0  ;;  %v5883_v2 = vld [vmem:[#allocation2 + $0xf6] sm:$0xff]  ;;  %v1302_v7 = vmul.f32 %v8466_v33, %v5866_v19  ;;  %v1381_v22 = vmul.f32 %v8510_v38, %v5838_v29  ;;  %v8541_v56 = vld [vmem:[#allocation41_spill] sm:$0xff] }
  0xd8   : > { %v1804_v9 = vadd.f32 %v8538_v40, %v1784_v35  ;;  %v1645_v1 = vadd.f32 %v1637_v15, %v1625_v51  ;;  %v1270_v45 = vadd.f32 %v1262_v10, %v1250_v20  ;;  %v1401_v6 = vmul.f32 %v8539_v8, %v5848_v14  ;;  %v8540_v32 = vld [vmem:[#allocation63_spill] sm:$0xff]  ;;  %v8542_v51 = vld [vmem:[#allocation57_spill] sm:$0xff]  ;;  %v8543_v40 = vld [vmem:[#allocation78_spill] sm:$0xff] }
  0xd9   : > { %v5894_v41 = vmul.f32 %v8541_v56, %v5715_v17  ;;  %v5898_v15 = vmul.f32 %v8522_v57, %v5721_v53  ;;  %v5900_v0 = vld [vmem:[#allocation2 + $0xf7] sm:$0xff]  ;;  %v1322_v10 = vmul.f32 %v8542_v51, %v5881_v46  ;;  %v1389_v20 = vadd.f32 %v1381_v22, %v1369_v47  ;;  %v8544_v53 = vld [vmem:[#allocation65_spill] sm:$0xff] }
  0xda   : > { %v1824_v23 = vadd.f32 %v8540_v32, %v1804_v9  ;;  %v1665_v35 = vadd.f32 %v1657_v55, %v1645_v1  ;;  %v5902_v33 = vld [vmem:[#allocation2 + $0xf8] sm:$0xff]  ;;  %v1290_v48 = vadd.f32 %v1282_v49, %v1270_v45  ;;  %v1421_v1 = vmul.f32 %v8543_v40, %v5851_v59 }
  0xdb   : > { %v1607_v9 = vadd.f32 %v1599_v3, %v1587_v11  ;;  %v5908_v17 = vld [vmem:[#allocation2 + $0xf9] sm:$0xff]  ;;  %v1342_v57 = vmul.f32 %v8544_v53, %v5883_v2  ;;  %v1362_v34 = vmul.f32 %v8506_v36, %v5900_v0  ;;  %v1409_v45 = vadd.f32 %v1401_v6, %v1389_v20 }
  0xdc   : > { %v1844_v55 = vadd.f32 %v1836_v5, %v1824_v23  ;;  %v1685_v32 = vadd.f32 %v1677_v43, %v1665_v35  ;;  %v1310_v56 = vadd.f32 %v1302_v7, %v1290_v48  ;;  %v1441_v49 = vmul.f32 %v8467_v62, %v5866_v19  ;;  %v5916_v51 = vld [vmem:[#allocation2 + $0xfa] sm:$0xff] }
  0xdd   : > { %v1382_v23 = vmul.f32 %v8510_v38, %v5902_v33  ;;  %v1520_v11 = vmul.f32 %v8517_v52, %v5838_v29  ;;  %v1402_v7 = vmul.f32 %v8539_v8, %v5908_v17  ;;  %v1429_v53 = vadd.f32 %v1421_v1, %v1409_v45  ;;  %v8545_v3 = vld [vmem:[#allocation55_spill] sm:$0xff] }
  0xde   : > { %v1864_v22 = vadd.f32 %v1856_v26, %v1844_v55  ;;  %v1705_v47 = vadd.f32 %v1697_v25, %v1685_v32  ;;  %v1330_v5 = vadd.f32 %v1322_v10, %v1310_v56  ;;  %v1461_v36 = vmul.f32 %v5219_v27, %v5881_v46  ;;  %v8547_v6 = vld [vmem:[#allocation103_spill] sm:$0xff] }
  0xdf   : > { %v1528_v26 = vadd.f32 %v1520_v11, %v1508_v30  ;;  %v1540_v35 = vmul.f32 %v8547_v6, %v5848_v14  ;;  %v5931_v38 = vld [vmem:[#allocation2 + $0xfb] sm:$0xff]  ;;  %v1422_v56 = vmul.f32 %v8543_v40, %v5916_v51  ;;  %v1449_v10 = vadd.f32 %v1441_v49, %v1429_v53 }
  0xe0   : > { %v5927_v43 = vadd.f32 %v8545_v3, %v1864_v22  ;;  %v1725_v25 = vadd.f32 %v1717_v42, %v1705_v47  ;;  %v1350_v48 = vadd.f32 %v1342_v57, %v1330_v5  ;;  %v1481_v8 = vmul.f32 %v5244_v58, %v5883_v2 }
  0xe1   : > { %v1548_v1 = vadd.f32 %v1540_v35, %v1528_v26  ;;  %v1560_v42 = vmul.f32 %v8523_v28, %v5851_v59  ;;  %v1469_v55 = vadd.f32 %v1461_v36, %v1449_v10  ;;  %v1501_v57 = vmul.f32 %v8514_v54, %v5900_v0 }
  0xe2   : > { %8546 = vst [vmem:[#allocation34_spill] sm:$0xff] %v5927_v43  ;;  %v1888_v27 = vsel %vm741_vm0, %v5927_v43, 0.0  ;;  %v1745_v20 = vadd.f32 %v1737_v16, %v1725_v25  ;;  %v1370_v30 = vadd.f32 %v1362_v34, %v1350_v48  ;;  %v1580_v40 = vmul.f32 %v8527_v13, %v5866_v19  ;;  %v8570_v43 = vld [vmem:[#allocation26_spill] sm:$0xff] }
  0xe3   : > { %1889 = vadd.xlane.f32.xlu0 %v1888_v27  ;;  %v1442_v45 = vmul.f32 %v8467_v62, %v5931_v38  ;;  %v1568_v49 = vadd.f32 %v1560_v42, %v1548_v1  ;;  %v1600_v16 = vmul.f32 %v8524_v4, %v5881_v46  ;;  %v1489_v47 = vadd.f32 %v1481_v8, %v1469_v55  ;;  %v5966_v8 = vld [vmem:[#allocation2 + $0x10f] sm:$0xff] }
  0xe4   : > { %v1765_v32 = vadd.f32 %v5864_v44, %v1745_v20  ;;  %v1390_v22 = vadd.f32 %v1382_v23, %v1370_v30  ;;  %v1521_v34 = vmul.f32 %v8517_v52, %v5902_v33  ;;  %v1619_v11 = vmul.f32 %v8529_v18, %v5754_v50  ;;  %v8548_v30 = vld [vmem:[#allocation114_spill] sm:$0xff] }
  0xe5   : > { %v1541_v44 = vmul.f32 %v8547_v6, %v5908_v17  ;;  %v1588_v53 = vadd.f32 %v1580_v40, %v1568_v49  ;;  %v1620_v62 = vmul.f32 %v8529_v18, %v5883_v2  ;;  %v1509_v25 = vadd.f32 %v1501_v57, %v1489_v47  ;;  %v5975_v57 = vld [vmem:[#allocation2 + $0x110] sm:$0xff] }
  0xe6   : > { %v1785_v5 = vadd.f32 %v5872_v12, %v1765_v32  ;;  %v1410_v36 = vadd.f32 %v1402_v7, %v1390_v22  ;;  %v1627_v26 = vadd.f32 %v1619_v11, %v1607_v9  ;;  %v1639_v23 = vmul.f32 %v8530_v63, %v5801_v37  ;;  %v8549_v22 = vld [vmem:[#allocation19_spill] sm:$0xff]  ;;  %v8550_v11 = vld [vmem:[#allocation22_spill] sm:$0xff] }
  0xe7   : > { %v1857_v48 = vmul.f32 %v8526_v61, %v5733_v21  ;;  %v1561_v12 = vmul.f32 %v8523_v28, %v5916_v51  ;;  %v1608_v10 = vadd.f32 %v1600_v16, %v1588_v53  ;;  %v1529_v20 = vadd.f32 %v1521_v34, %v1509_v25 }
  0xe8   : > { %v1805_v35 = vadd.f32 %v5876_v24, %v1785_v5  ;;  %v1430_v27 = vadd.f32 %v1422_v56, %v1410_v36  ;;  %v1647_v1 = vadd.f32 %v1639_v23, %v1627_v26  ;;  %v1659_v9 = vmul.f32 %v8531_v31, %v5838_v29  ;;  %v5993_v26 = vld [vmem:[#allocation2 + $0x111] sm:$0xff] }
  0xe9   : > { %v1628_v42 = vadd.f32 %v1620_v62, %v1608_v10  ;;  %v1640_v24 = vmul.f32 %v8530_v63, %v5900_v0  ;;  %v1679_v55 = vmul.f32 %v8548_v30, %v5848_v14  ;;  %v1549_v32 = vadd.f32 %v1541_v44, %v1529_v20  ;;  %v8551_v23 = vld [vmem:[#allocation31_spill] sm:$0xff] }
  0xea   : > { %v1825_v7 = vadd.f32 %v5894_v41, %v1805_v35  ;;  %v1450_v40 = vadd.f32 %v1442_v45, %v1430_v27  ;;  %v1581_v56 = vmul.f32 %v8527_v13, %v5931_v38  ;;  %v1667_v49 = vadd.f32 %v1659_v9, %v1647_v1  ;;  %v8553_v1 = vld [vmem:[#allocation46_spill] sm:$0xff] }
  0xeb   : > { %v1502_v41 = vmul.f32 %v8514_v54, %v5966_v8  ;;  %v1601_v47 = vmul.f32 %v8524_v4, %v8549_v22  ;;  %v1699_v34 = vmul.f32 %v8473_v39, %v5851_v59  ;;  %v1569_v53 = vadd.f32 %v1561_v12, %v1549_v32  ;;  %v8552_v12 = vld [vmem:[#allocation120_spill] sm:$0xff] }
  0xec   : > { %v1845_v16 = vadd.f32 %v5898_v15, %v1825_v7  ;;  %v1470_v5 = vadd.f32 %v8550_v11, %v1450_v40  ;;  %v1687_v45 = vadd.f32 %v1679_v55, %v1667_v49  ;;  %v1719_v44 = vmul.f32 %v5352_v60, %v5866_v19 }
  0xed   : > { %v1522_v15 = vmul.f32 %v8517_v52, %v5975_v57  ;;  %v1648_v36 = vadd.f32 %v1640_v24, %v1628_v42  ;;  %v1660_v25 = vmul.f32 %v8531_v31, %v5902_v33  ;;  %v1589_v10 = vadd.f32 %v1581_v56, %v1569_v53  ;;  %v8556_v24 = vld [vmem:[#allocation119_spill] sm:$0xff]  ;;  %v8557_v56 = vld [vmem:[#allocation12_spill] sm:$0xff] }
  0xee   : > { %v1865_v62 = vadd.f32 %v1857_v48, %v1845_v16  ;;  %v1490_v35 = vadd.f32 %v8551_v23, %v1470_v5  ;;  %v1707_v27 = vadd.f32 %v1699_v34, %v1687_v45  ;;  %v1739_v20 = vmul.f32 %v8552_v12, %v5881_v46  ;;  %v8554_v48 = vld [vmem:[#allocation38_spill] sm:$0xff]  ;;  %v8559_v53 = vld [vmem:[#allocation28_spill] sm:$0xff]  ;;  %v8560_v45 = vld [vmem:[#allocation61_spill] sm:$0xff] }
  0xef   : > { %v1478_v9 = vmul.f32 %v5244_v58, %v8553_v1  ;;  %v1498_v7 = vmul.f32 %v8514_v54, %v8554_v48  ;;  %v1621_v55 = vmul.f32 %v8529_v18, %v8556_v24  ;;  %v1609_v32 = vadd.f32 %v1601_v47, %v1589_v10  ;;  %v6029_v48 = vld [vmem:[#allocation2 + $0x112] sm:$0xff] }
  0xf0   : > { %v6003_v42 = vadd.f32 %v8545_v3, %v1865_v62  ;;  %v1510_v40 = vadd.f32 %v1502_v41, %v1490_v35  ;;  %v1727_v49 = vadd.f32 %v1719_v44, %v1707_v27  ;;  %v1759_v16 = vmul.f32 %v8557_v56, %v5883_v2  ;;  %v8558_v41 = vld [vmem:[#allocation121_spill] sm:$0xff]  ;;  %v8561_v2 = vld [vmem:[#allocation40_spill] sm:$0xff] }
  0xf1   : > { %v1542_v58 = vmul.f32 %v8547_v6, %v5993_v26  ;;  %v1668_v34 = vadd.f32 %v1660_v25, %v1648_v36  ;;  %v1680_v54 = vmul.f32 %v8548_v30, %v5908_v17  ;;  %v1779_v47 = vmul.f32 %v8558_v41, %v5900_v0  ;;  %v8562_v25 = vld [vmem:[#allocation122_spill] sm:$0xff] }
  0xf2   : > { %8555 = vst [vmem:[#allocation67_spill] sm:$0xff] %v6003_v42  ;;  %v1891_v46 = vsel %vm741_vm0, %v6003_v42, 0.0  ;;  %v1530_v11 = vadd.f32 %v1522_v15, %v1510_v40  ;;  %v1747_v5 = vadd.f32 %v1739_v20, %v1727_v49  ;;  %v1466_v44 = vadd.f32 %v8560_v45, %v8559_v53  ;;  %v8563_v15 = vld [vmem:[#allocation42_spill] sm:$0xff]  ;;  %v8564_v49 = vld [vmem:[#allocation41_spill] sm:$0xff] }
  0xf3   : > { %1892 = vadd.xlane.f32.xlu1 %v1891_v46  ;;  %v1518_v62 = vmul.f32 %v8517_v52, %v8561_v2  ;;  %v1641_v23 = vmul.f32 %v8530_v63, %v5966_v8  ;;  %v1629_v35 = vadd.f32 %v1621_v55, %v1609_v32  ;;  %v1799_v10 = vmul.f32 %v8562_v25, %v5902_v33  ;;  %v805_v32 = vld [vmem:[#allocation2 + $0x125] sm:$0xff] }
  0xf4   : > { %v1767_v36 = vadd.f32 %v1759_v16, %v1747_v5  ;;  %v1486_v27 = vadd.f32 %v1478_v9, %v1466_v44  ;;  %v1538_v20 = vmul.f32 %v8547_v6, %v8563_v15  ;;  %v1688_v1 = vadd.f32 %v1680_v54, %v1668_v34  ;;  %v6033_v16 = vld [vmem:[#allocation2 + $0x113] sm:$0xff]  ;;  %v8565_v33 = vld [vmem:[#allocation25_spill] sm:$0xff] }
  0xf5   : > { %v1700_v0 = vmul.f32 %v8473_v39, %v5916_v51  ;;  %v1550_v40 = vadd.f32 %v1542_v58, %v1530_v11  ;;  %v1819_v46 = vmul.f32 %v8564_v49, %v5908_v17  ;;  %v1558_v9 = vmul.f32 %v8523_v28, %v8565_v33  ;;  %v8566_v5 = vld [vmem:[#allocation27_spill] sm:$0xff]  ;;  %v819_v17 = vld [vmem:[#allocation2 + $0x126] sm:$0xff] }
  0xf6   : > { %v1787_v52 = vadd.f32 %v1779_v47, %v1767_v36  ;;  %v1506_v55 = vadd.f32 %v1498_v7, %v1486_v27  ;;  %v1578_v6 = vmul.f32 %v8527_v13, %v8566_v5  ;;  %v1720_v34 = vmul.f32 %v5352_v60, %v5931_v38  ;;  %v8567_v54 = vld [vmem:[#allocation123_spill] sm:$0xff]  ;;  %v833_v33 = vld [vmem:[#allocation2 + $0x127] sm:$0xff] }
  0xf7   : > { %v1839_v58 = vmul.f32 %v8567_v54, %v5916_v51  ;;  %v1649_v11 = vadd.f32 %v1641_v23, %v1629_v35  ;;  %v1562_v7 = vmul.f32 %v8523_v28, %v6029_v48  ;;  %v1708_v45 = vadd.f32 %v1700_v0, %v1688_v1  ;;  %v8568_v23 = vld [vmem:[#allocation35_spill] sm:$0xff]  ;;  %v847_v0 = vld [vmem:[#allocation2 + $0x128] sm:$0xff] }
  0xf8   : > { %v1807_v47 = vadd.f32 %v1799_v10, %v1787_v52  ;;  %v1526_v53 = vadd.f32 %v1518_v62, %v1506_v55  ;;  %v1859_v44 = vmul.f32 %v8526_v61, %v5931_v38  ;;  %v1582_v2 = vmul.f32 %v8527_v13, %v6033_v16 }
  0xf9   : > { %v1602_v36 = vmul.f32 %v8524_v4, %v805_v32  ;;  %v1570_v51 = vadd.f32 %v1562_v7, %v1550_v40  ;;  %v1661_v62 = vmul.f32 %v8531_v31, %v5975_v57  ;;  %v1598_v35 = vmul.f32 %v8524_v4, %v8568_v23  ;;  %v861_v7 = vld [vmem:[#allocation2 + $0x129] sm:$0xff] }
  0xfa   : > { %v1827_v27 = vadd.f32 %v1819_v46, %v1807_v47  ;;  %v1546_v15 = vadd.f32 %v1538_v20, %v1526_v53  ;;  %v1622_v28 = vmul.f32 %v8529_v18, %v819_v17  ;;  %v1681_v38 = vmul.f32 %v8548_v30, %v5993_v26  ;;  %v8569_v46 = vld [vmem:[#allocation59_spill] sm:$0xff] }
  0xfb   : > { %v1701_v13 = vmul.f32 %v8473_v39, %v6029_v48  ;;  %v1590_v20 = vadd.f32 %v1582_v2, %v1570_v51  ;;  %v1669_v52 = vadd.f32 %v1661_v62, %v1649_v11  ;;  %v1728_v40 = vadd.f32 %v1720_v34, %v1708_v45  ;;  %v889_v62 = vld [vmem:[#allocation2 + $0x12b] sm:$0xff] }
  0xfc   : > { %v1847_v10 = vadd.f32 %v1839_v58, %v1827_v27  ;;  %v1566_v1 = vadd.f32 %v1558_v9, %v1546_v15  ;;  %v1618_v55 = vmul.f32 %v8529_v18, %v8569_v46  ;;  %v1642_v5 = vmul.f32 %v8530_v63, %v833_v33  ;;  %v8571_v58 = vld [vmem:[#allocation30_spill] sm:$0xff]  ;;  %v8572_v15 = vld [vmem:[#allocation23_spill] sm:$0xff] }
  0xfd   : > { %v1721_v4 = vmul.f32 %v5352_v60, %v6033_v16  ;;  %v1610_v23 = vadd.f32 %v1602_v36, %v1590_v20  ;;  %v1689_v42 = vadd.f32 %v1681_v38, %v1669_v52  ;;  %v1638_v9 = vmul.f32 %v8530_v63, %v8570_v43  ;;  %v875_v27 = vld [vmem:[#allocation2 + $0x12a] sm:$0xff]  ;;  %v8573_v52 = vld [vmem:[#allocation16_spill] sm:$0xff] }
  0xfe   : > { %v1867_v47 = vadd.f32 %v1859_v44, %v1847_v10  ;;  %v1586_v53 = vadd.f32 %v1578_v6, %v1566_v1  ;;  %v1658_v11 = vmul.f32 %v8531_v31, %v8571_v58  ;;  %v1662_v34 = vmul.f32 %v8531_v31, %v847_v0  ;;  %v806_v10 = vld [vmem:[#allocation2 + $0x13d] sm:$0xff] }
  0xff   : > { %v1741_v18 = vmul.f32 %v8552_v12, %v805_v32  ;;  %v1630_v44 = vadd.f32 %v1622_v28, %v1610_v23  ;;  %v1709_v6 = vadd.f32 %v1701_v13, %v1689_v42  ;;  %v1678_v36 = vmul.f32 %v8548_v30, %v8572_v15 }
 0x100   : > { %v6071_v45 = vadd.f32 %v8545_v3, %v1867_v47  ;;  %v1606_v2 = vadd.f32 %v1598_v35, %v1586_v53  ;;  %v1682_v51 = vmul.f32 %v8548_v30, %v861_v7  ;;  %v1761_v63 = vmul.f32 %v8557_v56, %v819_v17 }
 0x101   : > { %v1740_v43 = vmul.f32 %v8552_v12, %v8549_v22  ;;  %v1650_v38 = vadd.f32 %v1642_v5, %v1630_v44  ;;  %v1729_v35 = vadd.f32 %v1721_v4, %v1709_v6  ;;  %v1702_v42 = vmul.f32 %v8473_v39, %v875_v27 }
 0x102   : > { %v1897_v31 = vsel %vm741_vm0, %v6071_v45, 0.0  ;;  %v1626_v32 = vadd.f32 %v1618_v55, %v1606_v2  ;;  %v1781_v28 = vmul.f32 %v8558_v41, %v833_v33  ;;  %v1760_v30 = vmul.f32 %v8557_v56, %v8556_v24  ;;  %v8574_v2 = vld [vmem:[#allocation24_spill] sm:$0xff] }
 0x103   : > { %1898 = vadd.xlane.f32.xlu0 %v1897_v31  ;;  %v1748_v13 = vadd.f32 %v1740_v43, %v1728_v40  ;;  %v1670_v1 = vadd.f32 %v1662_v34, %v1650_v38  ;;  %v1749_v22 = vadd.f32 %v1741_v18, %v1729_v35  ;;  %v1780_v20 = vmul.f32 %v8558_v41, %v5966_v8 }
 0x104   : > { %v1646_v17 = vadd.f32 %v1638_v9, %v1626_v32  ;;  %v1698_v46 = vmul.f32 %v8473_v39, %v8573_v52  ;;  %v1722_v55 = vmul.f32 %v5352_v60, %v889_v62  ;;  %v1801_v40 = vmul.f32 %v8562_v25, %v847_v0  ;;  %v820_v9 = vld [vmem:[#allocation2 + $0x13e] sm:$0xff] }
 0x105   : > { %v1768_v5 = vadd.f32 %v1760_v30, %v1748_v13  ;;  %v1690_v47 = vadd.f32 %v1682_v51, %v1670_v1  ;;  %v1769_v33 = vadd.f32 %v1761_v63, %v1749_v22  ;;  %v1718_v24 = vmul.f32 %v5352_v60, %v5733_v21  ;;  %v848_v51 = vld [vmem:[#allocation2 + $0x140] sm:$0xff] }
 0x106   : > { %v1666_v4 = vadd.f32 %v1658_v11, %v1646_v17  ;;  %v1742_v53 = vmul.f32 %v8552_v12, %v806_v10  ;;  %v1821_v23 = vmul.f32 %v8564_v49, %v861_v7  ;;  %v1800_v8 = vmul.f32 %v8562_v25, %v5975_v57  ;;  %v834_v11 = vld [vmem:[#allocation2 + $0x13f] sm:$0xff] }
 0x107   : > { %v1710_v58 = vadd.f32 %v1702_v42, %v1690_v47  ;;  %v1789_v34 = vadd.f32 %v1781_v28, %v1769_v33  ;;  %v1788_v18 = vadd.f32 %v1780_v20, %v1768_v5  ;;  %v1738_v44 = vmul.f32 %v8552_v12, %v8574_v2  ;;  %v862_v32 = vld [vmem:[#allocation2 + $0x141] sm:$0xff] }
 0x108   : > { %v1686_v39 = vadd.f32 %v1678_v36, %v1666_v4  ;;  %v1841_v0 = vmul.f32 %v8567_v54, %v875_v27  ;;  %v1762_v15 = vmul.f32 %v8557_v56, %v820_v9  ;;  %v1758_v7 = vmul.f32 %v8557_v56, %v5754_v50  ;;  %v876_v10 = vld [vmem:[#allocation2 + $0x142] sm:$0xff] }
 0x109   : > { %v1730_v60 = vadd.f32 %v1722_v55, %v1710_v58  ;;  %v1809_v21 = vadd.f32 %v1801_v40, %v1789_v34  ;;  %v1861_v57 = vmul.f32 %v8526_v61, %v889_v62  ;;  %v1820_v36 = vmul.f32 %v8564_v49, %v5993_v26  ;;  %v890_v4 = vld [vmem:[#allocation2 + $0x143] sm:$0xff] }
 0x10a   : > { %v1706_v6 = vadd.f32 %v1698_v46, %v1686_v39  ;;  %v1782_v63 = vmul.f32 %v8558_v41, %v834_v11  ;;  %v1808_v27 = vadd.f32 %v1800_v8, %v1788_v18  ;;  %v1778_v38 = vmul.f32 %v8558_v41, %v5801_v37 }
 0x10b   : > { %v1750_v12 = vadd.f32 %v1742_v53, %v1730_v60  ;;  %v1829_v31 = vadd.f32 %v1821_v23, %v1809_v21  ;;  %v1802_v50 = vmul.f32 %v8562_v25, %v848_v51  ;;  %v1798_v56 = vmul.f32 %v8562_v25, %v5838_v29 }
 0x10c   : > { %v1726_v43 = vadd.f32 %v1718_v24, %v1706_v6  ;;  %v1840_v26 = vmul.f32 %v8567_v54, %v6029_v48  ;;  %v1822_v62 = vmul.f32 %v8564_v49, %v862_v32  ;;  %v1828_v17 = vadd.f32 %v1820_v36, %v1808_v27 }
 0x10d   : > { %v1849_v42 = vadd.f32 %v1841_v0, %v1829_v31  ;;  %v1770_v28 = vadd.f32 %v1762_v15, %v1750_v12  ;;  %v1818_v37 = vmul.f32 %v8564_v49, %v5848_v14  ;;  %v1838_v29 = vmul.f32 %v8567_v54, %v5851_v59  ;;  %v8576_v0 = vld [vmem:[#allocation34_spill] sm:$0xff] }
 0x10e   : > { %v1746_v35 = vadd.f32 %v1738_v44, %v1726_v43  ;;  %v1860_v25 = vmul.f32 %v8526_v61, %v6033_v16  ;;  %v1842_v48 = vmul.f32 %v8567_v54, %v876_v10  ;;  %v1848_v55 = vadd.f32 %v1840_v26, %v1828_v17 }
 0x10f   : > { %v1869_v30 = vadd.f32 %v1861_v57, %v1849_v42  ;;  %v1790_v1 = vadd.f32 %v1782_v63, %v1770_v28  ;;  %v1858_v14 = vmul.f32 %v8526_v61, %v5866_v19  ;;  %v1862_v59 = vmul.f32 %v8526_v61, %v890_v4  ;;  %v8575_v61 = vld [vmem:[#allocation70_spill] sm:$0xff] }
 0x110   : > { %v1766_v13 = vadd.f32 %v1758_v7, %v1746_v35  ;;  %v1868_v33 = vadd.f32 %v1860_v25, %v1848_v55  ;;  %v8577_v7 = vld [vmem:[#allocation67_spill] sm:$0xff]  ;;  %v732_v25 = vld [vmem:[%s8578_s1] sm:$0x3] }
 0x111   : > { %v1883_v41 = vadd.f32 %v8545_v3, %v1869_v30  ;;  %v1810_v20 = vadd.f32 %v1802_v50, %v1790_v1  ;;  %4277 = vmatprep.subr.msk.bf16.mxu0 %vm2040_vm1, %v732_v25 }
 0x112   : > { %v1786_v22 = vadd.f32 %v1778_v38, %v1766_v13  ;;  %v1882_v54 = vadd.f32 %v8545_v3, %v1868_v33  ;;  %v4147_v33 = vld [vmem:[%s8579_s6] ss:$0 sm:$0xff] }
 0x113   : > { %v1903_v46 = vsel %vm741_vm0, %v1883_v41, 0.0  ;;  %v1830_v5 = vadd.f32 %v1822_v62, %v1810_v20 }
 0x114   : > { %v1806_v52 = vadd.f32 %v1798_v56, %v1786_v22  ;;  %1904 = vadd.xlane.f32.xlu0 %v1903_v46  ;;  %v1900_v8 = vsel %vm741_vm0, %v1882_v54, 0.0 }
 0x115   : > { %v1850_v40 = vadd.f32 %v1842_v48, %v1830_v5  ;;  %v2042_v48 = vsel %vm2040_vm1, %v732_v25, 0 }
 0x116   : > { %v1826_v47 = vadd.f32 %v1818_v37, %v1806_v52  ;;  %4220 = vmatpush3.bf16.msra.mxu0 %v2042_v48 }
 0x117   : > { %v1870_v53 = vadd.f32 %v1862_v59, %v1850_v40 }
 0x118   : > { %v1846_v49 = vadd.f32 %v1838_v29, %v1826_v47 }
 0x119   : > { %v1884_v9 = vadd.f32 %v8545_v3, %v1870_v53 }
 0x11a   : > { %v1866_v24 = vadd.f32 %v1858_v14, %v1846_v49 }
 0x11b   : > { %v1906_v19 = vsel %vm741_vm0, %v1884_v9, 0.0 }
 0x11c   : > { %v1880_v16 = vadd.f32 %v8545_v3, %v1866_v24 }
 0x11e   : > { %v1894_v23 = vsel %vm741_vm0, %v1880_v16, 0.0 }
 0x11f   : > { %1895 = vadd.xlane.f32.xlu1 %v1894_v23 }
 0x123   : > { %1901 = vadd.xlane.f32.xlu1 %v1900_v8 }
 0x127   : > { %1907 = vadd.xlane.f32.xlu1 %v1906_v19 }
 0x13a   : > { %v1887_v39 = vpop.xlane.xlu0 %1886 }
 0x13b   : > { %v1910_v58 = vmul.f32 0.25, %v1887_v39 }
 0x13d   : > { %v1918_v34 = vsub.f32 %v8575_v61, %v1910_v58 }
 0x13f   : > { %v1926_v18 = vmul.f32 %v1918_v34, %v1918_v34 }
 0x141   : > { %v1934_v11 = vsel %vm741_vm0, %v1926_v18, 0.0 }
 0x142   : > { %1935 = vadd.xlane.f32.xlu0 %v1934_v11 }
 0x16c   : > { %v1890_v2 = vpop.xlane.xlu0 %1889 }
 0x16d   : > { %v1911_v44 = vmul.f32 0.25, %v1890_v2 }
 0x16f   : > { %v1919_v6 = vsub.f32 %v8576_v0, %v1911_v44 }
 0x171   : > { %v1927_v60 = vmul.f32 %v1919_v6, %v1919_v6 }
 0x173   : > { %v1937_v21 = vsel %vm741_vm0, %v1927_v60, 0.0 }
 0x174   : > { %1938 = vadd.xlane.f32.xlu1 %v1937_v21 }
 0x17c   : > { %v1893_v3 = vpop.xlane.xlu1 %1892 }
 0x17d   : > { %v1912_v15 = vmul.f32 0.25, %v1893_v3 }
 0x17f   : > { %v6138_v57 = vsub.f32 %v8577_v7, %v1912_v15 }
 0x181   : > { %v1928_v36 = vmul.f32 %v6138_v57, %v6138_v57 }
 0x183   : > { %v1940_v51 = vsel %vm741_vm0, %v1928_v36, 0.0 }
 0x184   : > { %1941 = vadd.xlane.f32.xlu0 %v1940_v51 }
 0x18c   : > { %v1899_v63 = vpop.xlane.xlu0 %1898 }
 0x18d   : > { %v1914_v43 = vmul.f32 0.25, %v1899_v63 }
 0x18f   : > { %v6144_v12 = vsub.f32 %v6071_v45, %v1914_v43 }
 0x191   : > { %v1930_v31 = vmul.f32 %v6144_v12, %v6144_v12 }
 0x193   : > { %v1946_v27 = vsel %vm741_vm0, %v1930_v31, 0.0 }
 0x194   : > { %1947 = vadd.xlane.f32.xlu0 %v1946_v27 }
 0x19d   : > { %v1905_v32 = vpop.xlane.xlu0 %1904 }
 0x19e   : > { %v1916_v38 = vmul.f32 0.25, %v1905_v32 }
 0x1a0   : > { %v6149_v35 = vsub.f32 %v1883_v41, %v1916_v38 }
 0x1a2   : > { %v1932_v42 = vmul.f32 %v6149_v35, %v6149_v35 }
 0x1a4   : > { %v1952_v28 = vsel %vm741_vm0, %v1932_v42, 0.0 }
 0x1a5   : > { %1953 = vadd.xlane.f32.xlu0 %v1952_v28 }
 0x1a8   : > { %v1896_v50 = vpop.xlane.xlu1 %1895 }
 0x1a9   : > { %v1913_v56 = vmul.f32 0.25, %v1896_v50 }
 0x1ab   : > { %v6154_v45 = vsub.f32 %v1880_v16, %v1913_v56  ;;  %v4148_v16 = vld [vmem:[%s8580_s27] ss:$0 sm:$0xff] }
 0x1ac   : > { %v1902_v26 = vpop.xlane.xlu1 %1901 }
 0x1ad   : > { %v1915_v62 = vmul.f32 0.25, %v1902_v26  ;;  %v1929_v13 = vmul.f32 %v6154_v45, %v6154_v45 }
 0x1af   : > { %v6158_v30 = vsub.f32 %v1882_v54, %v1915_v62  ;;  %v1943_v17 = vsel %vm741_vm0, %v1929_v13, 0.0 }
 0x1b0   : > { %1944 = vadd.xlane.f32.xlu1 %v1943_v17  ;;  %v1908_v10 = vpop.xlane.xlu1 %1907 }
 0x1b1   : > { %v1917_v1 = vmul.f32 0.25, %v1908_v10  ;;  %v1931_v22 = vmul.f32 %v6158_v30, %v6158_v30 }
 0x1b3   : > { %v6163_v37 = vsub.f32 %v1884_v9, %v1917_v1  ;;  %v1949_v41 = vsel %vm741_vm0, %v1931_v22, 0.0 }
 0x1b4   : > { %1950 = vadd.xlane.f32.xlu1 %v1949_v41 }
 0x1b5   : > { %v1933_v20 = vmul.f32 %v6163_v37, %v6163_v37 }
 0x1b7   : > { %v1955_v29 = vsel %vm741_vm0, %v1933_v20, 0.0 }
 0x1b8   : > { %1956 = vadd.xlane.f32.xlu1 %v1955_v29 }
 0x1cb   : > { %v1936_v52 = vpop.xlane.xlu0 %1935 }
 0x1cc   : > { %v1958_v46 = vmul.f32 0.25, %v1936_v52  ;;  %v6199_v52 = vld [vmem:[%s7936_s10] sm:$0x3] }
 0x1ce   : > { %v1966_v55 = vadd.f32 1e-06, %v1958_v46  ;;  %v4149_v46 = vld [vmem:[%s7933_s7] ss:$0 sm:$0xff] }
 0x1d0   : > { %4296 = vrsqrt.f32 %v1966_v55 }
 0x1dd   : > { %v4297_v14 = vpop.eup %4296 }
 0x1de   : > { %v1982_v49 = vmul.f32 %v4297_v14, %v1918_v34 }
 0x1e0   : > { %v1996_v24 = vmul.f32 %v4147_v33, %v1982_v49 }
 0x1e2   : > { %v2010_v53 = vadd.f32 %v4148_v16, %v1996_v24 }
 0x1fd   : > { %v1939_v5 = vpop.xlane.xlu1 %1938 }
 0x1fe   : > { %v1959_v4 = vmul.f32 0.25, %v1939_v5 }
 0x200   : > { %v1967_v47 = vadd.f32 1e-06, %v1959_v4 }
 0x202   : > { %4298 = vrsqrt.f32 %v1967_v47 }
 0x20d   : > { %v1942_v9 = vpop.xlane.xlu0 %1941 }
 0x20e   : > { %v1960_v19 = vmul.f32 0.25, %v1942_v9 }
 0x20f   : > { %v4299_v40 = vpop.eup %4298 }
 0x210   : > { %v1983_v59 = vmul.f32 %v4299_v40, %v1919_v6  ;;  %v1968_v58 = vadd.f32 1e-06, %v1960_v19 }
 0x212   : > { %v1997_v54 = vmul.f32 %v4147_v33, %v1983_v59  ;;  %4300 = vrsqrt.f32 %v1968_v58 }
 0x214   : > { %v2011_v23 = vadd.f32 %v4148_v16, %v1997_v54 }
 0x216   : > { %v2018_v8 = vpack.c.bf16 %v2011_v23, %v2010_v53 }
 0x218   : > { %4221 = vmatprep.mubr.msk.bf16.mxu0 %vm741_vm0, %v2018_v8 }
 0x21d   : > { %v1948_v39 = vpop.xlane.xlu0 %1947 }
 0x21e   : > { %v1962_v61 = vmul.f32 0.25, %v1948_v39 }
 0x21f   : > { %v4301_v36 = vpop.eup %4300 }
 0x220   : > { %v1970_v18 = vadd.f32 1e-06, %v1962_v61  ;;  %v1984_v63 = vmul.f32 %v4301_v36, %v6138_v57 }
 0x222   : > { %4302 = vrsqrt.f32 %v1970_v18  ;;  %v1998_v27 = vmul.f32 %v4147_v33, %v1984_v63 }
 0x224   : > { %v2012_v56 = vadd.f32 %v4148_v16, %v1998_v27 }
 0x22e   : > { %v1954_v34 = vpop.xlane.xlu0 %1953 }
 0x22f   : > { %v1964_v11 = vmul.f32 0.25, %v1954_v34  ;;  %v4303_v43 = vpop.eup %4302 }
 0x230   : > { %v1986_v38 = vmul.f32 %v4303_v43, %v6144_v12 }
 0x231   : > { %v1972_v6 = vadd.f32 1e-06, %v1964_v11 }
 0x232   : > { %v2000_v13 = vmul.f32 %v4147_v33, %v1986_v38 }
 0x234   : > { %v2014_v22 = vadd.f32 %v4148_v16, %v2000_v13 }
 0x239   : > { %v1945_v2 = vpop.xlane.xlu1 %1944 }
 0x23a   : > { %v1961_v44 = vmul.f32 0.25, %v1945_v2 }
 0x23c   : > { %v1969_v0 = vadd.f32 1e-06, %v1961_v44 }
 0x23d   : > { %v1951_v60 = vpop.xlane.xlu1 %1950 }
 0x23e   : > { %4304 = vrsqrt.f32 %v1969_v0  ;;  %v1963_v21 = vmul.f32 0.25, %v1951_v60 }
 0x23f   : > { %4306 = vrsqrt.f32 %v1972_v6 }
 0x240   : > { %v1971_v3 = vadd.f32 1e-06, %v1963_v21 }
 0x241   : > { %v1957_v15 = vpop.xlane.xlu1 %1956 }
 0x242   : > { %4308 = vrsqrt.f32 %v1971_v3  ;;  %v1965_v7 = vmul.f32 0.25, %v1957_v15 }
 0x244   : > { %v1973_v51 = vadd.f32 1e-06, %v1965_v7 }
 0x246   : > { %4310 = vrsqrt.f32 %v1973_v51 }
 0x24b   : > { %v4305_v31 = vpop.eup %4304 }
 0x24c   : > { %v1985_v32 = vmul.f32 %v4305_v31, %v6154_v45  ;;  %v4307_v42 = vpop.eup %4306 }
 0x24d   : > { %v1988_v17 = vmul.f32 %v4307_v42, %v6149_v35  ;;  %v4290_v35 = vld [vmem:[%s7934_s8 + $0x8] sm:$0xff]  }
 0x24e   : > { %v1999_v28 = vmul.f32 %v4147_v33, %v1985_v32  ;;  %4229 = vmatprep.subr.bf16.mxu0 %v4290_v35  ;;  %4273 = vmatprep.subr.bf16.mxu1 %v4290_v35 }
 0x24f   : > { %v4309_v50 = vpop.eup %4308  ;;  %v2002_v12 = vmul.f32 %v4147_v33, %v1988_v17  ;;  %4275 = vmatpush3.bf16.msra.mxu1 %v4290_v35 }
 0x250   : > { %v2013_v26 = vadd.f32 %v4148_v16, %v1999_v28  ;;  %v1987_v62 = vmul.f32 %v4309_v50, %v6158_v30 }
 0x251   : > { %v2016_v25 = vadd.f32 %v4148_v16, %v2002_v12 }
 0x252   : > { %v2019_v10 = vpack.c.bf16 %v2013_v26, %v2012_v56  ;;  %v2001_v1 = vmul.f32 %v4147_v33, %v1987_v62 }
 0x253   : > { %v4311_v57 = vpop.eup %4310 }
 0x254   : > { %4222 = vmatmul.mubr.msk.bf16.vlgmr.msra.gmra.mxu0 %vm741_vm0, %v2019_v10  ;;  %v2015_v41 = vadd.f32 %v4148_v16, %v2001_v1  ;;  %v1989_v45 = vmul.f32 %v4311_v57, %v6163_v37  ;;  %v4291_v37 = vld [vmem:[%s7934_s8] sm:$0xff]  }
 0x255   : > { %4230 = vmatpush3.bf16.msra.mxu0 %v4290_v35  ;;  %4274 = vmatprep.subr.bf16.mxu1 %v4291_v37 }
 0x256   : > { %v2020_v20 = vpack.c.bf16 %v2015_v41, %v2014_v22  ;;  %v2003_v29 = vmul.f32 %v4147_v33, %v1989_v45  ;;  %4231 = vmatprep.subr.bf16.mxu0 %v4291_v37  ;;  %4276 = vmatpush3.bf16.msra.mxu1 %v4291_v37 }
 0x258   : > { %4225 = vmatprep.mubr.msk.bf16.mxu0 %vm741_vm0, %v2020_v20  ;;  %v2017_v48 = vadd.f32 %v4148_v16, %v2003_v29 }
 0x259   : > { %4232 = vmatpush3.bf16.msra.mxu0 %v4291_v37 }
 0x25a   : > { %v2021_v30 = vpack.c.bf16 %v2017_v48, %v2016_v25  ;;  %4278 = vmatprep.subr.msk.bf16.mxu0 %vm2040_vm1, %v6199_v52 }
 0x25c   : > { %4226 = vmatmul.mubr.msk.bf16.gmra.mxu0 %vm741_vm0, %v2021_v30 }
 0x314   : > { %v4223_v55 = vpop.f32.mrf.mxu0 }
 0x315   : > { %v6206_v5 = vadd.f32 %v4223_v55, %v4149_v46 }
 0x316   : > { %v2078_v4 = vpop.f32.mrf.mxu0 }
 0x317   : > { %v2111_v47 = vmul.f32 %v6206_v5, %v6206_v5  ;;  %v6210_v14 = vadd.f32 %v4149_v46, %v2078_v4 }
 0x318   : > { %v4224_v49 = vpop.f32.mrf.mxu0 }
 0x319   : > { %v2119_v33 = vmul.f32 %v2111_v47, %v6206_v5  ;;  %v2109_v40 = vmul.f32 %v6210_v14, %v6210_v14  ;;  %v6215_v59 = vadd.f32 %v4224_v49, %v4149_v46 }
 0x31a   : > { %v2081_v24 = vpop.f32.mrf.mxu0 }
 0x31b   : > { %v2127_v16 = vmul.f32 0.044715, %v2119_v33  ;;  %v2117_v54 = vmul.f32 %v2109_v40, %v6210_v14  ;;  %v2112_v53 = vmul.f32 %v6215_v59, %v6215_v59  ;;  %v6220_v23 = vadd.f32 %v4149_v46, %v2081_v24 }
 0x31c   : > { %v4227_v8 = vpop.f32.mrf.mxu0 }
 0x31d   : > { %v2135_v9 = vadd.f32 %v2127_v16, %v6206_v5  ;;  %v2125_v19 = vmul.f32 0.044715, %v2117_v54  ;;  %v2120_v39 = vmul.f32 %v2112_v53, %v6215_v59  ;;  %v2110_v58 = vmul.f32 %v6220_v23, %v6220_v23 }
 0x31e   : > { %v6226_v61 = vadd.f32 %v4227_v8, %v4149_v46  ;;  %v2094_v34 = vpop.f32.mrf.mxu0 }
 0x31f   : > { %v2143_v18 = vmul.f32 0.7978846, %v2135_v9  ;;  %v2133_v11 = vadd.f32 %v2125_v19, %v6210_v14  ;;  %v2128_v2 = vmul.f32 0.044715, %v2120_v39  ;;  %v2118_v44 = vmul.f32 %v2110_v58, %v6220_v23 }
 0x320   : > { %v2115_v0 = vmul.f32 %v6226_v61, %v6226_v61  ;;  %v6232_v6 = vadd.f32 %v4149_v46, %v2094_v34  ;;  %v4228_v60 = vpop.f32.mrf.mxu0  ;;  %v8581_v34 = vld [vmem:[#allocation9_spill] sm:$0xff] }
 0x321   : > { %v2141_v21 = vmul.f32 0.7978846, %v2133_v11  ;;  %v2136_v3 = vadd.f32 %v2128_v2, %v6215_v59  ;;  %v2126_v15 = vmul.f32 0.044715, %v2118_v44  ;;  %4312 = vtanh.f32 %v2143_v18  ;;  %v8582_v18 = vld [vmem:[#allocation10_spill] sm:$0xff] }
 0x322   : > { %v2123_v7 = vmul.f32 %v2115_v0, %v6226_v61  ;;  %v2113_v36 = vmul.f32 %v6232_v6, %v6232_v6  ;;  %v6238_v51 = vadd.f32 %v4228_v60, %v4149_v46  ;;  %v2097_v63 = vpop.f32.mrf.mxu0  ;;  %v2281_v11 = vpack.c.bf16 %v8582_v18, %v8581_v34 }
 0x323   : > { %4314 = vtanh.f32 %v2141_v21  ;;  %v2144_v43 = vmul.f32 0.7978846, %v2136_v3  ;;  %v2134_v31 = vadd.f32 %v2126_v15, %v6220_v23  ;;  %v6241_v27 = vadd.f32 %v4149_v46, %v2097_v63  ;;  %v8584_v63 = vld [vmem:[#allocation13_spill] sm:$0xff] }
 0x324   : > { %v2131_v32 = vmul.f32 0.044715, %v2123_v7  ;;  %v2121_v38 = vmul.f32 %v2113_v36, %v6232_v6  ;;  %v2116_v42 = vmul.f32 %v6238_v51, %v6238_v51  ;;  %v8583_v36 = vld [vmem:[#allocation11_spill] sm:$0xff] }
 0x325   : > { %4316 = vtanh.f32 %v2144_v43  ;;  %v2142_v28 = vmul.f32 0.7978846, %v2134_v31  ;;  %v2114_v50 = vmul.f32 %v6241_v27, %v6241_v27  ;;  %v2282_v43 = vpack.c.bf16 %v8584_v63, %v8583_v36 }
 0x326   : > { %v2139_v56 = vadd.f32 %v2131_v32, %v6226_v61  ;;  %v2129_v26 = vmul.f32 0.044715, %v2121_v38  ;;  %v2124_v62 = vmul.f32 %v2116_v42, %v6238_v51  ;;  %v8585_v32 = vld [vmem:[#allocation4_spill] sm:$0xff] }
 0x327   : > { %4318 = vtanh.f32 %v2142_v28  ;;  %v2122_v13 = vmul.f32 %v2114_v50, %v6241_v27  ;;  %v8586_v38 = vld [vmem:[#allocation36_spill] sm:$0xff] }
 0x328   : > { %v2147_v17 = vmul.f32 0.7978846, %v2139_v56  ;;  %v2137_v10 = vadd.f32 %v2129_v26, %v6232_v6  ;;  %v2132_v1 = vmul.f32 0.044715, %v2124_v62  ;;  %v2283_v42 = vpack.c.bf16 %v8586_v38, %v8585_v32  ;;  %v2379_v50 = vld [vmem:[%s7938_s12] sm:$0x7f] }
 0x329   : > { %v2130_v57 = vmul.f32 0.044715, %v2122_v13  ;;  %v8590_v56 = vld [vmem:[#allocation5_spill] sm:$0xff]  ;;  %v8592_v62 = vld [vmem:[#allocation6_spill] sm:$0xff] }
 0x32a   : > { %4320 = vtanh.f32 %v2147_v17  ;;  %v2145_v22 = vmul.f32 0.7978846, %v2137_v10  ;;  %v2140_v41 = vadd.f32 %v2132_v1, %v6238_v51  ;;  %v6368_v26 = vrot.slane %v2379_v50, %v8590_v56 }
 0x32b   : > { %v2138_v45 = vadd.f32 %v2130_v57, %v6241_v27  ;;  %v6371_v13 = vrot.slane %v2379_v50, %v8592_v62 }
 0x32c   : > { %v2148_v12 = vmul.f32 0.7978846, %v2140_v41  ;;  %4322 = vtanh.f32 %v2145_v22  ;;  %8591 = vst [vmem:[#allocation33_spill] sm:$0xff] %v6368_v26  ;;  %v8594_v22 = vld [vmem:[#allocation7_spill] sm:$0xff] }
 0x32d   : > { %v2146_v20 = vmul.f32 0.7978846, %v2138_v45  ;;  %8593 = vst [vmem:[#allocation53_spill] sm:$0xff] %v6371_v13  ;;  %v6376_v41 = vrot.slane %v2379_v50, %v8594_v22 }
 0x32e   : > { %4324 = vtanh.f32 %v2148_v12  ;;  %v4313_v29 = vpop.eup %4312 }
 0x32f   : > { %4326 = vtanh.f32 %v2146_v20  ;;  %v2159_v35 = vadd.f32 1.0, %v4313_v29  ;;  %8595 = vst [vmem:[#allocation71_spill] sm:$0xff] %v6376_v41  ;;  %v8596_v29 = vld [vmem:[#allocation8_spill] sm:$0xff] }
 0x330   : > { %v4315_v25 = vpop.eup %4314 }
 0x331   : > { %v2157_v48 = vadd.f32 1.0, %v4315_v25  ;;  %v2167_v49 = vmul.f32 0.5, %v2159_v35  ;;  %v6380_v25 = vrot.slane %v2379_v50, %v8596_v29 }
 0x332   : > { %v4317_v30 = vpop.eup %4316 }
 0x333   : > { %v2160_v37 = vadd.f32 1.0, %v4317_v30  ;;  %v2165_v55 = vmul.f32 0.5, %v2157_v48  ;;  %v2175_v8 = vmul.f32 %v2167_v49, %v6206_v5  ;;  %8597 = vst [vmem:[#allocation77_spill] sm:$0xff] %v6380_v25  ;;  %v8599_v49 = vld [vmem:[#allocation18_spill] sm:$0xff] }
 0x334   : > { %v4319_v46 = vpop.eup %4318 }
 0x335   : > { %v2168_v4 = vmul.f32 0.5, %v2160_v37  ;;  %v2158_v47 = vadd.f32 1.0, %v4319_v46  ;;  %v2173_v54 = vmul.f32 %v2165_v55, %v6210_v14  ;;  %v8598_v37 = vld [vmem:[#allocation17_spill] sm:$0xff] }
 0x336   : > { %v6384_v46 = vrot.slane %v2379_v50, %v8598_v37 }
 0x337   : > { %v4321_v33 = vpop.eup %4320  ;;  %v2166_v40 = vmul.f32 0.5, %v2158_v47  ;;  %v2176_v24 = vmul.f32 %v2168_v4, %v6215_v59  ;;  %v2304_v59 = vsel %vm2040_vm1, %v6199_v52, 0 }
 0x338   : > { %v2163_v9 = vadd.f32 1.0, %v4321_v33  ;;  %v6388_v33 = vrot.slane %v2379_v50, %v8599_v49 }
 0x339   : > { %v4323_v16 = vpop.eup %4322  ;;  %v2174_v53 = vmul.f32 %v2166_v40, %v6220_v23  ;;  %v2182_v44 = vpack.c.bf16 %v2176_v24, %v2175_v8  ;;  %v2380_v8 = vld [vmem:[%s7938_s12 + $0x8] sm:$0x7f] }
 0x33a   : > { %v2161_v19 = vadd.f32 1.0, %v4323_v16  ;;  %v2171_v60 = vmul.f32 0.5, %v2163_v9  ;;  %v6414_v36 = vrot.slane %v2380_v8, %v8596_v29 }
 0x33b   : > { %v4325_v39 = vpop.eup %4324  ;;  %v2181_v58 = vpack.c.bf16 %v2174_v53, %v2173_v54  ;;  %v8600_v54 = vld [vmem:[#allocation20_spill] sm:$0xff] }
 0x33c   : > { %v4327_v2 = vpop.eup %4326  ;;  %v2164_v0 = vadd.f32 1.0, %v4325_v39  ;;  %v2169_v23 = vmul.f32 0.5, %v2161_v19  ;;  %v2179_v52 = vmul.f32 %v2171_v60, %v6226_v61  ;;  %v8589_v61 = vmov 0.0   ;;  %8602 = vst [vmem:[#allocation56_spill] sm:$0xff] %v6414_v36 }
 0x33d   : > { %4233 = vmatprep.mubr.msk.bf16.mxu0 %vm2203_vm2, %v2181_v58  ;;  %v2162_v14 = vadd.f32 1.0, %v4327_v2  ;;  %2412 = vst.msk [vmem:[#allocation3 + $0x78] sm:$0xff] %vm2396_vm3, %v8589_v61  ;;  %2413 = vst.msk [vmem:[#allocation3 + $0x80] sm:$0xff] %vm2396_vm3, %v8589_v61  ;;  %v6392_v53 = vrot.slane %v2379_v50, %v8600_v54  ;;  %v6398_v19 = vrot.slane %v2380_v8, %v8590_v56 }
 0x33e   : > { %v2172_v5 = vmul.f32 0.5, %v2164_v0  ;;  %4234 = vmatmul.mubr.msk.bf16.vlgmr.msra.gmra.mxu0 %vm2203_vm2, %v2182_v44  ;;  %v2177_v15 = vmul.f32 %v2169_v23, %v6232_v6  ;;  %v8587_v6 = vld [vmem:[#allocation44_spill] sm:$0xff]  ;;  %2397 = vst.msk [vmem:[#allocation3] sm:$0xff] %vm2396_vm3, %v8589_v61  ;;  %2398 = vst.msk [vmem:[#allocation3 + $0x8] sm:$0xff] %vm2396_vm3, %v8589_v61  ;;  %v6424_v50 = vrot.slane %v2380_v8, %v8599_v49 }
 0x33f   : > { %4242 = vmatpush3.bf16.msra.mxu0 %v2304_v59  ;;  %v2170_v21 = vmul.f32 0.5, %v2162_v14  ;;  %4243 = vmatprep.mubr.msk.bf16.mxu0 %vm741_vm0, %v2281_v11  ;;  %2399 = vst.msk [vmem:[#allocation3 + $0x10] sm:$0xff] %vm2396_vm3, %v8589_v61  ;;  %2400 = vst.msk [vmem:[#allocation3 + $0x18] sm:$0xff] %vm2396_vm3, %v8589_v61  ;;  %v6402_v11 = vrot.slane %v2380_v8, %v8592_v62 }
 0x340   : > { %v2180_v3 = vmul.f32 %v2172_v5, %v6238_v51  ;;  %v8588_v51 = vld [vmem:[#allocation37_spill] sm:$0xff]  ;;  %2401 = vst.msk [vmem:[#allocation3 + $0x20] sm:$0xff] %vm2396_vm3, %v8589_v61  ;;  %2402 = vst.msk [vmem:[#allocation3 + $0x28] sm:$0xff] %vm2396_vm3, %v8589_v61  ;;  %v6409_v5 = vrot.slane %v2380_v8, %v8594_v22 }
 0x341   : > { %v2178_v7 = vmul.f32 %v2170_v21, %v6241_v27  ;;  %v2284_v27 = vpack.c.bf16 %v8588_v51, %v8587_v6  ;;  %2403 = vst.msk [vmem:[#allocation3 + $0x30] sm:$0xff] %vm2396_vm3, %v8589_v61  ;;  %2404 = vst.msk [vmem:[#allocation3 + $0x38] sm:$0xff] %vm2396_vm3, %v8589_v61 }
 0x342   : > { %v2184_v28 = vpack.c.bf16 %v2180_v3, %v2179_v52  ;;  %2405 = vst.msk [vmem:[#allocation3 + $0x40] sm:$0xff] %vm2396_vm3, %v8589_v61  ;;  %2406 = vst.msk [vmem:[#allocation3 + $0x48] sm:$0xff] %vm2396_vm3, %v8589_v61 }
 0x343   : > { %v2183_v31 = vpack.c.bf16 %v2178_v7, %v2177_v15  ;;  %2407 = vst.msk [vmem:[#allocation3 + $0x50] sm:$0xff] %vm2396_vm3, %v8589_v61  ;;  %2408 = vst.msk [vmem:[#allocation3 + $0x58] sm:$0xff] %vm2396_vm3, %v8589_v61 }
 0x344   : > { %2409 = vst.msk [vmem:[#allocation3 + $0x60] sm:$0xff] %vm2396_vm3, %v8589_v61  ;;  %2410 = vst.msk [vmem:[#allocation3 + $0x68] sm:$0xff] %vm2396_vm3, %v8589_v61 }
 0x345   : > { %4237 = vmatprep.mubr.msk.bf16.mxu1 %vm2203_vm2, %v2183_v31  ;;  %2411 = vst.msk [vmem:[#allocation3 + $0x70] sm:$0xff] %vm2396_vm3, %v8589_v61  ;;  %2414 = vst.msk [vmem:[#allocation3 + $0x88] sm:$0xff] %vm2396_vm3, %v8589_v61  ;;  %v2448_v17 = vld [vmem:[#allocation3 + $0x5] sm:$0xff] }
 0x346   : > { %4238 = vmatmul.mubr.msk.bf16.vlgmr.msra.gmra.mxu1 %vm2203_vm2, %v2184_v28  ;;  %4244 = vmatmul.mubr.msk.bf16.vlgmr.msra.gmra.mxu0 %vm741_vm0, %v2282_v43  ;;  %2415 = vst.msk [vmem:[#allocation3 + $0x90] sm:$0xff] %vm2396_vm3, %v8589_v61  ;;  %2416 = vst.msk [vmem:[#allocation3 + $0x98] sm:$0xff] %vm2396_vm3, %v8589_v61  ;;  %v2462_v10 = vld [vmem:[#allocation3 + $0x6] sm:$0xff]  ;;  %v2550_v1 = vmul.f32 %v6368_v26, %v2448_v17 }
 0x347   : > { %4247 = vmatprep.mubr.msk.bf16.mxu0 %vm741_vm0, %v2283_v42  ;;  %2417 = vst.msk [vmem:[#allocation3 + $0xa0] sm:$0xff] %vm2396_vm3, %v8589_v61  ;;  %2418 = vst.msk [vmem:[#allocation3 + $0xa8] sm:$0xff] %vm2396_vm3, %v8589_v61  ;;  %v2570_v57 = vmul.f32 %v6371_v13, %v2462_v10  ;;  %v2476_v45 = vld [vmem:[#allocation3 + $0x7] sm:$0xff]  ;;  %v2449_v34 = vld [vmem:[#allocation3 + $0x1d] sm:$0xff]  ;;  %v6419_v42 = vrot.slane %v2380_v8, %v8598_v37 }
 0x348   : > { %2419 = vst.msk [vmem:[#allocation3 + $0xb0] sm:$0xff] %vm2396_vm3, %v8589_v61  ;;  %2420 = vst.msk [vmem:[#allocation3 + $0xb8] sm:$0xff] %vm2396_vm3, %v8589_v61  ;;  %v2590_v20 = vmul.f32 %v6376_v41, %v2476_v45  ;;  %v2490_v48 = vld [vmem:[#allocation3 + $0x8] sm:$0xff]  ;;  %v2463_v18 = vld [vmem:[#allocation3 + $0x1e] sm:$0xff]  ;;  %v2690_v44 = vmul.f32 %v6398_v19, %v2449_v34  ;;  %v2551_v0 = vmul.f32 %v6368_v26, %v2449_v34 }
 0x349   : > { %2421 = vst.msk [vmem:[#allocation3 + $0xc0] sm:$0xff] %vm2396_vm3, %v8589_v61  ;;  %2422 = vst.msk [vmem:[#allocation3 + $0xc8] sm:$0xff] %vm2396_vm3, %v8589_v61  ;;  %v2578_v12 = vadd.f32 %v2570_v57, %v2550_v1  ;;  %v2610_v35 = vmul.f32 %v6380_v25, %v2490_v48  ;;  %v2504_v55 = vld [vmem:[#allocation3 + $0x9] sm:$0xff]  ;;  %v2571_v59 = vmul.f32 %v6371_v13, %v2463_v18  ;;  %v2477_v14 = vld [vmem:[#allocation3 + $0x1f] sm:$0xff] }
 0x34a   : > { %2423 = vst.msk [vmem:[#allocation3 + $0xd0] sm:$0xff] %vm2396_vm3, %v8589_v61  ;;  %2424 = vst.msk [vmem:[#allocation3 + $0xd8] sm:$0xff] %vm2396_vm3, %v8589_v61  ;;  %v2630_v47 = vmul.f32 %v6384_v46, %v2504_v55  ;;  %v2518_v40 = vld [vmem:[#allocation3 + $0xa] sm:$0xff]  ;;  %v2710_v60 = vmul.f32 %v6402_v11, %v2463_v18  ;;  %v2591_v3 = vmul.f32 %v6376_v41, %v2477_v14  ;;  %v2491_v15 = vld [vmem:[#allocation3 + $0x20] sm:$0xff] }
 0x34b   : > { %2425 = vst.msk [vmem:[#allocation3 + $0xe0] sm:$0xff] %vm2396_vm3, %v8589_v61  ;;  %2426 = vst.msk [vmem:[#allocation3 + $0xe8] sm:$0xff] %vm2396_vm3, %v8589_v61  ;;  %v2598_v30 = vadd.f32 %v2590_v20, %v2578_v12  ;;  %v2650_v16 = vmul.f32 %v6388_v33, %v2518_v40  ;;  %v2532_v9 = vld [vmem:[#allocation3 + $0xb] sm:$0xff]  ;;  %v2579_v21 = vadd.f32 %v2571_v59, %v2551_v0  ;;  %v2505_v31 = vld [vmem:[#allocation3 + $0x21] sm:$0xff] }
 0x34c   : > { %2427 = vst.msk [vmem:[#allocation3 + $0xf0] sm:$0xff] %vm2396_vm3, %v8589_v61  ;;  %2428 = vst.msk [vmem:[#allocation3 + $0xf8] sm:$0xff] %vm2396_vm3, %v8589_v61  ;;  %v2670_v58 = vmul.f32 %v6392_v53, %v2532_v9  ;;  %v2730_v52 = vmul.f32 %v6409_v5, %v2477_v14  ;;  %v2611_v43 = vmul.f32 %v6380_v25, %v2491_v15  ;;  %v2519_v51 = vld [vmem:[#allocation3 + $0x22] sm:$0xff]  ;;  %v2492_v14 = vld [vmem:[#allocation3 + $0x38] sm:$0xff] }
 0x34d   : > { %2429 = vst.msk [vmem:[#allocation3 + $0x100] sm:$0xff] %vm2396_vm3, %v8589_v61  ;;  %2430 = vst.msk [vmem:[#allocation3 + $0x108] sm:$0xff] %vm2396_vm3, %v8589_v61  ;;  %v2618_v4 = vadd.f32 %v2610_v35, %v2598_v30  ;;  %v2599_v63 = vadd.f32 %v2591_v3, %v2579_v21  ;;  %v2750_v38 = vmul.f32 %v6414_v36, %v2491_v15  ;;  %v2533_v1 = vld [vmem:[#allocation3 + $0x23] sm:$0xff]  ;;  %v2450_v35 = vld [vmem:[#allocation3 + $0x35] sm:$0xff] }
 0x34e   : > { %4248 = vmatmul.mubr.msk.bf16.gmra.mxu0 %vm741_vm0, %v2284_v27  ;;  %2431 = vst.msk [vmem:[#allocation3 + $0x110] sm:$0xff] %vm2396_vm3, %v8589_v61  ;;  %2432 = vst.msk [vmem:[#allocation3 + $0x118] sm:$0xff] %vm2396_vm3, %v8589_v61  ;;  %v2631_v6 = vmul.f32 %v6384_v46, %v2505_v31  ;;  %v2651_v10 = vmul.f32 %v6388_v33, %v2519_v51  ;;  %v2790_v45 = vmul.f32 %v6424_v50, %v2519_v51  ;;  %v6434_v20 = vld [vmem:[%s7938_s12 + $0x10] sm:$0x7f] }
 0x34f   : > { %2433 = vst.msk [vmem:[#allocation3 + $0x120] sm:$0xff] %vm2396_vm3, %v8589_v61  ;;  %2434 = vst.msk [vmem:[#allocation3 + $0x128] sm:$0xff] %vm2396_vm3, %v8589_v61  ;;  %v2638_v24 = vadd.f32 %v2630_v47, %v2618_v4  ;;  %v2619_v28 = vadd.f32 %v2611_v43, %v2599_v63  ;;  %v6429_v12 = vrot.slane %v2380_v8, %v8600_v54  ;;  %v2464_v4 = vld [vmem:[#allocation3 + $0x36] sm:$0xff] }
 0x350   : > { %2435 = vst.msk [vmem:[#allocation3 + $0x130] sm:$0xff] %vm2396_vm3, %v8589_v61  ;;  %2436 = vst.msk [vmem:[#allocation3 + $0x138] sm:$0xff] %vm2396_vm3, %v8589_v61  ;;  %v2671_v30 = vmul.f32 %v6392_v53, %v2533_v1  ;;  %v6439_v55 = vrot.slane %v6434_v20, %v8590_v56  ;;  %v2552_v8 = vmul.f32 %v6368_v26, %v2450_v35  ;;  %v2506_v63 = vld [vmem:[#allocation3 + $0x39] sm:$0xff] }
 0x351   : > { %2437 = vst.msk [vmem:[#allocation3 + $0x140] sm:$0xff] %vm2396_vm3, %v8589_v61  ;;  %2438 = vst.msk [vmem:[#allocation3 + $0x148] sm:$0xff] %vm2396_vm3, %v8589_v61  ;;  %v2658_v39 = vadd.f32 %v2650_v16, %v2638_v24  ;;  %v2770_v61 = vmul.f32 %v6419_v42, %v2505_v31  ;;  %v2639_v17 = vadd.f32 %v2631_v6, %v2619_v28 }
 0x352   : > { %8601 = vst [vmem:[#allocation79_spill] sm:$0xff] %v6398_v19  ;;  %8603 = vst [vmem:[#allocation75_spill] sm:$0xff] %v6419_v42  ;;  %v2810_v40 = vmul.f32 %v6429_v12, %v2533_v1  ;;  %v2691_v16 = vmul.f32 %v6398_v19, %v2450_v35  ;;  %v2572_v9 = vmul.f32 %v6371_v13, %v2464_v4 }
 0x353   : > { %v2678_v2 = vadd.f32 %v2670_v58, %v2658_v39  ;;  %8604 = vst [vmem:[#allocation83_spill] sm:$0xff] %v6424_v50  ;;  %8605 = vst [vmem:[#allocation60_spill] sm:$0xff] %v6429_v12  ;;  %v2659_v48 = vadd.f32 %v2651_v10, %v2639_v17  ;;  %v6447_v39 = vrot.slane %v6434_v20, %v8592_v62  ;;  %v2478_v58 = vld [vmem:[#allocation3 + $0x37] sm:$0xff] }
 0x354   : > { %8606 = vst [vmem:[#allocation80_spill] sm:$0xff] %v6439_v55  ;;  %v2830_v18 = vmul.f32 %v6439_v55, %v2450_v35  ;;  %v2580_v0 = vadd.f32 %v2572_v9, %v2552_v8  ;;  %v2592_v59 = vmul.f32 %v6376_v41, %v2478_v58  ;;  %v6455_v21 = vrot.slane %v6434_v20, %v8594_v22  ;;  %v2520_v17 = vld [vmem:[#allocation3 + $0x3a] sm:$0xff] }
 0x355   : > { %v2698_v23 = vadd.f32 %v2690_v44, %v2678_v2  ;;  %v2679_v24 = vadd.f32 %v2671_v30, %v2659_v48  ;;  %8607 = vst [vmem:[#allocation86_spill] sm:$0xff] %v6447_v39  ;;  %v2711_v44 = vmul.f32 %v6402_v11, %v2464_v4  ;;  %v2731_v15 = vmul.f32 %v6409_v5, %v2478_v58 }
 0x356   : > { %8608 = vst [vmem:[#allocation62_spill] sm:$0xff] %v6455_v21  ;;  %v2870_v31 = vmul.f32 %v6455_v21, %v2478_v58  ;;  %v2751_v6 = vmul.f32 %v6414_v36, %v2492_v14  ;;  %v2771_v30 = vmul.f32 %v6419_v42, %v2506_v63  ;;  %v6486_v9 = vrot.slane %v6434_v20, %v8599_v49  ;;  %v2534_v58 = vld [vmem:[#allocation3 + $0x3b] sm:$0xff] }
 0x357   : > { %v2718_v7 = vadd.f32 %v2710_v60, %v2698_v23  ;;  %v2699_v2 = vadd.f32 %v2691_v16, %v2679_v24  ;;  %v2850_v60 = vmul.f32 %v6447_v39, %v2464_v4  ;;  %v2652_v4 = vmul.f32 %v6388_v33, %v2520_v17  ;;  %v6481_v24 = vld [vmem:[%s7937_s11] ss:$0 sm:$0xff] }
 0x358   : > { %8611 = vst [vmem:[#allocation52_spill] sm:$0xff] %v6486_v9 }
 0x359   : > { %v2738_v32 = vadd.f32 %v2730_v52, %v2718_v7  ;;  %v2719_v3 = vadd.f32 %v2711_v44, %v2699_v2  ;;  %v2600_v7 = vadd.f32 %v2592_v59, %v2580_v0  ;;  %v2612_v52 = vmul.f32 %v6380_v25, %v2492_v14 }
 0x35a   : > { %v2791_v2 = vmul.f32 %v6424_v50, %v2520_v17 }
 0x35b   : > { %v2758_v27 = vadd.f32 %v2750_v38, %v2738_v32  ;;  %v6462_v32 = vrot.slane %v6434_v20, %v8596_v29  ;;  %v2739_v28 = vadd.f32 %v2731_v15, %v2719_v3  ;;  %v2620_v51 = vadd.f32 %v2612_v52, %v2600_v7 }
 0x35c   : > { %v2672_v3 = vmul.f32 %v6392_v53, %v2534_v58  ;;  %v2930_v7 = vmul.f32 %v6486_v9, %v2520_v17  ;;  %v6498_v52 = vrot.slane %v6434_v20, %v8600_v54 }
 0x35d   : > { %v2778_v57 = vadd.f32 %v2770_v61, %v2758_v27  ;;  %8609 = vst [vmem:[#allocation84_spill] sm:$0xff] %v6462_v32  ;;  %v2632_v27 = vmul.f32 %v6384_v46, %v2506_v63  ;;  %v2890_v1 = vmul.f32 %v6462_v32, %v2492_v14  ;;  %v2759_v48 = vadd.f32 %v2751_v6, %v2739_v28 }
 0x35e   : > { %8612 = vst [vmem:[#allocation64_spill] sm:$0xff] %v6498_v52  ;;  %v2811_v28 = vmul.f32 %v6429_v12, %v2534_v58 }
 0x35f   : > { %v2798_v47 = vadd.f32 %v2790_v45, %v2778_v57  ;;  %v6469_v57 = vrot.slane %v6434_v20, %v8598_v37  ;;  %v2640_v35 = vadd.f32 %v2632_v27, %v2620_v51 }
 0x361   : > { %v2818_v34 = vadd.f32 %v2810_v40, %v2798_v47  ;;  %8610 = vst [vmem:[#allocation89_spill] sm:$0xff] %v6469_v57  ;;  %v6476_v47 = vld [vmem:[%s7935_s9] ss:$0 sm:$0xff]  ;;  %v2910_v8 = vmul.f32 %v6469_v57, %v2506_v63  ;;  %v2660_v59 = vadd.f32 %v2652_v4, %v2640_v35 }
 0x363   : > { %v2838_v23 = vadd.f32 %v2830_v18, %v2818_v34  ;;  %v2779_v18 = vadd.f32 %v2771_v30, %v2759_v48  ;;  %v2950_v30 = vmul.f32 %v6498_v52, %v2534_v58 }
 0x365   : > { %v2858_v43 = vadd.f32 %v2850_v60, %v2838_v23  ;;  %v2382_v23 = vld [vmem:[%s7938_s12 + $0x18] sm:$0x7f] }
 0x366   : > { %v6509_v27 = vrot.slane %v2382_v23, %v8590_v56  ;;  %v6515_v17 = vrot.slane %v2382_v23, %v8592_v62  ;;  %v6524_v4 = vrot.slane %v2382_v23, %v8594_v22  ;;  %v6535_v58 = vrot.slane %v2382_v23, %v8596_v29 }
 0x367   : > { %v2878_v10 = vadd.f32 %v2870_v31, %v2858_v43 }
 0x368   : > { %8614 = vst [vmem:[#allocation92_spill] sm:$0xff] %v6509_v27  ;;  %8616 = vst [vmem:[#allocation68_spill] sm:$0xff] %v6515_v17 }
 0x369   : > { %v2898_v16 = vadd.f32 %v2890_v1, %v2878_v10  ;;  %v6517_v1 = vadd.f32 %v2672_v3, %v2660_v59  ;;  %8617 = vst [vmem:[#allocation90_spill] sm:$0xff] %v6524_v4  ;;  %8619 = vst [vmem:[#allocation54_spill] sm:$0xff] %v6535_v58  ;;  %v6545_v59 = vrot.slane %v2382_v23, %v8600_v54 }
 0x36b   : > { %v2918_v15 = vadd.f32 %v2910_v8, %v2898_v16  ;;  %8622 = vst [vmem:[#allocation93_spill] sm:$0xff] %v6545_v59 }
 0x36d   : > { %v2938_v48 = vadd.f32 %v2930_v7, %v2918_v15  ;;  %v2384_v15 = vld [vmem:[%s7938_s12 + $0x28] sm:$0x7f] }
 0x36f   : > { %v6555_v7 = vadd.f32 %v2950_v30, %v2938_v48  ;;  %v6586_v30 = vrot.slane %v2384_v15, %v8590_v56 }
 0x371   : > { %8632 = vst [vmem:[#allocation91_spill] sm:$0xff] %v6586_v30 }
 0x3fe   : > { %v4235_v38 = vpop.f32.mrf.mxu0 }
 0x3ff   : > { %v2259_v44 = vadd.f32 %v4235_v38, %v6476_v47  ;;  %v2799_v38 = vadd.f32 %v2791_v2, %v2779_v18  ;;  %v6541_v2 = vrot.slane %v2382_v23, %v8599_v49 }
 0x400   : > { %v2250_v61 = vpop.f32.mrf.mxu0 }
 0x401   : > { %v2251_v63 = vadd.f32 %v6476_v47, %v2250_v61  ;;  %v6532_v18 = vadd.f32 %v2811_v28, %v2799_v38  ;;  %8621 = vst [vmem:[#allocation73_spill] sm:$0xff] %v6541_v2  ;;  %v2385_v28 = vld [vmem:[%s7938_s12 + $0x30] sm:$0x7f] }
 0x402   : > { %v4236_v45 = vpop.f32.mrf.mxu0 }
 0x403   : > { %v2262_v51 = vadd.f32 %v4236_v45, %v6476_v47 }
 0x404   : > { %v2253_v40 = vpop.f32.mrf.mxu0 }
 0x405   : > { %v2254_v35 = vadd.f32 %v6476_v47, %v2253_v40  ;;  %v6538_v40 = vrot.slane %v2382_v23, %v8598_v37 }
 0x406   : > { %v4245_v34 = vpop.f32.mrf.mxu0  ;;  %v4239_v14 = vpop.f32.mrf.mxu1 }
 0x407   : > { %v2349_v0 = vadd.f32 %v4245_v34, %v6481_v24  ;;  %v2383_v34 = vld [vmem:[%s7938_s12 + $0x20] sm:$0x7f]  ;;  %8620 = vst [vmem:[#allocation82_spill] sm:$0xff] %v6538_v40 }
 0x408   : > { %v2340_v60 = vpop.f32.mrf.mxu0  ;;  %v2266_v10 = vpop.f32.mrf.mxu1  ;;  %v6564_v23 = vrot.slane %v2383_v34, %v8594_v22  ;;  %v6583_v48 = vrot.slane %v2383_v34, %v8600_v54 }
 0x409   : > { %v6501_v43 = vadd.f32 %v2349_v0, %v2259_v44  ;;  %v2341_v31 = vadd.f32 %v6481_v24, %v2340_v60  ;;  %v2275_v0 = vadd.f32 %v4239_v14, %v6476_v47  ;;  %v6561_v14 = vrot.slane %v2383_v34, %v8592_v62 }
 0x40a   : > { %v4246_v6 = vpop.f32.mrf.mxu0  ;;  %8626 = vst [vmem:[#allocation96_spill] sm:$0xff] %v6564_v23  ;;  %8631 = vst [vmem:[#allocation48_spill] sm:$0xff] %v6583_v48 }
 0x40b   : > { %8613 = vst [vmem:[#allocation87_spill] sm:$0xff] %v6501_v43  ;;  %2442 = vst.msk [vmem:[#allocation3 + $0x80] sm:$0xff] %vm2396_vm3, %v6501_v43  ;;  %v6511_v20 = vadd.f32 %v2341_v31, %v2251_v63  ;;  %v2352_v61 = vadd.f32 %v4246_v6, %v6481_v24  ;;  %v4240_v63 = vpop.f32.mrf.mxu1  ;;  %v6558_v31 = vrot.slane %v2383_v34, %v8590_v56 }
 0x40c   : > { %v2343_v45 = vpop.f32.mrf.mxu0  ;;  %8625 = vst [vmem:[#allocation76_spill] sm:$0xff] %v6561_v14  ;;  %v6574_v6 = vrot.slane %v2383_v34, %v8596_v29 }
 0x40d   : > { %8615 = vst [vmem:[#allocation45_spill] sm:$0xff] %v6511_v20  ;;  %2440 = vst.msk [vmem:[#allocation3 + $0x50] sm:$0xff] %vm2396_vm3, %v6511_v20  ;;  %v6526_v16 = vadd.f32 %v2352_v61, %v2262_v51  ;;  %v2344_v8 = vadd.f32 %v6481_v24, %v2343_v45  ;;  %v6577_v51 = vrot.slane %v2383_v34, %v8598_v37 }
 0x40e   : > { %v4249_v44 = vpop.f32.mrf.mxu0  ;;  %8624 = vst [vmem:[#allocation115_spill] sm:$0xff] %v6558_v31  ;;  %8628 = vst [vmem:[#allocation85_spill] sm:$0xff] %v6574_v6  ;;  %v6580_v61 = vrot.slane %v2383_v34, %v8599_v49  ;;  %v6589_v45 = vrot.slane %v2384_v15, %v8592_v62  ;;  %v6603_v34 = vrot.slane %v2384_v15, %v8599_v49 }
 0x40f   : > { %8618 = vst [vmem:[#allocation95_spill] sm:$0xff] %v6526_v16  ;;  %2443 = vst.msk [vmem:[#allocation3 + $0x98] sm:$0xff] %vm2396_vm3, %v6526_v16  ;;  %v6549_v60 = vadd.f32 %v2344_v8, %v2254_v35  ;;  %v2365_v3 = vadd.f32 %v4249_v44, %v6481_v24  ;;  %v6592_v35 = vrot.slane %v2384_v15, %v8594_v22 }
 0x410   : > { %8629 = vst [vmem:[#allocation101_spill] sm:$0xff] %v6577_v51  ;;  %8630 = vst [vmem:[#allocation88_spill] sm:$0xff] %v6580_v61  ;;  %v6597_v8 = vrot.slane %v2384_v15, %v8596_v29  ;;  %v6600_v44 = vrot.slane %v2384_v15, %v8598_v37  ;;  %v2356_v20 = vpop.f32.mrf.mxu0 }
 0x411   : > { %8623 = vst [vmem:[#allocation100_spill] sm:$0xff] %v6549_v60  ;;  %2441 = vst.msk [vmem:[#allocation3 + $0x68] sm:$0xff] %vm2396_vm3, %v6549_v60  ;;  %v6568_v38 = vadd.f32 %v2365_v3, %v2275_v0  ;;  %v6606_v0 = vrot.slane %v2384_v15, %v8600_v54  ;;  %v2269_v60 = vpop.f32.mrf.mxu1 }
 0x412   : > { %8633 = vst [vmem:[#allocation105_spill] sm:$0xff] %v6589_v45  ;;  %8634 = vst [vmem:[#allocation29_spill] sm:$0xff] %v6592_v35  ;;  %v6622_v15 = vld [vmem:[#allocation3 + $0x7d] sm:$0xff] }
 0x413   : > { %8627 = vst [vmem:[#allocation81_spill] sm:$0xff] %v6568_v38  ;;  %2446 = vst.msk [vmem:[#allocation3 + $0xe0] sm:$0xff] %vm2396_vm3, %v6568_v38  ;;  %v6611_v38 = vrot.slane %v2385_v28, %v8590_v56  ;;  %v6629_v56 = vrot.slane %v2385_v28, %v8598_v37 }
 0x414   : > { %8635 = vst [vmem:[#allocation21_spill] sm:$0xff] %v6597_v8  ;;  %8636 = vst [vmem:[#allocation49_spill] sm:$0xff] %v6600_v44  ;;  %v2451_v3 = vld [vmem:[#allocation3 + $0x4d] sm:$0xff]  ;;  %v6614_v8 = vrot.slane %v2385_v28, %v8592_v62  ;;  %v6617_v44 = vrot.slane %v2385_v28, %v8594_v22  ;;  %v6632_v62 = vrot.slane %v2385_v28, %v8599_v49 }
 0x415   : > { %8637 = vst [vmem:[#allocation94_spill] sm:$0xff] %v6603_v34  ;;  %8638 = vst [vmem:[#allocation39_spill] sm:$0xff] %v6606_v0  ;;  %v2465_v43 = vld [vmem:[#allocation3 + $0x4e] sm:$0xff]  ;;  %v6620_v34 = vrot.slane %v2385_v28, %v8596_v29  ;;  %v6624_v0 = vld [vmem:[#allocation3 + $0x7e] sm:$0xff]  ;;  %v2553_v35 = vmul.f32 %v6368_v26, %v2451_v3  ;;  %v6635_v22 = vadd.f32 %v6476_v47, %v2266_v10 }
 0x416   : > { %v6608_v16 = vld [vmem:[#allocation3 + $0x4f] sm:$0xff]  ;;  %8639 = vst [vmem:[#allocation99_spill] sm:$0xff] %v6611_v38  ;;  %8640 = vst [vmem:[#allocation47_spill] sm:$0xff] %v6614_v8  ;;  %v2573_v45 = vmul.f32 %v6371_v13, %v2465_v43  ;;  %v2692_v29 = vmul.f32 %v6398_v19, %v2451_v3  ;;  %v6644_v8 = vrot.slane %v2385_v28, %v8600_v54 }
 0x417   : > { %8641 = vst [vmem:[#allocation66_spill] sm:$0xff] %v6617_v44  ;;  %8642 = vst [vmem:[#allocation102_spill] sm:$0xff] %v6620_v34  ;;  %v6637_v44 = vld [vmem:[#allocation3 + $0x50] sm:$0xff]  ;;  %v6641_v34 = vadd.f32 %v4240_v63, %v6476_v47  ;;  %v2593_v49 = vmul.f32 %v6376_v41, %v6608_v16  ;;  %v6654_v10 = vadd.f32 %v6481_v24, %v2356_v20 }
 0x418   : > { %8643 = vst [vmem:[#allocation14_spill] sm:$0xff] %v6622_v15  ;;  %8644 = vst [vmem:[#allocation69_spill] sm:$0xff] %v6624_v0  ;;  %v6646_v38 = vld [vmem:[#allocation3 + $0x51] sm:$0xff]  ;;  %v2581_v37 = vadd.f32 %v2573_v45, %v2553_v35  ;;  %v6662_v54 = vmul.f32 %v6371_v13, %v6624_v0  ;;  %v2700_v28 = vadd.f32 %v2692_v29, %v6517_v1  ;;  %v6696_v31 = vld [vmem:[#allocation3 + $0x66] sm:$0xff] }
 0x419   : > { %8645 = vst [vmem:[#allocation32_spill] sm:$0xff] %v6629_v56  ;;  %8646 = vst [vmem:[#allocation51_spill] sm:$0xff] %v6632_v62  ;;  %v6651_v62 = vadd.f32 %v6476_v47, %v2269_v60  ;;  %v6658_v56 = vmul.f32 %v6368_v26, %v6622_v15  ;;  %v6664_v63 = vld [vmem:[#allocation3 + $0x52] sm:$0xff]  ;;  %v2712_v45 = vmul.f32 %v6402_v11, %v2465_v43  ;;  %v6706_v59 = vld [vmem:[#allocation3 + $0x67] sm:$0xff] }
 0x41a   : > { %8647 = vst [vmem:[#allocation107_spill] sm:$0xff] %v6641_v34  ;;  %8648 = vst [vmem:[#allocation97_spill] sm:$0xff] %v6644_v8  ;;  %v6670_v47 = vmul.f32 %v6398_v19, %v6622_v15  ;;  %v6672_v20 = vld [vmem:[#allocation3 + $0x53] sm:$0xff]  ;;  %v2601_v60 = vadd.f32 %v2593_v49, %v2581_v37  ;;  %v2613_v35 = vmul.f32 %v6380_v25, %v6637_v44 }
 0x41b   : > { %8649 = vst [vmem:[#allocation15_spill] sm:$0xff] %v6651_v62  ;;  %v2831_v8 = vmul.f32 %v6439_v55, %v2451_v3  ;;  %v6679_v30 = vmul.f32 %v6402_v11, %v6624_v0  ;;  %v2633_v1 = vmul.f32 %v6384_v46, %v6646_v38  ;;  %v2720_v29 = vadd.f32 %v2712_v45, %v2700_v28  ;;  %v6694_v45 = vld [vmem:[#allocation3 + $0x65] sm:$0xff] }
 0x41c   : > { %8650 = vst [vmem:[#allocation108_spill] sm:$0xff] %v6670_v47  ;;  %v2732_v48 = vmul.f32 %v6409_v5, %v6608_v16  ;;  %v2621_v61 = vadd.f32 %v2613_v35, %v2601_v60  ;;  %v2653_v37 = vmul.f32 %v6388_v33, %v6664_v63  ;;  %v2851_v51 = vmul.f32 %v6447_v39, %v2465_v43 }
 0x41d   : > { %8651 = vst [vmem:[#allocation98_spill] sm:$0xff] %v6679_v30  ;;  %v2839_v49 = vadd.f32 %v2831_v8, %v6532_v18  ;;  %v2673_v6 = vmul.f32 %v6392_v53, %v6672_v20  ;;  %v2752_v14 = vmul.f32 %v6414_v36, %v6637_v44  ;;  %v2970_v28 = vmul.f32 %v6509_v27, %v2451_v3 }
 0x41e   : > { %v2740_v23 = vadd.f32 %v2732_v48, %v2720_v29  ;;  %v2641_v60 = vadd.f32 %v2633_v1, %v2621_v61  ;;  %v2772_v35 = vmul.f32 %v6419_v42, %v6646_v38  ;;  %v2871_v8 = vmul.f32 %v6455_v21, %v6608_v16 }
 0x41f   : > { %v2859_v18 = vadd.f32 %v2851_v51, %v2839_v49  ;;  %v2891_v48 = vmul.f32 %v6462_v32, %v6637_v44  ;;  %v2978_v29 = vadd.f32 %v2970_v28, %v6555_v7  ;;  %v2990_v3 = vmul.f32 %v6515_v17, %v2465_v43  ;;  %v6716_v49 = vld [vmem:[#allocation3 + $0x68] sm:$0xff] }
 0x420   : > { %v2760_v30 = vadd.f32 %v2752_v14, %v2740_v23  ;;  %v2661_v47 = vadd.f32 %v2653_v37, %v2641_v60  ;;  %v2554_v61 = vmul.f32 %v6368_v26, %v6694_v45  ;;  %v2574_v51 = vmul.f32 %v6371_v13, %v6696_v31  ;;  %8652 = vst [vmem:[#allocation43_spill] sm:$0xff] %v6716_v49  ;;  %v6718_v37 = vld [vmem:[#allocation3 + $0x69] sm:$0xff] }
 0x421   : > { %v2879_v62 = vadd.f32 %v2871_v8, %v2859_v18  ;;  %v2792_v14 = vmul.f32 %v6424_v50, %v6664_v63  ;;  %v2911_v23 = vmul.f32 %v6469_v57, %v6646_v38  ;;  %v2998_v7 = vadd.f32 %v2990_v3, %v2978_v29  ;;  %8653 = vst [vmem:[#allocation112_spill] sm:$0xff] %v6718_v37 }
 0x422   : > { %v2780_v1 = vadd.f32 %v2772_v35, %v2760_v30  ;;  %v2681_v43 = vadd.f32 %v2673_v6, %v2661_v47  ;;  %v2582_v60 = vadd.f32 %v2574_v51, %v2554_v61  ;;  %v2594_v18 = vmul.f32 %v6376_v41, %v6706_v59 }
 0x423   : > { %v2899_v28 = vadd.f32 %v2891_v48, %v2879_v62  ;;  %v2812_v30 = vmul.f32 %v6429_v12, %v6672_v20  ;;  %v2931_v35 = vmul.f32 %v6486_v9, %v6664_v63  ;;  %v3010_v29 = vmul.f32 %v6524_v4, %v6608_v16 }
 0x424   : > { %v2800_v8 = vadd.f32 %v2792_v14, %v2780_v1  ;;  %v2602_v34 = vadd.f32 %v2594_v18, %v2582_v60  ;;  %v2614_v62 = vmul.f32 %v6380_v25, %v6716_v49  ;;  %v2693_v6 = vmul.f32 %v6398_v19, %v6694_v45  ;;  %v6738_v14 = vld [vmem:[#allocation3 + $0x6a] sm:$0xff] }
 0x425   : > { %v2919_v3 = vadd.f32 %v2911_v23, %v2899_v28  ;;  %v6734_v47 = vmul.f32 %v6439_v55, %v6622_v15  ;;  %v3018_v61 = vadd.f32 %v3010_v29, %v2998_v7  ;;  %v2634_v51 = vmul.f32 %v6384_v46, %v6718_v37 }
 0x426   : > { %v2820_v48 = vadd.f32 %v2812_v30, %v2800_v8  ;;  %v2622_v16 = vadd.f32 %v2614_v62, %v2602_v34  ;;  %v2701_v23 = vadd.f32 %v2693_v6, %v2681_v43  ;;  %v2713_v28 = vmul.f32 %v6402_v11, %v6696_v31 }
 0x427   : > { %v2939_v1 = vadd.f32 %v2931_v35, %v2919_v3  ;;  %v6744_v60 = vmul.f32 %v6447_v39, %v6624_v0  ;;  %v6748_v18 = vmul.f32 %v6509_v27, %v6622_v15  ;;  %v2951_v7 = vmul.f32 %v6498_v52, %v6672_v20  ;;  %v6758_v3 = vld [vmem:[#allocation3 + $0x6b] sm:$0xff] }
 0x428   : > { %v2832_v8 = vmul.f32 %v6439_v55, %v6694_v45  ;;  %v3030_v34 = vmul.f32 %v6535_v58, %v6637_v44  ;;  %v2642_v43 = vadd.f32 %v2634_v51, %v2622_v16  ;;  %v2721_v30 = vadd.f32 %v2713_v28, %v2701_v23 }
 0x429   : > { %8654 = vst [vmem:[#allocation116_spill] sm:$0xff] %v6744_v60  ;;  %v2733_v35 = vmul.f32 %v6409_v5, %v6706_v59  ;;  %v2959_v29 = vadd.f32 %v2951_v7, %v2939_v1  ;;  %v2654_v62 = vmul.f32 %v6388_v33, %v6738_v14  ;;  %v2852_v15 = vmul.f32 %v6447_v39, %v6696_v31  ;;  %v4250_v60 = vpop.f32.mrf.mxu0 }
 0x42a   : > { %v2840_v6 = vadd.f32 %v2832_v8, %v2820_v48  ;;  %v6766_v55 = vmul.f32 %v6515_v17, %v6624_v0  ;;  %v3038_v44 = vadd.f32 %v3030_v34, %v3018_v61  ;;  %v2753_v16 = vmul.f32 %v6414_v36, %v6716_v49 }
 0x42b   : > { %v2741_v51 = vadd.f32 %v2733_v35, %v2721_v30  ;;  %v2662_v1 = vadd.f32 %v2654_v62, %v2642_v43  ;;  %v2872_v28 = vmul.f32 %v6455_v21, %v6706_v59  ;;  %v2971_v48 = vmul.f32 %v6509_v27, %v6694_v45  ;;  %v2359_v62 = vpop.f32.mrf.mxu0 }
 0x42c   : > { %8655 = vst [vmem:[#allocation104_spill] sm:$0xff] %v6766_v55  ;;  %v2860_v23 = vadd.f32 %v2852_v15, %v2840_v6  ;;  %v2583_v7 = vadd.f32 %v6662_v54, %v6658_v56  ;;  %v3050_v8 = vmul.f32 %v6538_v40, %v6646_v38  ;;  %v2674_v61 = vmul.f32 %v6392_v53, %v6758_v3  ;;  %v6784_v6 = vld [vmem:[#allocation3 + $0x95] sm:$0xff] }
 0x42d   : > { %v2892_v34 = vmul.f32 %v6462_v32, %v6716_v49  ;;  %v2761_v43 = vadd.f32 %v2753_v16, %v2741_v51  ;;  %v2979_v30 = vadd.f32 %v2971_v48, %v2959_v29  ;;  %v2991_v35 = vmul.f32 %v6515_v17, %v6696_v31  ;;  %v6792_v55 = vld [vmem:[#allocation3 + $0x96] sm:$0xff]  ;;  %v6794_v51 = vld [vmem:[#allocation3 + $0x7f] sm:$0xff] }
 0x42e   : > { %v2880_v15 = vadd.f32 %v2872_v28, %v2860_v23  ;;  %v3058_v0 = vadd.f32 %v3050_v8, %v3038_v44  ;;  %v3070_v56 = vmul.f32 %v6541_v2, %v6664_v63  ;;  %v2773_v38 = vmul.f32 %v6419_v42, %v6718_v37  ;;  %v6804_v8 = vld [vmem:[#allocation3 + $0x97] sm:$0xff] }
 0x42f   : > { %v2912_v54 = vmul.f32 %v6469_v57, %v6718_v37  ;;  %v2682_v29 = vadd.f32 %v2674_v61, %v2662_v1  ;;  %v2999_v23 = vadd.f32 %v2991_v35, %v2979_v30  ;;  %v6798_v28 = vadd.f32 %v6654_v10, %v6635_v22  ;;  %8657 = vst [vmem:[#allocation117_spill] sm:$0xff] %v6804_v8  ;;  %v6810_v61 = vld [vmem:[#allocation3 + $0x80] sm:$0xff]  ;;  %v6824_v35 = vld [vmem:[#allocation3 + $0x98] sm:$0xff] }
 0x430   : > { %v2900_v16 = vadd.f32 %v2892_v34, %v2880_v15  ;;  %v3011_v63 = vmul.f32 %v6524_v4, %v6706_v59  ;;  %v2368_v44 = vadd.f32 %v4250_v60, %v6481_v24  ;;  %v2360_v48 = vadd.f32 %v6481_v24, %v2359_v62  ;;  %v8658_v34 = vld [vmem:[#allocation107_spill] sm:$0xff]  ;;  %8662 = vst [vmem:[#allocation118_spill] sm:$0xff] %v6824_v35 }
 0x431   : > { %8656 = vst [vmem:[#allocation109_spill] sm:$0xff] %v6798_v28  ;;  %v2556_v17 = vmul.f32 %v6368_v26, %v6784_v6  ;;  %v2781_v27 = vadd.f32 %v2773_v38, %v2761_v43  ;;  %2444 = vst.msk [vmem:[#allocation3 + $0xb0] sm:$0xff] %vm2396_vm3, %v6798_v28  ;;  %v2576_v22 = vmul.f32 %v6371_v13, %v6792_v55  ;;  %v8660_v43 = vld [vmem:[#allocation15_spill] sm:$0xff] }
 0x432   : > { %v2920_v1 = vadd.f32 %v2912_v54, %v2900_v16  ;;  %v2595_v10 = vmul.f32 %v6376_v41, %v6794_v51  ;;  %v2793_v24 = vmul.f32 %v6424_v50, %v6738_v14  ;;  %v3019_v60 = vadd.f32 %v3011_v63, %v2999_v23  ;;  %v6828_v38 = vld [vmem:[#allocation3 + $0x81] sm:$0xff]  ;;  %v8663_v23 = vld [vmem:[#allocation108_spill] sm:$0xff] }
 0x433   : > { %v6819_v15 = vadd.f32 %v2368_v44, %v8658_v34  ;;  %v6822_v30 = vadd.f32 %v2360_v48, %v8660_v43  ;;  %v2932_v62 = vmul.f32 %v6486_v9, %v6738_v14  ;;  %v2584_v54 = vadd.f32 %v2576_v22, %v2556_v17  ;;  %v6841_v34 = vld [vmem:[#allocation3 + $0x99] sm:$0xff] }
 0x434   : > { %v2596_v16 = vmul.f32 %v6376_v41, %v6804_v8  ;;  %v2603_v28 = vadd.f32 %v2595_v10, %v2583_v7  ;;  %v3078_v26 = vadd.f32 %v3070_v56, %v3058_v0  ;;  %v2702_v63 = vadd.f32 %v8663_v23, %v2682_v29  ;;  %8664 = vst [vmem:[#allocation110_spill] sm:$0xff] %v6841_v34  ;;  %v6843_v7 = vld [vmem:[#allocation3 + $0x82] sm:$0xff]  ;;  %v8665_v29 = vld [vmem:[#allocation93_spill] sm:$0xff] }
 0x435   : > { %8659 = vst [vmem:[#allocation124_spill] sm:$0xff] %v6819_v15  ;;  %8661 = vst [vmem:[#allocation106_spill] sm:$0xff] %v6822_v30  ;;  %v3031_v44 = vmul.f32 %v6535_v58, %v6716_v49  ;;  %v2615_v48 = vmul.f32 %v6380_v25, %v6810_v61  ;;  %v2801_v17 = vadd.f32 %v2793_v24, %v2781_v27  ;;  %v6864_v41 = vld [vmem:[#allocation3 + $0x9a] sm:$0xff] }
 0x436   : > { %2447 = vst.msk [vmem:[#allocation3 + $0xf8] sm:$0xff] %vm2396_vm3, %v6819_v15  ;;  %2445 = vst.msk [vmem:[#allocation3 + $0xc8] sm:$0xff] %vm2396_vm3, %v6822_v30  ;;  %v2940_v22 = vadd.f32 %v2932_v62, %v2920_v1  ;;  %v2604_v0 = vadd.f32 %v2596_v16, %v2584_v54  ;;  %v2616_v56 = vmul.f32 %v6380_v25, %v6824_v35  ;;  %v6857_v62 = vld [vmem:[#allocation3 + $0x83] sm:$0xff] }
 0x437   : > { %v3090_v10 = vmul.f32 %v8665_v29, %v6672_v20  ;;  %v3039_v43 = vadd.f32 %v3031_v44, %v3019_v60  ;;  %v2623_v23 = vadd.f32 %v2615_v48, %v2603_v28  ;;  %v2635_v15 = vmul.f32 %v6384_v46, %v6828_v38  ;;  %v8666_v16 = vld [vmem:[#allocation98_spill] sm:$0xff]  ;;  %8667 = vst [vmem:[#allocation111_spill] sm:$0xff] %v6864_v41 }
 0x438   : > { %v2813_v27 = vmul.f32 %v6429_v12, %v6758_v3  ;;  %v2952_v1 = vmul.f32 %v6498_v52, %v6758_v3  ;;  %v3051_v24 = vmul.f32 %v6538_v40, %v6718_v37  ;;  %v2624_v54 = vadd.f32 %v2616_v56, %v2604_v0 }
 0x439   : > { %v2636_v20 = vmul.f32 %v6384_v46, %v6841_v34  ;;  %v2643_v60 = vadd.f32 %v2635_v15, %v2623_v23  ;;  %v2655_v28 = vmul.f32 %v6388_v33, %v6843_v7  ;;  %v2722_v44 = vadd.f32 %v8666_v16, %v2702_v63 }
 0x43a   : > { %v3098_v48 = vadd.f32 %v3090_v10, %v3078_v26  ;;  %v2821_v30 = vadd.f32 %v2813_v27, %v2801_v17  ;;  %v2960_v25 = vadd.f32 %v2952_v1, %v2940_v22  ;;  %v2734_v13 = vmul.f32 %v6409_v5, %v6794_v51  ;;  %v8668_v22 = vld [vmem:[#allocation115_spill] sm:$0xff] }
 0x43b   : > { %v3059_v37 = vadd.f32 %v3051_v24, %v3039_v43  ;;  %v2644_v49 = vadd.f32 %v2636_v20, %v2624_v54  ;;  %v2663_v0 = vadd.f32 %v2655_v28, %v2643_v60  ;;  %v2675_v56 = vmul.f32 %v6392_v53, %v6857_v62  ;;  %v6880_v43 = vld [vmem:[#allocation3 + $0x9b] sm:$0xff] }
 0x43c   : > { %v3071_v15 = vmul.f32 %v6541_v2, %v6738_v14  ;;  %v6874_v63 = vmul.f32 %v8665_v29, %v6758_v3  ;;  %v2742_v26 = vadd.f32 %v2734_v13, %v2722_v44  ;;  %v2754_v17 = vmul.f32 %v6414_v36, %v6810_v61 }
 0x43d   : > { %v3110_v10 = vmul.f32 %v8668_v22, %v6694_v45  ;;  %v2656_v23 = vmul.f32 %v6388_v33, %v6864_v41  ;;  %v2683_v27 = vadd.f32 %v2675_v56, %v2663_v0  ;;  %v2695_v1 = vmul.f32 %v6398_v19, %v6784_v6 }
 0x43e   : > { %v6887_v24 = vadd.f32 %v6734_v47, %v2821_v30  ;;  %v6890_v13 = vadd.f32 %v6748_v18, %v2960_v25  ;;  %v2762_v54 = vadd.f32 %v2754_v17, %v2742_v26  ;;  %v2774_v20 = vmul.f32 %v6419_v42, %v6828_v38  ;;  %v8669_v17 = vld [vmem:[#allocation80_spill] sm:$0xff] }
 0x43f   : > { %v6894_v45 = vadd.f32 %v3071_v15, %v3059_v37  ;;  %v2664_v60 = vadd.f32 %v2656_v23, %v2644_v49  ;;  %v2703_v28 = vadd.f32 %v2695_v1, %v2683_v27  ;;  %v2715_v16 = vmul.f32 %v6402_v11, %v6792_v55 }
 0x440   : > { %v2676_v44 = vmul.f32 %v6392_v53, %v6880_v43  ;;  %v2735_v47 = vmul.f32 %v6409_v5, %v6804_v8  ;;  %v2782_v30 = vadd.f32 %v2774_v20, %v2762_v54  ;;  %v2794_v25 = vmul.f32 %v6424_v50, %v6843_v7 }
 0x441   : > { %v2723_v18 = vadd.f32 %v2715_v16, %v2703_v28  ;;  %v2755_v37 = vmul.f32 %v6414_v36, %v6824_v35  ;;  %v2775_v49 = vmul.f32 %v6419_v42, %v6841_v34  ;;  %v2795_v0 = vmul.f32 %v6424_v50, %v6864_v41 }
 0x442   : > { %v2802_v56 = vadd.f32 %v2794_v25, %v2782_v30  ;;  %v2814_v15 = vmul.f32 %v6429_v12, %v6857_v62  ;;  %v2815_v26 = vmul.f32 %v6429_v12, %v6880_v43  ;;  %v2834_v23 = vmul.f32 %v8669_v17, %v6784_v6  ;;  %v8671_v17 = vld [vmem:[#allocation76_spill] sm:$0xff] }
 0x443   : > { %v6916_v27 = vadd.f32 %v2676_v44, %v2664_v60  ;;  %v2743_v1 = vadd.f32 %v2735_v47, %v2723_v18  ;;  %v2854_v54 = vmul.f32 %v6447_v39, %v6792_v55  ;;  %v2873_v20 = vmul.f32 %v6455_v21, %v6794_v51 }
 0x444   : > { %v2822_v28 = vadd.f32 %v2814_v15, %v2802_v56  ;;  %v2874_v16 = vmul.f32 %v6455_v21, %v6804_v8  ;;  %v6926_v30 = vmul.f32 %v6462_v32, %v6810_v61  ;;  %v2894_v25 = vmul.f32 %v6462_v32, %v6824_v35  ;;  %v8672_v32 = vld [vmem:[#allocation92_spill] sm:$0xff] }
 0x445   : > { %8670 = vst [vmem:[#allocation113_spill] sm:$0xff] %v6916_v27  ;;  %v2763_v60 = vadd.f32 %v2755_v37, %v2743_v1  ;;  %v6932_v44 = vmul.f32 %v6469_v57, %v6828_v38  ;;  %v2914_v47 = vmul.f32 %v6469_v57, %v6841_v34  ;;  %v6938_v18 = vmul.f32 %v6486_v9, %v6843_v7 }
 0x446   : > { %v2842_v56 = vadd.f32 %v2834_v23, %v2822_v28  ;;  %v2934_v15 = vmul.f32 %v6486_v9, %v6864_v41  ;;  %v3118_v27 = vadd.f32 %v3110_v10, %v3098_v48  ;;  %v3130_v19 = vmul.f32 %v8671_v17, %v6696_v31  ;;  %v8673_v28 = vld [vmem:[#allocation68_spill] sm:$0xff] }
 0x447   : > { %v2783_v37 = vadd.f32 %v2775_v49, %v2763_v60  ;;  %v6946_v1 = vmul.f32 %v6498_v52, %v6857_v62  ;;  %v6950_v57 = vmul.f32 %v6498_v52, %v6880_v43  ;;  %v6954_v21 = vmul.f32 %v8672_v32, %v6784_v6  ;;  %v8675_v31 = vld [vmem:[#allocation96_spill] sm:$0xff] }
 0x448   : > { %v2862_v23 = vadd.f32 %v2854_v54, %v2842_v56  ;;  %v6958_v48 = vmul.f32 %v8673_v28, %v6792_v55  ;;  %v3138_v10 = vadd.f32 %v3130_v19, %v3118_v27  ;;  %v3150_v49 = vmul.f32 %v8675_v31, %v6706_v59  ;;  %v8678_v59 = vld [vmem:[#allocation43_spill] sm:$0xff]  ;;  %v8679_v28 = vld [vmem:[#allocation85_spill] sm:$0xff] }
 0x449   : > { %v3012_v60 = vmul.f32 %v6524_v4, %v6794_v51  ;;  %v6966_v52 = vmul.f32 %v6524_v4, %v6804_v8  ;;  %v3032_v32 = vmul.f32 %v6535_v58, %v6810_v61  ;;  %v6972_v54 = vmul.f32 %v6535_v58, %v6824_v35 }
 0x44a   : > { %8674 = vst [vmem:[#allocation74_spill] sm:$0xff] %v6958_v48  ;;  %v2882_v56 = vadd.f32 %v2874_v16, %v2862_v23  ;;  %v3052_v19 = vmul.f32 %v6538_v40, %v6828_v38  ;;  %v3158_v27 = vadd.f32 %v3150_v49, %v3138_v10  ;;  %v3170_v9 = vmul.f32 %v8679_v28, %v8678_v59  ;;  %v8682_v49 = vld [vmem:[#allocation112_spill] sm:$0xff] }
 0x44b   : > { %8676 = vst [vmem:[#allocation50_spill] sm:$0xff] %v6966_v52  ;;  %8677 = vst [vmem:[#allocation58_spill] sm:$0xff] %v6972_v54  ;;  %v2803_v48 = vadd.f32 %v2795_v0, %v2783_v37  ;;  %v6980_v4 = vmul.f32 %v6538_v40, %v6841_v34  ;;  %v6984_v52 = vmul.f32 %v6541_v2, %v6843_v7  ;;  %v8683_v0 = vld [vmem:[#allocation101_spill] sm:$0xff] }
 0x44c   : > { %v6988_v54 = vmul.f32 %v6541_v2, %v6864_v41  ;;  %v2902_v16 = vadd.f32 %v2894_v25, %v2882_v56  ;;  %v6992_v23 = vmul.f32 %v8665_v29, %v6857_v62  ;;  %v3178_v10 = vadd.f32 %v3170_v9, %v3158_v27 }
 0x44d   : > { %8680 = vst [vmem:[#allocation72_spill] sm:$0xff] %v6980_v4  ;;  %v3190_v37 = vmul.f32 %v8683_v0, %v8682_v49  ;;  %v6998_v59 = vmul.f32 %v8665_v29, %v6880_v43  ;;  %v7002_v4 = vmul.f32 %v8668_v22, %v6784_v6  ;;  %v7010_v25 = vmul.f32 %v8675_v31, %v6804_v8  ;;  %v8690_v49 = vld [vmem:[#allocation88_spill] sm:$0xff] }
 0x44e   : > { %8681 = vst [vmem:[#allocation63_spill] sm:$0xff] %v6988_v54  ;;  %v7006_v54 = vmul.f32 %v8671_v17, %v6792_v55  ;;  %v7014_v9 = vmul.f32 %v8679_v28, %v6824_v35  ;;  %v7018_v56 = vmul.f32 %v8683_v0, %v6841_v34  ;;  %v2922_v28 = vadd.f32 %v2914_v47, %v2902_v16  ;;  %v8703_v16 = vld [vmem:[#allocation49_spill] sm:$0xff] }
 0x44f   : > { %8684 = vst [vmem:[#allocation57_spill] sm:$0xff] %v6998_v59  ;;  %8685 = vst [vmem:[#allocation78_spill] sm:$0xff] %v7002_v4  ;;  %v3198_v27 = vadd.f32 %v3190_v37, %v3178_v10  ;;  %v3210_v59 = vmul.f32 %v8690_v49, %v6738_v14  ;;  %v7022_v4 = vadd.f32 %v2815_v26, %v2803_v48  ;;  %v8695_v10 = vld [vmem:[#allocation116_spill] sm:$0xff]  ;;  %v8697_v48 = vld [vmem:[#allocation14_spill] sm:$0xff] }
 0x450   : > { %8686 = vst [vmem:[#allocation65_spill] sm:$0xff] %v7006_v54  ;;  %8687 = vst [vmem:[#allocation55_spill] sm:$0xff] %v7010_v25  ;;  %v7026_v54 = vmul.f32 %v8690_v49, %v6864_v41  ;;  %v8693_v25 = vld [vmem:[#allocation48_spill] sm:$0xff]  ;;  %v2861_v37 = vadd.f32 %v8695_v10, %v6887_v24  ;;  %v8699_v49 = vld [vmem:[#allocation69_spill] sm:$0xff] }
 0x451   : > { %8688 = vst [vmem:[#allocation103_spill] sm:$0xff] %v7014_v9  ;;  %8689 = vst [vmem:[#allocation114_spill] sm:$0xff] %v7018_v56  ;;  %v3230_v29 = vmul.f32 %v8693_v25, %v6758_v3  ;;  %v7032_v9 = vmul.f32 %v8693_v25, %v6880_v43  ;;  %v3218_v0 = vadd.f32 %v3210_v59, %v3198_v27  ;;  %v8696_v14 = vld [vmem:[#allocation104_spill] sm:$0xff]  ;;  %v8698_v56 = vld [vmem:[#allocation91_spill] sm:$0xff] }
 0x452   : > { %8691 = vst [vmem:[#allocation19_spill] sm:$0xff] %v7022_v4  ;;  %8692 = vst [vmem:[#allocation22_spill] sm:$0xff] %v7026_v54  ;;  %v3000_v26 = vadd.f32 %v8696_v14, %v6890_v13  ;;  %v3250_v4 = vmul.f32 %v8698_v56, %v8697_v48  ;;  %v8700_v54 = vld [vmem:[#allocation105_spill] sm:$0xff]  ;;  %v3330_v59 = vmul.f32 %v8703_v16, %v6828_v38  ;;  %v8704_v13 = vld [vmem:[#allocation94_spill] sm:$0xff] }
 0x453   : > { %8694 = vst [vmem:[#allocation31_spill] sm:$0xff] %v7032_v9  ;;  %v3270_v2 = vmul.f32 %v8700_v54, %v8699_v49  ;;  %v8701_v3 = vld [vmem:[#allocation29_spill] sm:$0xff]  ;;  %v3238_v47 = vadd.f32 %v3230_v29, %v3218_v0  ;;  %v2881_v24 = vadd.f32 %v2873_v20, %v2861_v37  ;;  %v3350_v10 = vmul.f32 %v8704_v13, %v6843_v7  ;;  %v8705_v14 = vld [vmem:[#allocation39_spill] sm:$0xff] }
 0x454   : > { %v3290_v40 = vmul.f32 %v8701_v3, %v6794_v51  ;;  %v8702_v25 = vld [vmem:[#allocation21_spill] sm:$0xff]  ;;  %v3020_v27 = vadd.f32 %v3012_v60, %v3000_v26  ;;  %v3370_v56 = vmul.f32 %v8705_v14, %v6857_v62  ;;  %v8706_v54 = vld [vmem:[#allocation99_spill] sm:$0xff]  ;;  %v2942_v0 = vadd.f32 %v2934_v15, %v2922_v28  ;;  %v7065_v26 = vld [vmem:[#allocation3 + $0xb0] sm:$0xff] }
 0x455   : > { %v3310_v9 = vmul.f32 %v8702_v25, %v6810_v61  ;;  %v7054_v58 = vmul.f32 %v8706_v54, %v6784_v6  ;;  %v8707_v3 = vld [vmem:[#allocation47_spill] sm:$0xff]  ;;  %v3258_v16 = vadd.f32 %v3250_v4, %v3238_v47  ;;  %v2901_v20 = vadd.f32 %v6926_v30, %v2881_v24  ;;  %v7067_v14 = vld [vmem:[#allocation3 + $0xb1] sm:$0xff]  ;;  %v8708_v54 = vld [vmem:[#allocation66_spill] sm:$0xff] }
 0x456   : > { %v7058_v31 = vmul.f32 %v8707_v3, %v6792_v55  ;;  %v7060_v29 = vld [vmem:[#allocation3 + $0xae] sm:$0xff]  ;;  %v3040_v60 = vadd.f32 %v3032_v32, %v3020_v27  ;;  %v7071_v13 = vmul.f32 %v8708_v54, %v6804_v8  ;;  %v8709_v3 = vld [vmem:[#allocation102_spill] sm:$0xff]  ;;  %v8712_v24 = vld [vmem:[#allocation97_spill] sm:$0xff] }
 0x457   : > { %v7063_v37 = vld [vmem:[#allocation3 + $0xaf] sm:$0xff]  ;;  %v7075_v25 = vmul.f32 %v8709_v3, %v6824_v35  ;;  %v3278_v47 = vadd.f32 %v3270_v2, %v3258_v16  ;;  %v7089_v27 = vmul.f32 %v8712_v24, %v6880_v43  ;;  %v2921_v54 = vadd.f32 %v6932_v44, %v2901_v20  ;;  %v8713_v35 = vld [vmem:[#allocation53_spill] sm:$0xff] }
 0x458   : > { %v8710_v15 = vld [vmem:[#allocation32_spill] sm:$0xff]  ;;  %v8711_v32 = vld [vmem:[#allocation51_spill] sm:$0xff]  ;;  %v3060_v8 = vadd.f32 %v3052_v19, %v3040_v60  ;;  %v7108_v16 = vmul.f32 %v6384_v46, %v7067_v14  ;;  %v7111_v44 = vadd.f32 %v6950_v57, %v2942_v0  ;;  %v7128_v46 = vmul.f32 %v6409_v5, %v7063_v37 }
 0x459   : > { %v7079_v4 = vmul.f32 %v8710_v15, %v6841_v34  ;;  %v7083_v30 = vmul.f32 %v8711_v32, %v6864_v41  ;;  %v7085_v28 = vld [vmem:[#allocation3 + $0xb2] sm:$0xff]  ;;  %v7096_v15 = vmul.f32 %v8713_v35, %v7060_v29  ;;  %v8714_v34 = vld [vmem:[#allocation71_spill] sm:$0xff]  ;;  %v3298_v19 = vadd.f32 %v3290_v40, %v3278_v47  ;;  %v8718_v47 = vld [vmem:[#allocation62_spill] sm:$0xff] }
 0x45a   : > { %v7092_v3 = vld [vmem:[#allocation3 + $0xb3] sm:$0xff]  ;;  %v7100_v32 = vmul.f32 %v8714_v34, %v7063_v37  ;;  %v2941_v20 = vadd.f32 %v6938_v18, %v2921_v54  ;;  %v7116_v35 = vmul.f32 %v6388_v33, %v7085_v28  ;;  %v7132_v57 = vmul.f32 %v6414_v36, %v7065_v26 }
 0x45b   : > { %v8715_v41 = vld [vmem:[#allocation77_spill] sm:$0xff]  ;;  %v7120_v34 = vmul.f32 %v6392_v53, %v7092_v3  ;;  %v3318_v40 = vadd.f32 %v3310_v9, %v3298_v19  ;;  %v3080_v18 = vadd.f32 %v6984_v52, %v3060_v8  ;;  %v7138_v53 = vmul.f32 %v6419_v42, %v7067_v14  ;;  %v8736_v42 = vld [vmem:[#allocation78_spill] sm:$0xff] }
 0x45c   : > { %v7104_v2 = vmul.f32 %v8715_v41, %v7065_v26  ;;  %v7124_v41 = vmul.f32 %v6402_v11, %v7060_v29  ;;  %v2961_v33 = vadd.f32 %v6946_v1, %v2941_v20  ;;  %v7142_v54 = vmul.f32 %v6424_v50, %v7085_v28  ;;  %v8719_v20 = vld [vmem:[#allocation84_spill] sm:$0xff] }
 0x45d   : > { %8716 = vst [vmem:[#allocation120_spill] sm:$0xff] %v7120_v34  ;;  %v7146_v0 = vmul.f32 %v6429_v12, %v7092_v3  ;;  %v3099_v60 = vadd.f32 %v6874_v63, %v6894_v45  ;;  %v3111_v1 = vmul.f32 %v8668_v22, %v8697_v48  ;;  %v3338_v9 = vadd.f32 %v3330_v59, %v3318_v40  ;;  %v8721_v59 = vld [vmem:[#allocation74_spill] sm:$0xff] }
 0x45e   : > { %v2981_v52 = vadd.f32 %v6954_v21, %v2961_v33  ;;  %v2855_v8 = vmul.f32 %v6447_v39, %v7060_v29  ;;  %v7157_v19 = vmul.f32 %v8718_v47, %v7063_v37  ;;  %v7161_v34 = vmul.f32 %v8719_v20, %v7065_v26  ;;  %v8722_v47 = vld [vmem:[#allocation52_spill] sm:$0xff] }
 0x45f   : > { %8717 = vst [vmem:[#allocation46_spill] sm:$0xff] %v7146_v0  ;;  %v8720_v0 = vld [vmem:[#allocation89_spill] sm:$0xff]  ;;  %v3119_v45 = vadd.f32 %v3111_v1, %v3099_v60  ;;  %v3131_v48 = vmul.f32 %v8671_v17, %v8699_v49  ;;  %v3358_v21 = vadd.f32 %v3350_v10, %v3338_v9  ;;  %v3100_v33 = vadd.f32 %v6992_v23, %v3080_v18  ;;  %v8723_v20 = vld [vmem:[#allocation64_spill] sm:$0xff]  ;;  %v8727_v9 = vld [vmem:[#allocation90_spill] sm:$0xff] }
 0x460   : > { %v7165_v63 = vmul.f32 %v8720_v0, %v7067_v14  ;;  %v3001_v40 = vadd.f32 %v8721_v59, %v2981_v52  ;;  %v7173_v39 = vmul.f32 %v8722_v47, %v7085_v28  ;;  %v7177_v12 = vmul.f32 %v8723_v20, %v7092_v3  ;;  %v8725_v0 = vld [vmem:[#allocation68_spill] sm:$0xff]  ;;  %v8728_v23 = vld [vmem:[#allocation54_spill] sm:$0xff]  ;;  %v8730_v20 = vld [vmem:[#allocation73_spill] sm:$0xff] }
 0x461   : > { %v2994_v50 = vmul.f32 %v8725_v0, %v7060_v29  ;;  %v3139_v60 = vadd.f32 %v3131_v48, %v3119_v45  ;;  %v8726_v1 = vld [vmem:[#allocation96_spill] sm:$0xff]  ;;  %v3378_v10 = vadd.f32 %v3370_v56, %v3358_v21  ;;  %v3014_v52 = vmul.f32 %v8727_v9, %v7063_v37  ;;  %v8729_v59 = vld [vmem:[#allocation82_spill] sm:$0xff]  ;;  %v8732_v45 = vld [vmem:[#allocation93_spill] sm:$0xff] }
 0x462   : > { %8724 = vst [vmem:[#allocation38_spill] sm:$0xff] %v7177_v12  ;;  %v3151_v49 = vmul.f32 %v8726_v1, %v6794_v51  ;;  %v7187_v18 = vmul.f32 %v8728_v23, %v7065_v26  ;;  %v7191_v47 = vmul.f32 %v8729_v59, %v7067_v14  ;;  %v7195_v12 = vmul.f32 %v8730_v20, %v7085_v28  ;;  %v8734_v56 = vld [vmem:[#allocation85_spill] sm:$0xff]  ;;  %v8735_v23 = vld [vmem:[#allocation50_spill] sm:$0xff]  ;;  %v7212_v20 = vld [vmem:[#allocation3 + $0xad] sm:$0xff] }
 0x463   : > { %v7199_v48 = vmul.f32 %v8732_v45, %v7092_v3  ;;  %v3171_v21 = vmul.f32 %v8734_v56, %v6810_v61  ;;  %v3398_v9 = vadd.f32 %v7054_v58, %v3378_v10  ;;  %v3021_v0 = vadd.f32 %v8735_v23, %v3001_v40  ;;  %v8741_v40 = vld [vmem:[#allocation101_spill] sm:$0xff] }
 0x464   : > { %8731 = vst [vmem:[#allocation119_spill] sm:$0xff] %v7195_v12  ;;  %v3159_v51 = vadd.f32 %v3151_v49, %v3139_v60  ;;  %v7206_v36 = vadd.f32 %v8736_v42, %v3100_v33  ;;  %v7210_v59 = vmul.f32 %v8671_v17, %v7060_v29  ;;  %v7216_v45 = vmul.f32 %v8726_v1, %v7063_v37  ;;  %v8743_v49 = vld [vmem:[#allocation88_spill] sm:$0xff] }
 0x465   : > { %8733 = vst [vmem:[#allocation12_spill] sm:$0xff] %v7199_v48  ;;  %v7220_v61 = vmul.f32 %v8734_v56, %v7065_v26  ;;  %v3191_v60 = vmul.f32 %v8741_v40, %v6828_v38  ;;  %v3418_v42 = vadd.f32 %v7058_v31, %v3398_v9  ;;  %v7227_v33 = vmul.f32 %v8741_v40, %v7067_v14  ;;  %v8747_v31 = vld [vmem:[#allocation91_spill] sm:$0xff]  ;;  %v8753_v56 = vld [vmem:[#allocation92_spill] sm:$0xff] }
 0x466   : > { %8737 = vst [vmem:[#allocation121_spill] sm:$0xff] %v7206_v36  ;;  %8738 = vst [vmem:[#allocation28_spill] sm:$0xff] %v7210_v59  ;;  %v3179_v58 = vadd.f32 %v3171_v21, %v3159_v51  ;;  %v3211_v10 = vmul.f32 %v8743_v49, %v6843_v7  ;;  %v7233_v23 = vmul.f32 %v8743_v49, %v7085_v28  ;;  %v8749_v7 = vld [vmem:[#allocation33_spill] sm:$0xff] }
 0x467   : > { %8739 = vst [vmem:[#allocation61_spill] sm:$0xff] %v7216_v45  ;;  %8740 = vst [vmem:[#allocation40_spill] sm:$0xff] %v7220_v61  ;;  %v8745_v61 = vld [vmem:[#allocation48_spill] sm:$0xff]  ;;  %v3251_v9 = vmul.f32 %v8747_v31, %v6784_v6  ;;  %v3438_v21 = vadd.f32 %v7071_v13, %v3418_v42  ;;  %v2557_v40 = vmul.f32 %v8749_v7, %v7212_v20  ;;  %v8754_v42 = vld [vmem:[#allocation117_spill] sm:$0xff] }
 0x468   : > { %8742 = vst [vmem:[#allocation122_spill] sm:$0xff] %v7227_v33  ;;  %8744 = vst [vmem:[#allocation42_spill] sm:$0xff] %v7233_v23  ;;  %v3199_v45 = vadd.f32 %v3191_v60, %v3179_v58  ;;  %v3231_v51 = vmul.f32 %v8745_v61, %v6857_v62  ;;  %v7239_v38 = vmul.f32 %v8745_v61, %v7092_v3  ;;  %v8748_v33 = vld [vmem:[#allocation58_spill] sm:$0xff]  ;;  %v8750_v23 = vld [vmem:[#allocation79_spill] sm:$0xff] }
 0x469   : > { %v3041_v59 = vadd.f32 %v8748_v33, %v3021_v0  ;;  %v2696_v58 = vmul.f32 %v8750_v23, %v7212_v20  ;;  %v8751_v62 = vld [vmem:[#allocation105_spill] sm:$0xff]  ;;  %v8752_v61 = vld [vmem:[#allocation80_spill] sm:$0xff]  ;;  %v2974_v6 = vmul.f32 %v8753_v56, %v7212_v20  ;;  %v3458_v13 = vadd.f32 %v7075_v25, %v3438_v21 }
 0x46a   : > { %8746 = vst [vmem:[#allocation41_spill] sm:$0xff] %v7239_v38  ;;  %v3219_v60 = vadd.f32 %v3211_v10, %v3199_v45  ;;  %v3271_v49 = vmul.f32 %v8751_v62, %v6792_v55  ;;  %v2835_v38 = vmul.f32 %v8752_v61, %v7212_v20  ;;  %v8755_v0 = vld [vmem:[#allocation29_spill] sm:$0xff]  ;;  %v2585_v7 = vadd.f32 %v7096_v15, %v2557_v40  ;;  %v8757_v45 = vld [vmem:[#allocation118_spill] sm:$0xff]  ;;  %v8759_v55 = vld [vmem:[#allocation19_spill] sm:$0xff] }
 0x46b   : > { %v3291_v33 = vmul.f32 %v8755_v0, %v8754_v42  ;;  %v8756_v31 = vld [vmem:[#allocation113_spill] sm:$0xff]  ;;  %v2982_v36 = vadd.f32 %v2974_v6, %v7111_v44  ;;  %v3478_v61 = vadd.f32 %v7079_v4, %v3458_v13  ;;  %v8760_v56 = vld [vmem:[#allocation72_spill] sm:$0xff]  ;;  %v8761_v15 = vld [vmem:[#allocation110_spill] sm:$0xff] }
 0x46c   : > { %v2704_v1 = vadd.f32 %v2696_v58, %v8756_v31  ;;  %v3239_v17 = vadd.f32 %v3231_v51, %v3219_v60  ;;  %v8758_v10 = vld [vmem:[#allocation21_spill] sm:$0xff]  ;;  %v2843_v62 = vadd.f32 %v2835_v38, %v8759_v55  ;;  %v3061_v12 = vadd.f32 %v8760_v56, %v3041_v59  ;;  %v8764_v38 = vld [vmem:[#allocation94_spill] sm:$0xff] }
 0x46d   : > { %v3311_v48 = vmul.f32 %v8758_v10, %v8757_v45  ;;  %v2605_v25 = vadd.f32 %v7100_v32, %v2585_v7  ;;  %v8762_v40 = vld [vmem:[#allocation49_spill] sm:$0xff]  ;;  %v3002_v58 = vadd.f32 %v2994_v50, %v2982_v36  ;;  %v3498_v60 = vadd.f32 %v7083_v30, %v3478_v61  ;;  %v8763_v45 = vld [vmem:[#allocation111_spill] sm:$0xff]  ;;  %v7278_v32 = vld [vmem:[%s7939_s13] ss:$0 sm:$0xff] }
 0x46e   : > { %v2724_v21 = vadd.f32 %v7124_v41, %v2704_v1  ;;  %v3259_v42 = vadd.f32 %v3251_v9, %v3239_v17  ;;  %v3331_v31 = vmul.f32 %v8762_v40, %v8761_v15  ;;  %v2863_v51 = vadd.f32 %v2855_v8, %v2843_v62  ;;  %8765 = vst [vmem:[#allocation25_spill] sm:$0xff] %v7278_v32  ;;  %v8766_v41 = vld [vmem:[#allocation39_spill] sm:$0xff] }
 0x46f   : > { %v3351_v55 = vmul.f32 %v8764_v38, %v8763_v45  ;;  %v2625_v44 = vadd.f32 %v7104_v2, %v2605_v25  ;;  %v3371_v1 = vmul.f32 %v8766_v41, %v6880_v43  ;;  %v3022_v50 = vadd.f32 %v3014_v52, %v3002_v58  ;;  %v8767_v8 = vld [vmem:[#allocation63_spill] sm:$0xff] }
 0x470   : > { %v2744_v4 = vadd.f32 %v7128_v46, %v2724_v21  ;;  %v3279_v17 = vadd.f32 %v3271_v49, %v3259_v42  ;;  %v2883_v36 = vadd.f32 %v7157_v19, %v2863_v51  ;;  %v3518_v30 = vadd.f32 %v7089_v27, %v3498_v60  ;;  %v8768_v2 = vld [vmem:[#allocation99_spill] sm:$0xff]  ;;  %v8777_v60 = vld [vmem:[#allocation57_spill] sm:$0xff] }
 0x471   : > { %v3081_v59 = vadd.f32 %v8767_v8, %v3061_v12  ;;  %v3391_v56 = vmul.f32 %v8768_v2, %v7212_v20  ;;  %v2645_v9 = vadd.f32 %v7108_v16, %v2625_v44  ;;  %v3042_v62 = vadd.f32 %v7187_v18, %v3022_v50  ;;  %v8770_v19 = vld [vmem:[#allocation47_spill] sm:$0xff]  ;;  %v8771_v12 = vld [vmem:[#allocation66_spill] sm:$0xff]  ;;  %v8773_v16 = vld [vmem:[#allocation32_spill] sm:$0xff] }
 0x472   : > { %v2764_v46 = vadd.f32 %v7132_v57, %v2744_v4  ;;  %v3299_v61 = vadd.f32 %v3291_v33, %v3279_v17  ;;  %v2903_v49 = vadd.f32 %v7161_v34, %v2883_v36  ;;  %v7292_v43 = vadd.f32 %v7278_v32, %v3518_v30  ;;  %v8772_v57 = vld [vmem:[#allocation102_spill] sm:$0xff]  ;;  %v7327_v58 = vld [vmem:[#allocation3 + $0xc9] sm:$0xff] }
 0x473   : > { %v3411_v27 = vmul.f32 %v8770_v19, %v7060_v29  ;;  %v3431_v52 = vmul.f32 %v8771_v12, %v7063_v37  ;;  %v7301_v33 = vmul.f32 %v8772_v57, %v7065_v26  ;;  %v7305_v34 = vmul.f32 %v8773_v16, %v7067_v14  ;;  %v7308_v7 = vld [vmem:[#allocation3 + $0xc5] sm:$0xff]  ;;  %8776 = vst [vmem:[#allocation35_spill] sm:$0xff] %v7327_v58  ;;  %v8816_v16 = vld [vmem:[#allocation85_spill] sm:$0xff]  ;;  %v8819_v12 = vld [vmem:[#allocation88_spill] sm:$0xff] }
 0x474   : > { %8769 = vst [vmem:[#allocation27_spill] sm:$0xff] %v7292_v43  ;;  %v2784_v6 = vadd.f32 %v7138_v53, %v2764_v46  ;;  %v3319_v13 = vadd.f32 %v3311_v48, %v3299_v61  ;;  %v2923_v18 = vadd.f32 %v7165_v63, %v2903_v49  ;;  %v7310_v25 = vld [vmem:[#allocation3 + $0xc6] sm:$0xff]  ;;  %v3540_v53 = vsel %vm2396_vm3, %v7292_v43, 0.0  ;;  %v8780_v46 = vld [vmem:[#allocation56_spill] sm:$0xff] }
 0x475   : > { %v7312_v21 = vld [vmem:[#allocation3 + $0xc7] sm:$0xff]  ;;  %v7322_v15 = vmul.f32 %v8712_v24, %v7092_v3  ;;  %v3062_v51 = vadd.f32 %v7191_v47, %v3042_v62  ;;  %3541 = vadd.xlane.f32.xlu0 %v3540_v53  ;;  %v7330_v45 = vadd.f32 %v8777_v60, %v3081_v59  ;;  %v2665_v4 = vadd.f32 %v7116_v35, %v2645_v9 }
 0x476   : > { %8774 = vst [vmem:[#allocation123_spill] sm:$0xff] %v7312_v21  ;;  %v8775_v48 = vld [vmem:[#allocation51_spill] sm:$0xff]  ;;  %v3339_v44 = vadd.f32 %v3331_v31, %v3319_v13  ;;  %v7335_v17 = vmul.f32 %v8668_v22, %v7212_v20  ;;  %v2804_v47 = vadd.f32 %v7142_v54, %v2784_v6  ;;  %v2697_v30 = vmul.f32 %v8750_v23, %v7308_v7  ;;  %v8790_v60 = vld [vmem:[#allocation86_spill] sm:$0xff] }
 0x477   : > { %v7318_v42 = vmul.f32 %v8775_v48, %v7085_v28  ;;  %v7325_v63 = vld [vmem:[#allocation3 + $0xc8] sm:$0xff]  ;;  %8778 = vst [vmem:[#allocation59_spill] sm:$0xff] %v7330_v45  ;;  %v2717_v8 = vmul.f32 %v6402_v11, %v7310_v25  ;;  %v2737_v31 = vmul.f32 %v6409_v5, %v7312_v21  ;;  %v2943_v59 = vadd.f32 %v7173_v39, %v2923_v18  ;;  %v8786_v11 = vld [vmem:[#allocation60_spill] sm:$0xff]  ;;  %v8796_v45 = vld [vmem:[#allocation65_spill] sm:$0xff] }
 0x478   : > { %8779 = vst [vmem:[#allocation26_spill] sm:$0xff] %v7335_v17  ;;  %v7337_v36 = vld [vmem:[#allocation3 + $0xca] sm:$0xff]  ;;  %v3359_v35 = vadd.f32 %v3351_v55, %v3339_v44  ;;  %v2757_v61 = vmul.f32 %v8780_v46, %v7325_v63  ;;  %v2856_v44 = vmul.f32 %v8790_v60, %v7310_v25  ;;  %v8791_v46 = vld [vmem:[#allocation62_spill] sm:$0xff]  ;;  %v8795_v17 = vld [vmem:[#allocation121_spill] sm:$0xff] }
 0x479   : > { %v7339_v50 = vld [vmem:[#allocation3 + $0xcb] sm:$0xff] }
 0x47a   : > { %v8781_v9 = vld [vmem:[#allocation75_spill] sm:$0xff]  ;;  %v7362_v13 = vmul.f32 %v8786_v11, %v7339_v50  ;;  %v8788_v5 = vld [vmem:[#allocation80_spill] sm:$0xff]  ;;  %v3379_v55 = vadd.f32 %v3371_v1, %v3359_v35  ;;  %v8794_v11 = vld [vmem:[#allocation89_spill] sm:$0xff] }
 0x47b   : > { %v7353_v49 = vmul.f32 %v8781_v9, %v7327_v58  ;;  %v8783_v54 = vld [vmem:[#allocation119_spill] sm:$0xff]  ;;  %v2836_v39 = vmul.f32 %v8788_v5, %v7308_v7  ;;  %v8789_v18 = vld [vmem:[#allocation120_spill] sm:$0xff]  ;;  %v8792_v9 = vld [vmem:[#allocation46_spill] sm:$0xff] }
 0x47c   : > { %v3082_v62 = vadd.f32 %v8783_v54, %v3062_v51  ;;  %v8784_v23 = vld [vmem:[#allocation83_spill] sm:$0xff]  ;;  %8787 = vst [vmem:[#allocation16_spill] sm:$0xff] %v7362_v13  ;;  %v2685_v53 = vadd.f32 %v8789_v18, %v2665_v4  ;;  %v2876_v51 = vmul.f32 %v8791_v46, %v7312_v21  ;;  %v2824_v54 = vadd.f32 %v8792_v9, %v2804_v47  ;;  %v8797_v35 = vld [vmem:[#allocation38_spill] sm:$0xff]  ;;  %v8798_v18 = vld [vmem:[#allocation52_spill] sm:$0xff] }
 0x47d   : > { %8782 = vst [vmem:[#allocation30_spill] sm:$0xff] %v7353_v49  ;;  %v7358_v6 = vmul.f32 %v8784_v23, %v7337_v36  ;;  %v8793_v23 = vld [vmem:[#allocation84_spill] sm:$0xff]  ;;  %v2916_v13 = vmul.f32 %v8794_v11, %v7327_v58  ;;  %v3399_v1 = vadd.f32 %v3391_v56, %v3379_v55  ;;  %v2963_v4 = vadd.f32 %v8797_v35, %v2943_v59  ;;  %v8806_v59 = vld [vmem:[#allocation90_spill] sm:$0xff] }
 0x47e   : > { %v2896_v43 = vmul.f32 %v8793_v23, %v7325_v63  ;;  %v7381_v60 = vmul.f32 %v8798_v18, %v7337_v36  ;;  %v8800_v46 = vld [vmem:[#allocation64_spill] sm:$0xff]  ;;  %v3015_v55 = vmul.f32 %v8806_v59, %v7312_v21  ;;  %v8807_v35 = vld [vmem:[#allocation54_spill] sm:$0xff] }
 0x47f   : > { %8785 = vst [vmem:[#allocation23_spill] sm:$0xff] %v7358_v6  ;;  %v3140_v6 = vadd.f32 %v8796_v45, %v8795_v17  ;;  %v7385_v5 = vmul.f32 %v8800_v46, %v7339_v50  ;;  %v8802_v47 = vld [vmem:[#allocation12_spill] sm:$0xff]  ;;  %v8805_v45 = vld [vmem:[#allocation55_spill] sm:$0xff]  ;;  %v3419_v17 = vadd.f32 %v3411_v27, %v3399_v1  ;;  %v3035_v18 = vmul.f32 %v8807_v35, %v7325_v63  ;;  %v8808_v46 = vld [vmem:[#allocation82_spill] sm:$0xff] }
 0x480   : > { %8799 = vst [vmem:[#allocation24_spill] sm:$0xff] %v7381_v60  ;;  %v3102_v9 = vadd.f32 %v8802_v47, %v3082_v62  ;;  %v8803_v23 = vld [vmem:[#allocation92_spill] sm:$0xff]  ;;  %v8809_v62 = vld [vmem:[#allocation73_spill] sm:$0xff]  ;;  %v3114_v27 = vmul.f32 %v8668_v22, %v7308_v7  ;;  %v7421_v22 = vmul.f32 %v8819_v12, %v7337_v36  ;;  %v8821_v49 = vld [vmem:[#allocation22_spill] sm:$0xff] }
 0x481   : > { %8801 = vst [vmem:[#allocation70_spill] sm:$0xff] %v7385_v5  ;;  %v2975_v24 = vmul.f32 %v8803_v23, %v7308_v7  ;;  %v8804_v11 = vld [vmem:[#allocation68_spill] sm:$0xff]  ;;  %v3160_v56 = vadd.f32 %v8805_v45, %v3140_v6  ;;  %v3055_v5 = vmul.f32 %v8808_v46, %v7327_v58  ;;  %v7401_v47 = vmul.f32 %v8809_v62, %v7337_v36  ;;  %v8811_v23 = vld [vmem:[#allocation93_spill] sm:$0xff]  ;;  %v8813_v6 = vld [vmem:[#allocation103_spill] sm:$0xff] }
 0x482   : > { %v2995_v48 = vmul.f32 %v8804_v11, %v7310_v25  ;;  %v7405_v60 = vmul.f32 %v8811_v23, %v7339_v50  ;;  %v3439_v45 = vadd.f32 %v3431_v52, %v3419_v17  ;;  %v8814_v59 = vld [vmem:[#allocation76_spill] sm:$0xff]  ;;  %v3174_v62 = vmul.f32 %v8816_v16, %v7325_v63  ;;  %v8818_v23 = vld [vmem:[#allocation114_spill] sm:$0xff]  ;;  %8820 = vst [vmem:[#allocation9_spill] sm:$0xff] %v7421_v22 }
 0x483   : > { %8810 = vst [vmem:[#allocation34_spill] sm:$0xff] %v7401_v47  ;;  %v3180_v1 = vadd.f32 %v8813_v6, %v3160_v56  ;;  %v3134_v35 = vmul.f32 %v8814_v59, %v7310_v25  ;;  %v8815_v11 = vld [vmem:[#allocation96_spill] sm:$0xff]  ;;  %v8817_v47 = vld [vmem:[#allocation101_spill] sm:$0xff]  ;;  %v2705_v56 = vadd.f32 %v2697_v30, %v2685_v53  ;;  %v2844_v17 = vadd.f32 %v2836_v39, %v2824_v54  ;;  %v8824_v53 = vld [vmem:[#allocation31_spill] sm:$0xff] }
 0x484   : > { %8812 = vst [vmem:[#allocation67_spill] sm:$0xff] %v7405_v60  ;;  %v3154_v46 = vmul.f32 %v8815_v11, %v7312_v21  ;;  %v3194_v57 = vmul.f32 %v8817_v47, %v7327_v58  ;;  %v3459_v52 = vadd.f32 %v7301_v33, %v3439_v45  ;;  %v2983_v6 = vadd.f32 %v2975_v24, %v2963_v4  ;;  %v8822_v21 = vld [vmem:[#allocation48_spill] sm:$0xff]  ;;  %v8823_v47 = vld [vmem:[#allocation91_spill] sm:$0xff]  ;;  %v8825_v24 = vld [vmem:[#allocation105_spill] sm:$0xff] }
 0x485   : > { %v3200_v60 = vadd.f32 %v8818_v23, %v3180_v1  ;;  %v3122_v59 = vadd.f32 %v3114_v27, %v3102_v9  ;;  %v7427_v16 = vmul.f32 %v8822_v21, %v7339_v50  ;;  %v3252_v58 = vmul.f32 %v8823_v47, %v7212_v20  ;;  %v7463_v27 = vld [vmem:[#allocation3 + $0xe0] sm:$0xff] }
 0x486   : > { %v2725_v23 = vadd.f32 %v2717_v8, %v2705_v56  ;;  %v3479_v1 = vadd.f32 %v7305_v34, %v3459_v52  ;;  %v2864_v12 = vadd.f32 %v2856_v44, %v2844_v17  ;;  %v3003_v22 = vadd.f32 %v2995_v48, %v2983_v6  ;;  %v8830_v56 = vld [vmem:[#allocation102_spill] sm:$0xff]  ;;  %v8831_v52 = vld [vmem:[#allocation35_spill] sm:$0xff]  ;;  %v8832_v17 = vld [vmem:[#allocation32_spill] sm:$0xff] }
 0x487   : > { %v3220_v11 = vadd.f32 %v8821_v49, %v3200_v60  ;;  %v3142_v30 = vadd.f32 %v3134_v35, %v3122_v59  ;;  %v3272_v39 = vmul.f32 %v8825_v24, %v7060_v29  ;;  %v3292_v49 = vmul.f32 %v8755_v0, %v7063_v37 }
 0x488   : > { %v2745_v60 = vadd.f32 %v2737_v31, %v2725_v23  ;;  %v3499_v54 = vadd.f32 %v7318_v42, %v3479_v1  ;;  %v2884_v4 = vadd.f32 %v2876_v51, %v2864_v12  ;;  %v3023_v9 = vadd.f32 %v3015_v55, %v3003_v22  ;;  %v7455_v31 = vld [vmem:[#allocation3 + $0xdd] sm:$0xff]  ;;  %v8833_v23 = vld [vmem:[#allocation51_spill] sm:$0xff] }
 0x489   : > { %v3240_v33 = vadd.f32 %v8824_v53, %v3220_v11  ;;  %v3162_v20 = vadd.f32 %v3154_v46, %v3142_v30  ;;  %v3312_v34 = vmul.f32 %v8758_v10, %v7065_v26  ;;  %v3332_v48 = vmul.f32 %v8762_v40, %v7067_v14  ;;  %v8828_v46 = vld [vmem:[#allocation123_spill] sm:$0xff]  ;;  %v8829_v51 = vld [vmem:[#allocation66_spill] sm:$0xff] }
 0x48a   : > { %v2765_v44 = vadd.f32 %v2757_v61, %v2745_v60  ;;  %v3519_v11 = vadd.f32 %v7322_v15, %v3499_v54  ;;  %v2904_v29 = vadd.f32 %v2896_v43, %v2884_v4  ;;  %v3043_v59 = vadd.f32 %v3035_v18, %v3023_v9  ;;  %v8827_v15 = vld [vmem:[#allocation30_spill] sm:$0xff]  ;;  %v8838_v9 = vld [vmem:[#allocation23_spill] sm:$0xff] }
 0x48b   : > { %v3260_v8 = vadd.f32 %v3252_v58, %v3240_v33  ;;  %v3182_v35 = vadd.f32 %v3174_v62, %v3162_v20  ;;  %v3352_v42 = vmul.f32 %v8764_v38, %v7085_v28  ;;  %v3372_v22 = vmul.f32 %v8766_v41, %v7092_v3  ;;  %v7457_v61 = vld [vmem:[#allocation3 + $0xde] sm:$0xff] }
 0x48c   : > { %v3392_v12 = vmul.f32 %v8768_v2, %v7308_v7  ;;  %v7450_v26 = vadd.f32 %v7278_v32, %v3519_v11  ;;  %v3412_v14 = vmul.f32 %v8770_v19, %v7310_v25  ;;  %v2785_v43 = vadd.f32 %v8827_v15, %v2765_v44  ;;  %v7461_v62 = vld [vmem:[#allocation3 + $0xdf] sm:$0xff] }
 0x48d   : > { %v3280_v37 = vadd.f32 %v3272_v39, %v3260_v8  ;;  %v2924_v58 = vadd.f32 %v2916_v13, %v2904_v29  ;;  %v3432_v3 = vmul.f32 %v8829_v51, %v8828_v46  ;;  %v3063_v18 = vadd.f32 %v3055_v5, %v3043_v59  ;;  %v8834_v5 = vld [vmem:[#allocation97_spill] sm:$0xff]  ;;  %v7483_v53 = vld [vmem:[#allocation3 + $0xe1] sm:$0xff]  ;;  %v8839_v8 = vld [vmem:[#allocation24_spill] sm:$0xff] }
 0x48e   : > { %8826 = vst [vmem:[#allocation10_spill] sm:$0xff] %v7450_v26  ;;  %v3202_v55 = vadd.f32 %v3194_v57, %v3182_v35  ;;  %v3543_v45 = vsel %vm2396_vm3, %v7450_v26, 0.0  ;;  %v7469_v13 = vmul.f32 %v8830_v56, %v7325_v63  ;;  %v7473_v6 = vmul.f32 %v8832_v17, %v8831_v52  ;;  %v7485_v33 = vld [vmem:[#allocation3 + $0xe2] sm:$0xff]  ;;  %v8841_v29 = vld [vmem:[#allocation84_spill] sm:$0xff] }
 0x48f   : > { %v3300_v28 = vadd.f32 %v3292_v49, %v3280_v37  ;;  %v7477_v1 = vmul.f32 %v8833_v23, %v7337_v36  ;;  %3544 = vadd.xlane.f32.xlu1 %v3543_v45  ;;  %v7481_v30 = vmul.f32 %v8834_v5, %v7339_v50  ;;  %v7487_v39 = vld [vmem:[#allocation3 + $0xe3] sm:$0xff]  ;;  %v8836_v49 = vld [vmem:[#allocation80_spill] sm:$0xff]  ;;  %v2805_v20 = vadd.f32 %v8838_v9, %v2785_v43 }
 0x490   : > { %v2837_v60 = vmul.f32 %v8836_v49, %v7455_v31  ;;  %v8837_v54 = vld [vmem:[#allocation86_spill] sm:$0xff]  ;;  %v7499_v59 = vmul.f32 %v8841_v29, %v7463_v27  ;;  %v8844_v49 = vld [vmem:[#allocation59_spill] sm:$0xff] }
 0x491   : > { %v3320_v57 = vadd.f32 %v3312_v34, %v3300_v28  ;;  %8835 = vst [vmem:[#allocation11_spill] sm:$0xff] %v7481_v30  ;;  %v2857_v4 = vmul.f32 %v8837_v54, %v7457_v61  ;;  %v2944_v34 = vadd.f32 %v8839_v8, %v2924_v58  ;;  %v8840_v44 = vld [vmem:[#allocation62_spill] sm:$0xff]  ;;  %v8843_v28 = vld [vmem:[#allocation9_spill] sm:$0xff]  ;;  %v8847_v58 = vld [vmem:[#allocation52_spill] sm:$0xff] }
 0x492   : > { %v2877_v11 = vmul.f32 %v8840_v44, %v7461_v62  ;;  %v8842_v37 = vld [vmem:[#allocation34_spill] sm:$0xff]  ;;  %v3222_v45 = vadd.f32 %v8843_v28, %v3202_v55  ;;  %v8846_v54 = vld [vmem:[#allocation89_spill] sm:$0xff]  ;;  %v7511_v9 = vmul.f32 %v8847_v58, %v7485_v33  ;;  %v8849_v8 = vld [vmem:[#allocation64_spill] sm:$0xff] }
 0x493   : > { %v3340_v35 = vadd.f32 %v3332_v48, %v3320_v57  ;;  %v3083_v15 = vadd.f32 %v8842_v37, %v3063_v18  ;;  %v8845_v26 = vld [vmem:[#allocation26_spill] sm:$0xff]  ;;  %v7507_v43 = vmul.f32 %v8846_v54, %v7483_v53  ;;  %v7515_v44 = vmul.f32 %v8849_v8, %v7487_v39  ;;  %v8851_v48 = vld [vmem:[#allocation92_spill] sm:$0xff]  ;;  %v8860_v30 = vld [vmem:[#allocation61_spill] sm:$0xff] }
 0x494   : > { %v3121_v32 = vadd.f32 %v8845_v26, %v8844_v49  ;;  %8848 = vst [vmem:[#allocation13_spill] sm:$0xff] %v7511_v9  ;;  %v2976_v18 = vmul.f32 %v8851_v48, %v7455_v31  ;;  %v8852_v55 = vld [vmem:[#allocation68_spill] sm:$0xff]  ;;  %v8853_v26 = vld [vmem:[#allocation90_spill] sm:$0xff] }
 0x495   : > { %8850 = vst [vmem:[#allocation4_spill] sm:$0xff] %v7515_v44  ;;  %v3360_v57 = vadd.f32 %v3352_v42, %v3340_v35  ;;  %v2996_v29 = vmul.f32 %v8852_v55, %v7457_v61  ;;  %v3016_v37 = vmul.f32 %v8853_v26, %v7461_v62  ;;  %v8854_v28 = vld [vmem:[#allocation28_spill] sm:$0xff]  ;;  %v8856_v58 = vld [vmem:[#allocation70_spill] sm:$0xff]  ;;  %v8859_v42 = vld [vmem:[#allocation67_spill] sm:$0xff]  ;;  %v7532_v55 = vadd.f32 %v7427_v16, %v3222_v45 }
 0x496   : > { %v3141_v49 = vadd.f32 %v8854_v28, %v3121_v32  ;;  %v8855_v54 = vld [vmem:[#allocation16_spill] sm:$0xff]  ;;  %v2964_v9 = vadd.f32 %v8856_v58, %v2944_v34  ;;  %v8857_v23 = vld [vmem:[#allocation54_spill] sm:$0xff]  ;;  %v3103_v35 = vadd.f32 %v8859_v42, %v3083_v15  ;;  %v8861_v32 = vld [vmem:[#allocation73_spill] sm:$0xff] }
 0x497   : > { %v2825_v5 = vadd.f32 %v8855_v54, %v2805_v20  ;;  %v3036_v8 = vmul.f32 %v8857_v23, %v7463_v27  ;;  %v8858_v44 = vld [vmem:[#allocation82_spill] sm:$0xff]  ;;  %v3380_v48 = vadd.f32 %v3372_v22, %v3360_v57  ;;  %v7537_v28 = vmul.f32 %v8861_v32, %v7485_v33  ;;  %v8862_v20 = vld [vmem:[#allocation93_spill] sm:$0xff]  ;;  %v8864_v54 = vld [vmem:[#allocation115_spill] sm:$0xff] }
 0x498   : > { %v3056_v17 = vmul.f32 %v8858_v44, %v7483_v53  ;;  %v3161_v26 = vadd.f32 %v8860_v30, %v3141_v49  ;;  %v7541_v34 = vmul.f32 %v8862_v20, %v7487_v39  ;;  %v3115_v58 = vmul.f32 %v8864_v54, %v7455_v31  ;;  %v8865_v22 = vld [vmem:[#allocation76_spill] sm:$0xff]  ;;  %v8867_v30 = vld [vmem:[#allocation85_spill] sm:$0xff] }
 0x499   : > { %v3135_v57 = vmul.f32 %v8865_v22, %v7457_v61  ;;  %v3400_v15 = vadd.f32 %v3392_v12, %v3380_v48  ;;  %v8866_v16 = vld [vmem:[#allocation96_spill] sm:$0xff]  ;;  %v3175_v49 = vmul.f32 %v8867_v30, %v7463_v27  ;;  %v8869_v44 = vld [vmem:[#allocation101_spill] sm:$0xff]  ;;  %v7558_v54 = vmul.f32 %v8822_v21, %v7487_v39 }
 0x49a   : > { %8863 = vst [vmem:[#allocation36_spill] sm:$0xff] %v7541_v34  ;;  %v3155_v45 = vmul.f32 %v8866_v16, %v7461_v62  ;;  %v8868_v42 = vld [vmem:[#allocation40_spill] sm:$0xff]  ;;  %v3195_v23 = vmul.f32 %v8869_v44, %v7483_v53  ;;  %v3253_v12 = vmul.f32 %v8823_v47, %v7308_v7  ;;  %v8871_v16 = vld [vmem:[#allocation122_spill] sm:$0xff]  ;;  %v3254_v30 = vmul.f32 %v8823_v47, %v7455_v31 }
 0x49b   : > { %v3181_v32 = vadd.f32 %v8868_v42, %v3161_v26  ;;  %v8870_v20 = vld [vmem:[#allocation88_spill] sm:$0xff]  ;;  %v3420_v48 = vadd.f32 %v3412_v14, %v3400_v15  ;;  %v3273_v26 = vmul.f32 %v8825_v24, %v7310_v25  ;;  %v7569_v42 = vmul.f32 %v8825_v24, %v7457_v61 }
 0x49c   : > { %v3215_v34 = vmul.f32 %v8870_v20, %v7485_v33  ;;  %v3293_v21 = vmul.f32 %v8755_v0, %v8828_v46  ;;  %v7575_v20 = vmul.f32 %v8755_v0, %v7461_v62  ;;  %v2845_v7 = vadd.f32 %v2837_v60, %v2825_v5 }
 0x49d   : > { %v3201_v22 = vadd.f32 %v8871_v16, %v3181_v32  ;;  %v3440_v14 = vadd.f32 %v3432_v3, %v3420_v48  ;;  %v8873_v32 = vld [vmem:[#allocation42_spill] sm:$0xff]  ;;  %v2984_v16 = vadd.f32 %v2976_v18, %v2964_v9  ;;  %v3123_v47 = vadd.f32 %v3115_v58, %v3103_v35 }
 0x49e   : > { %8872 = vst [vmem:[#allocation44_spill] sm:$0xff] %v7575_v20  ;;  %v3313_v25 = vmul.f32 %v8758_v10, %v7325_v63  ;;  %v7582_v24 = vmul.f32 %v8758_v10, %v7463_v27  ;;  %v3333_v46 = vmul.f32 %v8762_v40, %v8831_v52  ;;  %v2865_v44 = vadd.f32 %v2857_v4, %v2845_v7  ;;  %v8874_v20 = vld [vmem:[#allocation41_spill] sm:$0xff] }
 0x49f   : > { %v3221_v15 = vadd.f32 %v8873_v32, %v3201_v22  ;;  %v3460_v0 = vadd.f32 %v7469_v13, %v3440_v14  ;;  %v3004_v3 = vadd.f32 %v2996_v29, %v2984_v16  ;;  %v3143_v60 = vadd.f32 %v3135_v57, %v3123_v47  ;;  %v8875_v57 = vld [vmem:[#allocation11_spill] sm:$0xff]  ;;  %v7642_v14 = vld [vmem:[#allocation3 + $0xf9] sm:$0xff] }
 0x4a0   : > { %v7590_v9 = vmul.f32 %v8762_v40, %v7483_v53  ;;  %v3353_v63 = vmul.f32 %v8764_v38, %v7337_v36  ;;  %v7596_v18 = vmul.f32 %v8764_v38, %v7485_v33  ;;  %v2885_v35 = vadd.f32 %v2877_v11, %v2865_v44  ;;  %v8881_v32 = vld [vmem:[#allocation25_spill] sm:$0xff] }
 0x4a1   : > { %v3241_v5 = vadd.f32 %v8874_v20, %v3221_v15  ;;  %v3480_v52 = vadd.f32 %v7473_v6, %v3460_v0  ;;  %v3024_v13 = vadd.f32 %v3016_v37, %v3004_v3  ;;  %v3163_v58 = vadd.f32 %v3155_v45, %v3143_v60  ;;  %v7648_v3 = vld [vmem:[#allocation3 + $0xfa] sm:$0xff] }
 0x4a2   : > { %v3373_v47 = vmul.f32 %v8766_v41, %v7339_v50  ;;  %v7603_v29 = vmul.f32 %v8766_v41, %v7487_v39  ;;  %v3393_v36 = vmul.f32 %v8768_v2, %v7455_v31  ;;  %v2905_v20 = vadd.f32 %v7499_v59, %v2885_v35  ;;  %v8884_v35 = vld [vmem:[#allocation68_spill] sm:$0xff] }
 0x4a3   : > { %v3261_v4 = vadd.f32 %v3253_v12, %v3241_v5  ;;  %v3500_v22 = vadd.f32 %v7477_v1, %v3480_v52  ;;  %v3044_v44 = vadd.f32 %v3036_v8, %v3024_v13  ;;  %v3183_v0 = vadd.f32 %v3175_v49, %v3163_v58  ;;  %v7621_v8 = vld [vmem:[#allocation3 + $0xf5] sm:$0xff] }
 0x4a4   : > { %v3413_v6 = vmul.f32 %v8770_v19, %v7457_v61  ;;  %v7613_v50 = vmul.f32 %v8829_v51, %v7461_v62  ;;  %v7617_v37 = vmul.f32 %v8830_v56, %v7463_v27  ;;  %v2925_v31 = vadd.f32 %v7507_v43, %v2905_v20  ;;  %v7623_v49 = vld [vmem:[#allocation3 + $0xf6] sm:$0xff]  ;;  %v8877_v27 = vld [vmem:[#allocation51_spill] sm:$0xff]  ;;  %v8886_v20 = vld [vmem:[#allocation54_spill] sm:$0xff] }
 0x4a5   : > { %v3281_v11 = vadd.f32 %v3273_v26, %v3261_v4  ;;  %v3520_v59 = vadd.f32 %v8875_v57, %v3500_v22  ;;  %v3064_v1 = vadd.f32 %v3056_v17, %v3044_v44  ;;  %v3203_v12 = vadd.f32 %v3195_v23, %v3183_v0  ;;  %v7625_v61 = vld [vmem:[#allocation3 + $0xf7] sm:$0xff]  ;;  %v8885_v4 = vld [vmem:[#allocation90_spill] sm:$0xff] }
 0x4a6   : > { %v8876_v62 = vld [vmem:[#allocation32_spill] sm:$0xff]  ;;  %v7633_v26 = vmul.f32 %v8877_v27, %v7485_v33  ;;  %v8878_v43 = vld [vmem:[#allocation97_spill] sm:$0xff]  ;;  %v2997_v52 = vmul.f32 %v8884_v35, %v7623_v49  ;;  %v3017_v13 = vmul.f32 %v8885_v4, %v7625_v61  ;;  %v3262_v58 = vadd.f32 %v3254_v30, %v7532_v55 }
 0x4a7   : > { %v3301_v45 = vadd.f32 %v3293_v21, %v3281_v11  ;;  %v7629_v48 = vmul.f32 %v8876_v62, %v7483_v53  ;;  %v7637_v7 = vmul.f32 %v8878_v43, %v7487_v39  ;;  %v8880_v21 = vld [vmem:[#allocation13_spill] sm:$0xff]  ;;  %v7645_v15 = vadd.f32 %v8881_v32, %v3520_v59  ;;  %v8883_v39 = vld [vmem:[#allocation92_spill] sm:$0xff]  ;;  %v8887_v11 = vld [vmem:[#allocation82_spill] sm:$0xff] }
 0x4a8   : > { %v2945_v17 = vadd.f32 %v8880_v21, %v2925_v31  ;;  %v7640_v23 = vld [vmem:[#allocation3 + $0xf8] sm:$0xff]  ;;  %v3084_v53 = vadd.f32 %v7537_v28, %v3064_v1  ;;  %v3223_v5 = vadd.f32 %v3215_v34, %v3203_v12  ;;  %v2977_v60 = vmul.f32 %v8883_v39, %v7621_v8  ;;  %v7661_v34 = vld [vmem:[#allocation3 + $0x10d] sm:$0xff] }
 0x4a9   : > { %8879 = vst [vmem:[#allocation37_spill] sm:$0xff] %v7637_v7  ;;  %8882 = vst [vmem:[#allocation7_spill] sm:$0xff] %v7645_v15  ;;  %v3321_v16 = vadd.f32 %v3313_v25, %v3301_v45  ;;  %v7650_v33 = vld [vmem:[#allocation3 + $0xfb] sm:$0xff]  ;;  %v3546_v25 = vsel %vm2396_vm3, %v7645_v15, 0.0  ;;  %v3037_v22 = vmul.f32 %v8886_v20, %v7640_v23  ;;  %v3057_v44 = vmul.f32 %v8887_v11, %v7642_v14  ;;  %v8888_v0 = vld [vmem:[#allocation4_spill] sm:$0xff] }
 0x4aa   : > { %3547 = vadd.xlane.f32.xlu0 %v3546_v25  ;;  %v2965_v31 = vadd.f32 %v8888_v0, %v2945_v17  ;;  %v8889_v57 = vld [vmem:[#allocation36_spill] sm:$0xff]  ;;  %v8890_v45 = vld [vmem:[#allocation73_spill] sm:$0xff]  ;;  %v3282_v30 = vadd.f32 %v7569_v42, %v3262_v58  ;;  %v8899_v11 = vld [vmem:[#allocation91_spill] sm:$0xff] }
 0x4ab   : > { %v3341_v28 = vadd.f32 %v3333_v46, %v3321_v16  ;;  %v3104_v59 = vadd.f32 %v8889_v57, %v3084_v53  ;;  %v3077_v55 = vmul.f32 %v8890_v45, %v7648_v3  ;;  %v3243_v46 = vadd.f32 %v7558_v54, %v3223_v5  ;;  %v8891_v12 = vld [vmem:[#allocation93_spill] sm:$0xff]  ;;  %v8892_v16 = vld [vmem:[#allocation115_spill] sm:$0xff]  ;;  %v8894_v17 = vld [vmem:[#allocation76_spill] sm:$0xff] }
 0x4ac   : > { %v3097_v21 = vmul.f32 %v8891_v12, %v7650_v33  ;;  %v3116_v39 = vmul.f32 %v8892_v16, %v7621_v8  ;;  %v7679_v35 = vmul.f32 %v8892_v16, %v7661_v34  ;;  %v3136_v53 = vmul.f32 %v8894_v17, %v7623_v49  ;;  %v8895_v4 = vld [vmem:[#allocation96_spill] sm:$0xff]  ;;  %v8897_v54 = vld [vmem:[#allocation85_spill] sm:$0xff] }
 0x4ad   : > { %v3361_v1 = vadd.f32 %v3353_v63, %v3341_v28  ;;  %v3156_v25 = vmul.f32 %v8895_v4, %v7625_v61  ;;  %v8896_v42 = vld [vmem:[#allocation44_spill] sm:$0xff]  ;;  %v3176_v5 = vmul.f32 %v8897_v54, %v7640_v23  ;;  %v8898_v28 = vld [vmem:[#allocation101_spill] sm:$0xff]  ;;  %v3255_v0 = vmul.f32 %v8899_v11, %v7621_v8 }
 0x4ae   : > { %8893 = vst [vmem:[#allocation8_spill] sm:$0xff] %v7679_v35  ;;  %v3302_v63 = vadd.f32 %v8896_v42, %v3282_v30  ;;  %v3196_v20 = vmul.f32 %v8898_v28, %v7642_v14  ;;  %v8900_v57 = vld [vmem:[#allocation88_spill] sm:$0xff]  ;;  %v2985_v16 = vadd.f32 %v2977_v60, %v2965_v31  ;;  %v3124_v15 = vadd.f32 %v3116_v39, %v3104_v59 }
 0x4af   : > { %v3381_v58 = vadd.f32 %v3373_v47, %v3361_v1  ;;  %v3216_v45 = vmul.f32 %v8900_v57, %v7648_v3  ;;  %v8901_v30 = vld [vmem:[#allocation48_spill] sm:$0xff]  ;;  %v8902_v1 = vld [vmem:[#allocation105_spill] sm:$0xff]  ;;  %v3263_v54 = vadd.f32 %v3255_v0, %v3243_v46  ;;  %v3256_v28 = vmul.f32 %v8899_v11, %v7661_v34 }
 0x4b0   : > { %v3322_v12 = vadd.f32 %v7582_v24, %v3302_v63  ;;  %v3236_v47 = vmul.f32 %v8901_v30, %v7650_v33  ;;  %v3275_v42 = vmul.f32 %v8902_v1, %v7623_v49  ;;  %v3005_v4 = vadd.f32 %v2997_v52, %v2985_v16  ;;  %v8903_v24 = vld [vmem:[#allocation29_spill] sm:$0xff]  ;;  %v2473_v0 = vld [vmem:[#allocation3 + $0x10e] sm:$0xff] }
 0x4b1   : > { %v3401_v32 = vadd.f32 %v3393_v36, %v3381_v58  ;;  %v3144_v7 = vadd.f32 %v3136_v53, %v3124_v15  ;;  %v3295_v60 = vmul.f32 %v8903_v24, %v7625_v61  ;;  %v3315_v36 = vmul.f32 %v8758_v10, %v7640_v23  ;;  %v2487_v16 = vld [vmem:[#allocation3 + $0x10f] sm:$0xff] }
 0x4b2   : > { %v3342_v35 = vadd.f32 %v7590_v9, %v3322_v12  ;;  %v3283_v31 = vadd.f32 %v3275_v42, %v3263_v54  ;;  %v3335_v59 = vmul.f32 %v8762_v40, %v7642_v14  ;;  %v3025_v39 = vadd.f32 %v3017_v13, %v3005_v4 }
 0x4b3   : > { %v3421_v57 = vadd.f32 %v3413_v6, %v3401_v32  ;;  %v3164_v63 = vadd.f32 %v3156_v25, %v3144_v7  ;;  %v3355_v9 = vmul.f32 %v8764_v38, %v7648_v3  ;;  %v3375_v6 = vmul.f32 %v8766_v41, %v7650_v33 }
 0x4b4   : > { %v3362_v46 = vadd.f32 %v7596_v18, %v3342_v35  ;;  %v3303_v32 = vadd.f32 %v3295_v60, %v3283_v31  ;;  %v3394_v52 = vmul.f32 %v8768_v2, %v7621_v8  ;;  %v3045_v53 = vadd.f32 %v3037_v22, %v3025_v39  ;;  %v8904_v31 = vld [vmem:[#allocation37_spill] sm:$0xff] }
 0x4b5   : > { %v3441_v58 = vadd.f32 %v7613_v50, %v3421_v57  ;;  %v3184_v54 = vadd.f32 %v3176_v5, %v3164_v63  ;;  %v3414_v7 = vmul.f32 %v8770_v19, %v7623_v49  ;;  %v3434_v50 = vmul.f32 %v8829_v51, %v7625_v61  ;;  %v8906_v39 = vld [vmem:[#allocation8_spill] sm:$0xff] }
 0x4b6   : > { %v3382_v15 = vadd.f32 %v7603_v29, %v3362_v46  ;;  %v3323_v13 = vadd.f32 %v3315_v36, %v3303_v32  ;;  %v3454_v4 = vmul.f32 %v8830_v56, %v7640_v23  ;;  %v3065_v25 = vadd.f32 %v3057_v44, %v3045_v53  ;;  %v2529_v53 = vld [vmem:[#allocation3 + $0x112] sm:$0xff] }
 0x4b7   : > { %v3461_v18 = vadd.f32 %v7617_v37, %v3441_v58  ;;  %v3204_v29 = vadd.f32 %v3196_v20, %v3184_v54  ;;  %v3474_v22 = vmul.f32 %v8876_v62, %v7642_v14  ;;  %v3494_v37 = vmul.f32 %v8877_v27, %v7648_v3  ;;  %v2501_v3 = vld [vmem:[#allocation3 + $0x110] sm:$0xff] }
 0x4b8   : > { %v3402_v35 = vadd.f32 %v3394_v52, %v3382_v15  ;;  %v3343_v49 = vadd.f32 %v3335_v59, %v3323_v13  ;;  %v3514_v61 = vmul.f32 %v8878_v43, %v7650_v33  ;;  %v3085_v57 = vadd.f32 %v3077_v55, %v3065_v25  ;;  %v8905_v55 = vld [vmem:[#allocation96_spill] sm:$0xff] }
 0x4b9   : > { %v3481_v8 = vadd.f32 %v7629_v48, %v3461_v18  ;;  %v3224_v12 = vadd.f32 %v3216_v45, %v3204_v29  ;;  %v3137_v20 = vmul.f32 %v8894_v17, %v2473_v0  ;;  %v3395_v48 = vmul.f32 %v8768_v2, %v7661_v34  ;;  %v2515_v58 = vld [vmem:[#allocation3 + $0x111] sm:$0xff] }
 0x4ba   : > { %v3422_v5 = vadd.f32 %v3414_v7, %v3402_v35  ;;  %v3363_v44 = vadd.f32 %v3355_v9, %v3343_v49  ;;  %v3105_v42 = vadd.f32 %v3097_v21, %v3085_v57  ;;  %v3276_v36 = vmul.f32 %v8902_v1, %v2473_v0  ;;  %v8907_v9 = vld [vmem:[#allocation25_spill] sm:$0xff]  ;;  %v8910_v49 = vld [vmem:[#allocation88_spill] sm:$0xff] }
 0x4bb   : > { %v3501_v23 = vadd.f32 %v7633_v26, %v3481_v8  ;;  %v3244_v60 = vadd.f32 %v3236_v47, %v3224_v12  ;;  %v3157_v45 = vmul.f32 %v8905_v55, %v2487_v16  ;;  %v3415_v46 = vmul.f32 %v8770_v19, %v2473_v0  ;;  %v8908_v47 = vld [vmem:[#allocation85_spill] sm:$0xff] }
 0x4bc   : > { %v3442_v14 = vadd.f32 %v3434_v50, %v3422_v5  ;;  %v3383_v33 = vadd.f32 %v3375_v6, %v3363_v44  ;;  %v3125_v63 = vadd.f32 %v8906_v39, %v3105_v42  ;;  %v3296_v34 = vmul.f32 %v8903_v24, %v2487_v16  ;;  %v8909_v50 = vld [vmem:[#allocation101_spill] sm:$0xff] }
 0x4bd   : > { %v3521_v59 = vadd.f32 %v8904_v31, %v3501_v23  ;;  %v3264_v17 = vadd.f32 %v3256_v28, %v3244_v60  ;;  %v3177_v32 = vmul.f32 %v8908_v47, %v2501_v3  ;;  %v3435_v52 = vmul.f32 %v8829_v51, %v2487_v16  ;;  %v2543_v29 = vld [vmem:[#allocation3 + $0x113] sm:$0xff]  ;;  %v2460_v23 = vld [vmem:[#allocation3 + $0x125] sm:$0xff] }
 0x4be   : > { %v3462_v26 = vadd.f32 %v3454_v4, %v3442_v14  ;;  %v3403_v15 = vadd.f32 %v3395_v48, %v3383_v33  ;;  %v3316_v54 = vmul.f32 %v8758_v10, %v2501_v3  ;;  %v3145_v18 = vadd.f32 %v3137_v20, %v3125_v63  ;;  %v2488_v63 = vld [vmem:[#allocation3 + $0x127] sm:$0xff] }
 0x4bf   : > { %v7742_v21 = vadd.f32 %v8907_v9, %v3521_v59  ;;  %v3284_v7 = vadd.f32 %v3276_v36, %v3264_v17  ;;  %v3197_v13 = vmul.f32 %v8909_v50, %v2515_v58  ;;  %v3455_v4 = vmul.f32 %v8830_v56, %v2501_v3  ;;  %v2474_v59 = vld [vmem:[#allocation3 + $0x126] sm:$0xff] }
 0x4c0   : > { %v3482_v6 = vadd.f32 %v3474_v22, %v3462_v26  ;;  %v3423_v35 = vadd.f32 %v3415_v46, %v3403_v15  ;;  %v3336_v0 = vmul.f32 %v8762_v40, %v2515_v58  ;;  %v3165_v8 = vadd.f32 %v3157_v45, %v3145_v18  ;;  %v2516_v18 = vld [vmem:[#allocation3 + $0x129] sm:$0xff] }
 0x4c1   : > { %v3549_v28 = vsel %vm2396_vm3, %v7742_v21, 0.0  ;;  %v3304_v22 = vadd.f32 %v3296_v34, %v3284_v7  ;;  %v3217_v5 = vmul.f32 %v8910_v49, %v2529_v53  ;;  %v3475_v12 = vmul.f32 %v8876_v62, %v2515_v58 }
 0x4c2   : > { %3550 = vadd.xlane.f32.xlu1 %v3549_v28  ;;  %v3502_v25 = vadd.f32 %v3494_v37, %v3482_v6  ;;  %v3443_v57 = vadd.f32 %v3435_v52, %v3423_v35  ;;  %v3356_v44 = vmul.f32 %v8764_v38, %v2529_v53  ;;  %v3185_v20 = vadd.f32 %v3177_v32, %v3165_v8  ;;  %v2502_v32 = vld [vmem:[#allocation3 + $0x128] sm:$0xff] }
 0x4c3   : > { %v3324_v48 = vadd.f32 %v3316_v54, %v3304_v22  ;;  %v3237_v14 = vmul.f32 %v8901_v30, %v2543_v29  ;;  %v3495_v37 = vmul.f32 %v8877_v27, %v2529_v53  ;;  %v3376_v3 = vmul.f32 %v8766_v41, %v2543_v29  ;;  %v2530_v35 = vld [vmem:[#allocation3 + $0x12a] sm:$0xff] }
 0x4c4   : > { %v3522_v16 = vadd.f32 %v3514_v61, %v3502_v25  ;;  %v3463_v42 = vadd.f32 %v3455_v4, %v3443_v57  ;;  %v3205_v36 = vadd.f32 %v3197_v13, %v3185_v20  ;;  %v3257_v61 = vmul.f32 %v8899_v11, %v2460_v23 }
 0x4c5   : > { %v3344_v31 = vadd.f32 %v3336_v0, %v3324_v48  ;;  %v3515_v55 = vmul.f32 %v8878_v43, %v2543_v29  ;;  %v3396_v30 = vmul.f32 %v8768_v2, %v2460_v23  ;;  %v3277_v17 = vmul.f32 %v8902_v1, %v2474_v59  ;;  %v2544_v0 = vld [vmem:[#allocation3 + $0x12b] sm:$0xff] }
 0x4c6   : > { %v7758_v60 = vadd.f32 %v8907_v9, %v3522_v16  ;;  %v3483_v33 = vadd.f32 %v3475_v12, %v3463_v42  ;;  %v3225_v46 = vadd.f32 %v3217_v5, %v3205_v36  ;;  %v3416_v47 = vmul.f32 %v8770_v19, %v2474_v59  ;;  %v2461_v5 = vld [vmem:[#allocation3 + $0x13d] sm:$0xff] }
 0x4c7   : > { %v3364_v26 = vadd.f32 %v3356_v44, %v3344_v31  ;;  %v3297_v6 = vmul.f32 %v8903_v24, %v2488_v63  ;;  %v3436_v53 = vmul.f32 %v8829_v51, %v2488_v63  ;;  %v3317_v28 = vmul.f32 %v8758_v10, %v2502_v32  ;;  %v2475_v44 = vld [vmem:[#allocation3 + $0x13e] sm:$0xff] }
 0x4c8   : > { %v3552_v45 = vsel %vm2396_vm3, %v7758_v60, 0.0  ;;  %v3503_v39 = vadd.f32 %v3495_v37, %v3483_v33  ;;  %v3245_v58 = vadd.f32 %v3237_v14, %v3225_v46  ;;  %v3456_v50 = vmul.f32 %v8830_v56, %v2502_v32  ;;  %v2489_v14 = vld [vmem:[#allocation3 + $0x13f] sm:$0xff] }
 0x4c9   : > { %3553 = vadd.xlane.f32.xlu0 %v3552_v45  ;;  %v3384_v34 = vadd.f32 %v3376_v3, %v3364_v26  ;;  %v3337_v4 = vmul.f32 %v8762_v40, %v2516_v18  ;;  %v3476_v25 = vmul.f32 %v8876_v62, %v2516_v18  ;;  %v3357_v8 = vmul.f32 %v8764_v38, %v2530_v35  ;;  %v2503_v3 = vld [vmem:[#allocation3 + $0x140] sm:$0xff] }
 0x4ca   : > { %v3523_v11 = vadd.f32 %v3515_v55, %v3503_v39  ;;  %v3265_v15 = vadd.f32 %v3257_v61, %v3245_v58  ;;  %v3496_v10 = vmul.f32 %v8877_v27, %v2530_v35  ;;  %v3377_v57 = vmul.f32 %v8766_v41, %v2544_v0  ;;  %v2517_v59 = vld [vmem:[#allocation3 + $0x141] sm:$0xff] }
 0x4cb   : > { %v3404_v52 = vadd.f32 %v3396_v30, %v3384_v34  ;;  %v3516_v16 = vmul.f32 %v8878_v43, %v2544_v0  ;;  %v3397_v40 = vmul.f32 %v8768_v2, %v2461_v5  ;;  %v3417_v38 = vmul.f32 %v8770_v19, %v2475_v44  ;;  %v2531_v2 = vld [vmem:[#allocation3 + $0x142] sm:$0xff] }
 0x4cc   : > { %v7771_v54 = vadd.f32 %v8907_v9, %v3523_v11  ;;  %v3285_v7 = vadd.f32 %v3277_v17, %v3265_v15  ;;  %v3437_v41 = vmul.f32 %v8829_v51, %v2489_v14  ;;  %v3457_v55 = vmul.f32 %v8830_v56, %v2503_v3  ;;  %v2545_v46 = vld [vmem:[#allocation3 + $0x143] sm:$0xff] }
 0x4cd   : > { %v3424_v1 = vadd.f32 %v3416_v47, %v3404_v52  ;;  %v3477_v30 = vmul.f32 %v8876_v62, %v2517_v59  ;;  %v3497_v19 = vmul.f32 %v8877_v27, %v2531_v2  ;;  %v3517_v63 = vmul.f32 %v8878_v43, %v2545_v46  ;;  %v8911_v11 = vld [vmem:[#allocation27_spill] sm:$0xff] }
 0x4ce   : > { %v3555_v13 = vsel %vm2396_vm3, %v7771_v54, 0.0  ;;  %v3305_v29 = vadd.f32 %v3297_v6, %v3285_v7  ;;  %v8912_v6 = vld [vmem:[#allocation10_spill] sm:$0xff] }
 0x4cf   : > { %3556 = vadd.xlane.f32.xlu1 %v3555_v13  ;;  %v3444_v24 = vadd.f32 %v3436_v53, %v3424_v1 }
 0x4d0   : > { %v3325_v49 = vadd.f32 %v3317_v28, %v3305_v29  ;;  %v8913_v28 = vld [vmem:[#allocation7_spill] sm:$0xff] }
 0x4d1   : > { %v3464_v22 = vadd.f32 %v3456_v50, %v3444_v24 }
 0x4d2   : > { %v3345_v23 = vadd.f32 %v3337_v4, %v3325_v49 }
 0x4d3   : > { %v3484_v12 = vadd.f32 %v3476_v25, %v3464_v22 }
 0x4d4   : > { %v3365_v48 = vadd.f32 %v3357_v8, %v3345_v23 }
 0x4d5   : > { %v3504_v20 = vadd.f32 %v3496_v10, %v3484_v12 }
 0x4d6   : > { %v3385_v37 = vadd.f32 %v3377_v57, %v3365_v48 }
 0x4d7   : > { %v3524_v42 = vadd.f32 %v3516_v16, %v3504_v20 }
 0x4d8   : > { %v3405_v31 = vadd.f32 %v3397_v40, %v3385_v37 }
 0x4d9   : > { %v3538_v36 = vadd.f32 %v8907_v9, %v3524_v42 }
 0x4da   : > { %v3425_v33 = vadd.f32 %v3417_v38, %v3405_v31  ;;  %v2389_v38 = vld [vmem:[%s7942_s16] sm:$0xf] }
 0x4db   : > { %v3558_v61 = vsel %vm2396_vm3, %v3538_v36, 0.0  ;;  %4279 = vmatprep.subr.msk.bf16.mxu1 %vm3695_vm4, %v2389_v38  ;;  %v3697_v3 = vsel %vm3695_vm4, %v2389_v38, 0 }
 0x4dc   : > { %3559 = vadd.xlane.f32.xlu0 %v3558_v61  ;;  %v3445_v45 = vadd.f32 %v3437_v41, %v3425_v33  ;;  %4252 = vmatpush3.bf16.msra.mxu1 %v3697_v3 }
 0x4de   : > { %v3465_v26 = vadd.f32 %v3457_v55, %v3445_v45  ;;  %v4167_v45 = vld [vmem:[%s7940_s14] ss:$0 sm:$0xff] }
 0x4e0   : > { %v3485_v39 = vadd.f32 %v3477_v30, %v3465_v26 }
 0x4e2   : > { %v3505_v17 = vadd.f32 %v3497_v19, %v3485_v39  ;;  %v4168_v19 = vld [vmem:[%s7941_s15] ss:$0 sm:$0xff] }
 0x4e4   : > { %v3525_v51 = vadd.f32 %v3517_v63, %v3505_v17 }
 0x4e6   : > { %v3539_v58 = vadd.f32 %v8907_v9, %v3525_v51 }
 0x4e8   : > { %v3561_v34 = vsel %vm2396_vm3, %v3539_v58, 0.0 }
 0x4e9   : > { %3562 = vadd.xlane.f32.xlu1 %v3561_v34 }
 0x4fe   : > { %v3542_v56 = vpop.xlane.xlu0 %3541 }
 0x4ff   : > { %v3565_v47 = vmul.f32 0.125, %v3542_v56 }
 0x501   : > { %v3573_v32 = vsub.f32 %v8911_v11, %v3565_v47 }
 0x503   : > { %v3581_v15 = vmul.f32 %v3573_v32, %v3573_v32 }
 0x505   : > { %v3589_v62 = vsel %vm2396_vm3, %v3581_v15, 0.0 }
 0x506   : > { %3590 = vadd.xlane.f32.xlu0 %v3589_v62 }
 0x518   : > { %v3545_v52 = vpop.xlane.xlu1 %3544 }
 0x519   : > { %v3566_v27 = vmul.f32 0.125, %v3545_v52 }
 0x51b   : > { %v3574_v53 = vsub.f32 %v8912_v6, %v3566_v27 }
 0x51d   : > { %v3582_v43 = vmul.f32 %v3574_v53, %v3574_v53 }
 0x51f   : > { %v3592_v18 = vsel %vm2396_vm3, %v3582_v43, 0.0 }
 0x520   : > { %3593 = vadd.xlane.f32.xlu1 %v3592_v18 }
 0x533   : > { %v3548_v9 = vpop.xlane.xlu0 %3547 }
 0x534   : > { %v3567_v7 = vmul.f32 0.125, %v3548_v9 }
 0x536   : > { %v7799_v1 = vsub.f32 %v8913_v28, %v3567_v7 }
 0x538   : > { %v3583_v50 = vmul.f32 %v7799_v1, %v7799_v1 }
 0x53a   : > { %v3595_v13 = vsel %vm2396_vm3, %v3583_v50, 0.0 }
 0x53b   : > { %3596 = vadd.xlane.f32.xlu0 %v3595_v13 }
 0x54b   : > { %v3551_v35 = vpop.xlane.xlu1 %3550 }
 0x54c   : > { %v3568_v4 = vmul.f32 0.125, %v3551_v35 }
 0x54e   : > { %v7805_v24 = vsub.f32 %v7742_v21, %v3568_v4 }
 0x550   : > { %v3584_v25 = vmul.f32 %v7805_v24, %v7805_v24 }
 0x552   : > { %v3554_v29 = vpop.xlane.xlu0 %3553  ;;  %v3598_v0 = vsel %vm2396_vm3, %v3584_v25, 0.0 }
 0x553   : > { %v3569_v8 = vmul.f32 0.125, %v3554_v29  ;;  %3599 = vadd.xlane.f32.xlu1 %v3598_v0 }
 0x555   : > { %v7811_v22 = vsub.f32 %v7758_v60, %v3569_v8 }
 0x557   : > { %v3585_v10 = vmul.f32 %v7811_v22, %v7811_v22 }
 0x558   : > { %v3557_v49 = vpop.xlane.xlu1 %3556 }
 0x559   : > { %v3601_v5 = vsel %vm2396_vm3, %v3585_v10, 0.0  ;;  %v3570_v57 = vmul.f32 0.125, %v3557_v49 }
 0x55a   : > { %3602 = vadd.xlane.f32.xlu0 %v3601_v5 }
 0x55b   : > { %v7817_v21 = vsub.f32 %v7771_v54, %v3570_v57 }
 0x55d   : > { %v3586_v12 = vmul.f32 %v7817_v21, %v7817_v21 }
 0x55f   : > { %v3604_v16 = vsel %vm2396_vm3, %v3586_v12, 0.0 }
 0x560   : > { %3605 = vadd.xlane.f32.xlu1 %v3604_v16 }
 0x565   : > { %v3560_v23 = vpop.xlane.xlu0 %3559 }
 0x566   : > { %v3571_v60 = vmul.f32 0.125, %v3560_v23 }
 0x568   : > { %v7822_v44 = vsub.f32 %v3538_v36, %v3571_v60 }
 0x56a   : > { %v3587_v40 = vmul.f32 %v7822_v44, %v7822_v44 }
 0x56c   : > { %v3607_v20 = vsel %vm2396_vm3, %v3587_v40, 0.0 }
 0x56d   : > { %3608 = vadd.xlane.f32.xlu0 %v3607_v20 }
 0x572   : > { %v3563_v48 = vpop.xlane.xlu1 %3562 }
 0x573   : > { %v3572_v14 = vmul.f32 0.125, %v3563_v48 }
 0x575   : > { %v7827_v54 = vsub.f32 %v3539_v58, %v3572_v14 }
 0x577   : > { %v3588_v42 = vmul.f32 %v7827_v54, %v7827_v54 }
 0x579   : > { %v3610_v37 = vsel %vm2396_vm3, %v3588_v42, 0.0 }
 0x57a   : > { %3611 = vadd.xlane.f32.xlu1 %v3610_v37 }
 0x58f   : > { %v3591_v36 = vpop.xlane.xlu0 %3590 }
 0x590   : > { %v3613_v31 = vmul.f32 0.125, %v3591_v36  ;;  %v4292_v36 = vld [vmem:[%s7944_s18 + $0x8] sm:$0xff]  }
 0x591   : > { %4261 = vmatprep.subr.bf16.mxu0 %v4292_v36 }
 0x592   : > { %v3621_v41 = vadd.f32 1e-06, %v3613_v31  ;;  %v4293_v31 = vld [vmem:[%s7944_s18] sm:$0xff]   ;;  %4262 = vmatpush3.bf16.msra.mxu0 %v4292_v36 }
 0x593   : > { %4263 = vmatprep.subr.bf16.mxu0 %v4293_v31 }
 0x594   : > { %4328 = vrsqrt.f32 %v3621_v41 }
 0x596   : > { %4264 = vmatpush3.bf16.msra.mxu0 %v4293_v31 }
 0x5a1   : > { %v4329_v55 = vpop.eup %4328 }
 0x5a2   : > { %v3637_v2 = vmul.f32 %v4329_v55, %v3573_v32 }
 0x5a4   : > { %v3651_v26 = vmul.f32 %v4167_v45, %v3637_v2 }
 0x5a6   : > { %v3665_v63 = vadd.f32 %v4168_v19, %v3651_v26 }
 0x5a9   : > { %v3594_v59 = vpop.xlane.xlu1 %3593 }
 0x5aa   : > { %v3614_v61 = vmul.f32 0.125, %v3594_v59 }
 0x5ac   : > { %v3622_v33 = vadd.f32 1e-06, %v3614_v61  ;;  %v7867_v61 = vld [vmem:[%s7943_s17] ss:$0 sm:$0xff] }
 0x5ae   : > { %4330 = vrsqrt.f32 %v3622_v33 }
 0x5bb   : > { %v4331_v30 = vpop.eup %4330 }
 0x5bc   : > { %v3638_v46 = vmul.f32 %v4331_v30, %v3574_v53 }
 0x5be   : > { %v3652_v39 = vmul.f32 %v4167_v45, %v3638_v46 }
 0x5c0   : > { %v3666_v17 = vadd.f32 %v4168_v19, %v3652_v39 }
 0x5c2   : > { %v3673_v51 = vpack.c.bf16 %v3666_v17, %v3665_v63 }
 0x5c4   : > { %4253 = vmatprep.mubr.msk.bf16.mxu1 %vm2396_vm3, %v3673_v51  ;;  %v3597_v58 = vpop.xlane.xlu0 %3596 }
 0x5c5   : > { %v3615_v34 = vmul.f32 0.125, %v3597_v58 }
 0x5c7   : > { %v3623_v56 = vadd.f32 1e-06, %v3615_v34 }
 0x5c9   : > { %4332 = vrsqrt.f32 %v3623_v56 }
 0x5d6   : > { %v4333_v27 = vpop.eup %4332 }
 0x5d7   : > { %v3639_v53 = vmul.f32 %v4333_v27, %v7799_v1 }
 0x5d9   : > { %v3653_v28 = vmul.f32 %v4167_v45, %v3639_v53 }
 0x5db   : > { %v3667_v13 = vadd.f32 %v4168_v19, %v3653_v28 }
 0x5dc   : > { %v3600_v47 = vpop.xlane.xlu1 %3599 }
 0x5dd   : > { %v3616_v11 = vmul.f32 0.125, %v3600_v47 }
 0x5df   : > { %v3624_v32 = vadd.f32 1e-06, %v3616_v11 }
 0x5e1   : > { %4334 = vrsqrt.f32 %v3624_v32 }
 0x5e3   : > { %v3603_v15 = vpop.xlane.xlu0 %3602 }
 0x5e4   : > { %v3617_v62 = vmul.f32 0.125, %v3603_v15 }
 0x5e6   : > { %v3625_v52 = vadd.f32 1e-06, %v3617_v62 }
 0x5e8   : > { %4336 = vrsqrt.f32 %v3625_v52 }
 0x5e9   : > { %v3606_v6 = vpop.xlane.xlu1 %3605 }
 0x5ea   : > { %v3618_v43 = vmul.f32 0.125, %v3606_v6 }
 0x5ec   : > { %v3626_v18 = vadd.f32 1e-06, %v3618_v43 }
 0x5ee   : > { %v4335_v9 = vpop.eup %4334  ;;  %4338 = vrsqrt.f32 %v3626_v18 }
 0x5ef   : > { %v3640_v7 = vmul.f32 %v4335_v9, %v7805_v24 }
 0x5f1   : > { %v3654_v50 = vmul.f32 %v4167_v45, %v3640_v7 }
 0x5f3   : > { %v3668_v35 = vadd.f32 %v4168_v19, %v3654_v50 }
 0x5f5   : > { %v4337_v4 = vpop.eup %4336  ;;  %v3674_v25 = vpack.c.bf16 %v3668_v35, %v3667_v13 }
 0x5f6   : > { %v3609_v29 = vpop.xlane.xlu0 %3608  ;;  %v3641_v0 = vmul.f32 %v4337_v4, %v7811_v22 }
 0x5f7   : > { %4254 = vmatmul.mubr.msk.bf16.vlgmr.msra.gmra.mxu1 %vm2396_vm3, %v3674_v25  ;;  %v3619_v8 = vmul.f32 0.125, %v3609_v29 }
 0x5f8   : > { %v3655_v10 = vmul.f32 %v4167_v45, %v3641_v0 }
 0x5f9   : > { %v3627_v5 = vadd.f32 1e-06, %v3619_v8 }
 0x5fa   : > { %v3669_v24 = vadd.f32 %v4168_v19, %v3655_v10 }
 0x5fb   : > { %v4339_v1 = vpop.eup %4338  ;;  %4340 = vrsqrt.f32 %v3627_v5 }
 0x5fc   : > { %v3642_v49 = vmul.f32 %v4339_v1, %v7817_v21 }
 0x5fe   : > { %v3656_v57 = vmul.f32 %v4167_v45, %v3642_v49 }
 0x600   : > { %v3670_v12 = vadd.f32 %v4168_v19, %v3656_v57 }
 0x602   : > { %v3675_v16 = vpack.c.bf16 %v3670_v12, %v3669_v24 }
 0x603   : > { %v3612_v23 = vpop.xlane.xlu1 %3611 }
 0x604   : > { %4257 = vmatprep.mubr.msk.bf16.mxu1 %vm2396_vm3, %v3675_v16  ;;  %v3620_v60 = vmul.f32 0.125, %v3612_v23 }
 0x606   : > { %v3628_v40 = vadd.f32 1e-06, %v3620_v60 }
 0x608   : > { %4342 = vrsqrt.f32 %v3628_v40  ;;  %v4341_v20 = vpop.eup %4340 }
 0x609   : > { %v3643_v22 = vmul.f32 %v4341_v20, %v7822_v44  ;;  %v3943_v44 = vld [vmem:[%s7946_s20] sm:$0xff] }
 0x60a   : > { %v4181_v41 = vcombine.low %v3943_v44, %v3943_v44 }
 0x60b   : > { %v3657_v48 = vmul.f32 %v4167_v45, %v3643_v22 }
 0x60c   : > { %v3978_v59 = vsel %vm3695_vm4, %v4181_v41, 0 }
 0x60d   : > { %v3671_v37 = vadd.f32 %v4168_v19, %v3657_v48 }
 0x615   : > { %v4343_v14 = vpop.eup %4342 }
 0x616   : > { %v3644_v42 = vmul.f32 %v4343_v14, %v7827_v54  ;;  %v4182_v54 = vcombine.high %v3943_v44, %v3943_v44 }
 0x618   : > { %v3658_v21 = vmul.f32 %v4167_v45, %v3644_v42  ;;  %4183 = vmatprep.subr.msk.bf16.mxu1 %vm3695_vm4, %v4182_v54 }
 0x619   : > { %3998 = vmatpush1.bf16.msra.mxu1 %v3978_v59 }
 0x61a   : > { %v3672_v38 = vadd.f32 %v4168_v19, %v3658_v21 }
 0x61c   : > { %v3676_v3 = vpack.c.bf16 %v3672_v38, %v3671_v37 }
 0x61e   : > { %4258 = vmatmul.mubr.msk.bf16.gmra.mxu1 %vm2396_vm3, %v3676_v3 }
 0x6b7   : > { %v4255_v33 = vpop.f32.mrf.mxu1 }
 0x6b8   : > { %v3742_v55 = vadd.f32 %v4255_v33, %v7867_v61 }
 0x6b9   : > { %v3733_v2 = vpop.f32.mrf.mxu1 }
 0x6ba   : > { %v3766_v45 = vmul.f32 %v3742_v55, %v3742_v55  ;;  %v3734_v30 = vadd.f32 %v7867_v61, %v3733_v2 }
 0x6bb   : > { %v4256_v46 = vpop.f32.mrf.mxu1 }
 0x6bc   : > { %v3774_v26 = vmul.f32 %v3766_v45, %v3742_v55  ;;  %v3764_v19 = vmul.f32 %v3734_v30, %v3734_v30  ;;  %v3745_v39 = vadd.f32 %v4256_v46, %v7867_v61 }
 0x6bd   : > { %v3736_v63 = vpop.f32.mrf.mxu1 }
 0x6be   : > { %v3782_v17 = vmul.f32 0.044715, %v3774_v26  ;;  %v3772_v51 = vmul.f32 %v3764_v19, %v3734_v30  ;;  %v3767_v58 = vmul.f32 %v3745_v39, %v3745_v39  ;;  %v3737_v34 = vadd.f32 %v7867_v61, %v3736_v63 }
 0x6c0   : > { %v3790_v56 = vadd.f32 %v3782_v17, %v3742_v55  ;;  %v3780_v47 = vmul.f32 0.044715, %v3772_v51  ;;  %v3775_v11 = vmul.f32 %v3767_v58, %v3745_v39  ;;  %v3765_v32 = vmul.f32 %v3737_v34, %v3737_v34 }
 0x6c2   : > { %v3798_v15 = vmul.f32 0.7978846, %v3790_v56  ;;  %v3788_v62 = vadd.f32 %v3780_v47, %v3734_v30  ;;  %v3783_v52 = vmul.f32 0.044715, %v3775_v11  ;;  %v3773_v27 = vmul.f32 %v3765_v32, %v3737_v34 }
 0x6c4   : > { %v3796_v6 = vmul.f32 0.7978846, %v3788_v62  ;;  %v3791_v53 = vadd.f32 %v3783_v52, %v3745_v39  ;;  %v3781_v43 = vmul.f32 0.044715, %v3773_v27  ;;  %4344 = vtanh.f32 %v3798_v15 }
 0x6c6   : > { %4346 = vtanh.f32 %v3796_v6  ;;  %v3799_v18 = vmul.f32 0.7978846, %v3791_v53  ;;  %v3789_v9 = vadd.f32 %v3781_v43, %v3737_v34 }
 0x6c8   : > { %4348 = vtanh.f32 %v3799_v18  ;;  %v3797_v7 = vmul.f32 0.7978846, %v3789_v9 }
 0x6ca   : > { %4350 = vtanh.f32 %v3797_v7 }
 0x6d1   : > { %v4345_v28 = vpop.eup %4344 }
 0x6d2   : > { %v3814_v4 = vadd.f32 1.0, %v4345_v28  ;;  %v4369_v28 = vmov 0  }
 0x6d3   : > { %v4347_v50 = vpop.eup %4346  ;;  %4015 = vmatprep.mubr.bf16.mxu1 %v4369_v28 }
 0x6d4   : > { %v3812_v13 = vadd.f32 1.0, %v4347_v50  ;;  %v3822_v1 = vmul.f32 0.5, %v3814_v4 }
 0x6d5   : > { %v4349_v35 = vpop.eup %4348 }
 0x6d6   : > { %v3815_v25 = vadd.f32 1.0, %v4349_v35  ;;  %v3820_v0 = vmul.f32 0.5, %v3812_v13  ;;  %v3830_v12 = vmul.f32 %v3822_v1, %v3742_v55  ;;  %v4174_v35 = vld [vmem:[%s7945_s19] ss:$0 sm:$0xff] }
 0x6d7   : > { %v4351_v29 = vpop.eup %4350  ;;  %v8915_v1 = vld [vmem:[#allocation100_spill] sm:$0xff] }
 0x6d8   : > { %v3823_v8 = vmul.f32 0.5, %v3815_v25  ;;  %v3813_v10 = vadd.f32 1.0, %v4351_v29  ;;  %v3828_v57 = vmul.f32 %v3820_v0, %v3734_v30 }
 0x6da   : > { %v3821_v49 = vmul.f32 0.5, %v3813_v10  ;;  %v3831_v5 = vmul.f32 %v3823_v8, %v3745_v39  ;;  %v8914_v8 = vld [vmem:[#allocation45_spill] sm:$0xff] }
 0x6dc   : > { %v3829_v24 = vmul.f32 %v3821_v49, %v3737_v34  ;;  %v3837_v23 = vpack.c.bf16 %v3831_v5, %v3830_v12  ;;  %v8916_v12 = vld [vmem:[#allocation95_spill] sm:$0xff] }
 0x6de   : > { %v3836_v16 = vpack.c.bf16 %v3829_v24, %v3828_v57  ;;  %v4259_v60 = vpop.f32.mrf.mxu1 }
 0x6df   : > { %v3758_v40 = vadd.f32 %v4259_v60, %v7867_v61 }
 0x6e0   : > { %4265 = vmatprep.mubr.msk.bf16.mxu0 %vm2203_vm2, %v3836_v16  ;;  %v3749_v20 = vpop.f32.mrf.mxu1 }
 0x6e1   : > { %4266 = vmatmul.mubr.msk.bf16.vlgmr.msra.gmra.mxu0 %vm2203_vm2, %v3837_v23  ;;  %v3770_v22 = vmul.f32 %v3758_v40, %v3758_v40  ;;  %v3750_v48 = vadd.f32 %v7867_v61, %v3749_v20  ;;  %v8917_v23 = vld [vmem:[#allocation87_spill] sm:$0xff] }
 0x6e2   : > { %v4260_v14 = vpop.f32.mrf.mxu1 }
 0x6e3   : > { %v3778_v42 = vmul.f32 %v3770_v22, %v3758_v40  ;;  %v3768_v21 = vmul.f32 %v3750_v48, %v3750_v48  ;;  %v3761_v37 = vadd.f32 %v4260_v14, %v7867_v61 }
 0x6e4   : > { %v3752_v38 = vpop.f32.mrf.mxu1 }
 0x6e5   : > { %v3786_v3 = vmul.f32 0.044715, %v3778_v42  ;;  %v3776_v36 = vmul.f32 %v3768_v21, %v3750_v48  ;;  %v3771_v31 = vmul.f32 %v3761_v37, %v3761_v37  ;;  %v3753_v44 = vadd.f32 %v7867_v61, %v3752_v38 }
 0x6e7   : > { %v3794_v54 = vadd.f32 %v3786_v3, %v3758_v40  ;;  %v3784_v41 = vmul.f32 0.044715, %v3776_v36  ;;  %v3779_v59 = vmul.f32 %v3771_v31, %v3761_v37  ;;  %v3769_v33 = vmul.f32 %v3753_v44, %v3753_v44  ;;  %v8919_v3 = vld [vmem:[#allocation106_spill] sm:$0xff] }
 0x6e9   : > { %v3802_v55 = vmul.f32 0.7978846, %v3794_v54  ;;  %v3792_v2 = vadd.f32 %v3784_v41, %v3750_v48  ;;  %v3787_v45 = vmul.f32 0.044715, %v3779_v59  ;;  %v3777_v30 = vmul.f32 %v3769_v33, %v3753_v44  ;;  %v8920_v41 = vld [vmem:[#allocation124_spill] sm:$0xff]  ;;  %v8921_v33 = vld [vmem:[#allocation81_spill] sm:$0xff] }
 0x6eb   : > { %v3800_v46 = vmul.f32 0.7978846, %v3792_v2  ;;  %v3795_v26 = vadd.f32 %v3787_v45, %v3761_v37  ;;  %v3785_v19 = vmul.f32 0.044715, %v3777_v30  ;;  %4352 = vtanh.f32 %v3802_v55  ;;  %v3944_v45 = vld [vmem:[%s7947_s21] sm:$0x3] }
 0x6ec   : > { %v8922_v30 = vld [vmem:[#allocation5_spill] sm:$0xff] }
 0x6ed   : > { %4354 = vtanh.f32 %v3800_v46  ;;  %v3803_v39 = vmul.f32 0.7978846, %v3795_v26  ;;  %v3793_v63 = vadd.f32 %v3785_v19, %v3753_v44  ;;  %v3953_v46 = vrot.slane %v3944_v45, %v8922_v30  ;;  %v8923_v26 = vld [vmem:[#allocation6_spill] sm:$0xff] }
 0x6ee   : > { %v3957_v19 = vrot.slane %v3944_v45, %v8923_v26 }
 0x6ef   : > { %4356 = vtanh.f32 %v3803_v39  ;;  %v3801_v17 = vmul.f32 0.7978846, %v3793_v63 }
 0x6f1   : > { %4358 = vtanh.f32 %v3801_v17 }
 0x6f8   : > { %v4353_v51 = vpop.eup %4352 }
 0x6f9   : > { %v3818_v56 = vadd.f32 1.0, %v4353_v51 }
 0x6fa   : > { %v4355_v61 = vpop.eup %4354 }
 0x6fb   : > { %v3816_v58 = vadd.f32 1.0, %v4355_v61  ;;  %v3826_v52 = vmul.f32 0.5, %v3818_v56 }
 0x6fc   : > { %v4357_v34 = vpop.eup %4356 }
 0x6fd   : > { %v3819_v47 = vadd.f32 1.0, %v4357_v34  ;;  %v3824_v32 = vmul.f32 0.5, %v3816_v58  ;;  %v3834_v18 = vmul.f32 %v3826_v52, %v3758_v40 }
 0x6fe   : > { %v4359_v11 = vpop.eup %4358 }
 0x6ff   : > { %v3827_v15 = vmul.f32 0.5, %v3819_v47  ;;  %v3817_v62 = vadd.f32 1.0, %v4359_v11  ;;  %v3832_v53 = vmul.f32 %v3824_v32, %v3750_v48 }
 0x701   : > { %v3825_v27 = vmul.f32 0.5, %v3817_v62  ;;  %v3835_v6 = vmul.f32 %v3827_v15, %v3761_v37  ;;  %v8918_v37 = vld [vmem:[#allocation109_spill] sm:$0xff] }
 0x703   : > { %v3833_v43 = vmul.f32 %v3825_v27, %v3753_v44  ;;  %v3839_v7 = vpack.c.bf16 %v3835_v6, %v3834_v18 }
 0x705   : > { %v3838_v9 = vpack.c.bf16 %v3833_v43, %v3832_v53 }
 0x707   : > { %4269 = vmatprep.mubr.msk.bf16.mxu0 %vm2203_vm2, %v3838_v9 }
 0x708   : > { %4270 = vmatmul.mubr.msk.bf16.gmra.mxu0 %vm2203_vm2, %v3839_v7 }
 0x7a1   : > { %v4267_v50 = vpop.f32.mrf.mxu0 }
 0x7a2   : > { %v3913_v24 = vadd.f32 %v4267_v50, %v4174_v35 }
 0x7a3   : > { %v3904_v13 = vpop.f32.mrf.mxu0 }
 0x7a4   : > { %v3905_v25 = vadd.f32 %v4174_v35, %v3904_v13  ;;  %v3937_v60 = vadd.f32 %v3913_v24, %v8917_v23 }
 0x7a5   : > { %v4268_v4 = vpop.f32.mrf.mxu0 }
 0x7a6   : > { %v3935_v10 = vadd.f32 %v3905_v25, %v8914_v8  ;;  %v3916_v5 = vadd.f32 %v4268_v4, %v4174_v35 }
 0x7a7   : > { %v3907_v29 = vpop.f32.mrf.mxu0 }
 0x7a8   : > { %v3908_v0 = vadd.f32 %v4174_v35, %v3907_v29  ;;  %v3938_v16 = vadd.f32 %v3916_v5, %v8916_v12 }
 0x7aa   : > { %v3936_v49 = vadd.f32 %v3908_v0, %v8915_v1  ;;  %v3946_v40 = vpack.c.bf16 %v3938_v16, %v3937_v60 }
 0x7ac   : > { %v3945_v57 = vpack.c.bf16 %v3936_v49, %v3935_v10 }
 0x7ae   : > { %4184 = vmatmul.mubr.msk.bf16.vlgmr.msra.gmra.mxu1 %vm2396_vm3, %v3945_v57 }
 0x7af   : > { %4025 = vmatprep.mubr.bf16.mxu1 %v4369_v28 }
 0x7b6   : > { %4185 = vmatmul.mubr.msk.bf16.gmra.mxu1 %vm2396_vm3, %v3946_v40 }
 0x7b7   : > { %4035 = vmatprep.mubr.bf16.mxu1 %v4369_v28 }
 0x7c8   : > { %v4271_v20 = vpop.f32.mrf.mxu0 }
 0x7c9   : > { %v3929_v54 = vadd.f32 %v4271_v20, %v4174_v35 }
 0x7ca   : > { %v3920_v22 = vpop.f32.mrf.mxu0 }
 0x7cb   : > { %v3921_v14 = vadd.f32 %v4174_v35, %v3920_v22  ;;  %v3941_v55 = vadd.f32 %v3929_v54, %v8921_v33 }
 0x7cc   : > { %v4272_v48 = vpop.f32.mrf.mxu0 }
 0x7cd   : > { %v3939_v38 = vadd.f32 %v3921_v14, %v8918_v37  ;;  %v3932_v31 = vadd.f32 %v4272_v48, %v4174_v35 }
 0x7ce   : > { %v3923_v42 = vpop.f32.mrf.mxu0 }
 0x7cf   : > { %v3924_v21 = vadd.f32 %v4174_v35, %v3923_v42  ;;  %v3942_v59 = vadd.f32 %v3932_v31, %v8920_v41 }
 0x7d1   : > { %v3940_v36 = vadd.f32 %v3924_v21, %v8919_v3  ;;  %v3948_v2 = vpack.c.bf16 %v3942_v59, %v3941_v55 }
 0x7d3   : > { %v3947_v44 = vpack.c.bf16 %v3940_v36, %v3939_v38 }
 0x7d5   : > { %4186 = vmatmul.mubr.msk.bf16.gmra.mxu1 %vm2396_vm3, %v3947_v44 }
 0x7d6   : > { %4045 = vmatprep.mubr.bf16.mxu1 %v4369_v28 }
 0x7dd   : > { %4187 = vmatmul.mubr.msk.bf16.gmra.mxu1 %vm2396_vm3, %v3948_v2 }
 0x86e   : > { %v4017_v39 = vpop.f32.mrf.mxu1 }
 0x86f   : > { %v4018_v63 = vadd.f32 %v4017_v39, %v3953_v46 }
 0x870   : > { %v4019_v17 = vpop.f32.mrf.mxu1 }
 0x871   : > { %4056 = vst [vmem:[%s7905_s29] sm:$0xff] %v4018_v63  ;;  %v4020_v51 = vadd.f32 %v4019_v17, %v3957_v19 }
 0x872   : > { %v4021_v61 = vpop.f32.mrf.mxu1 }
 0x873   : > { %4057 = vst [vmem:[%s7905_s29 + $0x8] sm:$0xff] %v4020_v51  ;;  %v4022_v58 = vadd.f32 %v4021_v61, %v3953_v46 }
 0x874   : > { %v4023_v34 = vpop.f32.mrf.mxu1 }
 0x875   : > { %4058 = vst [vmem:[%s7905_s29 + $0x10] sm:$0xff] %v4022_v58  ;;  %v4024_v56 = vadd.f32 %v4023_v34, %v3957_v19 }
 0x876   : > { %v4027_v47 = vpop.f32.mrf.mxu1 }
 0x877   : > { %4059 = vst [vmem:[%s7905_s29 + $0x18] sm:$0xff] %v4024_v56  ;;  %v4028_v11 = vadd.f32 %v4027_v47, %v3953_v46 }
 0x878   : > { %v4029_v32 = vpop.f32.mrf.mxu1 }
 0x879   : > { %4060 = vst [vmem:[%s7905_s29 + $0x20] sm:$0xff] %v4028_v11  ;;  %v4030_v15 = vadd.f32 %v4029_v32, %v3957_v19 }
 0x87a   : > { %v4031_v62 = vpop.f32.mrf.mxu1 }
 0x87b   : > { %4061 = vst [vmem:[%s7905_s29 + $0x28] sm:$0xff] %v4030_v15  ;;  %v4032_v52 = vadd.f32 %v4031_v62, %v3953_v46 }
 0x87c   : > { %v4033_v27 = vpop.f32.mrf.mxu1 }
 0x87d   : > { %4062 = vst [vmem:[%s7905_s29 + $0x30] sm:$0xff] %v4032_v52  ;;  %v4034_v6 = vadd.f32 %v4033_v27, %v3957_v19 }
 0x87f   : > { %4063 = vst [vmem:[%s7905_s29 + $0x38] sm:$0xff] %v4034_v6 }
 0x895   : > { %v4037_v53 = vpop.f32.mrf.mxu1 }
 0x896   : > { %v4038_v43 = vadd.f32 %v4037_v53, %v3953_v46 }
 0x897   : > { %v4039_v18 = vpop.f32.mrf.mxu1 }
 0x898   : > { %4064 = vst [vmem:[%s7905_s29 + $0x40] sm:$0xff] %v4038_v43  ;;  %v4040_v9 = vadd.f32 %v4039_v18, %v3957_v19 }
 0x899   : > { %v4041_v7 = vpop.f32.mrf.mxu1 }
 0x89a   : > { %4065 = vst [vmem:[%s7905_s29 + $0x48] sm:$0xff] %v4040_v9  ;;  %v4042_v28 = vadd.f32 %v4041_v7, %v3953_v46 }
 0x89b   : > { %v4043_v50 = vpop.f32.mrf.mxu1 }
 0x89c   : > { %4066 = vst [vmem:[%s7905_s29 + $0x50] sm:$0xff] %v4042_v28  ;;  %v4044_v13 = vadd.f32 %v4043_v50, %v3957_v19 }
 0x89d   : > { %v4047_v35 = vpop.f32.mrf.mxu1 }
 0x89e   : > { %4067 = vst [vmem:[%s7905_s29 + $0x58] sm:$0xff] %v4044_v13  ;;  %v4048_v4 = vadd.f32 %v4047_v35, %v3953_v46 }
 0x89f   : > { %v4049_v25 = vpop.f32.mrf.mxu1 }
 0x8a0   : > { %4068 = vst [vmem:[%s7905_s29 + $0x60] sm:$0xff] %v4048_v4  ;;  %v4050_v29 = vadd.f32 %v4049_v25, %v3957_v19 }
 0x8a1   : > { %v4051_v0 = vpop.f32.mrf.mxu1 }
 0x8a2   : > { %4069 = vst [vmem:[%s7905_s29 + $0x68] sm:$0xff] %v4050_v29  ;;  %v4052_v8 = vadd.f32 %v4051_v0, %v3953_v46 }
 0x8a3   : > { %v4053_v10 = vpop.f32.mrf.mxu1 }
 0x8a4   : > { %4070 = vst [vmem:[%s7905_s29 + $0x70] sm:$0xff] %v4052_v8  ;;  %v4054_v1 = vadd.f32 %v4053_v10, %v3957_v19 }
 0x8a6   : > { %4071 = vst [vmem:[%s7905_s29 + $0x78] sm:$0xff] %v4054_v1 }
 0x8a7 PF: > { %s32_s3 = sadd.s32 1, %s4366_s3  }
 0x8a8   : > { %p29_p4 = scmp.ge.s32.totalorder %s32_s3, 4  }
 0x8aa   :  { %31 = sbr.rel (!%p29_p4) target bundleno = 8 (0x8), region = 143 }

</bundles_post_ra>
